<compile_context>
chip_gen: v6e
topology: v6e:2x2x1
jax: 0.10.0
libtpu: 0.0.40
codegen_flags: <defaults>
</compile_context>

<pallas_src>
import jax
import jax.numpy as jnp
from jax.experimental import pallas as pl
from jax.experimental.pallas import tpu as pltpu

INPUT_DIMS = 3
NUM_CLASSES = 2
PHI_SIZES = (100, 100, 256)
F_SIZES = (100, 100, 100)
P_PARTICLES = 200  # hard-coded by torch.split(x.permute(1, 0), 200, dim=1)
LANE = 128         # lane-dense output slab width


def _round_up(x, m):
    return ((x + m - 1) // m) * m


def _vmem_capacity_bytes(default=64 * 1024 * 1024):
    """Best-effort per-core VMEM capacity query; conservative fallback."""
    try:
        info = pltpu.get_tpu_info()
        cap = getattr(info, "vmem_capacity_bytes", None)
        if cap:
            return int(cap)
    except Exception:
        pass
    return default


def _make_pfn_kernel(bt, p, d, compute_dtype, approx_recip):
    """Kernel closure over batch-tile size, particle count, feature dim, dtype."""
    nphi = PHI_SIZES[-1]

    def kernel(xm_ref,
               w1_ref, b1_ref, w2_ref, b2_ref, w3_ref, b3_ref,
               f1_ref, c1_ref, f2_ref, c2_ref, f3_ref, c3_ref,
               fo_ref, co_ref,
               out_ref):
        def dense_relu(x, w_ref, b_ref):
            # MXU matmul in compute_dtype with f32 accumulation; the result is
            # cast back to compute_dtype immediately (keeps activations bf16).
            y = jnp.dot(x.astype(compute_dtype), w_ref[...],
                        preferred_element_type=jnp.float32)
            y = y.astype(compute_dtype) + b_ref[...].astype(compute_dtype)
            return jnp.maximum(y, 0.0)

        # ---- phi MLP over the packed (bt*p, d+1) tile ----
        # The last input column is the binary mask; w1's last row is zero, so
        # it contributes exactly 0 to layer 1 (bit-identical to the D-column dot).
        h = dense_relu(xm_ref[...], w1_ref, b1_ref)        # (bt*p, 100)
        h = dense_relu(h, w2_ref, b2_ref)                  # (bt*p, 100)
        h = dense_relu(h, w3_ref, b3_ref)                  # (bt*p, 256)

        # ---- masked sum over particles ----
        # Reuse the mask column straight from the input block (binary, exact
        # in bf16); multiply (VPU) + sublane reduce (XLU) with f32 accumulation.
        mcol = xm_ref[:, d:d + 1]                          # (bt*p, 1)
        hm = (h * mcol).reshape(bt, p, nphi)               # (bt, p, 256)
        pooled = jnp.sum(hm.astype(jnp.float32), axis=1)   # (bt, 256) f32

        # ---- F MLP + lane-padded final Linear + softmax over 128 lanes ----
        # NOTE: pooled (f32) is cast to compute_dtype for the MXU; slight extra
        # rounding on the bf16 path, covered by the 5e-2 tolerance.
        y = dense_relu(pooled, f1_ref, c1_ref)
        y = dense_relu(y, f2_ref, c2_ref)
        y = dense_relu(y, f3_ref, c3_ref)
        logits = jnp.dot(y.astype(compute_dtype), fo_ref[...],
                         preferred_element_type=jnp.float32) + co_ref[...]  # (bt, 128) f32

        # Padded lanes have weight 0 and bias -1e30 -> exp() == 0, so the
        # softmax over all 128 lanes equals the softmax over the real classes.
        m = jnp.max(logits, axis=1, keepdims=True)
        e = jnp.exp(logits - m)
        denom = jnp.sum(e, axis=1, keepdims=True)
        out_ref[...] = e * pl.reciprocal(denom, approx=approx_recip)

    return kernel


def init_params(key):
    """Deterministic nn.Linear-style init (uniform +/- 1/sqrt(fan_in)).

    Weights are stored pre-transposed as (in, out), biases as (1, out)."""
    dims = []
    prev = INPUT_DIMS
    for dd in PHI_SIZES:
        dims.append((prev, dd)); prev = dd
    prev = PHI_SIZES[-1]
    for dd in F_SIZES:
        dims.append((prev, dd)); prev = dd
    dims.append((F_SIZES[-1], NUM_CLASSES))

    params = []
    for (fi, fo) in dims:
        key, kw, kb = jax.random.split(key, 3)
        bound = 1.0 / (fi ** 0.5)
        w = jax.random.uniform(kw, (fi, fo), jnp.float32, -bound, bound)
        b = jax.random.uniform(kb, (1, fo), jnp.float32, -bound, bound)
        params += [w, b]
    return params


def pfn_forward(features, mask, params, *, use_bf16=True,
                block_batch=None, vmem_limit_bytes=None):
    """Pallas forward pass.  block_batch / vmem_limit_bytes default per-generation."""
    B, P, D = features.shape
    assert P == P_PARTICLES, "torch.split(..., 200) hard-codes 200 particles per event"
    assert NUM_CLASSES <= LANE
    compute_dtype = jnp.bfloat16 if use_bf16 else jnp.float32

    # ---- per-generation tile & VMEM-limit selection ----
    vmem_cap = _vmem_capacity_bytes()
    if block_batch is None:
        if vmem_cap >= 120 * 1024 * 1024:        # 128-MiB parts (v5e / v6e)
            block_batch = 128 if use_bf16 else 64
        else:                                     # 64-MiB parts (v7x) or unknown
            block_batch = 64 if use_bf16 else 32
    assert block_batch % 8 == 0, "block_batch must be a multiple of 8"
    if vmem_limit_bytes is None:
        vmem_limit_bytes = max(32 * 1024 * 1024,
                               min(vmem_cap - 16 * 1024 * 1024,
                                   104 * 1024 * 1024))

    # At least two grid steps whenever B allows, so both v7x TCs get work.
    Bt = min(block_batch, _round_up(max(1, -(-B // 2)), 8))
    B_pad = pl.cdiv(B, Bt) * Bt
    grid = (B_pad // Bt,)

    # ---- pack features + binary mask into one (B_pad*P, D+1) array ----
    in_dtype = compute_dtype if use_bf16 else jnp.float32
    feat = features.reshape(B * P, D).astype(jnp.float32)
    mask_col = (mask.reshape(B, P) != 0).astype(jnp.float32).reshape(B * P, 1)
    xm = jnp.concatenate([feat, mask_col], axis=1)          # (B*P, D+1)
    if B_pad != B:
        xm = jnp.concatenate(
            [xm, jnp.zeros(((B_pad - B) * P, D + 1), xm.dtype)], axis=0)
    xm = xm.astype(in_dtype)

    # ---- prepare weights: zero mask row on w1, lane-padded final layer ----
    (w1, b1, w2, b2, w3, b3, f1, c1, f2, c2, f3, c3, fo, co) = params
    w1p = jnp.concatenate([w1, jnp.zeros((1, w1.shape[1]), w1.dtype)], axis=0)   # (D+1, 100)
    fop = jnp.concatenate(
        [fo, jnp.zeros((fo.shape[0], LANE - NUM_CLASSES), fo.dtype)], axis=1)    # (100, 128)
    cop = jnp.concatenate(
        [co, jnp.full((1, LANE - NUM_CLASSES), -1e30, co.dtype)], axis=1)        # (1, 128)

    weights = [w1p, w2, w3, f1, f2, f3, fop]
    biases = [b1, b2, b3, c1, c2, c3, cop]
    prepared = []
    for w, b in zip(weights, biases):
        prepared.append(w.astype(compute_dtype))   # MXU operands
        prepared.append(b.astype(jnp.float32))     # biases stay f32 in VMEM

    # ---- BlockSpecs: batch-tiled input/output, resident full-shape params ----
    in_specs = [pl.BlockSpec((Bt * P, D + 1), lambda i: (i, 0))]
    in_specs += [pl.BlockSpec(a.shape, lambda i: (0, 0)) for a in prepared]
    out_specs = pl.BlockSpec((Bt, LANE), lambda i: (i, 0))

    # ---- advisory cost estimate ----
    phi_flops = 2 * P * ((D + 1) * PHI_SIZES[0]
                         + PHI_SIZES[0] * PHI_SIZES[1]
                         + PHI_SIZES[1] * PHI_SIZES[2])
    f_flops = 2 * (PHI_SIZES[2] * F_SIZES[0] + F_SIZES[0] * F_SIZES[1]
                   + F_SIZES[1] * F_SIZES[2] + F_SIZES[2] * LANE)
    pool_flops = 2 * P * PHI_SIZES[2]
    flops = int(B_pad * (phi_flops + pool_flops + f_flops))
    bytes_accessed = int(
        xm.size * xm.dtype.itemsize
        + grid[0] * sum(a.size * a.dtype.itemsize for a in prepared)
        + B_pad * LANE * 4)
    cost = pl.CostEstimate(flops=flops,
                           transcendentals=int(B_pad * LANE),
                           bytes_accessed=bytes_accessed)

    out = pl.pallas_call(
        _make_pfn_kernel(Bt, P, D, compute_dtype, approx_recip=use_bf16),
        out_shape=jax.ShapeDtypeStruct((B_pad, LANE), jnp.float32),
        grid=grid,
        in_specs=in_specs,
        out_specs=out_specs,
        compiler_params=pltpu.CompilerParams(
            dimension_semantics=("parallel",),
            vmem_limit_bytes=int(vmem_limit_bytes)),
        cost_estimate=cost,
    )(xm, *prepared)

    return out[:B, :NUM_CLASSES]


def pfn_reference(features, mask, params):
    """Pure-JAX reference mirroring the PyTorch forward (f32 everywhere)."""
    B, P, D = features.shape
    x = features.reshape(B * P, D).astype(jnp.float32)
    (w1, b1, w2, b2, w3, b3, f1, c1, f2, c2, f3, c3, fo, co) = params
    h = jax.nn.relu(x @ w1 + b1)
    h = jax.nn.relu(h @ w2 + b2)
    h = jax.nn.relu(h @ w3 + b3)                                        # (B*P, 256)
    h = h.reshape(B, P, -1)
    m = (mask.reshape(B, P) != 0).astype(jnp.float32)[:, :, None]
    pooled = jnp.sum(h * m, axis=1)                                     # (B, 256)
    y = jax.nn.relu(pooled @ f1 + c1)
    y = jax.nn.relu(y @ f2 + c2)
    y = jax.nn.relu(y @ f3 + c3)
    logits = y @ fo + co
    return jax.nn.softmax(logits, axis=1)


if __name__ == "__main__":
    key = jax.random.PRNGKey(0)
    kf, km, kp = jax.random.split(key, 3)
    params = init_params(kp)

    # ---- small batch (single grid step) ----
    B = 2
    features = jax.random.normal(kf, (B, P_PARTICLES, INPUT_DIMS), jnp.float32)
    mask = (jax.random.uniform(km, (B, 1, P_PARTICLES)) > 0.25).astype(jnp.float32)
    ref = pfn_reference(features, mask, params)

    out_f32 = jax.block_until_ready(pfn_forward(features, mask, params, use_bf16=False))
    assert out_f32.shape == (B, NUM_CLASSES)
    assert jnp.allclose(out_f32, ref, atol=1e-5, rtol=1e-5)

    out_bf16 = jax.block_until_ready(pfn_forward(features, mask, params, use_bf16=True))
    assert out_bf16.shape == (B, NUM_CLASSES)
    # approx reciprocal on the bf16 path -> relaxed row-sum tolerance
    assert jnp.allclose(jnp.sum(out_bf16, axis=1), 1.0, atol=1e-2)
    assert jnp.allclose(out_bf16, ref, atol=5e-2, rtol=5e-2)

    # ---- larger batch: exercises batch padding and a multi-step parallel grid ----
    B2 = 100
    kf2, km2 = jax.random.split(jax.random.PRNGKey(1), 2)
    features2 = jax.random.normal(kf2, (B2, P_PARTICLES, INPUT_DIMS), jnp.float32)
    mask2 = (jax.random.uniform(km2, (B2, 1, P_PARTICLES)) > 0.25).astype(jnp.float32)
    ref2 = pfn_reference(features2, mask2, params)

    out2_f32 = jax.block_until_ready(pfn_forward(features2, mask2, params, use_bf16=False))
    assert out2_f32.shape == (B2, NUM_CLASSES)
    # slightly relaxed: accumulation-order differences across many rows
    assert jnp.allclose(out2_f32, ref2, atol=1e-4, rtol=1e-4)

    out2_bf16 = jax.block_until_ready(pfn_forward(features2, mask2, params, use_bf16=True))
    assert out2_bf16.shape == (B2, NUM_CLASSES)
    assert jnp.allclose(out2_bf16, ref2, atol=7.5e-2, rtol=7.5e-2)

    print("KERNEL_OK")
</pallas_src>

<mosaic_0001>
module attributes {stable_mosaic.version = 11 : i64} {
  func.func @kernel(%arg0: i32, %arg1: memref<1600x4xf32, #tpu.memory_space<vmem>>, %arg2: memref<4x100xf32, #tpu.memory_space<vmem>>, %arg3: memref<1x100xf32, #tpu.memory_space<vmem>>, %arg4: memref<100x100xf32, #tpu.memory_space<vmem>>, %arg5: memref<1x100xf32, #tpu.memory_space<vmem>>, %arg6: memref<100x256xf32, #tpu.memory_space<vmem>>, %arg7: memref<1x256xf32, #tpu.memory_space<vmem>>, %arg8: memref<256x100xf32, #tpu.memory_space<vmem>>, %arg9: memref<1x100xf32, #tpu.memory_space<vmem>>, %arg10: memref<100x100xf32, #tpu.memory_space<vmem>>, %arg11: memref<1x100xf32, #tpu.memory_space<vmem>>, %arg12: memref<100x100xf32, #tpu.memory_space<vmem>>, %arg13: memref<1x100xf32, #tpu.memory_space<vmem>>, %arg14: memref<100x128xf32, #tpu.memory_space<vmem>>, %arg15: memref<1x128xf32, #tpu.memory_space<vmem>>, %arg16: memref<8x128xf32, #tpu.memory_space<vmem>>) attributes {dimension_semantics = [#tpu.dimension_semantics<parallel>], iteration_bounds = array<i64: 1>, scalar_prefetch = 0 : i64, scratch_operands = 0 : i64, tpu.core_type = #tpu.core_type<tc>, window_params = [{transform_indices = @transform_0, window_bounds = array<i64: 1600, 4>}, {pipeline_mode = #tpu.pipeline_mode<synchronous>, transform_indices = @transform_1, window_bounds = array<i64: 4, 100>}, {pipeline_mode = #tpu.pipeline_mode<synchronous>, transform_indices = @transform_2, window_bounds = array<i64: 1, 100>}, {pipeline_mode = #tpu.pipeline_mode<synchronous>, transform_indices = @transform_3, window_bounds = array<i64: 100, 100>}, {pipeline_mode = #tpu.pipeline_mode<synchronous>, transform_indices = @transform_4, window_bounds = array<i64: 1, 100>}, {pipeline_mode = #tpu.pipeline_mode<synchronous>, transform_indices = @transform_5, window_bounds = array<i64: 100, 256>}, {pipeline_mode = #tpu.pipeline_mode<synchronous>, transform_indices = @transform_6, window_bounds = array<i64: 1, 256>}, {pipeline_mode = #tpu.pipeline_mode<synchronous>, transform_indices = @transform_7, window_bounds = array<i64: 256, 100>}, {pipeline_mode = #tpu.pipeline_mode<synchronous>, transform_indices = @transform_8, window_bounds = array<i64: 1, 100>}, {pipeline_mode = #tpu.pipeline_mode<synchronous>, transform_indices = @transform_9, window_bounds = array<i64: 100, 100>}, {pipeline_mode = #tpu.pipeline_mode<synchronous>, transform_indices = @transform_10, window_bounds = array<i64: 1, 100>}, {pipeline_mode = #tpu.pipeline_mode<synchronous>, transform_indices = @transform_11, window_bounds = array<i64: 100, 100>}, {pipeline_mode = #tpu.pipeline_mode<synchronous>, transform_indices = @transform_12, window_bounds = array<i64: 1, 100>}, {pipeline_mode = #tpu.pipeline_mode<synchronous>, transform_indices = @transform_13, window_bounds = array<i64: 100, 128>}, {pipeline_mode = #tpu.pipeline_mode<synchronous>, transform_indices = @transform_14, window_bounds = array<i64: 1, 128>}, {transform_indices = @transform_15, window_bounds = array<i64: 8, 128>}]} {
    %c0 = arith.constant 0 : index
    %c0_0 = arith.constant 0 : index
    %0 = vector.load %arg1[%c0, %c0_0] : memref<1600x4xf32, #tpu.memory_space<vmem>>, vector<1600x4xf32>
    %c0_1 = arith.constant 0 : index
    %c0_2 = arith.constant 0 : index
    %1 = vector.load %arg2[%c0_1, %c0_2] : memref<4x100xf32, #tpu.memory_space<vmem>>, vector<4x100xf32>
    %cst = arith.constant dense<0.000000e+00> : vector<1600x100xf32>
    %2 = tpu.matmul %0, %1, %cst {dimension_numbers = #tpu.dot_dimension_numbers<[1], [0], [0], [1], [0, 0, 1, 1], [], []>} : vector<1600x4xf32>, vector<4x100xf32>, vector<1600x100xf32> -> vector<1600x100xf32>
    %c0_3 = arith.constant 0 : index
    %c0_4 = arith.constant 0 : index
    %3 = vector.load %arg3[%c0_3, %c0_4] : memref<1x100xf32, #tpu.memory_space<vmem>>, vector<1x100xf32>
    %4 = vector.broadcast %3 : vector<1x100xf32> to vector<1600x100xf32>
    %5 = arith.addf %2, %4 : vector<1600x100xf32>
    %cst_5 = arith.constant 0.000000e+00 : f32
    %6 = vector.broadcast %cst_5 : f32 to vector<1600x100xf32>
    %7 = arith.maximumf %5, %6 : vector<1600x100xf32>
    %c0_6 = arith.constant 0 : index
    %c0_7 = arith.constant 0 : index
    %8 = vector.load %arg4[%c0_6, %c0_7] : memref<100x100xf32, #tpu.memory_space<vmem>>, vector<100x100xf32>
    %cst_8 = arith.constant dense<0.000000e+00> : vector<1600x100xf32>
    %9 = tpu.matmul %7, %8, %cst_8 {dimension_numbers = #tpu.dot_dimension_numbers<[1], [0], [0], [1], [0, 0, 1, 1], [], []>} : vector<1600x100xf32>, vector<100x100xf32>, vector<1600x100xf32> -> vector<1600x100xf32>
    %c0_9 = arith.constant 0 : index
    %c0_10 = arith.constant 0 : index
    %10 = vector.load %arg5[%c0_9, %c0_10] : memref<1x100xf32, #tpu.memory_space<vmem>>, vector<1x100xf32>
    %11 = vector.broadcast %10 : vector<1x100xf32> to vector<1600x100xf32>
    %12 = arith.addf %9, %11 : vector<1600x100xf32>
    %cst_11 = arith.constant 0.000000e+00 : f32
    %13 = vector.broadcast %cst_11 : f32 to vector<1600x100xf32>
    %14 = arith.maximumf %12, %13 : vector<1600x100xf32>
    %c0_12 = arith.constant 0 : index
    %c0_13 = arith.constant 0 : index
    %15 = vector.load %arg6[%c0_12, %c0_13] : memref<100x256xf32, #tpu.memory_space<vmem>>, vector<100x256xf32>
    %cst_14 = arith.constant dense<0.000000e+00> : vector<1600x256xf32>
    %16 = tpu.matmul %14, %15, %cst_14 {dimension_numbers = #tpu.dot_dimension_numbers<[1], [0], [0], [1], [0, 0, 1, 1], [], []>} : vector<1600x100xf32>, vector<100x256xf32>, vector<1600x256xf32> -> vector<1600x256xf32>
    %c0_15 = arith.constant 0 : index
    %c0_16 = arith.constant 0 : index
    %17 = vector.load %arg7[%c0_15, %c0_16] : memref<1x256xf32, #tpu.memory_space<vmem>>, vector<1x256xf32>
    %18 = vector.broadcast %17 : vector<1x256xf32> to vector<1600x256xf32>
    %19 = arith.addf %16, %18 : vector<1600x256xf32>
    %cst_17 = arith.constant 0.000000e+00 : f32
    %20 = vector.broadcast %cst_17 : f32 to vector<1600x256xf32>
    %21 = arith.maximumf %19, %20 : vector<1600x256xf32>
    %c0_18 = arith.constant 0 : index
    %c3 = arith.constant 3 : index
    %22 = vector.load %arg1[%c0_18, %c3] : memref<1600x4xf32, #tpu.memory_space<vmem>>, vector<1600x1xf32>
    %23 = vector.broadcast %22 : vector<1600x1xf32> to vector<1600x256xf32>
    %24 = arith.mulf %21, %23 : vector<1600x256xf32>
    %25 = vector.shape_cast %24 : vector<1600x256xf32> to vector<8x200x256xf32>
    %cst_19 = arith.constant dense<0.000000e+00> : vector<8x256xf32>
    %26 = vector.multi_reduction <add>, %25, %cst_19 [1] : vector<8x200x256xf32> to vector<8x256xf32>
    %c0_20 = arith.constant 0 : index
    %c0_21 = arith.constant 0 : index
    %27 = vector.load %arg8[%c0_20, %c0_21] : memref<256x100xf32, #tpu.memory_space<vmem>>, vector<256x100xf32>
    %cst_22 = arith.constant dense<0.000000e+00> : vector<8x100xf32>
    %28 = tpu.matmul %26, %27, %cst_22 {dimension_numbers = #tpu.dot_dimension_numbers<[1], [0], [0], [1], [0, 0, 1, 1], [], []>} : vector<8x256xf32>, vector<256x100xf32>, vector<8x100xf32> -> vector<8x100xf32>
    %c0_23 = arith.constant 0 : index
    %c0_24 = arith.constant 0 : index
    %29 = vector.load %arg9[%c0_23, %c0_24] : memref<1x100xf32, #tpu.memory_space<vmem>>, vector<1x100xf32>
    %30 = vector.broadcast %29 : vector<1x100xf32> to vector<8x100xf32>
    %31 = arith.addf %28, %30 : vector<8x100xf32>
    %cst_25 = arith.constant 0.000000e+00 : f32
    %32 = vector.broadcast %cst_25 : f32 to vector<8x100xf32>
    %33 = arith.maximumf %31, %32 : vector<8x100xf32>
    %c0_26 = arith.constant 0 : index
    %c0_27 = arith.constant 0 : index
    %34 = vector.load %arg10[%c0_26, %c0_27] : memref<100x100xf32, #tpu.memory_space<vmem>>, vector<100x100xf32>
    %cst_28 = arith.constant dense<0.000000e+00> : vector<8x100xf32>
    %35 = tpu.matmul %33, %34, %cst_28 {dimension_numbers = #tpu.dot_dimension_numbers<[1], [0], [0], [1], [0, 0, 1, 1], [], []>} : vector<8x100xf32>, vector<100x100xf32>, vector<8x100xf32> -> vector<8x100xf32>
    %c0_29 = arith.constant 0 : index
    %c0_30 = arith.constant 0 : index
    %36 = vector.load %arg11[%c0_29, %c0_30] : memref<1x100xf32, #tpu.memory_space<vmem>>, vector<1x100xf32>
    %37 = vector.broadcast %36 : vector<1x100xf32> to vector<8x100xf32>
    %38 = arith.addf %35, %37 : vector<8x100xf32>
    %cst_31 = arith.constant 0.000000e+00 : f32
    %39 = vector.broadcast %cst_31 : f32 to vector<8x100xf32>
    %40 = arith.maximumf %38, %39 : vector<8x100xf32>
    %c0_32 = arith.constant 0 : index
    %c0_33 = arith.constant 0 : index
    %41 = vector.load %arg12[%c0_32, %c0_33] : memref<100x100xf32, #tpu.memory_space<vmem>>, vector<100x100xf32>
    %cst_34 = arith.constant dense<0.000000e+00> : vector<8x100xf32>
    %42 = tpu.matmul %40, %41, %cst_34 {dimension_numbers = #tpu.dot_dimension_numbers<[1], [0], [0], [1], [0, 0, 1, 1], [], []>} : vector<8x100xf32>, vector<100x100xf32>, vector<8x100xf32> -> vector<8x100xf32>
    %c0_35 = arith.constant 0 : index
    %c0_36 = arith.constant 0 : index
    %43 = vector.load %arg13[%c0_35, %c0_36] : memref<1x100xf32, #tpu.memory_space<vmem>>, vector<1x100xf32>
    %44 = vector.broadcast %43 : vector<1x100xf32> to vector<8x100xf32>
    %45 = arith.addf %42, %44 : vector<8x100xf32>
    %cst_37 = arith.constant 0.000000e+00 : f32
    %46 = vector.broadcast %cst_37 : f32 to vector<8x100xf32>
    %47 = arith.maximumf %45, %46 : vector<8x100xf32>
    %c0_38 = arith.constant 0 : index
    %c0_39 = arith.constant 0 : index
    %48 = vector.load %arg14[%c0_38, %c0_39] : memref<100x128xf32, #tpu.memory_space<vmem>>, vector<100x128xf32>
    %cst_40 = arith.constant dense<0.000000e+00> : vector<8x128xf32>
    %49 = tpu.matmul %47, %48, %cst_40 {dimension_numbers = #tpu.dot_dimension_numbers<[1], [0], [0], [1], [0, 0, 1, 1], [], []>} : vector<8x100xf32>, vector<100x128xf32>, vector<8x128xf32> -> vector<8x128xf32>
    %c0_41 = arith.constant 0 : index
    %c0_42 = arith.constant 0 : index
    %50 = vector.load %arg15[%c0_41, %c0_42] : memref<1x128xf32, #tpu.memory_space<vmem>>, vector<1x128xf32>
    %51 = vector.broadcast %50 : vector<1x128xf32> to vector<8x128xf32>
    %52 = arith.addf %49, %51 : vector<8x128xf32>
    %cst_43 = arith.constant dense<0xFF800000> : vector<8xf32>
    %53 = vector.multi_reduction <maximumf>, %52, %cst_43 [1] : vector<8x128xf32> to vector<8xf32>
    %54 = vector.shape_cast %53 : vector<8xf32> to vector<8x1xf32>
    %55 = vector.broadcast %54 : vector<8x1xf32> to vector<8x128xf32>
    %56 = arith.subf %52, %55 : vector<8x128xf32>
    %57 = math.exp %56 : vector<8x128xf32>
    %cst_44 = arith.constant dense<0.000000e+00> : vector<8xf32>
    %58 = vector.multi_reduction <add>, %57, %cst_44 [1] : vector<8x128xf32> to vector<8xf32>
    %59 = vector.shape_cast %58 : vector<8xf32> to vector<8x1xf32>
    %60 = tpu.reciprocal %59 : vector<8x1xf32> -> vector<8x1xf32>
    %61 = vector.broadcast %60 : vector<8x1xf32> to vector<8x128xf32>
    %62 = arith.mulf %57, %61 : vector<8x128xf32>
    %c0_45 = arith.constant 0 : index
    %c0_46 = arith.constant 0 : index
    %63 = vector.load %arg16[%c0_45, %c0_46] : memref<8x128xf32, #tpu.memory_space<vmem>>, vector<8x128xf32>
    tpu.vector_store %arg16[%c0_45, %c0_46], %62 {strides = array<i32>} : memref<8x128xf32, #tpu.memory_space<vmem>>, vector<8x128xf32>,
    return
  }
  func.func @transform_0(%arg0: i32) -> (i32, i32) {
    %c0_i32 = arith.constant 0 : i32
    %c0_i32_0 = arith.constant 0 : i32
    return %arg0, %c0_i32 : i32, i32
  }
  func.func @transform_1(%arg0: i32) -> (i32, i32) {
    %c0_i32 = arith.constant 0 : i32
    %c0_i32_0 = arith.constant 0 : i32
    %c0_i32_1 = arith.constant 0 : i32
    return %c0_i32, %c0_i32_0 : i32, i32
  }
  func.func @transform_2(%arg0: i32) -> (i32, i32) {
    %c0_i32 = arith.constant 0 : i32
    %c0_i32_0 = arith.constant 0 : i32
    %c0_i32_1 = arith.constant 0 : i32
    return %c0_i32, %c0_i32_0 : i32, i32
  }
  func.func @transform_3(%arg0: i32) -> (i32, i32) {
    %c0_i32 = arith.constant 0 : i32
    %c0_i32_0 = arith.constant 0 : i32
    %c0_i32_1 = arith.constant 0 : i32
    return %c0_i32, %c0_i32_0 : i32, i32
  }
  func.func @transform_4(%arg0: i32) -> (i32, i32) {
    %c0_i32 = arith.constant 0 : i32
    %c0_i32_0 = arith.constant 0 : i32
    %c0_i32_1 = arith.constant 0 : i32
    return %c0_i32, %c0_i32_0 : i32, i32
  }
  func.func @transform_5(%arg0: i32) -> (i32, i32) {
    %c0_i32 = arith.constant 0 : i32
    %c0_i32_0 = arith.constant 0 : i32
    %c0_i32_1 = arith.constant 0 : i32
    return %c0_i32, %c0_i32_0 : i32, i32
  }
  func.func @transform_6(%arg0: i32) -> (i32, i32) {
    %c0_i32 = arith.constant 0 : i32
    %c0_i32_0 = arith.constant 0 : i32
    %c0_i32_1 = arith.constant 0 : i32
    return %c0_i32, %c0_i32_0 : i32, i32
  }
  func.func @transform_7(%arg0: i32) -> (i32, i32) {
    %c0_i32 = arith.constant 0 : i32
    %c0_i32_0 = arith.constant 0 : i32
    %c0_i32_1 = arith.constant 0 : i32
    return %c0_i32, %c0_i32_0 : i32, i32
  }
  func.func @transform_8(%arg0: i32) -> (i32, i32) {
    %c0_i32 = arith.constant 0 : i32
    %c0_i32_0 = arith.constant 0 : i32
    %c0_i32_1 = arith.constant 0 : i32
    return %c0_i32, %c0_i32_0 : i32, i32
  }
  func.func @transform_9(%arg0: i32) -> (i32, i32) {
    %c0_i32 = arith.constant 0 : i32
    %c0_i32_0 = arith.constant 0 : i32
    %c0_i32_1 = arith.constant 0 : i32
    return %c0_i32, %c0_i32_0 : i32, i32
  }
  func.func @transform_10(%arg0: i32) -> (i32, i32) {
    %c0_i32 = arith.constant 0 : i32
    %c0_i32_0 = arith.constant 0 : i32
    %c0_i32_1 = arith.constant 0 : i32
    return %c0_i32, %c0_i32_0 : i32, i32
  }
  func.func @transform_11(%arg0: i32) -> (i32, i32) {
    %c0_i32 = arith.constant 0 : i32
    %c0_i32_0 = arith.constant 0 : i32
    %c0_i32_1 = arith.constant 0 : i32
    return %c0_i32, %c0_i32_0 : i32, i32
  }
  func.func @transform_12(%arg0: i32) -> (i32, i32) {
    %c0_i32 = arith.constant 0 : i32
    %c0_i32_0 = arith.constant 0 : i32
    %c0_i32_1 = arith.constant 0 : i32
    return %c0_i32, %c0_i32_0 : i32, i32
  }
  func.func @transform_13(%arg0: i32) -> (i32, i32) {
    %c0_i32 = arith.constant 0 : i32
    %c0_i32_0 = arith.constant 0 : i32
    %c0_i32_1 = arith.constant 0 : i32
    return %c0_i32, %c0_i32_0 : i32, i32
  }
  func.func @transform_14(%arg0: i32) -> (i32, i32) {
    %c0_i32 = arith.constant 0 : i32
    %c0_i32_0 = arith.constant 0 : i32
    %c0_i32_1 = arith.constant 0 : i32
    return %c0_i32, %c0_i32_0 : i32, i32
  }
  func.func @transform_15(%arg0: i32) -> (i32, i32) {
    %c0_i32 = arith.constant 0 : i32
    %c0_i32_0 = arith.constant 0 : i32
    return %arg0, %c0_i32 : i32, i32
  }
}

</mosaic_0001>

<bundles_post_ra>
// kernel: tpu_custom_call.1
= control target key start
LH: loop header
LB: loop body
LE: loop exit
PB: predicated region body
PF: predicated region fallthrough
CT: control target
= control target key end

     0   :  { %vm860_vm0 = vcmask 1043456   ;;  %vm259_vm1 = vcmask 31744   ;;  %s15502_s0 = inlined_call_operand.vmem [shape: f32[1600,4], index: 0, kind: input, shape index: {}]   ;;  %s15503_s1 = inlined_call_operand.vmem [shape: f32[4,100], index: 1, kind: input, shape index: {}]   ;;  %s15504_s2 = inlined_call_operand.vmem [shape: f32[1,100], index: 2, kind: input, shape index: {}]   ;;  %s15505_s3 = inlined_call_operand.vmem [shape: f32[100,100], index: 3, kind: input, shape index: {}]   ;;  %s15506_s4 = inlined_call_operand.vmem [shape: f32[1,100], index: 4, kind: input, shape index: {}]   ;;  %s15507_s5 = inlined_call_operand.vmem [shape: f32[100,256], index: 5, kind: input, shape index: {}]   ;;  %s15508_s6 = inlined_call_operand.vmem [shape: f32[1,256], index: 6, kind: input, shape index: {}]   ;;  %s15509_s7 = inlined_call_operand.vmem [shape: f32[256,100], index: 7, kind: input, shape index: {}]   ;;  %s15510_s8 = inlined_call_operand.vmem [shape: f32[1,100], index: 8, kind: input, shape index: {}]   ;;  %s15511_s9 = inlined_call_operand.vmem [shape: f32[100,100], index: 9, kind: input, shape index: {}]   ;;  %s15512_s10 = inlined_call_operand.vmem [shape: f32[1,100], index: 10, kind: input, shape index: {}]   ;;  %s15513_s11 = inlined_call_operand.vmem [shape: f32[100,100], index: 11, kind: input, shape index: {}]   ;;  %s15514_s12 = inlined_call_operand.vmem [shape: f32[1,100], index: 12, kind: input, shape index: {}]   ;;  %s15515_s13 = inlined_call_operand.vmem [shape: f32[100,128], index: 13, kind: input, shape index: {}]   ;;  %s15516_s14 = inlined_call_operand.vmem [shape: f32[1,128], index: 14, kind: input, shape index: {}]   ;;  %s15517_s15 = inlined_call_operand.hbm [shape: f32[8,128], index: 15, kind: output, shape index: {}]  }
   0x1   :  { %v251_v0 = vld [vmem:[%s15503_s1] sm:$0xf]  ;;  %v73_v1 = vld [vmem:[%s15502_s0 + $0xb0] sm:$0xff]  ;;  %v74_v2 = vld [vmem:[%s15502_s0 + $0xb8] sm:$0xff] }
   0x2   :  { %10292 = vmatprep.subr.msk.mxu1 %vm860_vm0, %v251_v0  ;;  %9612 = vmatprep.mubr.msk.f32.mxu1 %vm259_vm1, %v73_v1  ;;  %v2141_v3 = vld [vmem:[%s15505_s3 + $0x60] sm:$0xf]  ;;  %v10561_v5 = vld [vmem:[%s15502_s0 + $0xc8] sm:$0xff]  ;;  %v10566_v6 = vld [vmem:[%s15502_s0 + $0xd0] sm:$0xff] }
   0x3   :  { %v75_v4 = vld [vmem:[%s15502_s0 + $0xc0] sm:$0xff]  ;;  %10293 = vmatpush3.msk.msra.mxu1 %vm860_vm0, %v251_v0  ;;  %9577 = vmatprep.subr.msk.mxu0 %vm860_vm0, %v251_v0  ;;  %v2140_v7 = vld [vmem:[%s15505_s3 + $0x58] sm:$0xff]  ;;  %v2139_v10 = vld [vmem:[%s15505_s3 + $0x50] sm:$0xff] }
   0x4   :  { %9613 = vmatmul.mubr.msk.f32.vlgmr.msra.gmra.mxu1 %vm259_vm1, %v74_v2  ;;  %9879 = vmatprep.subr.msk.mxu1 %vm860_vm0, %v2141_v3  ;;  %v10579_v8 = vld [vmem:[%s15502_s0 + $0xd8] sm:$0xff]  ;;  %v10584_v9 = vld [vmem:[%s15502_s0 + $0xe0] sm:$0xff]  ;;  %v10596_v11 = vld [vmem:[%s15502_s0 + $0xe8] sm:$0xff] }
   0x5   :  { %9880 = vmatpush3.msk.msra.mxu1 %vm860_vm0, %v2141_v3  ;;  %9615 = vmatprep.mubr.msk.f32.mxu1 %vm259_vm1, %v75_v4  ;;  %v10601_v12 = vld [vmem:[%s15502_s0 + $0xf0] sm:$0xff]  ;;  %v2138_v13 = vld [vmem:[%s15505_s3 + $0x48] sm:$0xff]  ;;  %v10613_v14 = vld [vmem:[%s15502_s0 + $0xf8] sm:$0xff] }
   0x6   :  { %9578 = vmatpush3.msk.msra.mxu0 %vm860_vm0, %v251_v0  ;;  %9881 = vmatprep.subr.mxu1 %v2140_v7  ;;  %v83_v15 = vld [vmem:[%s15502_s0 + $0x100] sm:$0xff]  ;;  %v84_v16 = vld [vmem:[%s15502_s0 + $0x108] sm:$0xff]  ;;  %v85_v18 = vld [vmem:[%s15502_s0 + $0x110] sm:$0xff] }
   0x7   :  { %9882 = vmatpush3.msra.mxu1 %v2140_v7  ;;  %v2137_v17 = vld [vmem:[%s15505_s3 + $0x40] sm:$0xff]  ;;  %v86_v19 = vld [vmem:[%s15502_s0 + $0x118] sm:$0xff]  ;;  %v88_v22 = vld [vmem:[%s15502_s0 + $0x128] sm:$0xff] }
   0x8   :  { %9616 = vmatmul.mubr.msk.f32.gmra.mxu1 %vm259_vm1, %v10561_v5  ;;  %9883 = vmatprep.subr.mxu1 %v2139_v10  ;;  %v87_v20 = vld [vmem:[%s15502_s0 + $0x120] sm:$0xff]  ;;  %v2136_v21 = vld [vmem:[%s15505_s3 + $0x38] sm:$0xff]  ;;  %v10654_v24 = vld [vmem:[%s15502_s0 + $0x8] sm:$0xff] }
   0x9   :  { %9618 = vmatprep.mubr.msk.f32.mxu1 %vm259_vm1, %v10566_v6  ;;  %9884 = vmatpush3.msra.mxu1 %v2139_v10  ;;  %v10649_v23 = vld [vmem:[%s15502_s0] sm:$0xff]  ;;  %v89_v25 = vld [vmem:[%s15502_s0 + $0x130] sm:$0xff] }
   0xa   :  { %9885 = vmatprep.subr.mxu1 %v2138_v13  ;;  %9579 = vmatprep.mubr.msk.f32.mxu0 %vm259_vm1, %v10649_v23 }
   0xb   :  { %9886 = vmatpush3.msra.mxu1 %v2138_v13 }
   0xc   :  { %9619 = vmatmul.mubr.msk.f32.gmra.mxu1 %vm259_vm1, %v10579_v8  ;;  %9887 = vmatprep.subr.mxu1 %v2137_v17 }
   0xd   :  { %9621 = vmatprep.mubr.msk.f32.mxu1 %vm259_vm1, %v10584_v9  ;;  %9888 = vmatpush3.msra.mxu1 %v2137_v17 }
   0xe   :  { %9889 = vmatprep.subr.mxu1 %v2136_v21 }
   0xf   :  { %9890 = vmatpush3.msra.mxu1 %v2136_v21 }
  0x10   :  { %9622 = vmatmul.mubr.msk.f32.gmra.mxu1 %vm259_vm1, %v10596_v11 }
  0x11   :  { %9624 = vmatprep.mubr.msk.f32.mxu1 %vm259_vm1, %v10601_v12 }
  0x14   :  { %9625 = vmatmul.mubr.msk.f32.gmra.mxu1 %vm259_vm1, %v10613_v14 }
  0x15   :  { %9627 = vmatprep.mubr.msk.f32.mxu1 %vm259_vm1, %v83_v15 }
  0x18   :  { %9628 = vmatmul.mubr.msk.f32.gmra.mxu1 %vm259_vm1, %v84_v16 }
  0x19   :  { %9630 = vmatprep.mubr.msk.f32.mxu1 %vm259_vm1, %v85_v18 }
  0x1c   :  { %9631 = vmatmul.mubr.msk.f32.gmra.mxu1 %vm259_vm1, %v86_v19 }
  0x1d   :  { %9633 = vmatprep.mubr.msk.f32.mxu1 %vm259_vm1, %v87_v20 }
  0x1e   :  { %20 = vsyncpa [#allocation3], 0  ;;  %9580 = vmatmul.mubr.msk.f32.vlgmr.msra.gmra.mxu0 %vm259_vm1, %v10654_v24  ;;  %v10667_v26 = vld [vmem:[%s15502_s0 + $0x10] sm:$0xff]  ;;  %v90_v27 = vld [vmem:[%s15502_s0 + $0x138] sm:$0xff]  ;;  %vm2149_vm2 = vcmask 818176   ;;  %vm8062_vm3 = vcmask 1041409  }
  0x1f   :  { %9582 = vmatprep.mubr.msk.f32.mxu0 %vm259_vm1, %v10667_v26  ;;  %v10678_v28 = vld [vmem:[%s15502_s0 + $0x18] sm:$0xff]  ;;  %v91_v29 = vld [vmem:[%s15502_s0 + $0x140] sm:$0xff]  ;;  %v92_v31 = vld [vmem:[%s15502_s0 + $0x148] sm:$0xff]  ;;  %vm8064_vm4 = vcmask 1042434   ;;  %vm8066_vm5 = vcmask 1043459   ;;  %vm8068_vm6 = vcmask 1044484  }
  0x20   :  { %9634 = vmatmul.mubr.msk.f32.gmra.mxu1 %vm259_vm1, %v88_v22  ;;  %v10689_v30 = vld [vmem:[%s15502_s0 + $0x20] sm:$0xff]  ;;  %v10700_v32 = vld [vmem:[%s15502_s0 + $0x28] sm:$0xff]  ;;  %v93_v33 = vld [vmem:[%s15502_s0 + $0x150] sm:$0xff]  ;;  %vm8070_vm7 = vcmask 1045509   ;;  %vm8072_vm8 = vcmask 1046534   ;;  %vm8074_vm9 = vcmask 1047559  }
  0x21   :  { %9636 = vmatprep.mubr.msk.f32.mxu1 %vm259_vm1, %v89_v25  ;;  %v2135_v34 = vld [vmem:[%s15505_s3 + $0x30] sm:$0xff]  ;;  %v94_v36 = vld [vmem:[%s15502_s0 + $0x158] sm:$0xff]  ;;  %v95_v38 = vld [vmem:[%s15502_s0 + $0x160] sm:$0xff]  ;;  %vm10453_vm10 = vmmov 0  }
  0x22   :  { %9583 = vmatmul.mubr.msk.f32.gmra.mxu0 %vm259_vm1, %v10678_v28  ;;  %v10714_v35 = vld [vmem:[%s15502_s0 + $0x30] sm:$0xff]  ;;  %9891 = vmatprep.subr.mxu1 %v2135_v34  ;;  %v10723_v37 = vld [vmem:[%s15502_s0 + $0x38] sm:$0xff]  ;;  %v10736_v39 = vld [vmem:[%s15502_s0 + $0x40] sm:$0xff] }
  0x23   :  { %9585 = vmatprep.mubr.msk.f32.mxu0 %vm259_vm1, %v10689_v30  ;;  %9892 = vmatpush3.msra.mxu1 %v2135_v34  ;;  %v96_v40 = vld [vmem:[%s15502_s0 + $0x168] sm:$0xff]  ;;  %v97_v42 = vld [vmem:[%s15502_s0 + $0x170] sm:$0xff]  ;;  %v98_v44 = vld [vmem:[%s15502_s0 + $0x178] sm:$0xff] }
  0x24   :  { %9637 = vmatmul.mubr.msk.f32.gmra.mxu1 %vm259_vm1, %v90_v27  ;;  %v60_v41 = vld [vmem:[%s15502_s0 + $0x48] sm:$0xff]  ;;  %v61_v43 = vld [vmem:[%s15502_s0 + $0x50] sm:$0xff]  ;;  %v62_v45 = vld [vmem:[%s15502_s0 + $0x58] sm:$0xff] }
  0x25   :  { %9639 = vmatprep.mubr.msk.f32.mxu1 %vm259_vm1, %v91_v29  ;;  %v99_v46 = vld [vmem:[%s15502_s0 + $0x180] sm:$0xff]  ;;  %v100_v48 = vld [vmem:[%s15502_s0 + $0x188] sm:$0xff]  ;;  %v10782_v50 = vld [vmem:[%s15502_s0 + $0x190] sm:$0xff] }
  0x26   :  { %9586 = vmatmul.mubr.msk.f32.gmra.mxu0 %vm259_vm1, %v10700_v32  ;;  %v63_v47 = vld [vmem:[%s15502_s0 + $0x60] sm:$0xff]  ;;  %v64_v49 = vld [vmem:[%s15502_s0 + $0x68] sm:$0xff]  ;;  %v65_v51 = vld [vmem:[%s15502_s0 + $0x70] sm:$0xff] }
  0x27   :  { %9588 = vmatprep.mubr.msk.f32.mxu0 %vm259_vm1, %v10714_v35  ;;  %v10794_v52 = vld [vmem:[%s15502_s0 + $0x198] sm:$0xff]  ;;  %v10803_v54 = vld [vmem:[%s15502_s0 + $0x1a0] sm:$0xff]  ;;  %v10816_v56 = vld [vmem:[%s15502_s0 + $0x1a8] sm:$0xff] }
  0x28   :  { %9640 = vmatmul.mubr.msk.f32.gmra.mxu1 %vm259_vm1, %v92_v31  ;;  %v66_v53 = vld [vmem:[%s15502_s0 + $0x78] sm:$0xff]  ;;  %v67_v55 = vld [vmem:[%s15502_s0 + $0x80] sm:$0xff]  ;;  %v68_v57 = vld [vmem:[%s15502_s0 + $0x88] sm:$0xff] }
  0x29   :  { %9642 = vmatprep.mubr.msk.f32.mxu1 %vm259_vm1, %v93_v33  ;;  %v10825_v58 = vld [vmem:[%s15502_s0 + $0x1b0] sm:$0xff]  ;;  %v10838_v60 = vld [vmem:[%s15502_s0 + $0x1b8] sm:$0xff]  ;;  %v10847_v62 = vld [vmem:[%s15502_s0 + $0x1c0] sm:$0xff] }
  0x2a   :  { %9589 = vmatmul.mubr.msk.f32.gmra.mxu0 %vm259_vm1, %v10723_v37  ;;  %v69_v59 = vld [vmem:[%s15502_s0 + $0x90] sm:$0xff]  ;;  %v70_v61 = vld [vmem:[%s15502_s0 + $0x98] sm:$0xff]  ;;  %v10857_v63 = vld [vmem:[%s15502_s0 + $0x1c8] sm:$0xff] }
  0x2b   :  { %9591 = vmatprep.mubr.msk.f32.mxu0 %vm259_vm1, %v10736_v39  ;;  %v10862_v0 = vld [vmem:[%s15502_s0 + $0x1d0] sm:$0xff]  ;;  %v71_v1 = vld [vmem:[%s15502_s0 + $0xa0] sm:$0xff]  ;;  %v2134_v2 = vld [vmem:[%s15505_s3 + $0x28] sm:$0xff] }
  0x2c   :  { %9643 = vmatmul.mubr.msk.f32.gmra.mxu1 %vm259_vm1, %v94_v36  ;;  %v72_v3 = vld [vmem:[%s15502_s0 + $0xa8] sm:$0xff]  ;;  %9893 = vmatprep.subr.mxu1 %v2134_v2  ;;  %v110_v4 = vld [vmem:[%s15502_s0 + $0x1d8] sm:$0xff]  ;;  %v111_v7 = vld [vmem:[%s15502_s0 + $0x1e0] sm:$0xff] }
  0x2d   :  { %9645 = vmatprep.mubr.msk.f32.mxu1 %vm259_vm1, %v95_v38  ;;  %9894 = vmatpush3.msra.mxu1 %v2134_v2  ;;  %v112_v10 = vld [vmem:[%s15502_s0 + $0x1e8] sm:$0xff]  ;;  %v113_v13 = vld [vmem:[%s15502_s0 + $0x1f0] sm:$0xff]  ;;  %v114_v15 = vld [vmem:[%s15502_s0 + $0x1f8] sm:$0xff] }
  0x2e   :  { %9592 = vmatmul.mubr.msk.f32.gmra.mxu0 %vm259_vm1, %v60_v41  ;;  %v115_v16 = vld [vmem:[%s15502_s0 + $0x200] sm:$0xff]  ;;  %v116_v17 = vld [vmem:[%s15502_s0 + $0x208] sm:$0xff]  ;;  %v117_v18 = vld [vmem:[%s15502_s0 + $0x210] sm:$0xff] }
  0x2f   :  { %9594 = vmatprep.mubr.msk.f32.mxu0 %vm259_vm1, %v61_v43  ;;  %v118_v19 = vld [vmem:[%s15502_s0 + $0x218] sm:$0xff]  ;;  %v119_v20 = vld [vmem:[%s15502_s0 + $0x220] sm:$0xff]  ;;  %v120_v21 = vld [vmem:[%s15502_s0 + $0x228] sm:$0xff] }
  0x30   :  { %9646 = vmatmul.mubr.msk.f32.gmra.mxu1 %vm259_vm1, %v96_v40  ;;  %v121_v22 = vld [vmem:[%s15502_s0 + $0x230] sm:$0xff]  ;;  %v122_v25 = vld [vmem:[%s15502_s0 + $0x238] sm:$0xff]  ;;  %v123_v27 = vld [vmem:[%s15502_s0 + $0x240] sm:$0xff] }
  0x31   :  { %9648 = vmatprep.mubr.msk.f32.mxu1 %vm259_vm1, %v97_v42  ;;  %v2133_v29 = vld [vmem:[%s15505_s3 + $0x20] sm:$0xff]  ;;  %v124_v31 = vld [vmem:[%s15502_s0 + $0x248] sm:$0xff]  ;;  %v125_v33 = vld [vmem:[%s15502_s0 + $0x250] sm:$0xff] }
  0x32   :  { %9595 = vmatmul.mubr.msk.f32.gmra.mxu0 %vm259_vm1, %v62_v45  ;;  %9895 = vmatprep.subr.mxu1 %v2133_v29  ;;  %v10949_v34 = vld [vmem:[%s15502_s0 + $0x258] sm:$0xff]  ;;  %v10954_v36 = vld [vmem:[%s15502_s0 + $0x260] sm:$0xff]  ;;  %v10963_v38 = vld [vmem:[%s15502_s0 + $0x268] sm:$0xff] }
  0x33   :  { %9597 = vmatprep.mubr.msk.f32.mxu0 %vm259_vm1, %v63_v47  ;;  %9896 = vmatpush3.msra.mxu1 %v2133_v29  ;;  %v10968_v40 = vld [vmem:[%s15502_s0 + $0x270] sm:$0xff]  ;;  %v10977_v41 = vld [vmem:[%s15502_s0 + $0x278] sm:$0xff]  ;;  %v10982_v42 = vld [vmem:[%s15502_s0 + $0x280] sm:$0xff] }
  0x34   :  { %9649 = vmatmul.mubr.msk.f32.gmra.mxu1 %vm259_vm1, %v98_v44  ;;  %v10991_v43 = vld [vmem:[%s15502_s0 + $0x288] sm:$0xff]  ;;  %v10996_v44 = vld [vmem:[%s15502_s0 + $0x290] sm:$0xff]  ;;  %v11005_v45 = vld [vmem:[%s15502_s0 + $0x298] sm:$0xff] }
  0x35   :  { %9651 = vmatprep.mubr.msk.f32.mxu1 %vm259_vm1, %v99_v46  ;;  %v11010_v46 = vld [vmem:[%s15502_s0 + $0x2a0] sm:$0xff]  ;;  %v136_v47 = vld [vmem:[%s15502_s0 + $0x2a8] sm:$0xff]  ;;  %v145_v2 = vld [vmem:[%s15502_s0 + $0x2f0] sm:$0xff] }
  0x36   :  { %9598 = vmatmul.mubr.msk.f32.gmra.mxu0 %vm259_vm1, %v64_v49  ;;  %v137_v49 = vld [vmem:[%s15502_s0 + $0x2b0] sm:$0xff]  ;;  %v11148_v29 = vld [vmem:[%s15502_s0 + $0x368] sm:$0xff] }
  0x37   :  { %9600 = vmatprep.mubr.msk.f32.mxu0 %vm259_vm1, %v65_v51  ;;  %v138_v51 = vld [vmem:[%s15502_s0 + $0x2b8] sm:$0xff] }
  0x38   :  { %9652 = vmatmul.mubr.msk.f32.gmra.mxu1 %vm259_vm1, %v100_v48  ;;  %v2132_v48 = vld [vmem:[%s15505_s3 + $0x18] sm:$0xff] }
  0x39   :  { %9654 = vmatprep.mubr.msk.f32.mxu1 %vm259_vm1, %v10782_v50  ;;  %9897 = vmatprep.subr.mxu1 %v2132_v48 }
  0x3a   :  { %9601 = vmatmul.mubr.msk.f32.gmra.mxu0 %vm259_vm1, %v66_v53  ;;  %9898 = vmatpush3.msra.mxu1 %v2132_v48  ;;  %v139_v53 = vld [vmem:[%s15502_s0 + $0x2c0] sm:$0xff]  ;;  %v164_v48 = vld [vmem:[%s15502_s0 + $0x388] sm:$0xff] }
  0x3b   :  { %9603 = vmatprep.mubr.msk.f32.mxu0 %vm259_vm1, %v67_v55  ;;  %v140_v55 = vld [vmem:[%s15502_s0 + $0x2c8] sm:$0xff] }
  0x3c   :  { %9655 = vmatmul.mubr.msk.f32.gmra.mxu1 %vm259_vm1, %v10794_v52 }
  0x3d   :  { %9657 = vmatprep.mubr.msk.f32.mxu1 %vm259_vm1, %v10803_v54 }
  0x3e   :  { %9604 = vmatmul.mubr.msk.f32.gmra.mxu0 %vm259_vm1, %v68_v57  ;;  %v141_v57 = vld [vmem:[%s15502_s0 + $0x2d0] sm:$0xff] }
  0x3f   :  { %9606 = vmatprep.mubr.msk.f32.mxu0 %vm259_vm1, %v69_v59  ;;  %v142_v59 = vld [vmem:[%s15502_s0 + $0x2d8] sm:$0xff] }
  0x40   :  { %9658 = vmatmul.mubr.msk.f32.gmra.mxu1 %vm259_vm1, %v10816_v56 }
  0x41   :  { %9660 = vmatprep.mubr.msk.f32.mxu1 %vm259_vm1, %v10825_v58 }
  0x42   :  { %9607 = vmatmul.mubr.msk.f32.gmra.mxu0 %vm259_vm1, %v70_v61  ;;  %v143_v61 = vld [vmem:[%s15502_s0 + $0x2e0] sm:$0xff] }
  0x43   :  { %9609 = vmatprep.mubr.msk.f32.mxu0 %vm259_vm1, %v71_v1  ;;  %v144_v1 = vld [vmem:[%s15502_s0 + $0x2e8] sm:$0xff] }
  0x44   :  { %9661 = vmatmul.mubr.msk.f32.gmra.mxu1 %vm259_vm1, %v10838_v60 }
  0x45   :  { %9663 = vmatprep.mubr.msk.f32.mxu1 %vm259_vm1, %v10847_v62 }
  0x46   :  { %9610 = vmatmul.mubr.msk.f32.gmra.mxu0 %vm259_vm1, %v72_v3  ;;  %v146_v3 = vld [vmem:[%s15502_s0 + $0x2f8] sm:$0xff] }
  0x48   :  { %9664 = vmatmul.mubr.msk.f32.gmra.mxu1 %vm259_vm1, %v10857_v63 }
  0x49   :  { %9666 = vmatprep.mubr.msk.f32.mxu1 %vm259_vm1, %v10862_v0 }
  0x4c   :  { %9667 = vmatmul.mubr.msk.f32.gmra.mxu1 %vm259_vm1, %v110_v4  ;;  %v147_v4 = vld [vmem:[%s15502_s0 + $0x300] sm:$0xff] }
  0x4d   :  { %9669 = vmatprep.mubr.msk.f32.mxu1 %vm259_vm1, %v111_v7  ;;  %v148_v7 = vld [vmem:[%s15502_s0 + $0x308] sm:$0xff] }
  0x50   :  { %9670 = vmatmul.mubr.msk.f32.gmra.mxu1 %vm259_vm1, %v112_v10  ;;  %v149_v10 = vld [vmem:[%s15502_s0 + $0x310] sm:$0xff] }
  0x51   :  { %9672 = vmatprep.mubr.msk.f32.mxu1 %vm259_vm1, %v113_v13  ;;  %v150_v13 = vld [vmem:[%s15502_s0 + $0x318] sm:$0xff] }
  0x54   :  { %9673 = vmatmul.mubr.msk.f32.gmra.mxu1 %vm259_vm1, %v114_v15  ;;  %v2131_v15 = vld [vmem:[%s15505_s3 + $0x10] sm:$0xff] }
  0x55   :  { %9675 = vmatprep.mubr.msk.f32.mxu1 %vm259_vm1, %v115_v16  ;;  %v11084_v16 = vld [vmem:[%s15502_s0 + $0x320] sm:$0xff]  ;;  %9899 = vmatprep.subr.mxu1 %v2131_v15 }
  0x56   :  { %9900 = vmatpush3.msra.mxu1 %v2131_v15 }
  0x58   :  { %9676 = vmatmul.mubr.msk.f32.gmra.mxu1 %vm259_vm1, %v116_v17  ;;  %v11092_v17 = vld [vmem:[%s15502_s0 + $0x328] sm:$0xff] }
  0x59   :  { %9678 = vmatprep.mubr.msk.f32.mxu1 %vm259_vm1, %v117_v18  ;;  %v11097_v18 = vld [vmem:[%s15502_s0 + $0x330] sm:$0xff] }
  0x5c   :  { %9679 = vmatmul.mubr.msk.f32.gmra.mxu1 %vm259_vm1, %v118_v19  ;;  %v11106_v19 = vld [vmem:[%s15502_s0 + $0x338] sm:$0xff] }
  0x5d   :  { %9681 = vmatprep.mubr.msk.f32.mxu1 %vm259_vm1, %v119_v20  ;;  %v11111_v20 = vld [vmem:[%s15502_s0 + $0x340] sm:$0xff] }
  0x60   :  { %9682 = vmatmul.mubr.msk.f32.gmra.mxu1 %vm259_vm1, %v120_v21  ;;  %v11120_v21 = vld [vmem:[%s15502_s0 + $0x348] sm:$0xff] }
  0x61   :  { %9684 = vmatprep.mubr.msk.f32.mxu1 %vm259_vm1, %v121_v22  ;;  %v11125_v22 = vld [vmem:[%s15502_s0 + $0x350] sm:$0xff] }
  0x64   :  { %9685 = vmatmul.mubr.msk.f32.gmra.mxu1 %vm259_vm1, %v122_v25  ;;  %v11134_v25 = vld [vmem:[%s15502_s0 + $0x358] sm:$0xff] }
  0x65   :  { %9687 = vmatprep.mubr.msk.f32.mxu1 %vm259_vm1, %v123_v27  ;;  %v11139_v27 = vld [vmem:[%s15502_s0 + $0x360] sm:$0xff] }
  0x68   :  { %9688 = vmatmul.mubr.msk.f32.gmra.mxu1 %vm259_vm1, %v124_v31  ;;  %v11153_v31 = vld [vmem:[%s15502_s0 + $0x370] sm:$0xff] }
  0x69   :  { %9690 = vmatprep.mubr.msk.f32.mxu1 %vm259_vm1, %v125_v33  ;;  %15658 = vst [vmem:[#allocation5_spill] sm:$0xff] %v11153_v31  ;;  %v162_v33 = vld [vmem:[%s15502_s0 + $0x378] sm:$0xff] }
  0x6c   :  { %9691 = vmatmul.mubr.msk.f32.gmra.mxu1 %vm259_vm1, %v10949_v34 }
  0x6d   :  { %9693 = vmatprep.mubr.msk.f32.mxu1 %vm259_vm1, %v10954_v36 }
  0x70   :  { %9694 = vmatmul.mubr.msk.f32.gmra.mxu1 %vm259_vm1, %v10963_v38 }
  0x71   :  { %9696 = vmatprep.mubr.msk.f32.mxu1 %vm259_vm1, %v10968_v40 }
  0x74   :  { %9697 = vmatmul.mubr.msk.f32.gmra.mxu1 %vm259_vm1, %v10977_v41 }
  0x75   :  { %9699 = vmatprep.mubr.msk.f32.mxu1 %vm259_vm1, %v10982_v42 }
  0x78   :  { %9700 = vmatmul.mubr.msk.f32.gmra.mxu1 %vm259_vm1, %v10991_v43 }
  0x79   :  { %9702 = vmatprep.mubr.msk.f32.mxu1 %vm259_vm1, %v10996_v44 }
  0x7c   :  { %9703 = vmatmul.mubr.msk.f32.gmra.mxu1 %vm259_vm1, %v11005_v45 }
  0x7d   :  { %9705 = vmatprep.mubr.msk.f32.mxu1 %vm259_vm1, %v11010_v46 }
  0x80   :  { %9706 = vmatmul.mubr.msk.f32.gmra.mxu1 %vm259_vm1, %v136_v47  ;;  %v163_v47 = vld [vmem:[%s15502_s0 + $0x380] sm:$0xff] }
  0x81   :  { %9708 = vmatprep.mubr.msk.f32.mxu1 %vm259_vm1, %v137_v49  ;;  %v2130_v49 = vld [vmem:[%s15505_s3 + $0x8] sm:$0xff] }
  0x82   :  { %9901 = vmatprep.subr.mxu1 %v2130_v49 }
  0x83   :  { %9902 = vmatpush3.msra.mxu1 %v2130_v49 }
  0x84   :  { %9709 = vmatmul.mubr.msk.f32.gmra.mxu1 %vm259_vm1, %v138_v51  ;;  %v165_v51 = vld [vmem:[%s15502_s0 + $0x390] sm:$0xff] }
  0x85   :  { %9711 = vmatprep.mubr.msk.f32.mxu1 %vm259_vm1, %v139_v53  ;;  %v166_v53 = vld [vmem:[%s15502_s0 + $0x398] sm:$0xff] }
  0x88   :  { %9712 = vmatmul.mubr.msk.f32.gmra.mxu1 %vm259_vm1, %v140_v55  ;;  %v167_v55 = vld [vmem:[%s15502_s0 + $0x3a0] sm:$0xff] }
  0x89   :  { %9714 = vmatprep.mubr.msk.f32.mxu1 %vm259_vm1, %v141_v57  ;;  %v168_v57 = vld [vmem:[%s15502_s0 + $0x3a8] sm:$0xff] }
  0x8c   :  { %9715 = vmatmul.mubr.msk.f32.gmra.mxu1 %vm259_vm1, %v142_v59  ;;  %v169_v59 = vld [vmem:[%s15502_s0 + $0x3b0] sm:$0xff] }
  0x8d   :  { %9717 = vmatprep.mubr.msk.f32.mxu1 %vm259_vm1, %v143_v61  ;;  %v170_v61 = vld [vmem:[%s15502_s0 + $0x3b8] sm:$0xff] }
  0x90   :  { %9718 = vmatmul.mubr.msk.f32.gmra.mxu1 %vm259_vm1, %v144_v1  ;;  %v171_v1 = vld [vmem:[%s15502_s0 + $0x3c0] sm:$0xff] }
  0x91   :  { %9720 = vmatprep.mubr.msk.f32.mxu1 %vm259_vm1, %v145_v2 }
  0x94   :  { %9721 = vmatmul.mubr.msk.f32.gmra.mxu1 %vm259_vm1, %v146_v3  ;;  %v172_v3 = vld [vmem:[%s15502_s0 + $0x3c8] sm:$0xff] }
  0x95   :  { %9723 = vmatprep.mubr.msk.f32.mxu1 %vm259_vm1, %v147_v4 }
  0x98   :  { %9724 = vmatmul.mubr.msk.f32.gmra.mxu1 %vm259_vm1, %v148_v7  ;;  %v173_v7 = vld [vmem:[%s15502_s0 + $0x3d0] sm:$0xff] }
  0x99   :  { %9726 = vmatprep.mubr.msk.f32.mxu1 %vm259_vm1, %v149_v10 }
  0x9c   :  { %9727 = vmatmul.mubr.msk.f32.gmra.mxu1 %vm259_vm1, %v150_v13  ;;  %v174_v13 = vld [vmem:[%s15502_s0 + $0x3d8] sm:$0xff] }
  0x9d   :  { %9729 = vmatprep.mubr.msk.f32.mxu1 %vm259_vm1, %v11084_v16 }
  0xa0   :  { %9730 = vmatmul.mubr.msk.f32.gmra.mxu1 %vm259_vm1, %v11092_v17 }
  0xa1   :  { %9732 = vmatprep.mubr.msk.f32.mxu1 %vm259_vm1, %v11097_v18 }
  0xa4   :  { %9733 = vmatmul.mubr.msk.f32.gmra.mxu1 %vm259_vm1, %v11106_v19 }
  0xa5   :  { %9735 = vmatprep.mubr.msk.f32.mxu1 %vm259_vm1, %v11111_v20 }
  0xa8   :  { %9736 = vmatmul.mubr.msk.f32.gmra.mxu1 %vm259_vm1, %v11120_v21 }
  0xa9   :  { %9738 = vmatprep.mubr.msk.f32.mxu1 %vm259_vm1, %v11125_v22 }
  0xac   :  { %9739 = vmatmul.mubr.msk.f32.gmra.mxu1 %vm259_vm1, %v11134_v25 }
  0xad   :  { %9741 = vmatprep.mubr.msk.f32.mxu1 %vm259_vm1, %v11139_v27 }
  0xb0   :  { %9742 = vmatmul.mubr.msk.f32.gmra.mxu1 %vm259_vm1, %v11148_v29 }
  0xb1   :  { %9744 = vmatprep.mubr.msk.f32.mxu1 %vm259_vm1, %v11153_v31 }
  0xb4   :  { %9745 = vmatmul.mubr.msk.f32.gmra.mxu1 %vm259_vm1, %v162_v33  ;;  %v175_v33 = vld [vmem:[%s15502_s0 + $0x3e0] sm:$0xff] }
  0xb5   :  { %9747 = vmatprep.mubr.msk.f32.mxu1 %vm259_vm1, %v163_v47 }
  0xb8   :  { %9748 = vmatmul.mubr.msk.f32.gmra.mxu1 %vm259_vm1, %v164_v48  ;;  %v11231_v48 = vld [vmem:[%s15502_s0 + $0x3e8] sm:$0xff] }
  0xb9   :  { %9750 = vmatprep.mubr.msk.f32.mxu1 %vm259_vm1, %v165_v51  ;;  %v11238_v51 = vld [vmem:[%s15502_s0 + $0x3f0] sm:$0xff] }
  0xbc   :  { %9751 = vmatmul.mubr.msk.f32.gmra.mxu1 %vm259_vm1, %v166_v53  ;;  %v2129_v53 = vld [vmem:[%s15505_s3] sm:$0xff] }
  0xbd   :  { %9753 = vmatprep.mubr.msk.f32.mxu1 %vm259_vm1, %v167_v55  ;;  %9903 = vmatprep.subr.mxu1 %v2129_v53 }
  0xbe   :  { %9904 = vmatpush3.msra.mxu1 %v2129_v53  ;;  %v11288_v53 = vld [vmem:[%s15502_s0 + $0x418] sm:$0xff] }
  0xc0   :  { %9754 = vmatmul.mubr.msk.f32.gmra.mxu1 %vm259_vm1, %v168_v57  ;;  %v11252_v57 = vld [vmem:[%s15502_s0 + $0x3f8] sm:$0xff] }
  0xc1   :  { %9756 = vmatprep.mubr.msk.f32.mxu1 %vm259_vm1, %v169_v59 }
  0xc4   :  { %v11200_v2 = vpop.f32.mrf.mxu1  ;;  %9757 = vmatmul.mubr.msk.f32.gmra.mxu1 %vm259_vm1, %v170_v61  ;;  %v11259_v61 = vld [vmem:[%s15502_s0 + $0x400] sm:$0xff] }
  0xc5   :  { %9759 = vmatprep.mubr.msk.f32.mxu1 %vm259_vm1, %v171_v1 }
  0xc6   :  { %v11207_v4 = vpop.f32.mrf.mxu1 }
  0xc8   :  { %v11212_v10 = vpop.f32.mrf.mxu1  ;;  %9760 = vmatmul.mubr.msk.f32.gmra.mxu1 %vm259_vm1, %v172_v3  ;;  %v11270_v3 = vld [vmem:[%s15502_s0 + $0x408] sm:$0xff] }
  0xc9   :  { %15659 = vst [vmem:[#allocation6_spill] sm:$0xff] %v11212_v10  ;;  %9762 = vmatprep.mubr.msk.f32.mxu1 %vm259_vm1, %v173_v7 }
  0xca   :  { %v11219_v15 = vpop.f32.mrf.mxu1 }
  0xcb   :  { %15660 = vst [vmem:[#allocation7_spill] sm:$0xff] %v11219_v15 }
  0xcc   :  { %v11224_v47 = vpop.f32.mrf.mxu1  ;;  %9763 = vmatmul.mubr.msk.f32.gmra.mxu1 %vm259_vm1, %v174_v13  ;;  %v11277_v13 = vld [vmem:[%s15502_s0 + $0x410] sm:$0xff] }
  0xcd   :  { %15661 = vst [vmem:[#allocation8_spill] sm:$0xff] %v11224_v47  ;;  %9765 = vmatprep.mubr.msk.f32.mxu1 %vm259_vm1, %v175_v33 }
  0xce   :  { %v11233_v49 = vpop.f32.mrf.mxu1 }
  0xcf   :  { %15662 = vst [vmem:[#allocation9_spill] sm:$0xff] %v11233_v49 }
  0xd0   :  { %v11243_v55 = vpop.f32.mrf.mxu1  ;;  %9766 = vmatmul.mubr.msk.f32.gmra.mxu1 %vm259_vm1, %v11231_v48 }
  0xd1   :  { %15663 = vst [vmem:[#allocation10_spill] sm:$0xff] %v11243_v55  ;;  %9768 = vmatprep.mubr.msk.f32.mxu1 %vm259_vm1, %v11238_v51 }
  0xd2   :  { %v11254_v59 = vpop.f32.mrf.mxu1 }
  0xd3   :  { %15664 = vst [vmem:[#allocation11_spill] sm:$0xff] %v11254_v59 }
  0xd4   :  { %v11261_v1 = vpop.f32.mrf.mxu1  ;;  %9769 = vmatmul.mubr.msk.f32.gmra.mxu1 %vm259_vm1, %v11252_v57 }
  0xd5   :  { %15665 = vst [vmem:[#allocation12_spill] sm:$0xff] %v11261_v1  ;;  %9771 = vmatprep.mubr.msk.f32.mxu1 %vm259_vm1, %v11259_v61 }
  0xd6   :  { %v11272_v7 = vpop.f32.mrf.mxu1 }
  0xd7   :  { %15666 = vst [vmem:[#allocation13_spill] sm:$0xff] %v11272_v7  ;;  %v11295_v7 = vld [vmem:[%s15502_s0 + $0x420] sm:$0xff] }
  0xd8   :  { %v11279_v33 = vpop.f32.mrf.mxu1  ;;  %9772 = vmatmul.mubr.msk.f32.gmra.mxu1 %vm259_vm1, %v11270_v3 }
  0xd9   :  { %15667 = vst [vmem:[#allocation14_spill] sm:$0xff] %v11279_v33  ;;  %9774 = vmatprep.mubr.msk.f32.mxu1 %vm259_vm1, %v11277_v13  ;;  %v11306_v33 = vld [vmem:[%s15502_s0 + $0x428] sm:$0xff] }
  0xda   :  { %v11290_v1 = vpop.f32.mrf.mxu1 }
  0xdb   :  { %15668 = vst [vmem:[#allocation15_spill] sm:$0xff] %v11290_v1  ;;  %v11313_v1 = vld [vmem:[%s15502_s0 + $0x430] sm:$0xff] }
  0xdc   :  { %v11297_v55 = vpop.f32.mrf.mxu1  ;;  %9775 = vmatmul.mubr.msk.f32.gmra.mxu1 %vm259_vm1, %v11288_v53  ;;  %15671 = vst [vmem:[#allocation18_spill] sm:$0xff] %v11313_v1 }
  0xdd   :  { %15669 = vst [vmem:[#allocation16_spill] sm:$0xff] %v11297_v55  ;;  %9777 = vmatprep.mubr.msk.f32.mxu1 %vm259_vm1, %v11295_v7  ;;  %v11324_v55 = vld [vmem:[%s15502_s0 + $0x438] sm:$0xff] }
  0xde   :  { %v11308_v59 = vpop.f32.mrf.mxu1  ;;  %15673 = vst [vmem:[#allocation20_spill] sm:$0xff] %v11324_v55 }
  0xdf   :  { %15670 = vst [vmem:[#allocation17_spill] sm:$0xff] %v11308_v59  ;;  %v187_v59 = vld [vmem:[%s15502_s0 + $0x440] sm:$0xff] }
  0xe0   :  { %v11315_v47 = vpop.f32.mrf.mxu1  ;;  %9778 = vmatmul.mubr.msk.f32.gmra.mxu1 %vm259_vm1, %v11306_v33 }
  0xe1   :  { %15672 = vst [vmem:[#allocation19_spill] sm:$0xff] %v11315_v47  ;;  %9780 = vmatprep.mubr.msk.f32.mxu1 %vm259_vm1, %v11313_v1  ;;  %v188_v47 = vld [vmem:[%s15502_s0 + $0x448] sm:$0xff] }
  0xe2   :  { %v11326_v31 = vpop.f32.mrf.mxu1 }
  0xe3   :  { %15674 = vst [vmem:[#allocation21_spill] sm:$0xff] %v11326_v31  ;;  %v189_v31 = vld [vmem:[%s15502_s0 + $0x450] sm:$0xff] }
  0xe4   :  { %v11331_v49 = vpop.f32.mrf.mxu1  ;;  %9781 = vmatmul.mubr.msk.f32.gmra.mxu1 %vm259_vm1, %v11324_v55  ;;  %v10451_v55 = vmov 3  }
  0xe5   :  { %15675 = vst [vmem:[#allocation22_spill] sm:$0xff] %v11331_v49  ;;  %9783 = vmatprep.mubr.msk.f32.mxu1 %vm259_vm1, %v187_v59  ;;  %v190_v59 = vld [vmem:[%s15502_s0 + $0x458] sm:$0xff]  ;;  %10299 = vset.pattern.permute.xlu1 %v10451_v55 }
  0xe6   :  { %v11339_v1 = vpop.f32.mrf.mxu1  ;;  %10298 = vset.pattern.permute.xlu0 %v10451_v55  ;;  %6428 = vperm.xlu1 %10299, %v10561_v5   ;;  %v193_v55 = vld [vmem:[%s15502_s0 + $0x470] sm:$0xff]  ;;  %v194_v5 = vld [vmem:[%s15502_s0 + $0x478] sm:$0xff] }
  0xe7   :  { %15676 = vst [vmem:[#allocation23_spill] sm:$0xff] %v11339_v1  ;;  %v191_v1 = vld [vmem:[%s15502_s0 + $0x460] sm:$0xff]  ;;  %6328 = vperm.xlu0 %10298, %v10649_v23  }
  0xe8   :  { %v11344_v10 = vpop.f32.mrf.mxu1  ;;  %9784 = vmatmul.mubr.msk.f32.gmra.mxu1 %vm259_vm1, %v188_v47 }
  0xe9   :  { %15677 = vst [vmem:[#allocation24_spill] sm:$0xff] %v11344_v10  ;;  %9786 = vmatprep.mubr.msk.f32.mxu1 %vm259_vm1, %v189_v31  ;;  %v192_v31 = vld [vmem:[%s15502_s0 + $0x468] sm:$0xff] }
  0xea   :  { %v11351_v49 = vpop.f32.mrf.mxu1  ;;  %6432 = vperm.xlu1 %10299, %v10566_v6   ;;  %v196_v6 = vld [vmem:[%s15502_s0 + $0x488] sm:$0xff] }
  0xeb   :  { %6332 = vperm.xlu0 %10298, %v10654_v24  }
  0xec   :  { %v11356_v15 = vpop.f32.mrf.mxu1  ;;  %9787 = vmatmul.mubr.msk.f32.gmra.mxu1 %vm259_vm1, %v190_v59 }
  0xed   :  { %9789 = vmatprep.mubr.msk.f32.mxu1 %vm259_vm1, %v191_v1  ;;  %v195_v1 = vld [vmem:[%s15502_s0 + $0x480] sm:$0xff] }
  0xee   :  { %v11365_v47 = vpop.f32.mrf.mxu1  ;;  %6532 = vperm.xlu1 %10299, %v10794_v52   ;;  %v198_v52 = vld [vmem:[%s15502_s0 + $0x498] sm:$0xff] }
  0xef   :  { %6528 = vperm.xlu0 %10298, %v10782_v50  }
  0xf0   :  { %v11370_v10 = vpop.f32.mrf.mxu1  ;;  %9790 = vmatmul.mubr.msk.f32.gmra.mxu1 %vm259_vm1, %v192_v31  ;;  %v197_v31 = vld [vmem:[%s15502_s0 + $0x490] sm:$0xff] }
  0xf1   :  { %9792 = vmatprep.mubr.msk.f32.mxu1 %vm259_vm1, %v193_v55 }
  0xf2   :  { %v11379_v23 = vpop.f32.mrf.mxu1  ;;  %6436 = vperm.xlu1 %10299, %v10579_v8   ;;  %v200_v8 = vld [vmem:[%s15502_s0 + $0x4a8] sm:$0xff] }
  0xf3   :  { %6336 = vperm.xlu0 %10298, %v10667_v26  }
  0xf4   :  { %v11384_v59 = vpop.f32.mrf.mxu1  ;;  %9793 = vmatmul.mubr.msk.f32.gmra.mxu1 %vm259_vm1, %v194_v5  ;;  %v199_v5 = vld [vmem:[%s15502_s0 + $0x4a0] sm:$0xff] }
  0xf5   :  { %9795 = vmatprep.mubr.msk.f32.mxu1 %vm259_vm1, %v195_v1 }
  0xf6   :  { %v11393_v24 = vpop.f32.mrf.mxu1  ;;  %6632 = vperm.xlu1 %10299, %v10954_v36   ;;  %v202_v36 = vld [vmem:[%s15502_s0 + $0x4b8] sm:$0xff] }
  0xf7   :  { %6628 = vperm.xlu0 %10298, %v10949_v34  }
  0xf8   :  { %v11398_v55 = vpop.f32.mrf.mxu1  ;;  %9796 = vmatmul.mubr.msk.f32.gmra.mxu1 %vm259_vm1, %v196_v6  ;;  %v201_v6 = vld [vmem:[%s15502_s0 + $0x4b0] sm:$0xff] }
  0xf9   :  { %9798 = vmatprep.mubr.msk.f32.mxu1 %vm259_vm1, %v197_v31 }
  0xfa   :  { %v11407_v50 = vpop.f32.mrf.mxu1  ;;  %6728 = vperm.xlu1 %10299, %v11084_v16  }
  0xfb   :  { %6536 = vperm.xlu0 %10298, %v10803_v54   ;;  %v11451_v54 = vld [vmem:[%s15502_s0 + $0x4c8] sm:$0xff] }
  0xfc   :  { %v11412_v1 = vpop.f32.mrf.mxu1  ;;  %9799 = vmatmul.mubr.msk.f32.gmra.mxu1 %vm259_vm1, %v198_v52  ;;  %v11440_v52 = vld [vmem:[%s15502_s0 + $0x4c0] sm:$0xff] }
  0xfd   :  { %9801 = vmatprep.mubr.msk.f32.mxu1 %vm259_vm1, %v199_v5 }
  0xfe   :  { %v11421_v26 = vpop.f32.mrf.mxu1  ;;  %6340 = vperm.xlu1 %10299, %v10678_v28   ;;  %v11471_v28 = vld [vmem:[%s15502_s0 + $0x4d8] sm:$0xff] }
  0xff   :  { %6732 = vperm.xlu0 %10298, %v11092_v17  }
 0x100   :  { %v11426_v31 = vpop.f32.mrf.mxu1  ;;  %9802 = vmatmul.mubr.msk.f32.gmra.mxu1 %vm259_vm1, %v200_v8  ;;  %v11459_v8 = vld [vmem:[%s15502_s0 + $0x4d0] sm:$0xff] }
 0x101   :  { %15678 = vst [vmem:[#allocation25_spill] sm:$0xff] %v11426_v31  ;;  %9804 = vmatprep.mubr.msk.f32.mxu1 %vm259_vm1, %v201_v6 }
 0x102   :  { %v11435_v34 = vpop.f32.mrf.mxu1  ;;  %6636 = vperm.xlu1 %10299, %v10963_v38  }
 0x103   :  { %6440 = vperm.xlu0 %10298, %v10584_v9   ;;  %v11491_v9 = vld [vmem:[%s15502_s0 + $0x4e8] sm:$0xff] }
 0x104   :  { %v11442_v5 = vpop.f32.mrf.mxu1  ;;  %9805 = vmatmul.mubr.msk.f32.gmra.mxu1 %vm259_vm1, %v202_v36 }
 0x105   :  { %15679 = vst [vmem:[#allocation26_spill] sm:$0xff] %v11442_v5  ;;  %9807 = vmatprep.mubr.msk.f32.mxu1 %vm259_vm1, %v11440_v52 }
 0x106   :  { %v11454_v16 = vpop.f32.mrf.mxu1  ;;  %6832 = vperm.xlu1 %10299, %v11238_v51  }
 0x107   :  { %15680 = vst [vmem:[#allocation27_spill] sm:$0xff] %v11454_v16  ;;  %6828 = vperm.xlu0 %10298, %v11231_v48   ;;  %v11511_v48 = vld [vmem:[%s15502_s0 + $0x4f8] sm:$0xff] }
 0x108   :  { %v11461_v5 = vpop.f32.mrf.mxu1  ;;  %9808 = vmatmul.mubr.msk.f32.gmra.mxu1 %vm259_vm1, %v11451_v54 }
 0x109   :  { %15681 = vst [vmem:[#allocation28_spill] sm:$0xff] %v11461_v5  ;;  %9810 = vmatprep.mubr.msk.f32.mxu1 %vm259_vm1, %v11459_v8  ;;  %v11479_v5 = vld [vmem:[%s15502_s0 + $0x4e0] sm:$0xff] }
 0x10a   :  { %v11474_v17 = vpop.f32.mrf.mxu1  ;;  %6736 = vperm.xlu1 %10299, %v11097_v18  }
 0x10b   :  { %15682 = vst [vmem:[#allocation29_spill] sm:$0xff] %v11474_v17  ;;  %6540 = vperm.xlu0 %10298, %v10816_v56   ;;  %v212_v56 = vld [vmem:[%s15502_s0 + $0x508] sm:$0xff] }
 0x10c   :  { %v11481_v16 = vpop.f32.mrf.mxu1  ;;  %9811 = vmatmul.mubr.msk.f32.gmra.mxu1 %vm259_vm1, %v11471_v28 }
 0x10d   :  { %15683 = vst [vmem:[#allocation30_spill] sm:$0xff] %v11481_v16  ;;  %9813 = vmatprep.mubr.msk.f32.mxu1 %vm259_vm1, %v11479_v5  ;;  %v11499_v16 = vld [vmem:[%s15502_s0 + $0x4f0] sm:$0xff] }
 0x10e   :  { %v11494_v38 = vpop.f32.mrf.mxu1  ;;  %6932 = vperm.xlu1 %10299, %v202_v36   ;;  %v214_v36 = vld [vmem:[%s15502_s0 + $0x518] sm:$0xff] }
 0x10f   :  { %15684 = vst [vmem:[#allocation31_spill] sm:$0xff] %v11494_v38  ;;  %6928 = vperm.xlu0 %10298, %v201_v6  }
 0x110   :  { %v11501_v17 = vpop.f32.mrf.mxu1  ;;  %9814 = vmatmul.mubr.msk.f32.gmra.mxu1 %vm259_vm1, %v11491_v9 }
 0x111   :  { %15685 = vst [vmem:[#allocation32_spill] sm:$0xff] %v11501_v17  ;;  %9816 = vmatprep.mubr.msk.f32.mxu1 %vm259_vm1, %v11499_v16  ;;  %v11519_v17 = vld [vmem:[%s15502_s0 + $0x500] sm:$0xff] }
 0x112   :  { %v11514_v51 = vpop.f32.mrf.mxu1  ;;  %6444 = vperm.xlu1 %10299, %v10596_v11   ;;  %v216_v11 = vld [vmem:[%s15502_s0 + $0x528] sm:$0xff] }
 0x113   :  { %15686 = vst [vmem:[#allocation33_spill] sm:$0xff] %v11514_v51  ;;  %v213_v51 = vld [vmem:[%s15502_s0 + $0x510] sm:$0xff]  ;;  %6344 = vperm.xlu0 %10298, %v10689_v30  }
 0x114   :  { %v11521_v38 = vpop.f32.mrf.mxu1  ;;  %9817 = vmatmul.mubr.msk.f32.gmra.mxu1 %vm259_vm1, %v11511_v48 }
 0x115   :  { %15687 = vst [vmem:[#allocation34_spill] sm:$0xff] %v11521_v38  ;;  %9819 = vmatprep.mubr.msk.f32.mxu1 %vm259_vm1, %v11519_v17  ;;  %v215_v38 = vld [vmem:[%s15502_s0 + $0x520] sm:$0xff] }
 0x116   :  { %v11530_v18 = vpop.f32.mrf.mxu1  ;;  %6836 = vperm.xlu1 %10299, %v11252_v57   ;;  %v226_v57 = vld [vmem:[%s15502_s0 + $0x578] sm:$0xff] }
 0x117   :  { %15688 = vst [vmem:[#allocation35_spill] sm:$0xff] %v11530_v18  ;;  %6640 = vperm.xlu0 %10298, %v10968_v40   ;;  %v218_v40 = vld [vmem:[%s15502_s0 + $0x538] sm:$0xff] }
 0x118   :  { %v11535_v31 = vpop.f32.mrf.mxu1  ;;  %9820 = vmatmul.mubr.msk.f32.gmra.mxu1 %vm259_vm1, %v212_v56  ;;  %v227_v56 = vld [vmem:[%s15502_s0 + $0x580] sm:$0xff] }
 0x119   :  { %9822 = vmatprep.mubr.msk.f32.mxu1 %vm259_vm1, %v213_v51  ;;  %v217_v51 = vld [vmem:[%s15502_s0 + $0x530] sm:$0xff] }
 0x11a   :  { %v11544_v6 = vpop.f32.mrf.mxu1  ;;  %7032 = vperm.xlu1 %10299, %v227_v56  }
 0x11b   :  { %7028 = vperm.xlu0 %10298, %v226_v57  }
 0x11c   :  { %v11549_v18 = vpop.f32.mrf.mxu1  ;;  %9823 = vmatmul.mubr.msk.f32.gmra.mxu1 %vm259_vm1, %v214_v36 }
 0x11d   :  { %15689 = vst [vmem:[#allocation36_spill] sm:$0xff] %v11549_v18  ;;  %9825 = vmatprep.mubr.msk.f32.mxu1 %vm259_vm1, %v215_v38 }
 0x11e   :  { %v11558_v30 = vpop.f32.mrf.mxu1  ;;  %6740 = vperm.xlu1 %10299, %v11106_v19   ;;  %v222_v19 = vld [vmem:[%s15502_s0 + $0x558] sm:$0xff] }
 0x11f   :  { %15690 = vst [vmem:[#allocation37_spill] sm:$0xff] %v11558_v30  ;;  %6544 = vperm.xlu0 %10298, %v10825_v58  }
 0x120   :  { %v11566_v36 = vpop.f32.mrf.mxu1  ;;  %9826 = vmatmul.mubr.msk.f32.gmra.mxu1 %vm259_vm1, %v216_v11  ;;  %v220_v11 = vld [vmem:[%s15502_s0 + $0x548] sm:$0xff] }
 0x121   :  { %15691 = vst [vmem:[#allocation38_spill] sm:$0xff] %v11566_v36  ;;  %9828 = vmatprep.mubr.msk.f32.mxu1 %vm259_vm1, %v217_v51  ;;  %v219_v36 = vld [vmem:[%s15502_s0 + $0x540] sm:$0xff] }
 0x122   :  { %v11576_v38 = vpop.f32.mrf.mxu1  ;;  %6348 = vperm.xlu1 %10299, %v10700_v32   ;;  %v224_v32 = vld [vmem:[%s15502_s0 + $0x568] sm:$0xff] }
 0x123   :  { %15692 = vst [vmem:[#allocation39_spill] sm:$0xff] %v11576_v38  ;;  %v221_v38 = vld [vmem:[%s15502_s0 + $0x550] sm:$0xff]  ;;  %6936 = vperm.xlu0 %10298, %v11440_v52  }
 0x124   :  { %v11581_v18 = vpop.f32.mrf.mxu1  ;;  %9829 = vmatmul.mubr.msk.f32.gmra.mxu1 %vm259_vm1, %v218_v40 }
 0x125   :  { %9831 = vmatprep.mubr.msk.f32.mxu1 %vm259_vm1, %v219_v36  ;;  %v223_v36 = vld [vmem:[%s15502_s0 + $0x560] sm:$0xff] }
 0x126   :  { %v11590_v51 = vpop.f32.mrf.mxu1  ;;  %6644 = vperm.xlu1 %10299, %v10977_v41   ;;  %v11629_v41 = vpop.f32.mrf.mxu0 }
 0x127   :  { %6448 = vperm.xlu0 %10298, %v10601_v12  }
 0x128   :  { %v11595_v30 = vpop.f32.mrf.mxu1  ;;  %9832 = vmatmul.mubr.msk.f32.gmra.mxu1 %vm259_vm1, %v220_v11  ;;  %v228_v11 = vld [vmem:[%s15502_s0 + $0x588] sm:$0xff] }
 0x129   :  { %15693 = vst [vmem:[#allocation40_spill] sm:$0xff] %v11595_v30  ;;  %9834 = vmatprep.mubr.msk.f32.mxu1 %vm259_vm1, %v221_v38  ;;  %v225_v38 = vld [vmem:[%s15502_s0 + $0x570] sm:$0xff]  ;;  %v242_v30 = vld [vmem:[%s15502_s0 + $0x5f8] sm:$0xff] }
 0x12a   :  { %v11604_v58 = vpop.f32.mrf.mxu1  ;;  %7036 = vperm.xlu1 %10299, %v228_v11  }
 0x12b   :  { %15694 = vst [vmem:[#allocation41_spill] sm:$0xff] %v11604_v58  ;;  %6840 = vperm.xlu0 %10298, %v11259_v61   ;;  %v229_v61 = vld [vmem:[%s15502_s0 + $0x590] sm:$0xff] }
 0x12c   :  { %v11609_v40 = vpop.f32.mrf.mxu1  ;;  %9835 = vmatmul.mubr.msk.f32.gmra.mxu1 %vm259_vm1, %v222_v19 }
 0x12d   :  { %15695 = vst [vmem:[#allocation42_spill] sm:$0xff] %v11609_v40  ;;  %9837 = vmatprep.mubr.msk.f32.mxu1 %vm259_vm1, %v223_v36  ;;  %v11638_v40 = vpop.f32.mrf.mxu0 }
 0x12e   :  { %v11618_v52 = vpop.f32.mrf.mxu1  ;;  %6744 = vperm.xlu1 %10299, %v11111_v20  }
 0x12f   :  { %15696 = vst [vmem:[#allocation43_spill] sm:$0xff] %v11618_v52  ;;  %6548 = vperm.xlu0 %10298, %v10838_v60   ;;  %v230_v60 = vld [vmem:[%s15502_s0 + $0x598] sm:$0xff] }
 0x130   :  { %v11626_v19 = vpop.f32.mrf.mxu1  ;;  %9838 = vmatmul.mubr.msk.f32.gmra.mxu1 %vm259_vm1, %v224_v32 }
 0x131   :  { %15697 = vst [vmem:[#allocation44_spill] sm:$0xff] %v11626_v19  ;;  %9840 = vmatprep.mubr.msk.f32.mxu1 %vm259_vm1, %v225_v38  ;;  %v11648_v38 = vpop.f32.mrf.mxu0 }
 0x132   :  { %v11633_v12 = vpop.f32.mrf.mxu1  ;;  %6352 = vperm.xlu1 %10299, %v10714_v35   ;;  %v11677_v35 = vld [vmem:[%s15502_s0 + $0x5a8] sm:$0xff] }
 0x133   :  { %15698 = vst [vmem:[#allocation45_spill] sm:$0xff] %v11633_v12  ;;  %6940 = vperm.xlu0 %10298, %v11451_v54  }
 0x134   :  { %v11635_v36 = vpop.f32.mrf.mxu1  ;;  %9841 = vmatmul.mubr.msk.f32.gmra.mxu1 %vm259_vm1, %v226_v57  ;;  %v11666_v57 = vpop.f32.mrf.mxu0 }
 0x135   :  { %15699 = vst [vmem:[#allocation46_spill] sm:$0xff] %v11635_v36  ;;  %9843 = vmatprep.mubr.msk.f32.mxu1 %vm259_vm1, %v227_v56  ;;  %v11664_v56 = vld [vmem:[%s15502_s0 + $0x5a0] sm:$0xff] }
 0x136   :  { %v11643_v32 = vpop.f32.mrf.mxu1  ;;  %6648 = vperm.xlu1 %10299, %v10982_v42  }
 0x137   :  { %15700 = vst [vmem:[#allocation47_spill] sm:$0xff] %v11643_v32  ;;  %6452 = vperm.xlu0 %10298, %v10613_v14   ;;  %v11698_v14 = vld [vmem:[%s15502_s0 + $0x5b8] sm:$0xff] }
 0x138   :  { %v11650_v19 = vpop.f32.mrf.mxu1  ;;  %9844 = vmatmul.mubr.msk.f32.gmra.mxu1 %vm259_vm1, %v228_v11 }
 0x139   :  { %15701 = vst [vmem:[#allocation48_spill] sm:$0xff] %v11650_v19  ;;  %9846 = vmatprep.mubr.msk.f32.mxu1 %vm259_vm1, %v229_v61  ;;  %v11687_v19 = vpop.f32.mrf.mxu0 }
 0x13a   :  { %v11659_v20 = vpop.f32.mrf.mxu1  ;;  %7040 = vperm.xlu1 %10299, %v229_v61  }
 0x13b   :  { %15702 = vst [vmem:[#allocation49_spill] sm:$0xff] %v11659_v20  ;;  %6844 = vperm.xlu0 %10298, %v11270_v3   ;;  %v11708_v20 = vpop.f32.mrf.mxu0  ;;  %v11720_v3 = vld [vmem:[%s15502_s0 + $0x5c8] sm:$0xff] }
 0x13c   :  { %v11668_v11 = vpop.f32.mrf.mxu1  ;;  %9847 = vmatmul.mubr.msk.f32.gmra.mxu1 %vm259_vm1, %v230_v60 }
 0x13d   :  { %15703 = vst [vmem:[#allocation50_spill] sm:$0xff] %v11668_v11  ;;  %9849 = vmatprep.mubr.msk.f32.mxu1 %vm259_vm1, %v11664_v56  ;;  %v11685_v11 = vld [vmem:[%s15502_s0 + $0x5b0] sm:$0xff]  ;;  %v11730_v36 = vpop.f32.mrf.mxu0 }
 0x13e   :  { %v11680_v54 = vpop.f32.mrf.mxu1  ;;  %6748 = vperm.xlu1 %10299, %v11120_v21  }
 0x13f   :  { %15704 = vst [vmem:[#allocation51_spill] sm:$0xff] %v11680_v54  ;;  %6552 = vperm.xlu0 %10298, %v10847_v62   ;;  %v11742_v62 = vld [vmem:[%s15502_s0 + $0x5d8] sm:$0xff]  ;;  %v11752_v32 = vpop.f32.mrf.mxu0 }
 0x140   :  { %v11689_v42 = vpop.f32.mrf.mxu1  ;;  %9850 = vmatmul.mubr.msk.f32.gmra.mxu1 %vm259_vm1, %v11677_v35 }
 0x141   :  { %15705 = vst [vmem:[#allocation52_spill] sm:$0xff] %v11689_v42  ;;  %9852 = vmatprep.mubr.msk.f32.mxu1 %vm259_vm1, %v11685_v11  ;;  %v11706_v42 = vld [vmem:[%s15502_s0 + $0x5c0] sm:$0xff]  ;;  %v11772_v52 = vpop.f32.mrf.mxu0 }
 0x142   :  { %v11701_v54 = vpop.f32.mrf.mxu1  ;;  %6356 = vperm.xlu1 %10299, %v10723_v37  }
 0x143   :  { %15706 = vst [vmem:[#allocation53_spill] sm:$0xff] %v11701_v54  ;;  %6944 = vperm.xlu0 %10298, %v11459_v8   ;;  %v240_v8 = vld [vmem:[%s15502_s0 + $0x5e8] sm:$0xff]  ;;  %v11787_v58 = vpop.f32.mrf.mxu0 }
 0x144   :  { %v11710_v61 = vpop.f32.mrf.mxu1  ;;  %9853 = vmatmul.mubr.msk.f32.gmra.mxu1 %vm259_vm1, %v11698_v14 }
 0x145   :  { %15707 = vst [vmem:[#allocation54_spill] sm:$0xff] %v11710_v61  ;;  %9855 = vmatprep.mubr.msk.f32.mxu1 %vm259_vm1, %v11706_v42  ;;  %v11728_v61 = vld [vmem:[%s15502_s0 + $0x5d0] sm:$0xff] }
 0x146   :  { %v11723_v54 = vpop.f32.mrf.mxu1  ;;  %6652 = vperm.xlu1 %10299, %v10991_v43  }
 0x147   :  { %15708 = vst [vmem:[#allocation55_spill] sm:$0xff] %v11723_v54 }
 0x148   :  { %v11732_v21 = vpop.f32.mrf.mxu1  ;;  %9856 = vmatmul.mubr.msk.f32.gmra.mxu1 %vm259_vm1, %v11720_v3 }
 0x149   :  { %15709 = vst [vmem:[#allocation56_spill] sm:$0xff] %v11732_v21  ;;  %9858 = vmatprep.mubr.msk.f32.mxu1 %vm259_vm1, %v11728_v61  ;;  %v11750_v21 = vld [vmem:[%s15502_s0 + $0x5e0] sm:$0xff] }
 0x14a   :  { %v11745_v54 = vpop.f32.mrf.mxu1  ;;  %7044 = vperm.xlu1 %10299, %v230_v60  }
 0x14b   :  { %15710 = vst [vmem:[#allocation57_spill] sm:$0xff] %v11745_v54  ;;  %v10304_v54 = vld [vmem:[%s15502_s0 + $0x100] sm:$0xff] }
 0x14c   :  { %v11754_v37 = vpop.f32.mrf.mxu1  ;;  %9859 = vmatmul.mubr.msk.f32.gmra.mxu1 %vm259_vm1, %v11742_v62  ;;  %6456 = vperm.xlu0 %10298, %v10304_v54  }
 0x14d   :  { %15711 = vst [vmem:[#allocation58_spill] sm:$0xff] %v11754_v37  ;;  %9861 = vmatprep.mubr.msk.f32.mxu1 %vm259_vm1, %v11750_v21  ;;  %v241_v37 = vld [vmem:[%s15502_s0 + $0x5f0] sm:$0xff] }
 0x14e   :  { %v11767_v12 = vpop.f32.mrf.mxu1  ;;  %6752 = vperm.xlu1 %10299, %v11125_v22  }
 0x14f   :  { %15712 = vst [vmem:[#allocation59_spill] sm:$0xff] %v11767_v12  ;;  %v243_v12 = vld [vmem:[%s15502_s0 + $0x600] sm:$0xff] }
 0x150   :  { %v11774_v43 = vpop.f32.mrf.mxu1  ;;  %9862 = vmatmul.mubr.msk.f32.gmra.mxu1 %vm259_vm1, %v240_v8  ;;  %6848 = vperm.xlu0 %10298, %v11277_v13   ;;  %v244_v13 = vld [vmem:[%s15502_s0 + $0x608] sm:$0xff]  ;;  %v11803_v8 = vpop.f32.mrf.mxu0 }
 0x151   :  { %15713 = vst [vmem:[#allocation60_spill] sm:$0xff] %v11774_v43  ;;  %9864 = vmatprep.mubr.msk.f32.mxu1 %vm259_vm1, %v241_v37  ;;  %v245_v37 = vld [vmem:[%s15502_s0 + $0x610] sm:$0xff] }
 0x152   :  { %v11782_v54 = vpop.f32.mrf.mxu1  ;;  %6360 = vperm.xlu1 %10299, %v10736_v39   ;;  %v11824_v39 = vld [vmem:[%s15504_s2] ss:$0 sm:$0xff] }
 0x154   :  { %v11789_v43 = vpop.f32.mrf.mxu1  ;;  %9865 = vmatmul.mubr.msk.f32.gmra.mxu1 %vm259_vm1, %v242_v30  ;;  %6556 = vperm.xlu0 %10298, %v10857_v63   ;;  %v246_v63 = vld [vmem:[%s15502_s0 + $0x618] sm:$0xff]  ;;  %v247_v30 = vld [vmem:[%s15502_s0 + $0x620] sm:$0xff] }
 0x155   :  { %15714 = vst [vmem:[#allocation61_spill] sm:$0xff] %v11789_v43  ;;  %9867 = vmatprep.mubr.msk.f32.mxu1 %vm259_vm1, %v243_v12  ;;  %v11819_v12 = vpop.f32.mrf.mxu0 }
 0x156   :  { %v11798_v60 = vpop.f32.mrf.mxu1  ;;  %6656 = vperm.xlu1 %10299, %v10996_v44   ;;  %v249_v44 = vld [vmem:[%s15502_s0 + $0x630] sm:$0xff] }
 0x158   :  { %v11805_v43 = vpop.f32.mrf.mxu1  ;;  %9868 = vmatmul.mubr.msk.f32.gmra.mxu1 %vm259_vm1, %v244_v13  ;;  %6948 = vperm.xlu0 %10298, %v11471_v28   ;;  %v248_v28 = vld [vmem:[%s15502_s0 + $0x628] sm:$0xff] }
 0x159   :  { %15715 = vst [vmem:[#allocation62_spill] sm:$0xff] %v11805_v43  ;;  %9870 = vmatprep.mubr.msk.f32.mxu1 %vm259_vm1, %v245_v37  ;;  %v931_v37 = vadd.f32 %v11824_v39, %v11638_v40  ;;  %v10305_v43 = vld [vmem:[%s15502_s0 + $0x108] sm:$0xff] }
 0x15a   :  { %v11814_v22 = vpop.f32.mrf.mxu1  ;;  %7048 = vperm.xlu1 %10299, %v11664_v56   ;;  %v946_v56 = vadd.f32 %v11648_v38, %v11824_v39 }
 0x15b   :  { %15716 = vst [vmem:[#allocation63_spill] sm:$0xff] %v11814_v22  ;;  %v1929_v40 = vmax.f32 %v931_v37, 0.0 }
 0x15c   :  { %v11826_v13 = vpop.f32.mrf.mxu1  ;;  %9871 = vmatmul.mubr.msk.f32.gmra.mxu1 %vm259_vm1, %v246_v63  ;;  %6460 = vperm.xlu0 %10298, %v10305_v43   ;;  %v11844_v63 = vpop.f32.mrf.mxu0  ;;  %v250_v43 = vld [vmem:[%s15502_s0 + $0x638] sm:$0xff] }
 0x15d   :  { %15717 = vst [vmem:[#allocation64_spill] sm:$0xff] %v11826_v13  ;;  %9873 = vmatprep.mubr.msk.f32.mxu1 %vm259_vm1, %v247_v30  ;;  %v941_v13 = vadd.f32 %v11824_v39, %v11666_v57 }
 0x15e   :  { %v11839_v22 = vpop.f32.mrf.mxu1  ;;  %6756 = vperm.xlu1 %10299, %v11134_v25  }
 0x15f   :  { %15718 = vst [vmem:[#allocation65_spill] sm:$0xff] %v11839_v22  ;;  %v936_v22 = vadd.f32 %v11629_v41, %v11824_v39 }
 0x160   :  { %v11846_v30 = vpop.f32.mrf.mxu1  ;;  %9874 = vmatmul.mubr.msk.f32.gmra.mxu1 %vm259_vm1, %v248_v28  ;;  %6852 = vperm.xlu0 %10298, %v11288_v53   ;;  %v990_v28 = vpop.f32.mrf.mxu0  ;;  %v951_v53 = vadd.f32 %v11824_v39, %v11708_v20  ;;  %v10306_v20 = vld [vmem:[%s15502_s0 + $0x48] sm:$0xff] }
 0x161   :  { %15719 = vst [vmem:[#allocation66_spill] sm:$0xff] %v11846_v30  ;;  %9876 = vmatprep.mubr.msk.f32.mxu1 %vm259_vm1, %v249_v44  ;;  %v1931_v44 = vmax.f32 %v941_v13, 0.0  ;;  %v1930_v41 = vmax.f32 %v936_v22, 0.0  ;;  %v11875_v38 = vpop.permute.xlu1 %6428  ;;  %v961_v22 = vadd.f32 %v11824_v39, %v11752_v32  ;;  %v10307_v32 = vld [vmem:[%s15502_s0 + $0x110] sm:$0xff] }
 0x162   :  { %v11859_v30 = vpop.f32.mrf.mxu1  ;;  %15722 = vst [vmem:[#allocation69_spill] sm:$0xff] %v11875_v38  ;;  %6364 = vperm.xlu1 %10299, %v10306_v20  }
 0x163   :  { %15720 = vst [vmem:[#allocation67_spill] sm:$0xff] %v11859_v30  ;;  %v11873_v30 = vpop.f32.mrf.mxu0 }
 0x164   :  { %v11863_v37 = vpop.f32.mrf.mxu1  ;;  %9877 = vmatmul.mubr.msk.f32.gmra.mxu1 %vm259_vm1, %v250_v43  ;;  %6560 = vperm.xlu0 %10298, %v10862_v0   ;;  %v956_v43 = vadd.f32 %v11687_v19, %v11824_v39  ;;  %v1933_v0 = vmax.f32 %v951_v53, 0.0 }
 0x165   :  { %15721 = vst [vmem:[#allocation68_spill] sm:$0xff] %v11863_v37  ;;  %9905 = vmatprep.mubr.msk.f32.mxu1 %vm2149_vm2, %v1929_v40  ;;  %v1932_v37 = vmax.f32 %v946_v56, 0.0  ;;  %v1000_v19 = vpop.f32.mrf.mxu0  ;;  %v11891_v40 = vpop.permute.xlu1 %6432 }
 0x166   :  { %v11871_v57 = vpop.f32.mrf.mxu1  ;;  %15723 = vst [vmem:[#allocation70_spill] sm:$0xff] %v11891_v40  ;;  %v1934_v56 = vmax.f32 %v956_v43, 0.0  ;;  %6660 = vperm.xlu1 %10299, %v11005_v45   ;;  %v976_v45 = vadd.f32 %v11772_v52, %v11824_v39 }
 0x168   :  { %v11879_v25 = vpop.f32.mrf.mxu1  ;;  %9906 = vmatmul.mubr.msk.f32.vlgmr.msra.gmra.mxu1 %vm2149_vm2, %v1930_v41  ;;  %6952 = vperm.xlu0 %10298, %v11479_v5   ;;  %v966_v41 = vadd.f32 %v11730_v36, %v11824_v39  ;;  %v971_v5 = vadd.f32 %v11824_v39, %v11787_v58  ;;  %v9605_v36 = vpop.f32.mrf.mxu0  ;;  %v1938_v52 = vmax.f32 %v976_v45, 0.0 }
 0x169   :  { %9908 = vmatprep.mubr.msk.f32.mxu1 %vm2149_vm2, %v1931_v44  ;;  %v1935_v44 = vmax.f32 %v961_v22, 0.0  ;;  %v11907_v43 = vpop.permute.xlu1 %6532 }
 0x16a   :  { %v11889_v13 = vpop.f32.mrf.mxu1  ;;  %15724 = vst [vmem:[#allocation71_spill] sm:$0xff] %v11907_v43  ;;  %v1936_v20 = vmax.f32 %v966_v41, 0.0  ;;  %7052 = vperm.xlu1 %10299, %v11677_v35   ;;  %v1937_v58 = vmax.f32 %v971_v5, 0.0  ;;  %v1010_v41 = vpop.f32.mrf.mxu0  ;;  %v986_v43 = vadd.f32 %v11803_v8, %v11824_v39 }
 0x16c   :  { %v11895_v38 = vpop.f32.mrf.mxu1  ;;  %9909 = vmatmul.mubr.msk.f32.gmra.mxu1 %vm2149_vm2, %v1932_v37  ;;  %6464 = vperm.xlu0 %10298, %v10307_v32   ;;  %v9608_v5 = vpop.f32.mrf.mxu0  ;;  %v1940_v45 = vmax.f32 %v986_v43, 0.0 }
 0x16d   :  { %9911 = vmatprep.mubr.msk.f32.mxu1 %vm2149_vm2, %v1933_v0  ;;  %v981_v0 = vadd.f32 %v11824_v39, %v11819_v12  ;;  %v11921_v32 = vpop.permute.xlu1 %6436  ;;  %v10308_v12 = vld [vmem:[%s15502_s0 + $0x1d8] sm:$0xff]  ;;  %v1026_v40 = vadd.f32 %v9608_v5, %v11824_v39 }
 0x16e   :  { %v11905_v53 = vpop.f32.mrf.mxu1  ;;  %15725 = vst [vmem:[#allocation72_spill] sm:$0xff] %v11921_v32  ;;  %6760 = vperm.xlu1 %10299, %v11139_v27  }
 0x16f   :  { %v1939_v35 = vmax.f32 %v981_v0, 0.0  ;;  %v1001_v0 = vadd.f32 %v11824_v39, %v1000_v19  ;;  %v10310_v19 = vld [vmem:[%s15502_s0 + $0x118] sm:$0xff] }
 0x170   :  { %v11911_v37 = vpop.f32.mrf.mxu1  ;;  %9912 = vmatmul.mubr.msk.f32.gmra.mxu1 %vm2149_vm2, %v1934_v56  ;;  %6856 = vperm.xlu0 %10298, %v11295_v7   ;;  %v991_v7 = vadd.f32 %v11824_v39, %v990_v28  ;;  %v10309_v28 = vld [vmem:[%s15502_s0 + $0x50] sm:$0xff] }
 0x171   :  { %9914 = vmatprep.mubr.msk.f32.mxu1 %vm2149_vm2, %v1935_v44  ;;  %v11936_v8 = vpop.permute.xlu1 %6632 }
 0x172   :  { %v11919_v22 = vpop.f32.mrf.mxu1  ;;  %15726 = vst [vmem:[#allocation73_spill] sm:$0xff] %v11936_v8  ;;  %6368 = vperm.xlu1 %10299, %v10309_v28  }
 0x174   :  { %v11925_v56 = vpop.f32.mrf.mxu1  ;;  %9915 = vmatmul.mubr.msk.f32.gmra.mxu1 %vm2149_vm2, %v1936_v20  ;;  %6564 = vperm.xlu0 %10298, %v10308_v12   ;;  %v996_v20 = vadd.f32 %v11844_v63, %v11824_v39  ;;  %v1020_v12 = vpop.f32.mrf.mxu0 }
 0x175   :  { %9917 = vmatprep.mubr.msk.f32.mxu1 %vm2149_vm2, %v1937_v58  ;;  %v1941_v58 = vmax.f32 %v991_v7, 0.0  ;;  %v11951_v63 = vpop.permute.xlu1 %6728 }
 0x176   :  { %v11934_v44 = vpop.f32.mrf.mxu1  ;;  %15727 = vst [vmem:[#allocation74_spill] sm:$0xff] %v11951_v63  ;;  %v1942_v8 = vmax.f32 %v996_v20, 0.0  ;;  %6664 = vperm.xlu1 %10299, %v11010_v46   ;;  %v9611_v20 = vpop.f32.mrf.mxu0 }
 0x178   :  { %v11940_v27 = vpop.f32.mrf.mxu1  ;;  %9918 = vmatmul.mubr.msk.f32.gmra.mxu1 %vm2149_vm2, %v1938_v52  ;;  %6956 = vperm.xlu0 %10298, %v11491_v9   ;;  %v1006_v52 = vadd.f32 %v11873_v30, %v11824_v39  ;;  %v1011_v9 = vadd.f32 %v11824_v39, %v1010_v41  ;;  %v1021_v41 = vadd.f32 %v11824_v39, %v1020_v12  ;;  %v10311_v12 = vld [vmem:[%s15502_s0 + $0x1e0] sm:$0xff] }
 0x179   :  { %9920 = vmatprep.mubr.msk.f32.mxu1 %vm2149_vm2, %v1939_v35  ;;  %v1943_v35 = vmax.f32 %v1001_v0, 0.0  ;;  %v11966_v30 = vpop.permute.xlu1 %6340  ;;  %v1030_v0 = vpop.f32.mrf.mxu0 }
 0x17a   :  { %v11949_v43 = vpop.f32.mrf.mxu1  ;;  %15728 = vst [vmem:[#allocation75_spill] sm:$0xff] %v11966_v30  ;;  %v1944_v28 = vmax.f32 %v1006_v52, 0.0  ;;  %7056 = vperm.xlu1 %10299, %v11685_v11   ;;  %v1945_v46 = vmax.f32 %v1011_v9, 0.0  ;;  %v1947_v11 = vmax.f32 %v1021_v41, 0.0  ;;  %v1948_v9 = vmax.f32 %v1026_v40, 0.0  ;;  %v4041_v41 = vld [vmem:[%s15507_s5 + $0xb8] sm:$0xff] }
 0x17b   :  { %v10316_v30 = vld [vmem:[%s15502_s0 + $0x60] sm:$0xff] }
 0x17c   :  { %v11955_v32 = vpop.f32.mrf.mxu1  ;;  %9921 = vmatmul.mubr.msk.f32.gmra.mxu1 %vm2149_vm2, %v1940_v45  ;;  %6468 = vperm.xlu0 %10298, %v10310_v19   ;;  %v1016_v45 = vadd.f32 %v9605_v36, %v11824_v39 }
 0x17d   :  { %9923 = vmatprep.mubr.msk.f32.mxu1 %vm2149_vm2, %v1941_v58  ;;  %v11978_v19 = vpop.permute.xlu1 %6636 }
 0x17e   :  { %v11964_v7 = vpop.f32.mrf.mxu1  ;;  %15729 = vst [vmem:[#allocation76_spill] sm:$0xff] %v11978_v19  ;;  %v1946_v52 = vmax.f32 %v1016_v45, 0.0  ;;  %6764 = vperm.xlu1 %10299, %v11148_v29   ;;  %v4042_v29 = vld [vmem:[%s15507_s5 + $0xc0] sm:$0xf]  ;;  %v1036_v45 = vadd.f32 %v9611_v20, %v11824_v39  ;;  %v1041_v20 = vadd.f32 %v11824_v39, %v11207_v4 }
 0x17f   :  { %v4038_v4 = vld [vmem:[%s15507_s5 + $0xa0] sm:$0xff] }
 0x180   :  { %v11969_v63 = vpop.f32.mrf.mxu1  ;;  %9924 = vmatmul.mubr.msk.f32.gmra.mxu1 %vm2149_vm2, %v1942_v8  ;;  %6860 = vperm.xlu0 %10298, %v11306_v33   ;;  %v1031_v8 = vadd.f32 %v11824_v39, %v1030_v0  ;;  %v4043_v33 = vld [vmem:[%s15507_s5 + $0xc8] sm:$0xf]  ;;  %v10312_v0 = vld [vmem:[%s15502_s0 + $0x58] sm:$0xff] }
 0x181   :  { %9926 = vmatprep.mubr.msk.f32.mxu1 %vm2149_vm2, %v1943_v35  ;;  %8874 = vmatprep.subr.msk.mxu0 %vm860_vm0, %v4043_v33  ;;  %v11999_v5 = vpop.permute.xlu1 %6832 }
 0x182   :  { %v11976_v58 = vpop.f32.mrf.mxu1  ;;  %15730 = vst [vmem:[#allocation77_spill] sm:$0xff] %v11999_v5  ;;  %8875 = vmatpush1.msk.msra.mxu0 %vm860_vm0, %v4042_v29  ;;  %6372 = vperm.xlu1 %10299, %v10312_v0   ;;  %v1046_v29 = vadd.f32 %v11200_v2, %v11824_v39  ;;  %v4037_v2 = vld [vmem:[%s15507_s5 + $0x98] sm:$0xff] }
 0x183   :  { %4670 = vmatprep.subr.mxu0 %v4041_v41  ;;  %v15732_v41 = vld [vmem:[#allocation7_spill] sm:$0xff] }
 0x184   :  { %v11980_v36 = vpop.f32.mrf.mxu1  ;;  %9927 = vmatmul.mubr.msk.f32.gmra.mxu1 %vm2149_vm2, %v1944_v28  ;;  %6568 = vperm.xlu0 %10298, %v10311_v12   ;;  %v10313_v12 = vld [vmem:[%s15502_s0 + $0x2a8] sm:$0xff]  ;;  %v1051_v0 = vadd.f32 %v11824_v39, %v15732_v41 }
 0x185   :  { %9929 = vmatprep.mubr.msk.f32.mxu1 %vm2149_vm2, %v1945_v46  ;;  %v1949_v46 = vmax.f32 %v1031_v8, 0.0  ;;  %v1950_v8 = vmax.f32 %v1036_v45, 0.0  ;;  %v10314_v45 = vld [vmem:[%s15502_s0 + $0x120] sm:$0xff]  ;;  %v15736_v41 = vld [vmem:[#allocation9_spill] sm:$0xff] }
 0x186   :  { %v11993_v35 = vpop.f32.mrf.mxu1  ;;  %6668 = vperm.xlu1 %10299, %v10313_v12  }
 0x188   :  { %v12001_v28 = vpop.f32.mrf.mxu1  ;;  %9930 = vmatmul.mubr.msk.f32.gmra.mxu1 %vm2149_vm2, %v1946_v52  ;;  %6960 = vperm.xlu0 %10298, %v11499_v16   ;;  %v4040_v52 = vld [vmem:[%s15507_s5 + $0xb0] sm:$0xff]  ;;  %v4039_v16 = vld [vmem:[%s15507_s5 + $0xa8] sm:$0xff] }
 0x189   :  { %9932 = vmatprep.mubr.msk.f32.mxu1 %vm2149_vm2, %v1947_v11  ;;  %v12021_v11 = vpop.permute.xlu1 %6736  ;;  %4671 = vmatpush1.msra.mxu0 %v4040_v52 }
 0x18a   :  { %v12013_v40 = vpop.f32.mrf.mxu1  ;;  %15731 = vst [vmem:[#allocation78_spill] sm:$0xff] %v12021_v11  ;;  %4672 = vmatprep.subr.mxu0 %v4039_v16  ;;  %7060 = vperm.xlu1 %10299, %v11698_v14   ;;  %v1952_v16 = vmax.f32 %v1046_v29, 0.0  ;;  %v4035_v11 = vld [vmem:[%s15507_s5 + $0x88] sm:$0xff]  ;;  %v4034_v29 = vld [vmem:[%s15507_s5 + $0x80] sm:$0xff] }
 0x18b   :  { %4673 = vmatpush1.msra.mxu0 %v4038_v4  ;;  %v15734_v4 = vld [vmem:[#allocation6_spill] sm:$0xff] }
 0x18c   :  { %v12023_v33 = vpop.f32.mrf.mxu1  ;;  %9933 = vmatmul.mubr.msk.f32.gmra.mxu1 %vm2149_vm2, %v1948_v9  ;;  %6472 = vperm.xlu0 %10298, %v10314_v45   ;;  %v1056_v12 = vadd.f32 %v15734_v4, %v11824_v39 }
 0x18d   :  { %9935 = vmatprep.mubr.msk.f32.mxu1 %vm2149_vm2, %v1949_v46  ;;  %v1951_v46 = vmax.f32 %v1041_v20, 0.0  ;;  %v12045_v52 = vpop.permute.xlu1 %6932  ;;  %v4036_v20 = vld [vmem:[%s15507_s5 + $0x90] sm:$0xff]  ;;  %4674 = vmatprep.subr.mxu0 %v4037_v2 }
 0x18e   :  { %v12038_v9 = vpop.f32.mrf.mxu1  ;;  %15733 = vst [vmem:[#allocation7_spill] sm:$0xff] %v12045_v52  ;;  %v1061_v52 = vadd.f32 %v11824_v39, %v15736_v41  ;;  %4675 = vmatpush1.msra.mxu0 %v4036_v20  ;;  %v1954_v2 = vmax.f32 %v1056_v12, 0.0  ;;  %v15739_v20 = vld [vmem:[#allocation8_spill] sm:$0xff]  ;;  %v4032_v12 = vld [vmem:[%s15507_s5 + $0x70] sm:$0xff] }
 0x18f   :  { %4676 = vmatprep.subr.mxu0 %v4035_v11  ;;  %v1066_v4 = vadd.f32 %v15739_v20, %v11824_v39 }
 0x190   :  { %v12047_v5 = vpop.f32.mrf.mxu1  ;;  %9936 = vmatmul.mubr.msk.f32.gmra.mxu1 %vm2149_vm2, %v1950_v8  ;;  %v15735_v8 = vld [vmem:[#allocation18_spill] sm:$0xff]  ;;  %4677 = vmatpush1.msra.mxu0 %v4034_v29  ;;  %v1955_v11 = vmax.f32 %v1061_v52, 0.0 }
 0x191   :  { %9938 = vmatprep.mubr.msk.f32.mxu1 %vm2149_vm2, %v1951_v46  ;;  %6864 = vperm.xlu0 %10298, %v15735_v8   ;;  %v1953_v46 = vmax.f32 %v1051_v0, 0.0  ;;  %v12068_v19 = vpop.permute.xlu1 %6444  ;;  %v15738_v0 = vld [vmem:[#allocation5_spill] sm:$0xff]  ;;  %v1956_v52 = vmax.f32 %v1066_v4, 0.0 }
 0x192   :  { %v12060_v45 = vpop.f32.mrf.mxu1  ;;  %15737 = vst [vmem:[#allocation6_spill] sm:$0xff] %v12068_v19  ;;  %6768 = vperm.xlu1 %10299, %v15738_v0   ;;  %v4033_v0 = vld [vmem:[%s15507_s5 + $0x78] sm:$0xff]  ;;  %v4031_v4 = vld [vmem:[%s15507_s5 + $0x68] sm:$0xff] }
 0x193   :  { %4678 = vmatprep.subr.mxu0 %v4033_v0 }
 0x194   :  { %v12070_v14 = vpop.f32.mrf.mxu1  ;;  %9939 = vmatmul.mubr.msk.f32.gmra.mxu1 %vm2149_vm2, %v1952_v16  ;;  %v10315_v16 = vld [vmem:[%s15502_s0 + $0x1e8] sm:$0xff]  ;;  %4679 = vmatpush1.msra.mxu0 %v4032_v12 }
 0x195   :  { %9941 = vmatprep.mubr.msk.f32.mxu1 %vm2149_vm2, %v1953_v46  ;;  %6572 = vperm.xlu0 %10298, %v10315_v16   ;;  %v15740_v46 = vld [vmem:[#allocation11_spill] sm:$0xff]  ;;  %v12093_v20 = vpop.permute.xlu1 %6836  ;;  %v15743_v16 = vld [vmem:[#allocation10_spill] sm:$0xff] }
 0x196   :  { %v12080_v8 = vpop.f32.mrf.mxu1  ;;  %v1071_v41 = vadd.f32 %v11824_v39, %v15740_v46  ;;  %15741 = vst [vmem:[#allocation18_spill] sm:$0xff] %v12093_v20  ;;  %v1076_v46 = vadd.f32 %v15743_v16, %v11824_v39  ;;  %6376 = vperm.xlu1 %10299, %v10316_v30   ;;  %4680 = vmatprep.subr.mxu0 %v4031_v4  ;;  %v15749_v4 = vld [vmem:[#allocation15_spill] sm:$0xff] }
 0x198   :  { %v12095_v29 = vpop.f32.mrf.mxu1  ;;  %9942 = vmatmul.mubr.msk.f32.gmra.mxu1 %vm2149_vm2, %v1954_v2  ;;  %v1957_v20 = vmax.f32 %v1071_v41, 0.0  ;;  %v1958_v30 = vmax.f32 %v1076_v46, 0.0  ;;  %v15747_v41 = vld [vmem:[#allocation12_spill] sm:$0xff] }
 0x199   :  { %15742 = vst [vmem:[#allocation9_spill] sm:$0xff] %v12095_v29  ;;  %9944 = vmatprep.mubr.msk.f32.mxu1 %vm2149_vm2, %v1955_v11  ;;  %6964 = vperm.xlu0 %10298, %v11511_v48   ;;  %v15744_v29 = vld [vmem:[#allocation13_spill] sm:$0xff]  ;;  %v4030_v11 = vld [vmem:[%s15507_s5 + $0x60] sm:$0xff]  ;;  %v12115_v0 = vpop.permute.xlu1 %7032  ;;  %v4029_v48 = vld [vmem:[%s15507_s5 + $0x58] sm:$0xff] }
 0x19a   :  { %v12101_v19 = vpop.f32.mrf.mxu1  ;;  %v1081_v2 = vadd.f32 %v11824_v39, %v15744_v29  ;;  %15745 = vst [vmem:[#allocation5_spill] sm:$0xff] %v12115_v0  ;;  %4681 = vmatpush1.msra.mxu0 %v4030_v11  ;;  %v1086_v29 = vadd.f32 %v15747_v41, %v11824_v39  ;;  %v10317_v0 = vld [vmem:[%s15502_s0 + $0x2b0] sm:$0xff]  ;;  %v10318_v41 = vld [vmem:[%s15502_s0 + $0x128] sm:$0xff] }
 0x19b   :  { %4682 = vmatprep.subr.mxu0 %v4029_v48  ;;  %6672 = vperm.xlu1 %10299, %v10317_v0   ;;  %v4028_v11 = vld [vmem:[%s15507_s5 + $0x50] sm:$0xff] }
 0x19c   :  { %v12117_v12 = vpop.f32.mrf.mxu1  ;;  %9945 = vmatmul.mubr.msk.f32.gmra.mxu1 %vm2149_vm2, %v1956_v52  ;;  %v1959_v52 = vmax.f32 %v1081_v2, 0.0  ;;  %4683 = vmatpush1.msra.mxu0 %v4028_v11  ;;  %v4027_v2 = vld [vmem:[%s15507_s5 + $0x48] sm:$0xff]  ;;  %v1960_v0 = vmax.f32 %v1086_v29, 0.0 }
 0x19d   :  { %15746 = vst [vmem:[#allocation8_spill] sm:$0xff] %v12117_v12  ;;  %9947 = vmatprep.mubr.msk.f32.mxu1 %vm2149_vm2, %v1957_v20  ;;  %v1091_v20 = vadd.f32 %v11824_v39, %v15749_v4  ;;  %v12136_v46 = vpop.permute.xlu1 %6740  ;;  %6476 = vperm.xlu0 %10298, %v10318_v41   ;;  %v15752_v4 = vld [vmem:[#allocation14_spill] sm:$0xff] }
 0x19e   :  { %v12126_v16 = vpop.f32.mrf.mxu1  ;;  %15750 = vst [vmem:[#allocation10_spill] sm:$0xff] %v12136_v46  ;;  %v1096_v46 = vadd.f32 %v15752_v4, %v11824_v39  ;;  %4684 = vmatprep.subr.mxu0 %v4027_v2  ;;  %v15757_v2 = vld [vmem:[#allocation16_spill] sm:$0xff] }
 0x19f   :  { %15748 = vst [vmem:[#allocation11_spill] sm:$0xff] %v12126_v16  ;;  %7064 = vperm.xlu1 %10299, %v11706_v42   ;;  %v1961_v41 = vmax.f32 %v1091_v20, 0.0  ;;  %v15755_v16 = vld [vmem:[#allocation20_spill] sm:$0xff]  ;;  %v4025_v42 = vld [vmem:[%s15507_s5 + $0x38] sm:$0xff]  ;;  %v4024_v20 = vld [vmem:[%s15507_s5 + $0x30] sm:$0xff]  ;;  %v1106_v4 = vadd.f32 %v15757_v2, %v11824_v39 }
 0x1a0   :  { %v12141_v48 = vpop.f32.mrf.mxu1  ;;  %9948 = vmatmul.mubr.msk.f32.gmra.mxu1 %vm2149_vm2, %v1958_v30 }
 0x1a1   :  { %15751 = vst [vmem:[#allocation13_spill] sm:$0xff] %v12141_v48  ;;  %9950 = vmatprep.mubr.msk.f32.mxu1 %vm2149_vm2, %v1959_v52  ;;  %v15753_v48 = vld [vmem:[#allocation17_spill] sm:$0xff]  ;;  %v4026_v52 = vld [vmem:[%s15507_s5 + $0x40] sm:$0xff]  ;;  %v12158_v11 = vpop.permute.xlu1 %6348  ;;  %6868 = vperm.xlu0 %10298, %v15755_v16  }
 0x1a2   :  { %v12150_v12 = vpop.f32.mrf.mxu1  ;;  %v1101_v30 = vadd.f32 %v11824_v39, %v15753_v48  ;;  %15754 = vst [vmem:[#allocation12_spill] sm:$0xff] %v12158_v11  ;;  %4685 = vmatpush1.msra.mxu0 %v4026_v52  ;;  %v1962_v48 = vmax.f32 %v1096_v46, 0.0  ;;  %v15758_v52 = vld [vmem:[#allocation21_spill] sm:$0xff] }
 0x1a3   :  { %4686 = vmatprep.subr.mxu0 %v4025_v42  ;;  %v1111_v11 = vadd.f32 %v11824_v39, %v15758_v52  ;;  %v4023_v46 = vld [vmem:[%s15507_s5 + $0x28] sm:$0xff]  ;;  %v10320_v42 = vld [vmem:[%s15502_s0 + $0x1f0] sm:$0xff] }
 0x1a4   :  { %v12161_v29 = vpop.f32.mrf.mxu1  ;;  %9951 = vmatmul.mubr.msk.f32.gmra.mxu1 %vm2149_vm2, %v1960_v0  ;;  %v10319_v0 = vld [vmem:[%s15502_s0 + $0x378] sm:$0xff]  ;;  %4687 = vmatpush1.msra.mxu0 %v4024_v20  ;;  %v1964_v20 = vmax.f32 %v1106_v4, 0.0  ;;  %v4020_v4 = vld [vmem:[%s15507_s5 + $0x10] sm:$0xff] }
 0x1a5   :  { %15756 = vst [vmem:[#allocation15_spill] sm:$0xff] %v12161_v29  ;;  %9953 = vmatprep.mubr.msk.f32.mxu1 %vm2149_vm2, %v1961_v41  ;;  %6772 = vperm.xlu1 %10299, %v10319_v0   ;;  %v1963_v41 = vmax.f32 %v1101_v30, 0.0  ;;  %v12183_v29 = vpop.permute.xlu1 %6644  ;;  %v4022_v30 = vld [vmem:[%s15507_s5 + $0x20] sm:$0xff]  ;;  %v15761_v0 = vld [vmem:[#allocation19_spill] sm:$0xff] }
 0x1a6   :  { %v12173_v16 = vpop.f32.mrf.mxu1  ;;  %15759 = vst [vmem:[#allocation14_spill] sm:$0xff] %v12183_v29  ;;  %6576 = vperm.xlu0 %10298, %v10320_v42   ;;  %4688 = vmatprep.subr.mxu0 %v4023_v46  ;;  %v1116_v52 = vadd.f32 %v15761_v0, %v11824_v39  ;;  %v10321_v42 = vld [vmem:[%s15502_s0 + $0x68] sm:$0xff]  ;;  %v15762_v46 = vld [vmem:[#allocation23_spill] sm:$0xff] }
 0x1a7   :  { %4689 = vmatpush1.msra.mxu0 %v4022_v30 }
 0x1a8   :  { %v12188_v2 = vpop.f32.mrf.mxu1  ;;  %9954 = vmatmul.mubr.msk.f32.gmra.mxu1 %vm2149_vm2, %v1962_v48  ;;  %v4021_v48 = vld [vmem:[%s15507_s5 + $0x18] sm:$0xff] }
 0x1a9   :  { %15760 = vst [vmem:[#allocation17_spill] sm:$0xff] %v12188_v2  ;;  %9956 = vmatprep.mubr.msk.f32.mxu1 %vm2149_vm2, %v1963_v41  ;;  %6380 = vperm.xlu1 %10299, %v10321_v42   ;;  %v1965_v41 = vmax.f32 %v1111_v11, 0.0  ;;  %v1121_v2 = vadd.f32 %v11824_v39, %v15762_v46  ;;  %v12210_v0 = vpop.permute.xlu1 %7036  ;;  %v4019_v11 = vld [vmem:[%s15507_s5 + $0x8] sm:$0xff]  ;;  %v4018_v42 = vld [vmem:[%s15507_s5] sm:$0xff]  ;;  %v15765_v46 = vld [vmem:[#allocation22_spill] sm:$0xff] }
 0x1aa   :  { %v12197_v29 = vpop.f32.mrf.mxu1  ;;  %4690 = vmatprep.subr.mxu0 %v4021_v48  ;;  %15763 = vst [vmem:[#allocation20_spill] sm:$0xff] %v12210_v0  ;;  %6968 = vperm.xlu0 %10298, %v11519_v17   ;;  %v1966_v48 = vmax.f32 %v1116_v52, 0.0  ;;  %v1126_v17 = vadd.f32 %v15765_v46, %v11824_v39  ;;  %v10323_v52 = vld [vmem:[%s15502_s0 + $0x130] sm:$0xff] }
 0x1ab   :  { %4691 = vmatpush1.msra.mxu0 %v4020_v4  ;;  %v1967_v4 = vmax.f32 %v1121_v2, 0.0 }
 0x1ac   :  { %v12213_v30 = vpop.f32.mrf.mxu1  ;;  %9957 = vmatmul.mubr.msk.f32.gmra.mxu1 %vm2149_vm2, %v1964_v20  ;;  %4692 = vmatprep.subr.mxu0 %v4019_v11  ;;  %v10322_v20 = vld [vmem:[%s15502_s0 + $0x2b8] sm:$0xff]  ;;  %v15539_v11 = vmov 0.0   ;;  %v1968_v2 = vmax.f32 %v1126_v17, 0.0  ;;  %v1146_v17 = vadd.f32 %v11356_v15, %v11824_v39 }
 0x1ad   :  { %15764 = vst [vmem:[#allocation16_spill] sm:$0xff] %v12213_v30  ;;  %9959 = vmatprep.mubr.msk.f32.mxu1 %vm2149_vm2, %v1965_v41  ;;  %6676 = vperm.xlu1 %10299, %v10322_v20   ;;  %v1131_v41 = vadd.f32 %v11824_v39, %v11351_v49  ;;  %v12233_v30 = vpop.permute.xlu1 %6744 }
 0x1ae   :  { %v12225_v0 = vpop.f32.mrf.mxu1  ;;  %4693 = vmatpush1.msra.mxu0 %v4018_v42  ;;  %4726 = vmatprep.mubr.f32.mxu0 %v15539_v11  ;;  %15767 = vst [vmem:[#allocation19_spill] sm:$0xff] %v12233_v30  ;;  %v15768_v42 = vld [vmem:[#allocation24_spill] sm:$0xff]  ;;  %v1141_v30 = vadd.f32 %v11824_v39, %v11365_v47  ;;  %v1972_v15 = vmax.f32 %v1146_v17, 0.0  ;;  %v1166_v17 = vadd.f32 %v11384_v59, %v11824_v39 }
 0x1af   :  { %15766 = vst [vmem:[#allocation21_spill] sm:$0xff] %v12225_v0  ;;  %6480 = vperm.xlu0 %10298, %v10323_v52   ;;  %v1136_v49 = vadd.f32 %v15768_v42, %v11824_v39  ;;  %v1969_v11 = vmax.f32 %v1131_v41, 0.0  ;;  %v1151_v41 = vadd.f32 %v11824_v39, %v11379_v23 }
 0x1b0   :  { %v12238_v46 = vpop.f32.mrf.mxu1  ;;  %9960 = vmatmul.mubr.msk.f32.gmra.mxu1 %vm2149_vm2, %v1966_v48  ;;  %v1971_v47 = vmax.f32 %v1141_v30, 0.0  ;;  %v10325_v30 = vld [vmem:[%s15502_s0 + $0x70] sm:$0xff]  ;;  %v1976_v59 = vmax.f32 %v1166_v17, 0.0 }
 0x1b1   :  { %9962 = vmatprep.mubr.msk.f32.mxu1 %vm2149_vm2, %v1967_v4  ;;  %7068 = vperm.xlu1 %10299, %v11720_v3   ;;  %v12249_v0 = vpop.permute.xlu1 %6352  ;;  %v1970_v48 = vmax.f32 %v1136_v49, 0.0  ;;  %v10324_v3 = vld [vmem:[%s15502_s0 + $0x380] sm:$0xff]  ;;  %v1973_v23 = vmax.f32 %v1151_v41, 0.0 }
 0x1b2   :  { %v12244_v20 = vpop.f32.mrf.mxu1  ;;  %15769 = vst [vmem:[#allocation23_spill] sm:$0xff] %v12249_v0  ;;  %v10326_v41 = vld [vmem:[%s15502_s0 + $0x2c0] sm:$0xff]  ;;  %v15779_v0 = vld [vmem:[#allocation27_spill] sm:$0xff] }
 0x1b4   :  { %v12251_v52 = vpop.f32.mrf.mxu1  ;;  %9963 = vmatmul.mubr.msk.f32.gmra.mxu1 %vm2149_vm2, %v1968_v2 }
 0x1b5   :  { %9965 = vmatprep.mubr.msk.f32.mxu1 %vm2149_vm2, %v1969_v11  ;;  %6776 = vperm.xlu1 %10299, %v10324_v3   ;;  %v12264_v42 = vpop.permute.xlu1 %6648  ;;  %v1156_v11 = vadd.f32 %v11370_v10, %v11824_v39  ;;  %v1161_v3 = vadd.f32 %v11824_v39, %v11393_v24 }
 0x1b6   :  { %v12257_v4 = vpop.f32.mrf.mxu1  ;;  %15770 = vst [vmem:[#allocation22_spill] sm:$0xff] %v12264_v42 }
 0x1b7   :  { %v1974_v10 = vmax.f32 %v1156_v11, 0.0  ;;  %v1975_v24 = vmax.f32 %v1161_v3, 0.0  ;;  %v1176_v11 = vadd.f32 %v11398_v55, %v11824_v39  ;;  %v1186_v55 = vadd.f32 %v11412_v1, %v11824_v39 }
 0x1b8   :  { %v12266_v2 = vpop.f32.mrf.mxu1  ;;  %9966 = vmatmul.mubr.msk.f32.gmra.mxu1 %vm2149_vm2, %v1970_v48 }
 0x1b9   :  { %9968 = vmatprep.mubr.msk.f32.mxu1 %vm2149_vm2, %v1971_v47  ;;  %6384 = vperm.xlu1 %10299, %v10325_v30   ;;  %v12279_v42 = vpop.permute.xlu1 %7040  ;;  %v1171_v30 = vadd.f32 %v11824_v39, %v11407_v50  ;;  %v1181_v50 = vadd.f32 %v11824_v39, %v11421_v26 }
 0x1ba   :  { %v12272_v49 = vpop.f32.mrf.mxu1  ;;  %15771 = vst [vmem:[#allocation24_spill] sm:$0xff] %v12279_v42 }
 0x1bb   :  { %v1977_v3 = vmax.f32 %v1171_v30, 0.0  ;;  %v1979_v26 = vmax.f32 %v1181_v50, 0.0  ;;  %v15777_v50 = vld [vmem:[#allocation25_spill] sm:$0xff] }
 0x1bc   :  { %v12281_v48 = vpop.f32.mrf.mxu1  ;;  %9969 = vmatmul.mubr.msk.f32.gmra.mxu1 %vm2149_vm2, %v1972_v15 }
 0x1bd   :  { %9971 = vmatprep.mubr.msk.f32.mxu1 %vm2149_vm2, %v1973_v23  ;;  %6680 = vperm.xlu1 %10299, %v10326_v41   ;;  %v12294_v42 = vpop.permute.xlu1 %6748 }
 0x1be   :  { %v12287_v47 = vpop.f32.mrf.mxu1  ;;  %15772 = vst [vmem:[#allocation79_spill] sm:$0xff] %v12294_v42 }
 0x1c0   :  { %v12296_v15 = vpop.f32.mrf.mxu1  ;;  %9972 = vmatmul.mubr.msk.f32.gmra.mxu1 %vm2149_vm2, %v1974_v10  ;;  %v1978_v10 = vmax.f32 %v1176_v11, 0.0  ;;  %v10328_v11 = vld [vmem:[%s15502_s0 + $0x440] sm:$0xff] }
 0x1c1   :  { %9974 = vmatprep.mubr.msk.f32.mxu1 %vm2149_vm2, %v1975_v24  ;;  %7072 = vperm.xlu1 %10299, %v11728_v61   ;;  %v12307_v41 = vpop.permute.xlu1 %6356  ;;  %v10327_v61 = vld [vmem:[%s15502_s0 + $0x388] sm:$0xff]  ;;  %v1191_v24 = vadd.f32 %v11824_v39, %v11435_v34 }
 0x1c2   :  { %v12302_v23 = vpop.f32.mrf.mxu1  ;;  %15773 = vst [vmem:[#allocation80_spill] sm:$0xff] %v12307_v41 }
 0x1c3   :  { %v1981_v41 = vmax.f32 %v1191_v24, 0.0  ;;  %v15783_v24 = vld [vmem:[#allocation26_spill] sm:$0xff] }
 0x1c4   :  { %v12309_v42 = vpop.f32.mrf.mxu1  ;;  %9975 = vmatmul.mubr.msk.f32.gmra.mxu1 %vm2149_vm2, %v1976_v59  ;;  %v12324_v59 = vpop.permute.xlu0 %6328  ;;  %6872 = vperm.xlu0 %10298, %v10328_v11   ;;  %v1201_v11 = vadd.f32 %v11824_v39, %v15779_v0 }
 0x1c5   :  { %9977 = vmatprep.mubr.msk.f32.mxu1 %vm2149_vm2, %v1977_v3  ;;  %6780 = vperm.xlu1 %10299, %v10327_v61   ;;  %v12322_v30 = vpop.permute.xlu1 %6652  ;;  %15775 = vst [vmem:[#allocation82_spill] sm:$0xff] %v12324_v59  ;;  %v1980_v3 = vmax.f32 %v1186_v55, 0.0  ;;  %v1196_v61 = vadd.f32 %v15777_v50, %v11824_v39  ;;  %v10330_v55 = vld [vmem:[%s15502_s0 + $0x1f8] sm:$0xff]  ;;  %v1206_v50 = vadd.f32 %v15783_v24, %v11824_v39 }
 0x1c6   :  { %v12315_v17 = vpop.f32.mrf.mxu1  ;;  %15774 = vst [vmem:[#allocation81_spill] sm:$0xff] %v12322_v30  ;;  %v10329_v30 = vld [vmem:[%s15502_s0 + $0x78] sm:$0xff] }
 0x1c8   :  { %v12329_v1 = vpop.f32.mrf.mxu1  ;;  %9978 = vmatmul.mubr.msk.f32.gmra.mxu1 %vm2149_vm2, %v1978_v10  ;;  %v12344_v10 = vpop.permute.xlu0 %6332  ;;  %6580 = vperm.xlu0 %10298, %v10330_v55  }
 0x1c9   :  { %15776 = vst [vmem:[#allocation83_spill] sm:$0xff] %v12329_v1  ;;  %9980 = vmatprep.mubr.msk.f32.mxu1 %vm2149_vm2, %v1979_v26  ;;  %6388 = vperm.xlu1 %10299, %v10329_v30   ;;  %v12342_v59 = vpop.permute.xlu1 %7044  ;;  %15781 = vst [vmem:[#allocation84_spill] sm:$0xff] %v12344_v10  ;;  %v1982_v30 = vmax.f32 %v1196_v61, 0.0  ;;  %v1983_v10 = vmax.f32 %v1201_v11, 0.0  ;;  %v15785_v1 = vld [vmem:[#allocation29_spill] sm:$0xff]  ;;  %v15788_v11 = vld [vmem:[#allocation28_spill] sm:$0xff] }
 0x1ca   :  { %v12335_v34 = vpop.f32.mrf.mxu1  ;;  %15780 = vst [vmem:[#allocation27_spill] sm:$0xff] %v12342_v59  ;;  %v10331_v59 = vld [vmem:[%s15502_s0 + $0x2c8] sm:$0xff]  ;;  %v1211_v55 = vadd.f32 %v11824_v39, %v15785_v1  ;;  %v1216_v24 = vadd.f32 %v15788_v11, %v11824_v39  ;;  %v10334_v11 = vld [vmem:[%s15502_s0 + $0x390] sm:$0xff] }
 0x1cb   :  { %15778 = vst [vmem:[#allocation25_spill] sm:$0xff] %v12335_v34 }
 0x1cc   :  { %v12349_v26 = vpop.f32.mrf.mxu1  ;;  %9981 = vmatmul.mubr.msk.f32.gmra.mxu1 %vm2149_vm2, %v1980_v3  ;;  %v12364_v3 = vpop.permute.xlu0 %6528 }
 0x1cd   :  { %15782 = vst [vmem:[#allocation85_spill] sm:$0xff] %v12349_v26  ;;  %9983 = vmatprep.mubr.msk.f32.mxu1 %vm2149_vm2, %v1981_v41  ;;  %6684 = vperm.xlu1 %10299, %v10331_v59   ;;  %v12362_v26 = vpop.permute.xlu1 %6752  ;;  %15787 = vst [vmem:[#allocation86_spill] sm:$0xff] %v12364_v3  ;;  %v10332_v41 = vld [vmem:[%s15502_s0 + $0x508] sm:$0xff]  ;;  %v1984_v59 = vmax.f32 %v1206_v50, 0.0  ;;  %v15789_v3 = vld [vmem:[#allocation31_spill] sm:$0xff] }
 0x1ce   :  { %v12355_v0 = vpop.f32.mrf.mxu1  ;;  %15786 = vst [vmem:[#allocation29_spill] sm:$0xff] %v12362_v26  ;;  %6972 = vperm.xlu0 %10298, %v10332_v41   ;;  %v1985_v26 = vmax.f32 %v1211_v55, 0.0  ;;  %v15793_v50 = vld [vmem:[#allocation30_spill] sm:$0xff] }
 0x1cf   :  { %15784 = vst [vmem:[#allocation26_spill] sm:$0xff] %v12355_v0  ;;  %v1221_v0 = vadd.f32 %v11824_v39, %v15789_v3  ;;  %v1226_v55 = vadd.f32 %v15793_v50, %v11824_v39 }
 0x1d0   :  { %v12369_v61 = vpop.f32.mrf.mxu1  ;;  %9984 = vmatmul.mubr.msk.f32.gmra.mxu1 %vm2149_vm2, %v1982_v30  ;;  %v12382_v41 = vpop.permute.xlu0 %6336 }
 0x1d1   :  { %9986 = vmatprep.mubr.msk.f32.mxu1 %vm2149_vm2, %v1983_v10  ;;  %7076 = vperm.xlu1 %10299, %v11742_v62   ;;  %v12380_v34 = vpop.permute.xlu1 %6360  ;;  %15791 = vst [vmem:[#allocation31_spill] sm:$0xff] %v12382_v41  ;;  %v10333_v10 = vld [vmem:[%s15502_s0 + $0x138] sm:$0xff]  ;;  %v1986_v62 = vmax.f32 %v1216_v24, 0.0  ;;  %v15795_v41 = vld [vmem:[#allocation33_spill] sm:$0xff]  ;;  %v1988_v50 = vmax.f32 %v1226_v55, 0.0 }
 0x1d2   :  { %v12375_v1 = vpop.f32.mrf.mxu1  ;;  %15790 = vst [vmem:[#allocation28_spill] sm:$0xff] %v12380_v34  ;;  %6484 = vperm.xlu0 %10298, %v10333_v10   ;;  %v1987_v34 = vmax.f32 %v1221_v0, 0.0  ;;  %v1231_v10 = vadd.f32 %v11824_v39, %v15795_v41  ;;  %v15799_v0 = vld [vmem:[#allocation32_spill] sm:$0xff] }
 0x1d4   :  { %v12387_v30 = vpop.f32.mrf.mxu1  ;;  %9987 = vmatmul.mubr.msk.f32.gmra.mxu1 %vm2149_vm2, %v1984_v59  ;;  %v12402_v59 = vpop.permute.xlu0 %6628 }
 0x1d5   :  { %15792 = vst [vmem:[#allocation87_spill] sm:$0xff] %v12387_v30  ;;  %9989 = vmatprep.mubr.msk.f32.mxu1 %vm2149_vm2, %v1985_v26  ;;  %6784 = vperm.xlu1 %10299, %v10334_v11   ;;  %v12400_v30 = vpop.permute.xlu1 %6656  ;;  %15797 = vst [vmem:[#allocation88_spill] sm:$0xff] %v12402_v59  ;;  %v10335_v26 = vld [vmem:[%s15502_s0 + $0x448] sm:$0xff]  ;;  %v1236_v11 = vadd.f32 %v15799_v0, %v11824_v39  ;;  %v1989_v59 = vmax.f32 %v1231_v10, 0.0  ;;  %v15804_v10 = vld [vmem:[#allocation34_spill] sm:$0xff] }
 0x1d6   :  { %v12393_v3 = vpop.f32.mrf.mxu1  ;;  %15796 = vst [vmem:[#allocation33_spill] sm:$0xff] %v12400_v30  ;;  %6876 = vperm.xlu0 %10298, %v10335_v26   ;;  %v10336_v30 = vld [vmem:[%s15502_s0 + $0x80] sm:$0xff]  ;;  %v1246_v0 = vadd.f32 %v15804_v10, %v11824_v39 }
 0x1d7   :  { %15794 = vst [vmem:[#allocation30_spill] sm:$0xff] %v12393_v3  ;;  %v15800_v3 = vld [vmem:[#allocation35_spill] sm:$0xff] }
 0x1d8   :  { %v12407_v24 = vpop.f32.mrf.mxu1  ;;  %9990 = vmatmul.mubr.msk.f32.gmra.mxu1 %vm2149_vm2, %v1986_v62  ;;  %v1241_v26 = vadd.f32 %v11824_v39, %v15800_v3  ;;  %v1992_v10 = vmax.f32 %v1246_v0, 0.0 }
 0x1d9   :  { %15798 = vst [vmem:[#allocation89_spill] sm:$0xff] %v12407_v24  ;;  %9992 = vmatprep.mubr.msk.f32.mxu1 %vm2149_vm2, %v1987_v34  ;;  %6392 = vperm.xlu1 %10299, %v10336_v30   ;;  %v12420_v24 = vpop.permute.xlu0 %6536  ;;  %v10337_v34 = vld [vmem:[%s15502_s0 + $0x200] sm:$0xff]  ;;  %v12429_v55 = vpop.permute.xlu1 %7048  ;;  %v1990_v30 = vmax.f32 %v1236_v11, 0.0 }
 0x1da   :  { %v12413_v41 = vpop.f32.mrf.mxu1  ;;  %15801 = vst [vmem:[#allocation32_spill] sm:$0xff] %v12420_v24  ;;  %6584 = vperm.xlu0 %10298, %v10337_v34   ;;  %15803 = vst [vmem:[#allocation90_spill] sm:$0xff] %v12429_v55  ;;  %v10338_v24 = vld [vmem:[%s15502_s0 + $0x2d0] sm:$0xff]  ;;  %v1991_v34 = vmax.f32 %v1241_v26, 0.0  ;;  %v15807_v55 = vld [vmem:[#allocation37_spill] sm:$0xff] }
 0x1dc   :  { %v12425_v62 = vpop.f32.mrf.mxu1  ;;  %9993 = vmatmul.mubr.msk.f32.gmra.mxu1 %vm2149_vm2, %v1988_v50 }
 0x1dd   :  { %15802 = vst [vmem:[#allocation35_spill] sm:$0xff] %v12425_v62  ;;  %9995 = vmatprep.mubr.msk.f32.mxu1 %vm2149_vm2, %v1989_v59  ;;  %6688 = vperm.xlu1 %10299, %v10338_v24   ;;  %v1251_v62 = vadd.f32 %v11824_v39, %v11544_v6  ;;  %v12440_v50 = vpop.permute.xlu0 %6732  ;;  %v10339_v59 = vld [vmem:[%s15502_s0 + $0x510] sm:$0xff]  ;;  %v1256_v24 = vadd.f32 %v11535_v31, %v11824_v39 }
 0x1de   :  { %v12433_v3 = vpop.f32.mrf.mxu1  ;;  %15806 = vst [vmem:[#allocation91_spill] sm:$0xff] %v12440_v50  ;;  %6976 = vperm.xlu0 %10298, %v10339_v59   ;;  %v1261_v50 = vadd.f32 %v11824_v39, %v15807_v55 }
 0x1df   :  { %15805 = vst [vmem:[#allocation34_spill] sm:$0xff] %v12433_v3  ;;  %v1993_v6 = vmax.f32 %v1251_v62, 0.0  ;;  %v12456_v3 = vpop.permute.xlu1 %6756  ;;  %v1994_v31 = vmax.f32 %v1256_v24, 0.0 }
 0x1e0   :  { %v12445_v11 = vpop.f32.mrf.mxu1  ;;  %9996 = vmatmul.mubr.msk.f32.gmra.mxu1 %vm2149_vm2, %v1990_v30  ;;  %15808 = vst [vmem:[#allocation37_spill] sm:$0xff] %v12456_v3  ;;  %v10340_v30 = vld [vmem:[%s15502_s0 + $0x140] sm:$0xff]  ;;  %v1995_v3 = vmax.f32 %v1261_v50, 0.0  ;;  %v15816_v50 = vld [vmem:[#allocation38_spill] sm:$0xff] }
 0x1e1   :  { %9998 = vmatprep.mubr.msk.f32.mxu1 %vm2149_vm2, %v1991_v34  ;;  %7080 = vperm.xlu1 %10299, %v11750_v21   ;;  %v12458_v59 = vpop.permute.xlu0 %6440  ;;  %v15811_v21 = vld [vmem:[#allocation36_spill] sm:$0xff]  ;;  %v10341_v34 = vld [vmem:[%s15502_s0 + $0x398] sm:$0xff] }
 0x1e2   :  { %v12451_v26 = vpop.f32.mrf.mxu1  ;;  %15809 = vst [vmem:[#allocation92_spill] sm:$0xff] %v12458_v59  ;;  %6488 = vperm.xlu0 %10298, %v10340_v30   ;;  %v1266_v62 = vadd.f32 %v15811_v21, %v11824_v39  ;;  %v15812_v59 = vld [vmem:[#allocation39_spill] sm:$0xff] }
 0x1e3   :  { %v1271_v30 = vadd.f32 %v11824_v39, %v15812_v59 }
 0x1e4   :  { %v12463_v0 = vpop.f32.mrf.mxu1  ;;  %9999 = vmatmul.mubr.msk.f32.gmra.mxu1 %vm2149_vm2, %v1992_v10  ;;  %v10342_v10 = vld [vmem:[%s15502_s0 + $0x450] sm:$0xff]  ;;  %v1996_v21 = vmax.f32 %v1266_v62, 0.0 }
 0x1e5   :  { %15810 = vst [vmem:[#allocation93_spill] sm:$0xff] %v12463_v0  ;;  %10001 = vmatprep.mubr.msk.f32.mxu1 %vm2149_vm2, %v1993_v6  ;;  %6788 = vperm.xlu1 %10299, %v10341_v34   ;;  %v12476_v0 = vpop.permute.xlu0 %6828  ;;  %v12485_v6 = vpop.permute.xlu1 %6364  ;;  %v1276_v34 = vadd.f32 %v15816_v50, %v11824_v39 }
 0x1e6   :  { %v12469_v55 = vpop.f32.mrf.mxu1  ;;  %15813 = vst [vmem:[#allocation36_spill] sm:$0xff] %v12476_v0  ;;  %6880 = vperm.xlu0 %10298, %v10342_v10   ;;  %15815 = vst [vmem:[#allocation94_spill] sm:$0xff] %v12485_v6  ;;  %v10343_v0 = vld [vmem:[%s15502_s0 + $0x88] sm:$0xff]  ;;  %v1997_v10 = vmax.f32 %v1271_v30, 0.0 }
 0x1e7   :  { %v1998_v50 = vmax.f32 %v1276_v34, 0.0  ;;  %v15821_v6 = vld [vmem:[#allocation41_spill] sm:$0xff]  ;;  %v10346_v34 = vld [vmem:[%s15502_s0 + $0x518] sm:$0xff] }
 0x1e8   :  { %v12481_v24 = vpop.f32.mrf.mxu1  ;;  %10002 = vmatmul.mubr.msk.f32.gmra.mxu1 %vm2149_vm2, %v1994_v31 }
 0x1e9   :  { %15814 = vst [vmem:[#allocation39_spill] sm:$0xff] %v12481_v24  ;;  %10004 = vmatprep.mubr.msk.f32.mxu1 %vm2149_vm2, %v1995_v3  ;;  %6396 = vperm.xlu1 %10299, %v10343_v0   ;;  %v1281_v24 = vadd.f32 %v11824_v39, %v11590_v51  ;;  %v12496_v31 = vpop.permute.xlu0 %6540  ;;  %v10344_v3 = vld [vmem:[%s15502_s0 + $0x208] sm:$0xff]  ;;  %v1286_v0 = vadd.f32 %v11581_v18, %v11824_v39  ;;  %v10345_v51 = vld [vmem:[%s15502_s0 + $0x2d8] sm:$0xff] }
 0x1ea   :  { %v12489_v59 = vpop.f32.mrf.mxu1  ;;  %15818 = vst [vmem:[#allocation95_spill] sm:$0xff] %v12496_v31  ;;  %6588 = vperm.xlu0 %10298, %v10344_v3   ;;  %v1291_v3 = vadd.f32 %v11824_v39, %v15821_v6 }
 0x1eb   :  { %15817 = vst [vmem:[#allocation38_spill] sm:$0xff] %v12489_v59  ;;  %v1999_v31 = vmax.f32 %v1281_v24, 0.0  ;;  %v15825_v24 = vld [vmem:[#allocation40_spill] sm:$0xff] }
 0x1ec   :  { %v12501_v62 = vpop.f32.mrf.mxu1  ;;  %10005 = vmatmul.mubr.msk.f32.gmra.mxu1 %vm2149_vm2, %v1996_v21 }
 0x1ed   :  { %15819 = vst [vmem:[#allocation96_spill] sm:$0xff] %v12501_v62  ;;  %10007 = vmatprep.mubr.msk.f32.mxu1 %vm2149_vm2, %v1997_v10  ;;  %6692 = vperm.xlu1 %10299, %v10345_v51   ;;  %v12514_v62 = vpop.permute.xlu1 %6660  ;;  %v12516_v21 = vpop.permute.xlu0 %6928  ;;  %v2000_v10 = vmax.f32 %v1286_v0, 0.0  ;;  %v1296_v51 = vadd.f32 %v15825_v24, %v11824_v39 }
 0x1ee   :  { %v12507_v30 = vpop.f32.mrf.mxu1  ;;  %15822 = vst [vmem:[#allocation41_spill] sm:$0xff] %v12514_v62  ;;  %15823 = vst [vmem:[#allocation98_spill] sm:$0xff] %v12516_v21  ;;  %6980 = vperm.xlu0 %10298, %v10346_v34   ;;  %v10347_v21 = vld [vmem:[%s15502_s0 + $0x5e8] sm:$0xff]  ;;  %v2001_v62 = vmax.f32 %v1291_v3, 0.0  ;;  %v15831_v3 = vld [vmem:[#allocation42_spill] sm:$0xff] }
 0x1ef   :  { %15820 = vst [vmem:[#allocation97_spill] sm:$0xff] %v12507_v30  ;;  %v15827_v30 = vld [vmem:[#allocation43_spill] sm:$0xff]  ;;  %v1306_v24 = vadd.f32 %v15831_v3, %v11824_v39 }
 0x1f0   :  { %v12521_v18 = vpop.f32.mrf.mxu1  ;;  %10008 = vmatmul.mubr.msk.f32.gmra.mxu1 %vm2149_vm2, %v1998_v50  ;;  %v1301_v34 = vadd.f32 %v11824_v39, %v15827_v30 }
 0x1f1   :  { %15824 = vst [vmem:[#allocation99_spill] sm:$0xff] %v12521_v18  ;;  %10010 = vmatprep.mubr.msk.f32.mxu1 %vm2149_vm2, %v1999_v31  ;;  %7084 = vperm.xlu1 %10299, %v10347_v21   ;;  %v12534_v18 = vpop.permute.xlu0 %6344  ;;  %v10348_v31 = vld [vmem:[%s15502_s0 + $0x148] sm:$0xff]  ;;  %v12543_v0 = vpop.permute.xlu1 %7052  ;;  %v2002_v21 = vmax.f32 %v1296_v51, 0.0  ;;  %v2004_v3 = vmax.f32 %v1306_v24, 0.0  ;;  %v10352_v24 = vld [vmem:[%s15502_s0 + $0x210] sm:$0xff] }
 0x1f2   :  { %v12527_v6 = vpop.f32.mrf.mxu1  ;;  %15828 = vst [vmem:[#allocation43_spill] sm:$0xff] %v12534_v18  ;;  %6492 = vperm.xlu0 %10298, %v10348_v31   ;;  %15830 = vst [vmem:[#allocation101_spill] sm:$0xff] %v12543_v0  ;;  %v10349_v18 = vld [vmem:[%s15502_s0 + $0x3a0] sm:$0xff]  ;;  %v2003_v31 = vmax.f32 %v1301_v34, 0.0 }
 0x1f3   :  { %15826 = vst [vmem:[#allocation40_spill] sm:$0xff] %v12527_v6  ;;  %v15833_v6 = vld [vmem:[#allocation45_spill] sm:$0xff] }
 0x1f4   :  { %v12539_v50 = vpop.f32.mrf.mxu1  ;;  %10011 = vmatmul.mubr.msk.f32.gmra.mxu1 %vm2149_vm2, %v2000_v10 }
 0x1f5   :  { %15829 = vst [vmem:[#allocation100_spill] sm:$0xff] %v12539_v50  ;;  %10013 = vmatprep.mubr.msk.f32.mxu1 %vm2149_vm2, %v2001_v62  ;;  %6792 = vperm.xlu1 %10299, %v10349_v18   ;;  %v1311_v50 = vadd.f32 %v11824_v39, %v15833_v6  ;;  %v12554_v10 = vpop.permute.xlu0 %6640  ;;  %v10350_v62 = vld [vmem:[%s15502_s0 + $0x458] sm:$0xff]  ;;  %v15836_v18 = vld [vmem:[#allocation44_spill] sm:$0xff]  ;;  %v10351_v6 = vld [vmem:[%s15502_s0 + $0x90] sm:$0xff] }
 0x1f6   :  { %v12547_v30 = vpop.f32.mrf.mxu1  ;;  %15834 = vst [vmem:[#allocation45_spill] sm:$0xff] %v12554_v10  ;;  %6884 = vperm.xlu0 %10298, %v10350_v62   ;;  %v1316_v34 = vadd.f32 %v15836_v18, %v11824_v39 }
 0x1f7   :  { %15832 = vst [vmem:[#allocation42_spill] sm:$0xff] %v12547_v30  ;;  %v2005_v10 = vmax.f32 %v1311_v50, 0.0  ;;  %v15838_v30 = vld [vmem:[#allocation47_spill] sm:$0xff]  ;;  %v15842_v50 = vld [vmem:[#allocation46_spill] sm:$0xff] }
 0x1f8   :  { %v12559_v51 = vpop.f32.mrf.mxu1  ;;  %10014 = vmatmul.mubr.msk.f32.gmra.mxu1 %vm2149_vm2, %v2002_v21  ;;  %v1321_v62 = vadd.f32 %v11824_v39, %v15838_v30  ;;  %v2006_v18 = vmax.f32 %v1316_v34, 0.0  ;;  %v12586_v39 = vld [vmem:[%s15504_s2] ss:$0 sm:$0xff] }
 0x1f9   :  { %15835 = vst [vmem:[#allocation102_spill] sm:$0xff] %v12559_v51  ;;  %10016 = vmatprep.mubr.msk.f32.mxu1 %vm2149_vm2, %v2003_v31  ;;  %6400 = vperm.xlu1 %10299, %v10351_v6   ;;  %v12572_v51 = vpop.permute.xlu1 %6760  ;;  %v12574_v21 = vpop.permute.xlu0 %7028  ;;  %v1326_v30 = vadd.f32 %v12586_v39, %v15842_v50 }
 0x1fa   :  { %v12565_v0 = vpop.f32.mrf.mxu1  ;;  %15839 = vst [vmem:[#allocation47_spill] sm:$0xff] %v12572_v51  ;;  %15840 = vst [vmem:[#allocation103_spill] sm:$0xff] %v12574_v21  ;;  %6592 = vperm.xlu0 %10298, %v10352_v24   ;;  %v10354_v24 = vld [vmem:[%s15502_s0 + $0x2e0] sm:$0xff]  ;;  %v2007_v21 = vmax.f32 %v1321_v62, 0.0 }
 0x1fb   :  { %15837 = vst [vmem:[#allocation44_spill] sm:$0xff] %v12565_v0  ;;  %v10355_v51 = vld [vmem:[%s15502_s0 + $0x520] sm:$0xff]  ;;  %v15850_v0 = vld [vmem:[#allocation51_spill] sm:$0xff] }
 0x1fc   :  { %v12579_v31 = vpop.f32.mrf.mxu1  ;;  %10017 = vmatmul.mubr.msk.f32.gmra.mxu1 %vm2149_vm2, %v2004_v3  ;;  %v15844_v3 = vld [vmem:[#allocation49_spill] sm:$0xff]  ;;  %v15848_v62 = vld [vmem:[#allocation48_spill] sm:$0xff] }
 0x1fd   :  { %15841 = vst [vmem:[#allocation104_spill] sm:$0xff] %v12579_v31  ;;  %10019 = vmatprep.mubr.msk.f32.mxu1 %vm2149_vm2, %v2005_v10  ;;  %6696 = vperm.xlu1 %10299, %v10354_v24   ;;  %v1331_v10 = vadd.f32 %v12586_v39, %v15844_v3  ;;  %v12597_v34 = vpop.permute.xlu0 %6544  ;;  %v12606_v50 = vpop.permute.xlu1 %6368  ;;  %v2008_v24 = vmax.f32 %v1326_v30, 0.0 }
 0x1fe   :  { %v12590_v6 = vpop.f32.mrf.mxu1  ;;  %15845 = vst [vmem:[#allocation49_spill] sm:$0xff] %v12597_v34  ;;  %6984 = vperm.xlu0 %10298, %v10355_v51   ;;  %15847 = vst [vmem:[#allocation106_spill] sm:$0xff] %v12606_v50  ;;  %v10356_v34 = vld [vmem:[%s15502_s0 + $0x5f0] sm:$0xff] }
 0x1ff   :  { %15843 = vst [vmem:[#allocation46_spill] sm:$0xff] %v12590_v6  ;;  %v1336_v6 = vadd.f32 %v12586_v39, %v15848_v62  ;;  %v2009_v51 = vmax.f32 %v1331_v10, 0.0  ;;  %v15853_v50 = vld [vmem:[#allocation50_spill] sm:$0xff] }
 0x200   :  { %v12602_v31 = vpop.f32.mrf.mxu1  ;;  %10020 = vmatmul.mubr.msk.f32.gmra.mxu1 %vm2149_vm2, %v2006_v18  ;;  %v1346_v10 = vadd.f32 %v12586_v39, %v15853_v50 }
 0x201   :  { %15846 = vst [vmem:[#allocation105_spill] sm:$0xff] %v12602_v31  ;;  %10022 = vmatprep.mubr.msk.f32.mxu1 %vm2149_vm2, %v2007_v21  ;;  %7088 = vperm.xlu1 %10299, %v10356_v34   ;;  %v1341_v31 = vadd.f32 %v12586_v39, %v15850_v0  ;;  %v12617_v18 = vpop.permute.xlu0 %6936  ;;  %v10357_v21 = vld [vmem:[%s15502_s0 + $0x150] sm:$0xff]  ;;  %v2010_v62 = vmax.f32 %v1336_v6, 0.0  ;;  %v10358_v0 = vld [vmem:[%s15502_s0 + $0x3a8] sm:$0xff]  ;;  %v10359_v6 = vld [vmem:[%s15502_s0 + $0x460] sm:$0xff] }
 0x202   :  { %v12610_v3 = vpop.f32.mrf.mxu1  ;;  %15851 = vst [vmem:[#allocation51_spill] sm:$0xff] %v12617_v18  ;;  %6496 = vperm.xlu0 %10298, %v10357_v21  }
 0x203   :  { %15849 = vst [vmem:[#allocation48_spill] sm:$0xff] %v12610_v3  ;;  %v2011_v18 = vmax.f32 %v1341_v31, 0.0  ;;  %v15855_v3 = vld [vmem:[#allocation53_spill] sm:$0xff]  ;;  %v15859_v31 = vld [vmem:[#allocation52_spill] sm:$0xff] }
 0x204   :  { %v12622_v30 = vpop.f32.mrf.mxu1  ;;  %10023 = vmatmul.mubr.msk.f32.gmra.mxu1 %vm2149_vm2, %v2008_v24  ;;  %v1351_v21 = vadd.f32 %v12586_v39, %v15855_v3 }
 0x205   :  { %15852 = vst [vmem:[#allocation107_spill] sm:$0xff] %v12622_v30  ;;  %10025 = vmatprep.mubr.msk.f32.mxu1 %vm2149_vm2, %v2009_v51  ;;  %6796 = vperm.xlu1 %10299, %v10358_v0   ;;  %v12635_v30 = vpop.permute.xlu1 %6664  ;;  %v12637_v24 = vpop.permute.xlu0 %6448  ;;  %v2012_v51 = vmax.f32 %v1346_v10, 0.0  ;;  %v1356_v0 = vadd.f32 %v12586_v39, %v15859_v31 }
 0x206   :  { %v12628_v34 = vpop.f32.mrf.mxu1  ;;  %15856 = vst [vmem:[#allocation53_spill] sm:$0xff] %v12635_v30  ;;  %15857 = vst [vmem:[#allocation108_spill] sm:$0xff] %v12637_v24  ;;  %6888 = vperm.xlu0 %10298, %v10359_v6   ;;  %v10360_v30 = vld [vmem:[%s15502_s0 + $0x98] sm:$0xff]  ;;  %v2013_v24 = vmax.f32 %v1351_v21, 0.0  ;;  %v15865_v21 = vld [vmem:[#allocation54_spill] sm:$0xff] }
 0x207   :  { %15854 = vst [vmem:[#allocation50_spill] sm:$0xff] %v12628_v34  ;;  %v15861_v34 = vld [vmem:[#allocation55_spill] sm:$0xff]  ;;  %v1366_v31 = vadd.f32 %v12586_v39, %v15865_v21 }
 0x208   :  { %v12642_v50 = vpop.f32.mrf.mxu1  ;;  %10026 = vmatmul.mubr.msk.f32.gmra.mxu1 %vm2149_vm2, %v2010_v62  ;;  %v1361_v6 = vadd.f32 %v12586_v39, %v15861_v34 }
 0x209   :  { %15858 = vst [vmem:[#allocation109_spill] sm:$0xff] %v12642_v50  ;;  %10028 = vmatprep.mubr.msk.f32.mxu1 %vm2149_vm2, %v2011_v18  ;;  %6404 = vperm.xlu1 %10299, %v10360_v30   ;;  %v12655_v50 = vpop.permute.xlu0 %6840  ;;  %v10361_v18 = vld [vmem:[%s15502_s0 + $0x218] sm:$0xff]  ;;  %v12664_v10 = vpop.permute.xlu1 %7056  ;;  %v2014_v30 = vmax.f32 %v1356_v0, 0.0  ;;  %v2016_v21 = vmax.f32 %v1366_v31, 0.0 }
 0x20a   :  { %v12648_v3 = vpop.f32.mrf.mxu1  ;;  %15862 = vst [vmem:[#allocation55_spill] sm:$0xff] %v12655_v50  ;;  %6596 = vperm.xlu0 %10298, %v10361_v18   ;;  %15864 = vst [vmem:[#allocation111_spill] sm:$0xff] %v12664_v10  ;;  %v10362_v50 = vld [vmem:[%s15502_s0 + $0x2e8] sm:$0xff]  ;;  %v2015_v18 = vmax.f32 %v1361_v6, 0.0  ;;  %v15870_v10 = vld [vmem:[#allocation56_spill] sm:$0xff] }
 0x20b   :  { %15860 = vst [vmem:[#allocation52_spill] sm:$0xff] %v12648_v3  ;;  %v15867_v3 = vld [vmem:[#allocation57_spill] sm:$0xff]  ;;  %v10365_v31 = vld [vmem:[%s15502_s0 + $0x158] sm:$0xff] }
 0x20c   :  { %v12660_v62 = vpop.f32.mrf.mxu1  ;;  %10029 = vmatmul.mubr.msk.f32.gmra.mxu1 %vm2149_vm2, %v2012_v51 }
 0x20d   :  { %15863 = vst [vmem:[#allocation110_spill] sm:$0xff] %v12660_v62  ;;  %10031 = vmatprep.mubr.msk.f32.mxu1 %vm2149_vm2, %v2013_v24  ;;  %6700 = vperm.xlu1 %10299, %v10362_v50   ;;  %v1371_v62 = vadd.f32 %v12586_v39, %v15867_v3  ;;  %v12675_v51 = vpop.permute.xlu0 %6548  ;;  %v10363_v24 = vld [vmem:[%s15502_s0 + $0x528] sm:$0xff]  ;;  %v1376_v50 = vadd.f32 %v12586_v39, %v15870_v10  ;;  %v10364_v3 = vld [vmem:[%s15502_s0 + $0x5f8] sm:$0xff] }
 0x20e   :  { %v12668_v34 = vpop.f32.mrf.mxu1  ;;  %15868 = vst [vmem:[#allocation57_spill] sm:$0xff] %v12675_v51  ;;  %6988 = vperm.xlu0 %10298, %v10363_v24  }
 0x20f   :  { %15866 = vst [vmem:[#allocation54_spill] sm:$0xff] %v12668_v34  ;;  %v2017_v51 = vmax.f32 %v1371_v62, 0.0  ;;  %v15872_v34 = vld [vmem:[#allocation59_spill] sm:$0xff]  ;;  %v15876_v62 = vld [vmem:[#allocation58_spill] sm:$0xff] }
 0x210   :  { %v12680_v0 = vpop.f32.mrf.mxu1  ;;  %10032 = vmatmul.mubr.msk.f32.gmra.mxu1 %vm2149_vm2, %v2014_v30  ;;  %v1381_v24 = vadd.f32 %v12586_v39, %v15872_v34 }
 0x211   :  { %15869 = vst [vmem:[#allocation112_spill] sm:$0xff] %v12680_v0  ;;  %10034 = vmatprep.mubr.msk.f32.mxu1 %vm2149_vm2, %v2015_v18  ;;  %7092 = vperm.xlu1 %10299, %v10364_v3   ;;  %v12693_v0 = vpop.permute.xlu1 %6764  ;;  %v12695_v30 = vpop.permute.xlu0 %6940  ;;  %v2018_v18 = vmax.f32 %v1376_v50, 0.0  ;;  %v1386_v3 = vadd.f32 %v12586_v39, %v15876_v62 }
 0x212   :  { %v12686_v6 = vpop.f32.mrf.mxu1  ;;  %15873 = vst [vmem:[#allocation59_spill] sm:$0xff] %v12693_v0  ;;  %15874 = vst [vmem:[#allocation113_spill] sm:$0xff] %v12695_v30  ;;  %6500 = vperm.xlu0 %10298, %v10365_v31   ;;  %v10366_v30 = vld [vmem:[%s15502_s0 + $0x3b0] sm:$0xff]  ;;  %v2019_v0 = vmax.f32 %v1381_v24, 0.0  ;;  %v1391_v31 = vadd.f32 %v12586_v39, %v11782_v54  ;;  %v15881_v24 = vld [vmem:[#allocation60_spill] sm:$0xff] }
 0x213   :  { %15871 = vst [vmem:[#allocation56_spill] sm:$0xff] %v12686_v6  ;;  %v1396_v62 = vadd.f32 %v12586_v39, %v15881_v24  ;;  %v15904_v6 = vld [vmem:[#allocation68_spill] sm:$0xff] }
 0x214   :  { %v12700_v10 = vpop.f32.mrf.mxu1  ;;  %10035 = vmatmul.mubr.msk.f32.gmra.mxu1 %vm2149_vm2, %v2016_v21 }
 0x215   :  { %15875 = vst [vmem:[#allocation114_spill] sm:$0xff] %v12700_v10  ;;  %10037 = vmatprep.mubr.msk.f32.mxu1 %vm2149_vm2, %v2017_v51  ;;  %6800 = vperm.xlu1 %10299, %v10366_v30   ;;  %v12713_v10 = vpop.permute.xlu0 %6452  ;;  %v10367_v51 = vld [vmem:[%s15502_s0 + $0x468] sm:$0xff]  ;;  %v12722_v50 = vpop.permute.xlu1 %6372  ;;  %v2020_v30 = vmax.f32 %v1386_v3, 0.0  ;;  %v2022_v24 = vmax.f32 %v1396_v62, 0.0  ;;  %v10371_v62 = vld [vmem:[%s15502_s0 + $0x530] sm:$0xff] }
 0x216   :  { %v12706_v34 = vpop.f32.mrf.mxu1  ;;  %15878 = vst [vmem:[#allocation115_spill] sm:$0xff] %v12713_v10  ;;  %6892 = vperm.xlu0 %10298, %v10367_v51   ;;  %15880 = vst [vmem:[#allocation117_spill] sm:$0xff] %v12722_v50  ;;  %v10368_v10 = vld [vmem:[%s15502_s0 + $0xa0] sm:$0xff]  ;;  %v2021_v51 = vmax.f32 %v1391_v31, 0.0  ;;  %v15885_v50 = vld [vmem:[#allocation61_spill] sm:$0xff] }
 0x217   :  { %15877 = vst [vmem:[#allocation58_spill] sm:$0xff] %v12706_v34 }
 0x218   :  { %v12718_v21 = vpop.f32.mrf.mxu1  ;;  %10038 = vmatmul.mubr.msk.f32.gmra.mxu1 %vm2149_vm2, %v2018_v18 }
 0x219   :  { %15879 = vst [vmem:[#allocation116_spill] sm:$0xff] %v12718_v21  ;;  %10040 = vmatprep.mubr.msk.f32.mxu1 %vm2149_vm2, %v2019_v0  ;;  %6408 = vperm.xlu1 %10299, %v10368_v10   ;;  %v1401_v21 = vadd.f32 %v12586_v39, %v11798_v60  ;;  %v12733_v18 = vpop.permute.xlu0 %6844  ;;  %v10369_v0 = vld [vmem:[%s15502_s0 + $0x220] sm:$0xff]  ;;  %v1406_v10 = vadd.f32 %v12586_v39, %v15885_v50  ;;  %v10370_v60 = vld [vmem:[%s15502_s0 + $0x2f0] sm:$0xff] }
 0x21a   :  { %v12726_v54 = vpop.f32.mrf.mxu1  ;;  %15883 = vst [vmem:[#allocation118_spill] sm:$0xff] %v12733_v18  ;;  %6600 = vperm.xlu0 %10298, %v10369_v0  }
 0x21b   :  { %15882 = vst [vmem:[#allocation60_spill] sm:$0xff] %v12726_v54  ;;  %v2023_v18 = vmax.f32 %v1401_v21, 0.0  ;;  %v15887_v54 = vld [vmem:[#allocation63_spill] sm:$0xff]  ;;  %v15891_v21 = vld [vmem:[#allocation62_spill] sm:$0xff] }
 0x21c   :  { %v12738_v3 = vpop.f32.mrf.mxu1  ;;  %10041 = vmatmul.mubr.msk.f32.gmra.mxu1 %vm2149_vm2, %v2020_v30  ;;  %v1411_v0 = vadd.f32 %v12586_v39, %v15887_v54 }
 0x21d   :  { %15884 = vst [vmem:[#allocation119_spill] sm:$0xff] %v12738_v3  ;;  %10043 = vmatprep.mubr.msk.f32.mxu1 %vm2149_vm2, %v2021_v51  ;;  %6704 = vperm.xlu1 %10299, %v10370_v60   ;;  %v12751_v3 = vpop.permute.xlu1 %6668  ;;  %v12753_v30 = vpop.permute.xlu0 %6552  ;;  %v2024_v51 = vmax.f32 %v1406_v10, 0.0  ;;  %v1416_v60 = vadd.f32 %v12586_v39, %v15891_v21 }
 0x21e   :  { %v12744_v31 = vpop.f32.mrf.mxu1  ;;  %15888 = vst [vmem:[#allocation63_spill] sm:$0xff] %v12751_v3  ;;  %15889 = vst [vmem:[#allocation120_spill] sm:$0xff] %v12753_v30  ;;  %6992 = vperm.xlu0 %10298, %v10371_v62   ;;  %v10372_v3 = vld [vmem:[%s15502_s0 + $0x600] sm:$0xff]  ;;  %v2025_v30 = vmax.f32 %v1411_v0, 0.0 }
 0x21f   :  { %15886 = vst [vmem:[#allocation61_spill] sm:$0xff] %v12744_v31  ;;  %v15893_v31 = vld [vmem:[#allocation65_spill] sm:$0xff]  ;;  %v15897_v0 = vld [vmem:[#allocation64_spill] sm:$0xff] }
 0x220   :  { %v12758_v50 = vpop.f32.mrf.mxu1  ;;  %10044 = vmatmul.mubr.msk.f32.gmra.mxu1 %vm2149_vm2, %v2022_v24  ;;  %v1421_v62 = vadd.f32 %v12586_v39, %v15893_v31  ;;  %v1426_v21 = vadd.f32 %v12586_v39, %v15897_v0 }
 0x221   :  { %15890 = vst [vmem:[#allocation121_spill] sm:$0xff] %v12758_v50  ;;  %10046 = vmatprep.mubr.msk.f32.mxu1 %vm2149_vm2, %v2023_v18  ;;  %7096 = vperm.xlu1 %10299, %v10372_v3   ;;  %v12771_v50 = vpop.permute.xlu0 %6944  ;;  %v10373_v18 = vld [vmem:[%s15502_s0 + $0x160] sm:$0xff]  ;;  %v12780_v10 = vpop.permute.xlu1 %7060  ;;  %v2026_v3 = vmax.f32 %v1416_v60, 0.0 }
 0x222   :  { %v12764_v54 = vpop.f32.mrf.mxu1  ;;  %15894 = vst [vmem:[#allocation65_spill] sm:$0xff] %v12771_v50  ;;  %6504 = vperm.xlu0 %10298, %v10373_v18   ;;  %15896 = vst [vmem:[#allocation123_spill] sm:$0xff] %v12780_v10  ;;  %v10374_v50 = vld [vmem:[%s15502_s0 + $0x3b8] sm:$0xff]  ;;  %v2027_v18 = vmax.f32 %v1421_v62, 0.0  ;;  %v2028_v0 = vmax.f32 %v1426_v21, 0.0  ;;  %v15901_v10 = vld [vmem:[#allocation66_spill] sm:$0xff] }
 0x223   :  { %15892 = vst [vmem:[#allocation62_spill] sm:$0xff] %v12764_v54  ;;  %v15899_v54 = vld [vmem:[#allocation67_spill] sm:$0xff] }
 0x224   :  { %v12776_v24 = vpop.f32.mrf.mxu1  ;;  %10047 = vmatmul.mubr.msk.f32.gmra.mxu1 %vm2149_vm2, %v2024_v51 }
 0x225   :  { %15895 = vst [vmem:[#allocation122_spill] sm:$0xff] %v12776_v24  ;;  %10049 = vmatprep.mubr.msk.f32.mxu1 %vm2149_vm2, %v2025_v30  ;;  %6804 = vperm.xlu1 %10299, %v10374_v50   ;;  %v1431_v24 = vadd.f32 %v12586_v39, %v15899_v54  ;;  %v12791_v51 = vpop.permute.xlu0 %6456  ;;  %v10375_v30 = vld [vmem:[%s15502_s0 + $0x470] sm:$0xff]  ;;  %v1436_v50 = vadd.f32 %v12586_v39, %v15901_v10  ;;  %v12803_v54 = vld [vmem:[%s15506_s4] ss:$0 sm:$0xff] }
 0x226   :  { %v12784_v31 = vpop.f32.mrf.mxu1  ;;  %15900 = vst [vmem:[#allocation67_spill] sm:$0xff] %v12791_v51  ;;  %6896 = vperm.xlu0 %10298, %v10375_v30   ;;  %v10376_v51 = vld [vmem:[%s15502_s0 + $0xa8] sm:$0xff] }
 0x227   :  { %15898 = vst [vmem:[#allocation64_spill] sm:$0xff] %v12784_v31  ;;  %v2029_v30 = vmax.f32 %v1431_v24, 0.0  ;;  %v10377_v31 = vld [vmem:[%s15502_s0 + $0x228] sm:$0xff] }
 0x228   :  { %v9907_v60 = vpop.f32.mrf.mxu1  ;;  %10050 = vmatmul.mubr.msk.f32.gmra.mxu1 %vm2149_vm2, %v2026_v3  ;;  %v1441_v3 = vadd.f32 %v12586_v39, %v11871_v57  ;;  %v2030_v57 = vmax.f32 %v1436_v50, 0.0  ;;  %v15906_v50 = vmov 0.0  }
 0x229   :  { %10052 = vmatprep.mubr.msk.f32.mxu1 %vm2149_vm2, %v2027_v18  ;;  %6412 = vperm.xlu1 %10299, %v10376_v51   ;;  %v12811_v18 = vpop.permute.xlu1 %6768  ;;  %v12813_v10 = vpop.permute.xlu0 %6848  ;;  %v2825_v51 = vadd.f32 %v9907_v60, %v12803_v54 }
 0x22a   :  { %v2819_v62 = vpop.f32.mrf.mxu1  ;;  %15902 = vst [vmem:[#allocation66_spill] sm:$0xff] %v12811_v18  ;;  %15903 = vst [vmem:[#allocation124_spill] sm:$0xff] %v12813_v10  ;;  %6604 = vperm.xlu0 %10298, %v10377_v31   ;;  %v10378_v10 = vld [vmem:[%s15502_s0 + $0x2f8] sm:$0xff]  ;;  %v2031_v59 = vmax.f32 %v1441_v3, 0.0  ;;  %v1451_v31 = vadd.f32 %v12586_v39, %v11889_v13 }
 0x22b   :  { %v2820_v21 = vadd.f32 %v12803_v54, %v2819_v62  ;;  %v1446_v62 = vadd.f32 %v12586_v39, %v15904_v6 }
 0x22c   :  { %v9910_v34 = vpop.f32.mrf.mxu1  ;;  %10053 = vmatmul.mubr.msk.f32.gmra.mxu1 %vm2149_vm2, %v2028_v0  ;;  %v10379_v0 = vld [vmem:[%s15502_s0 + $0x538] sm:$0xff] }
 0x22d   :  { %v3818_v24 = vmax.f32 %v2820_v21, 0.0  ;;  %10055 = vmatprep.mubr.msk.f32.mxu1 %vm2149_vm2, %v2029_v30  ;;  %6708 = vperm.xlu1 %10299, %v10378_v10   ;;  %v12829_v60 = vpop.permute.xlu0 %6556  ;;  %v3819_v30 = vmax.f32 %v2825_v51, 0.0  ;;  %v12838_v13 = vpop.permute.xlu1 %6376  ;;  %v2032_v21 = vmax.f32 %v1446_v62, 0.0  ;;  %v1456_v10 = vadd.f32 %v12586_v39, %v11879_v25 }
 0x22e   :  { %v2829_v18 = vpop.f32.mrf.mxu1  ;;  %15905 = vst [vmem:[#allocation68_spill] sm:$0xff] %v12829_v60  ;;  %6996 = vperm.xlu0 %10298, %v10379_v0   ;;  %v10380_v0 = vld [vmem:[%s15502_s0 + $0x608] sm:$0xff]  ;;  %v1461_v51 = vadd.f32 %v12586_v39, %v11905_v53  ;;  %v2835_v62 = vadd.f32 %v9910_v34, %v12803_v54 }
 0x22f   :  { %8876 = vmatmul.mubr.msk.f32.vlgmr.msra.gmra.mxu0 %vm2149_vm2, %v3818_v24  ;;  %v2830_v3 = vadd.f32 %v12803_v54, %v2829_v18  ;;  %v2034_v53 = vmax.f32 %v1456_v10, 0.0 }
 0x230   :  { %v9913_v6 = vpop.f32.mrf.mxu1  ;;  %10056 = vmatmul.mubr.msk.f32.gmra.mxu1 %vm2149_vm2, %v2030_v57  ;;  %4732 = vmatprep.mubr.f32.mxu0 %v15906_v50  ;;  %v2033_v57 = vmax.f32 %v1451_v31, 0.0 }
 0x231   :  { %10058 = vmatprep.mubr.msk.f32.mxu1 %vm2149_vm2, %v2031_v59  ;;  %7100 = vperm.xlu1 %10299, %v10380_v0   ;;  %v12848_v18 = vpop.permute.xlu0 %6948  ;;  %v10381_v59 = vld [vmem:[%s15502_s0 + $0x168] sm:$0xff]  ;;  %v3820_v31 = vmax.f32 %v2830_v3, 0.0  ;;  %v12867_v34 = vpop.permute.xlu1 %6672 }
 0x232   :  { %v2839_v24 = vpop.f32.mrf.mxu1  ;;  %15907 = vst [vmem:[#allocation125_spill] sm:$0xff] %v12848_v18  ;;  %6508 = vperm.xlu0 %10298, %v10381_v59   ;;  %v10382_v59 = vld [vmem:[%s15502_s0 + $0x3c0] sm:$0xff]  ;;  %v2035_v18 = vmax.f32 %v1461_v51, 0.0  ;;  %15908 = vst [vmem:[#allocation126_spill] sm:$0xff] %v12867_v34 }
 0x233   :  { %8877 = vmatmul.mubr.msk.f32.gmra.mxu0 %vm2149_vm2, %v3819_v30  ;;  %v1466_v30 = vadd.f32 %v12586_v39, %v11895_v38  ;;  %v10383_v38 = vld [vmem:[%s15502_s0 + $0x478] sm:$0xff] }
 0x234   :  { %v12853_v25 = vpop.f32.mrf.mxu1  ;;  %10059 = vmatmul.mubr.msk.f32.gmra.mxu1 %vm2149_vm2, %v2032_v21  ;;  %4738 = vmatprep.mubr.f32.mxu0 %v15906_v50  ;;  %v1471_v21 = vadd.f32 %v12586_v39, %v11919_v22  ;;  %v2840_v22 = vadd.f32 %v12803_v54, %v2839_v24 }
 0x235   :  { %10061 = vmatprep.mubr.msk.f32.mxu1 %vm2149_vm2, %v2033_v57  ;;  %6808 = vperm.xlu1 %10299, %v10382_v59   ;;  %v12869_v3 = vpop.permute.xlu0 %6460  ;;  %v3821_v57 = vmax.f32 %v2835_v62, 0.0  ;;  %v2036_v51 = vmax.f32 %v1466_v30, 0.0  ;;  %v2845_v62 = vadd.f32 %v9913_v6, %v12803_v54  ;;  %v1491_v6 = vadd.f32 %v12586_v39, %v11949_v43 }
 0x236   :  { %v2849_v0 = vpop.f32.mrf.mxu1  ;;  %15909 = vst [vmem:[#allocation127_spill] sm:$0xff] %v12869_v3  ;;  %6900 = vperm.xlu0 %10298, %v10383_v38   ;;  %v10384_v38 = vld [vmem:[%s15502_s0 + $0xb0] sm:$0xff]  ;;  %v2037_v34 = vmax.f32 %v1471_v21, 0.0  ;;  %v3822_v30 = vmax.f32 %v2840_v22, 0.0  ;;  %v10387_v22 = vld [vmem:[%s15502_s0 + $0x540] sm:$0xff] }
 0x237   :  { %8878 = vmatmul.mubr.msk.f32.gmra.mxu0 %vm2149_vm2, %v3820_v31  ;;  %v1476_v31 = vadd.f32 %v12586_v39, %v11911_v37 }
 0x238   :  { %v12874_v10 = vpop.f32.mrf.mxu1  ;;  %10062 = vmatmul.mubr.msk.f32.gmra.mxu1 %vm2149_vm2, %v2034_v53  ;;  %4744 = vmatprep.mubr.f32.mxu0 %v15906_v50  ;;  %v1481_v53 = vadd.f32 %v12586_v39, %v11934_v44  ;;  %v12901_v44 = vpop.permute.xlu1 %7064 }
 0x239   :  { %10064 = vmatprep.mubr.msk.f32.mxu1 %vm2149_vm2, %v2035_v18  ;;  %6416 = vperm.xlu1 %10299, %v10384_v38   ;;  %v12890_v24 = vpop.permute.xlu0 %6852  ;;  %v10385_v18 = vld [vmem:[%s15502_s0 + $0x230] sm:$0xff]  ;;  %15911 = vst [vmem:[#allocation129_spill] sm:$0xff] %v12901_v44  ;;  %v2038_v21 = vmax.f32 %v1476_v31, 0.0  ;;  %v3823_v31 = vmax.f32 %v2845_v62, 0.0  ;;  %v2041_v44 = vmax.f32 %v1491_v6, 0.0 }
 0x23a   :  { %v12882_v59 = vpop.f32.mrf.mxu1  ;;  %15910 = vst [vmem:[#allocation128_spill] sm:$0xff] %v12890_v24  ;;  %6608 = vperm.xlu0 %10298, %v10385_v18   ;;  %v10386_v18 = vld [vmem:[%s15502_s0 + $0x300] sm:$0xff] }
 0x23b   :  { %8879 = vmatmul.mubr.msk.f32.gmra.mxu0 %vm2149_vm2, %v3821_v57  ;;  %v1486_v57 = vadd.f32 %v12586_v39, %v11925_v56 }
 0x23c   :  { %v12895_v37 = vpop.f32.mrf.mxu1  ;;  %10065 = vmatmul.mubr.msk.f32.gmra.mxu1 %vm2149_vm2, %v2036_v51  ;;  %4750 = vmatprep.mubr.f32.mxu0 %v15906_v50  ;;  %v2039_v51 = vmax.f32 %v1481_v53, 0.0  ;;  %v2850_v53 = vadd.f32 %v12803_v54, %v2849_v0  ;;  %v12934_v0 = vpop.permute.xlu1 %6772 }
 0x23d   :  { %10067 = vmatprep.mubr.msk.f32.mxu1 %vm2149_vm2, %v2037_v34  ;;  %6712 = vperm.xlu1 %10299, %v10386_v18   ;;  %v12913_v34 = vpop.permute.xlu0 %6560  ;;  %v2040_v43 = vmax.f32 %v1486_v57, 0.0  ;;  %15913 = vst [vmem:[#allocation131_spill] sm:$0xff] %v12934_v0  ;;  %v1591_v0 = vadd.f32 %v12586_v39, %v12150_v12 }
 0x23e   :  { %v12905_v38 = vpop.f32.mrf.mxu1  ;;  %15912 = vst [vmem:[#allocation130_spill] sm:$0xff] %v12913_v34  ;;  %7000 = vperm.xlu0 %10298, %v10387_v22   ;;  %v10388_v22 = vld [vmem:[%s15502_s0 + $0x610] sm:$0xff] }
 0x23f   :  { %8880 = vmatmul.mubr.msk.f32.gmra.mxu0 %vm2149_vm2, %v3822_v30  ;;  %v1496_v30 = vadd.f32 %v12586_v39, %v11940_v27  ;;  %v10389_v27 = vld [vmem:[%s15502_s0 + $0x170] sm:$0xff] }
 0x240   :  { %v12918_v56 = vpop.f32.mrf.mxu1  ;;  %10068 = vmatmul.mubr.msk.f32.gmra.mxu1 %vm2149_vm2, %v2038_v21  ;;  %4756 = vmatprep.mubr.f32.mxu0 %v15906_v50  ;;  %v1501_v21 = vadd.f32 %v12586_v39, %v11964_v7  ;;  %v2855_v7 = vadd.f32 %v12853_v25, %v12803_v54 }
 0x241   :  { %10070 = vmatprep.mubr.msk.f32.mxu1 %vm2149_vm2, %v2039_v51  ;;  %7104 = vperm.xlu1 %10299, %v10388_v22   ;;  %v12936_v62 = vpop.permute.xlu0 %6952  ;;  %v3824_v51 = vmax.f32 %v2850_v53, 0.0  ;;  %v2042_v6 = vmax.f32 %v1496_v30, 0.0  ;;  %v2860_v30 = vadd.f32 %v12803_v54, %v12882_v59 }
 0x242   :  { %v12926_v18 = vpop.f32.mrf.mxu1  ;;  %15914 = vst [vmem:[#allocation132_spill] sm:$0xff] %v12936_v62  ;;  %6512 = vperm.xlu0 %10298, %v10389_v27   ;;  %v10390_v27 = vld [vmem:[%s15502_s0 + $0x3c8] sm:$0xff]  ;;  %v1511_v62 = vadd.f32 %v12586_v39, %v11976_v58  ;;  %v3825_v53 = vmax.f32 %v2855_v7, 0.0  ;;  %v12970_v58 = vpop.permute.xlu1 %6380  ;;  %v1521_v7 = vadd.f32 %v12586_v39, %v11993_v35 }
 0x243   :  { %8881 = vmatmul.mubr.msk.f32.gmra.mxu0 %vm2149_vm2, %v3823_v31  ;;  %v1506_v31 = vadd.f32 %v12586_v39, %v11955_v32 }
 0x244   :  { %v12941_v57 = vpop.f32.mrf.mxu1  ;;  %10071 = vmatmul.mubr.msk.f32.gmra.mxu1 %vm2149_vm2, %v2040_v43  ;;  %4762 = vmatprep.mubr.f32.mxu0 %v15906_v50  ;;  %v2043_v43 = vmax.f32 %v1501_v21, 0.0 }
 0x245   :  { %10073 = vmatprep.mubr.msk.f32.mxu1 %vm2149_vm2, %v2041_v44  ;;  %6812 = vperm.xlu1 %10299, %v10390_v27   ;;  %v12958_v25 = vpop.permute.xlu0 %6464  ;;  %v10391_v44 = vld [vmem:[%s15502_s0 + $0x480] sm:$0xff]  ;;  %v2044_v21 = vmax.f32 %v1506_v31, 0.0  ;;  %v10393_v31 = vld [vmem:[%s15502_s0 + $0x238] sm:$0xff] }
 0x246   :  { %v12950_v22 = vpop.f32.mrf.mxu1  ;;  %15915 = vst [vmem:[#allocation133_spill] sm:$0xff] %v12958_v25  ;;  %6904 = vperm.xlu0 %10298, %v10391_v44   ;;  %v2045_v44 = vmax.f32 %v1511_v62, 0.0  ;;  %v2865_v62 = vadd.f32 %v12874_v10, %v12803_v54  ;;  %v13004_v10 = vpop.permute.xlu1 %6676 }
 0x247   :  { %8882 = vmatmul.mubr.msk.f32.gmra.mxu0 %vm2149_vm2, %v3824_v51  ;;  %v1516_v51 = vadd.f32 %v12586_v39, %v11969_v63  ;;  %15917 = vst [vmem:[#allocation135_spill] sm:$0xff] %v13004_v10 }
 0x248   :  { %v12963_v32 = vpop.f32.mrf.mxu1  ;;  %10074 = vmatmul.mubr.msk.f32.gmra.mxu1 %vm2149_vm2, %v2042_v6  ;;  %4768 = vmatprep.mubr.f32.mxu0 %v15906_v50  ;;  %v10392_v6 = vld [vmem:[%s15502_s0 + $0xb8] sm:$0xff] }
 0x249   :  { %10076 = vmatprep.mubr.msk.f32.mxu1 %vm2149_vm2, %v2043_v43  ;;  %6420 = vperm.xlu1 %10299, %v10392_v6   ;;  %v12982_v59 = vpop.permute.xlu0 %6856  ;;  %v3826_v43 = vmax.f32 %v2860_v30, 0.0  ;;  %v2046_v35 = vmax.f32 %v1516_v51, 0.0 }
 0x24a   :  { %v12974_v27 = vpop.f32.mrf.mxu1  ;;  %15916 = vst [vmem:[#allocation134_spill] sm:$0xff] %v12982_v59  ;;  %6612 = vperm.xlu0 %10298, %v10393_v31   ;;  %v10394_v31 = vld [vmem:[%s15502_s0 + $0x308] sm:$0xff]  ;;  %v1531_v59 = vadd.f32 %v12586_v39, %v12013_v40  ;;  %v2870_v40 = vadd.f32 %v12803_v54, %v12905_v38 }
 0x24b   :  { %8883 = vmatmul.mubr.msk.f32.gmra.mxu0 %vm2149_vm2, %v3825_v53  ;;  %v1526_v53 = vadd.f32 %v12586_v39, %v11980_v36  ;;  %v10395_v36 = vld [vmem:[%s15502_s0 + $0x548] sm:$0xff]  ;;  %v2900_v12 = vadd.f32 %v12803_v54, %v12974_v27 }
 0x24c   :  { %v12987_v63 = vpop.f32.mrf.mxu1  ;;  %10077 = vmatmul.mubr.msk.f32.gmra.mxu1 %vm2149_vm2, %v2044_v21  ;;  %4774 = vmatprep.mubr.f32.mxu0 %v15906_v50  ;;  %v2047_v21 = vmax.f32 %v1521_v7, 0.0 }
 0x24d   :  { %10079 = vmatprep.mubr.msk.f32.mxu1 %vm2149_vm2, %v2045_v44  ;;  %6716 = vperm.xlu1 %10299, %v10394_v31   ;;  %v13006_v30 = vpop.permute.xlu0 %6564  ;;  %v3827_v44 = vmax.f32 %v2865_v62, 0.0  ;;  %v2048_v7 = vmax.f32 %v1526_v53, 0.0  ;;  %v1541_v62 = vadd.f32 %v12586_v39, %v12038_v9  ;;  %v10397_v53 = vld [vmem:[%s15502_s0 + $0x178] sm:$0xff]  ;;  %v13040_v9 = vpop.permute.xlu1 %7068 }
 0x24e   :  { %v12996_v6 = vpop.f32.mrf.mxu1  ;;  %15918 = vst [vmem:[#allocation136_spill] sm:$0xff] %v13006_v30  ;;  %7004 = vperm.xlu0 %10298, %v10395_v36   ;;  %v10396_v36 = vld [vmem:[%s15502_s0 + $0x618] sm:$0xff]  ;;  %15920 = vst [vmem:[#allocation138_spill] sm:$0xff] %v13040_v9 }
 0x24f   :  { %8884 = vmatmul.mubr.msk.f32.gmra.mxu0 %vm2149_vm2, %v3826_v43  ;;  %v1536_v43 = vadd.f32 %v12586_v39, %v12001_v28 }
 0x250   :  { %v13011_v51 = vpop.f32.mrf.mxu1  ;;  %10080 = vmatmul.mubr.msk.f32.gmra.mxu1 %vm2149_vm2, %v2046_v35  ;;  %4780 = vmatprep.mubr.f32.mxu0 %v15906_v50  ;;  %v2049_v35 = vmax.f32 %v1531_v59, 0.0  ;;  %v2875_v59 = vadd.f32 %v12895_v37, %v12803_v54  ;;  %v1551_v37 = vadd.f32 %v12586_v39, %v12060_v45 }
 0x251   :  { %10082 = vmatprep.mubr.msk.f32.mxu1 %vm2149_vm2, %v2047_v21  ;;  %7108 = vperm.xlu1 %10299, %v10396_v36   ;;  %v13028_v38 = vpop.permute.xlu0 %6956  ;;  %v3828_v21 = vmax.f32 %v2870_v40, 0.0  ;;  %v1546_v36 = vadd.f32 %v12586_v39, %v12023_v33 }
 0x252   :  { %v13020_v31 = vpop.f32.mrf.mxu1  ;;  %15919 = vst [vmem:[#allocation137_spill] sm:$0xff] %v13028_v38  ;;  %6516 = vperm.xlu0 %10298, %v10397_v53   ;;  %v2051_v53 = vmax.f32 %v1541_v62, 0.0  ;;  %v2880_v62 = vadd.f32 %v12803_v54, %v12926_v18  ;;  %v13074_v18 = vpop.permute.xlu1 %6776 }
 0x253   :  { %8885 = vmatmul.mubr.msk.f32.gmra.mxu0 %vm2149_vm2, %v3827_v44  ;;  %v2050_v44 = vmax.f32 %v1536_v43, 0.0  ;;  %v10399_v43 = vld [vmem:[%s15502_s0 + $0x488] sm:$0xff]  ;;  %v2052_v45 = vmax.f32 %v1546_v36, 0.0  ;;  %15922 = vst [vmem:[#allocation140_spill] sm:$0xff] %v13074_v18 }
 0x254   :  { %v13033_v28 = vpop.f32.mrf.mxu1  ;;  %10083 = vmatmul.mubr.msk.f32.gmra.mxu1 %vm2149_vm2, %v2048_v7  ;;  %4786 = vmatprep.mubr.f32.mxu0 %v15906_v50  ;;  %v10398_v7 = vld [vmem:[%s15502_s0 + $0x3d0] sm:$0xff] }
 0x255   :  { %10085 = vmatprep.mubr.msk.f32.mxu1 %vm2149_vm2, %v2049_v35  ;;  %6816 = vperm.xlu1 %10299, %v10398_v7   ;;  %v13052_v40 = vpop.permute.xlu0 %6468  ;;  %v3829_v35 = vmax.f32 %v2875_v59, 0.0  ;;  %v1561_v59 = vadd.f32 %v12586_v39, %v12080_v8  ;;  %v2885_v8 = vadd.f32 %v12918_v56, %v12803_v54 }
 0x256   :  { %v13044_v38 = vpop.f32.mrf.mxu1  ;;  %15921 = vst [vmem:[#allocation139_spill] sm:$0xff] %v13052_v40  ;;  %6908 = vperm.xlu0 %10298, %v10399_v43   ;;  %v10400_v43 = vld [vmem:[%s15502_s0 + $0xc0] sm:$0xff] }
 0x257   :  { %8886 = vmatmul.mubr.msk.f32.gmra.mxu0 %vm2149_vm2, %v3828_v21  ;;  %v1556_v21 = vadd.f32 %v12586_v39, %v12047_v5  ;;  %v10401_v5 = vld [vmem:[%s15502_s0 + $0x240] sm:$0xff] }
 0x258   :  { %v13057_v33 = vpop.f32.mrf.mxu1  ;;  %10086 = vmatmul.mubr.msk.f32.gmra.mxu1 %vm2149_vm2, %v2050_v44  ;;  %4792 = vmatprep.mubr.f32.mxu0 %v15906_v50  ;;  %v2053_v44 = vmax.f32 %v1551_v37, 0.0  ;;  %v3830_v37 = vmax.f32 %v2880_v62, 0.0  ;;  %v10403_v62 = vld [vmem:[%s15502_s0 + $0x550] sm:$0xff] }
 0x259   :  { %10088 = vmatprep.mubr.msk.f32.mxu1 %vm2149_vm2, %v2051_v53  ;;  %6424 = vperm.xlu1 %10299, %v10400_v43   ;;  %v13076_v53 = vpop.permute.xlu0 %6860  ;;  %v1566_v43 = vadd.f32 %v12586_v39, %v12070_v14 }
 0x25a   :  { %v13066_v7 = vpop.f32.mrf.mxu1  ;;  %15923 = vst [vmem:[#allocation141_spill] sm:$0xff] %v13076_v53  ;;  %6616 = vperm.xlu0 %10298, %v10401_v5   ;;  %v10402_v5 = vld [vmem:[%s15502_s0 + $0x310] sm:$0xff]  ;;  %v1571_v53 = vadd.f32 %v12586_v39, %v12101_v19  ;;  %v13110_v19 = vpop.permute.xlu1 %6384 }
 0x25b   :  { %8887 = vmatmul.mubr.msk.f32.gmra.mxu0 %vm2149_vm2, %v3829_v35  ;;  %v2054_v35 = vmax.f32 %v1556_v21, 0.0  ;;  %v3831_v21 = vmax.f32 %v2885_v8, 0.0  ;;  %v15926_v8 = vld [vmem:[#allocation11_spill] sm:$0xff] }
 0x25c   :  { %v13081_v36 = vpop.f32.mrf.mxu1  ;;  %10089 = vmatmul.mubr.msk.f32.gmra.mxu1 %vm2149_vm2, %v2052_v45  ;;  %4798 = vmatprep.mubr.f32.mxu0 %v15906_v50  ;;  %v2055_v45 = vmax.f32 %v1561_v59, 0.0  ;;  %v2056_v59 = vmax.f32 %v1566_v43, 0.0  ;;  %v1581_v18 = vadd.f32 %v12586_v39, %v15926_v8  ;;  %v10405_v43 = vld [vmem:[%s15502_s0 + $0x180] sm:$0xff] }
 0x25d   :  { %10091 = vmatprep.mubr.msk.f32.mxu1 %vm2149_vm2, %v2053_v44  ;;  %6720 = vperm.xlu1 %10299, %v10402_v5   ;;  %v13098_v56 = vpop.permute.xlu0 %6568  ;;  %v2890_v44 = vadd.f32 %v12803_v54, %v12950_v22 }
 0x25e   :  { %v13090_v9 = vpop.f32.mrf.mxu1  ;;  %15924 = vst [vmem:[#allocation142_spill] sm:$0xff] %v13098_v56  ;;  %7008 = vperm.xlu0 %10298, %v10403_v62   ;;  %v2057_v62 = vmax.f32 %v1571_v53, 0.0  ;;  %v2895_v53 = vadd.f32 %v12941_v57, %v12803_v54  ;;  %v13144_v57 = vpop.permute.xlu1 %6680  ;;  %v1631_v56 = vadd.f32 %v12586_v39, %v12244_v20 }
 0x25f   :  { %8888 = vmatmul.mubr.msk.f32.gmra.mxu0 %vm2149_vm2, %v3830_v37  ;;  %v15925_v37 = vld [vmem:[#allocation9_spill] sm:$0xff]  ;;  %15929 = vst [vmem:[#allocation11_spill] sm:$0xff] %v13144_v57 }
 0x260   :  { %v13103_v14 = vpop.f32.mrf.mxu1  ;;  %10092 = vmatmul.mubr.msk.f32.gmra.mxu1 %vm2149_vm2, %v2054_v35  ;;  %4804 = vmatprep.mubr.f32.mxu0 %v15906_v50  ;;  %v1576_v5 = vadd.f32 %v12586_v39, %v15925_v37  ;;  %v10404_v35 = vld [vmem:[%s15502_s0 + $0x620] sm:$0xff]  ;;  %v3832_v37 = vmax.f32 %v2890_v44, 0.0 }
 0x261   :  { %10094 = vmatprep.mubr.msk.f32.mxu1 %vm2149_vm2, %v2055_v45  ;;  %7112 = vperm.xlu1 %10299, %v10404_v35   ;;  %v13122_v22 = vpop.permute.xlu0 %6960  ;;  %v15928_v35 = vld [vmem:[#allocation8_spill] sm:$0xff] }
 0x262   :  { %v13114_v24 = vpop.f32.mrf.mxu1  ;;  %15927 = vst [vmem:[#allocation9_spill] sm:$0xff] %v13122_v22  ;;  %6520 = vperm.xlu0 %10298, %v10405_v43   ;;  %v1586_v8 = vadd.f32 %v12586_v39, %v15928_v35  ;;  %v10406_v43 = vld [vmem:[%s15502_s0 + $0x3d8] sm:$0xff]  ;;  %v15931_v35 = vld [vmem:[#allocation13_spill] sm:$0xff] }
 0x263   :  { %8889 = vmatmul.mubr.msk.f32.gmra.mxu0 %vm2149_vm2, %v3831_v21  ;;  %v2058_v21 = vmax.f32 %v1576_v5, 0.0  ;;  %v10407_v5 = vld [vmem:[%s15502_s0 + $0x490] sm:$0xff] }
 0x264   :  { %v13127_v45 = vpop.f32.mrf.mxu1  ;;  %10095 = vmatmul.mubr.msk.f32.gmra.mxu1 %vm2149_vm2, %v2056_v59  ;;  %4810 = vmatprep.mubr.f32.mxu0 %v15906_v50  ;;  %v2059_v59 = vmax.f32 %v1581_v18, 0.0  ;;  %v3833_v18 = vmax.f32 %v2895_v53, 0.0  ;;  %v1601_v53 = vadd.f32 %v12586_v39, %v12173_v16  ;;  %v13180_v16 = vpop.permute.xlu1 %7072 }
 0x265   :  { %10097 = vmatprep.mubr.msk.f32.mxu1 %vm2149_vm2, %v2057_v62  ;;  %6820 = vperm.xlu1 %10299, %v10406_v43   ;;  %v13146_v44 = vpop.permute.xlu0 %6472  ;;  %v1596_v43 = vadd.f32 %v12586_v39, %v15931_v35  ;;  %v3834_v35 = vmax.f32 %v2900_v12, 0.0  ;;  %15933 = vst [vmem:[#allocation143_spill] sm:$0xff] %v13180_v16 }
 0x266   :  { %v13136_v22 = vpop.f32.mrf.mxu1  ;;  %15930 = vst [vmem:[#allocation8_spill] sm:$0xff] %v13146_v44  ;;  %6912 = vperm.xlu0 %10298, %v10407_v5   ;;  %v10408_v5 = vld [vmem:[%s15502_s0 + $0x318] sm:$0xff] }
 0x267   :  { %8890 = vmatmul.mubr.msk.f32.gmra.mxu0 %vm2149_vm2, %v3832_v37  ;;  %v2060_v37 = vmax.f32 %v1586_v8, 0.0  ;;  %v10409_v8 = vld [vmem:[%s15502_s0 + $0x248] sm:$0xff] }
 0x268   :  { %v13151_v62 = vpop.f32.mrf.mxu1  ;;  %10098 = vmatmul.mubr.msk.f32.gmra.mxu1 %vm2149_vm2, %v2058_v21  ;;  %4816 = vmatprep.mubr.f32.mxu0 %v15906_v50  ;;  %v2061_v21 = vmax.f32 %v1591_v0, 0.0  ;;  %v2905_v0 = vadd.f32 %v12963_v32, %v12803_v54  ;;  %v1611_v32 = vadd.f32 %v12586_v39, %v12197_v29 }
 0x269   :  { %10100 = vmatprep.mubr.msk.f32.mxu1 %vm2149_vm2, %v2059_v59  ;;  %6724 = vperm.xlu1 %10299, %v10408_v5   ;;  %v13168_v27 = vpop.permute.xlu0 %6864  ;;  %v15934_v5 = vld [vmem:[#allocation15_spill] sm:$0xff] }
 0x26a   :  { %v13160_v57 = vpop.f32.mrf.mxu1  ;;  %15932 = vst [vmem:[#allocation13_spill] sm:$0xff] %v13168_v27  ;;  %6620 = vperm.xlu0 %10298, %v10409_v8   ;;  %v1606_v27 = vadd.f32 %v12586_v39, %v15934_v5  ;;  %v2063_v8 = vmax.f32 %v1601_v53, 0.0  ;;  %v3835_v5 = vmax.f32 %v2905_v0, 0.0  ;;  %v2910_v53 = vadd.f32 %v12803_v54, %v12996_v6  ;;  %v13214_v6 = vpop.permute.xlu1 %6780 }
 0x26b   :  { %8891 = vmatmul.mubr.msk.f32.gmra.mxu0 %vm2149_vm2, %v3833_v18  ;;  %v2062_v18 = vmax.f32 %v1596_v43, 0.0  ;;  %v10411_v43 = vld [vmem:[%s15502_s0 + $0x558] sm:$0xff] }
 0x26c   :  { %v13173_v59 = vpop.f32.mrf.mxu1  ;;  %10101 = vmatmul.mubr.msk.f32.gmra.mxu1 %vm2149_vm2, %v2060_v37  ;;  %4822 = vmatprep.mubr.f32.mxu0 %v15906_v50  ;;  %v10410_v37 = vld [vmem:[%s15502_s0 + $0x628] sm:$0xff]  ;;  %v2064_v29 = vmax.f32 %v1606_v27, 0.0 }
 0x26d   :  { %10103 = vmatprep.mubr.msk.f32.mxu1 %vm2149_vm2, %v2061_v21  ;;  %7116 = vperm.xlu1 %10299, %v10410_v37   ;;  %v13192_v12 = vpop.permute.xlu0 %6572  ;;  %v10413_v27 = vld [vmem:[%s15502_s0 + $0x188] sm:$0xff] }
 0x26e   :  { %v13184_v10 = vpop.f32.mrf.mxu1  ;;  %15935 = vst [vmem:[#allocation15_spill] sm:$0xff] %v13192_v12  ;;  %7012 = vperm.xlu0 %10298, %v10411_v43   ;;  %v10412_v43 = vld [vmem:[%s15502_s0 + $0x568] sm:$0xff]  ;;  %v13250_v20 = vpop.permute.xlu1 %6388 }
 0x26f   :  { %8892 = vmatmul.mubr.msk.f32.gmra.mxu0 %vm2149_vm2, %v3834_v35  ;;  %v15936_v35 = vld [vmem:[#allocation17_spill] sm:$0xff] }
 0x270   :  { %v13197_v21 = vpop.f32.mrf.mxu1  ;;  %10104 = vmatmul.mubr.msk.f32.gmra.mxu1 %vm2149_vm2, %v2062_v18  ;;  %4828 = vmatprep.mubr.f32.mxu0 %v15906_v50  ;;  %v1616_v37 = vadd.f32 %v12586_v39, %v15936_v35  ;;  %v2065_v18 = vmax.f32 %v1611_v32, 0.0  ;;  %v15937_v12 = vld [vmem:[#allocation21_spill] sm:$0xff]  ;;  %15938 = vst [vmem:[#allocation17_spill] sm:$0xff] %v13214_v6  ;;  %v2915_v32 = vadd.f32 %v12987_v63, %v12803_v54 }
 0x271   :  { %10106 = vmatprep.mubr.msk.f32.mxu1 %vm2149_vm2, %v2063_v8  ;;  %7020 = vperm.xlu1 %10299, %v10412_v43   ;;  %v1621_v0 = vadd.f32 %v12586_v39, %v15937_v12  ;;  %v13216_v8 = vpop.permute.xlu0 %6964  ;;  %v3836_v12 = vmax.f32 %v2910_v53, 0.0  ;;  %v15940_v43 = vld [vmem:[#allocation16_spill] sm:$0xff]  ;;  %v10415_v53 = vld [vmem:[%s15502_s0 + $0x498] sm:$0xff] }
 0x272   :  { %v13206_v16 = vpop.f32.mrf.mxu1  ;;  %15939 = vst [vmem:[#allocation21_spill] sm:$0xff] %v13216_v8  ;;  %6524 = vperm.xlu0 %10298, %v10413_v27   ;;  %v1626_v8 = vadd.f32 %v12586_v39, %v15940_v43  ;;  %v10414_v27 = vld [vmem:[%s15502_s0 + $0x630] sm:$0xff]  ;;  %v1636_v43 = vadd.f32 %v12586_v39, %v12238_v46 }
 0x273   :  { %8893 = vmatmul.mubr.msk.f32.gmra.mxu0 %vm2149_vm2, %v3835_v5  ;;  %v2066_v5 = vmax.f32 %v1616_v37, 0.0 }
 0x274   :  { %v13221_v35 = vpop.f32.mrf.mxu1  ;;  %10107 = vmatmul.mubr.msk.f32.gmra.mxu1 %vm2149_vm2, %v2064_v29  ;;  %4834 = vmatprep.mubr.f32.mxu0 %v15906_v50  ;;  %v2067_v29 = vmax.f32 %v1621_v0, 0.0  ;;  %v2920_v0 = vadd.f32 %v12803_v54, %v13020_v31 }
 0x275   :  { %10109 = vmatprep.mubr.msk.f32.mxu1 %vm2149_vm2, %v2065_v18  ;;  %7120 = vperm.xlu1 %10299, %v10414_v27   ;;  %v13238_v63 = vpop.permute.xlu0 %6476  ;;  %v3837_v18 = vmax.f32 %v2915_v32, 0.0  ;;  %v1641_v32 = vadd.f32 %v12586_v39, %v12257_v4  ;;  %v2070_v4 = vmax.f32 %v1636_v43, 0.0 }
 0x276   :  { %v13230_v6 = vpop.f32.mrf.mxu1  ;;  %15941 = vst [vmem:[#allocation16_spill] sm:$0xff] %v13238_v63  ;;  %6916 = vperm.xlu0 %10298, %v10415_v53   ;;  %v2069_v53 = vmax.f32 %v1631_v56, 0.0  ;;  %v2925_v56 = vadd.f32 %v13011_v51, %v12803_v54  ;;  %v10418_v51 = vld [vmem:[%s15502_s0 + $0x560] sm:$0xff] }
 0x277   :  { %8894 = vmatmul.mubr.msk.f32.gmra.mxu0 %vm2149_vm2, %v3836_v12  ;;  %v2068_v12 = vmax.f32 %v1626_v8, 0.0  ;;  %v10417_v8 = vld [vmem:[%s15502_s0 + $0x250] sm:$0xff] }
 0x278   :  { %v13243_v37 = vpop.f32.mrf.mxu1  ;;  %10110 = vmatmul.mubr.msk.f32.gmra.mxu1 %vm2149_vm2, %v2066_v5  ;;  %4840 = vmatprep.mubr.f32.mxu0 %v15906_v50  ;;  %v10416_v5 = vld [vmem:[%s15502_s0 + $0x638] sm:$0xff] }
 0x279   :  { %10112 = vmatprep.mubr.msk.f32.mxu1 %vm2149_vm2, %v2067_v29  ;;  %7124 = vperm.xlu1 %10299, %v10416_v5   ;;  %v13262_v31 = vpop.permute.xlu0 %6868  ;;  %v3838_v29 = vmax.f32 %v2920_v0, 0.0 }
 0x27a   :  { %v13254_v27 = vpop.f32.mrf.mxu1  ;;  %15942 = vst [vmem:[#allocation144_spill] sm:$0xff] %v13262_v31  ;;  %6624 = vperm.xlu0 %10298, %v10417_v8   ;;  %v2071_v31 = vmax.f32 %v1641_v32, 0.0  ;;  %v1651_v8 = vadd.f32 %v12586_v39, %v12272_v49  ;;  %v2930_v49 = vadd.f32 %v12803_v54, %v13044_v38  ;;  %v10419_v38 = vld [vmem:[%s15502_s0 + $0x4a0] sm:$0xff] }
 0x27b   :  { %8895 = vmatmul.mubr.msk.f32.gmra.mxu0 %vm2149_vm2, %v3837_v18  ;;  %v1646_v18 = vadd.f32 %v12586_v39, %v12251_v52  ;;  %v3839_v52 = vmax.f32 %v2925_v56, 0.0 }
 0x27c   :  { %v13267_v46 = vpop.f32.mrf.mxu1  ;;  %10113 = vmatmul.mubr.msk.f32.gmra.mxu1 %vm2149_vm2, %v2068_v12  ;;  %4846 = vmatprep.mubr.f32.mxu0 %v15906_v50  ;;  %v13281_v12 = vpop.permute.xlu1 %6684  ;;  %v3840_v56 = vmax.f32 %v2930_v49, 0.0 }
 0x27d   :  { %10115 = vmatprep.mubr.msk.f32.mxu1 %vm2149_vm2, %v2069_v53  ;;  %15943 = vst [vmem:[#allocation145_spill] sm:$0xff] %v13281_v12  ;;  %v13283_v30 = vpop.permute.xlu0 %6576  ;;  %v2072_v43 = vmax.f32 %v1646_v18, 0.0  ;;  %v1656_v53 = vadd.f32 %v12586_v39, %v12266_v2  ;;  %v2935_v2 = vadd.f32 %v13033_v28, %v12803_v54  ;;  %v10420_v28 = vld [vmem:[%s15502_s0 + $0x3e0] sm:$0xff]  ;;  %v15953_v12 = vld [vmem:[#allocation26_spill] sm:$0xff] }
 0x27e   :  { %v13276_v5 = vpop.f32.mrf.mxu1  ;;  %15944 = vst [vmem:[#allocation146_spill] sm:$0xff] %v13283_v30  ;;  %7016 = vperm.xlu0 %10298, %v10418_v51   ;;  %v1661_v51 = vadd.f32 %v12586_v39, %v12287_v47 }
 0x27f   :  { %8896 = vmatmul.mubr.msk.f32.gmra.mxu0 %vm2149_vm2, %v3838_v29  ;;  %v2073_v29 = vmax.f32 %v1651_v8, 0.0  ;;  %v2074_v18 = vmax.f32 %v1656_v53, 0.0  ;;  %v1666_v8 = vadd.f32 %v12586_v39, %v12281_v48  ;;  %v3841_v48 = vmax.f32 %v2935_v2, 0.0 }
 0x280   :  { %v13288_v0 = vpop.f32.mrf.mxu1  ;;  %10116 = vmatmul.mubr.msk.f32.gmra.mxu1 %vm2149_vm2, %v2070_v4  ;;  %4852 = vmatprep.mubr.f32.mxu0 %v15906_v50  ;;  %v13314_v47 = vpop.permute.xlu1 %7076  ;;  %v2940_v53 = vadd.f32 %v12803_v54, %v13066_v7  ;;  %v10421_v7 = vld [vmem:[%s15502_s0 + $0x4a8] sm:$0xff] }
 0x281   :  { %10118 = vmatprep.mubr.msk.f32.mxu1 %vm2149_vm2, %v2071_v31  ;;  %v13302_v4 = vpop.permute.xlu0 %6968  ;;  %15946 = vst [vmem:[#allocation148_spill] sm:$0xff] %v13314_v47 }
 0x282   :  { %v13297_v32 = vpop.f32.mrf.mxu1  ;;  %15945 = vst [vmem:[#allocation147_spill] sm:$0xff] %v13302_v4  ;;  %6920 = vperm.xlu0 %10298, %v10419_v38   ;;  %v2075_v38 = vmax.f32 %v1661_v51, 0.0 }
 0x283   :  { %8897 = vmatmul.mubr.msk.f32.gmra.mxu0 %vm2149_vm2, %v3839_v52 }
 0x284   :  { %v13307_v31 = vpop.f32.mrf.mxu1  ;;  %10119 = vmatmul.mubr.msk.f32.gmra.mxu1 %vm2149_vm2, %v2072_v43  ;;  %4858 = vmatprep.mubr.f32.mxu0 %v15906_v50  ;;  %v1671_v43 = vadd.f32 %v12586_v39, %v12302_v23  ;;  %v2076_v23 = vmax.f32 %v1666_v8, 0.0 }
 0x285   :  { %10121 = vmatprep.mubr.msk.f32.mxu1 %vm2149_vm2, %v2073_v29  ;;  %v13323_v4 = vpop.permute.xlu0 %6480  ;;  %v1676_v29 = vadd.f32 %v12586_v39, %v12296_v15  ;;  %v2945_v15 = vadd.f32 %v13057_v33, %v12803_v54 }
 0x286   :  { %v13318_v52 = vpop.f32.mrf.mxu1  ;;  %15947 = vst [vmem:[#allocation149_spill] sm:$0xff] %v13323_v4  ;;  %6824 = vperm.xlu0 %10298, %v10420_v28   ;;  %v1681_v28 = vadd.f32 %v12586_v39, %v12315_v17  ;;  %v3842_v17 = vmax.f32 %v2940_v53, 0.0  ;;  %v10423_v53 = vld [vmem:[%s15502_s0 + $0x570] sm:$0xff]  ;;  %v15970_v4 = vld [vmem:[#allocation40_spill] sm:$0xff] }
 0x287   :  { %8898 = vmatmul.mubr.msk.f32.gmra.mxu0 %vm2149_vm2, %v3840_v56  ;;  %v2077_v56 = vmax.f32 %v1671_v43, 0.0  ;;  %v2078_v39 = vmax.f32 %v1676_v29, 0.0 }
 0x288   :  { %v13328_v49 = vpop.f32.mrf.mxu1  ;;  %10122 = vmatmul.mubr.msk.f32.gmra.mxu1 %vm2149_vm2, %v2074_v18  ;;  %4864 = vmatprep.mubr.f32.mxu0 %v15906_v50  ;;  %v13342_v18 = vpop.permute.xlu1 %6784 }
 0x289   :  { %10124 = vmatprep.mubr.msk.f32.mxu1 %vm2149_vm2, %v2075_v38  ;;  %15948 = vst [vmem:[#allocation150_spill] sm:$0xff] %v13342_v18  ;;  %v13344_v2 = vpop.permute.xlu0 %6872  ;;  %v13359_v38 = vld [vmem:[%s15504_s2] ss:$0 sm:$0xff] }
 0x28a   :  { %v13337_v51 = vpop.f32.mrf.mxu1  ;;  %15949 = vst [vmem:[#allocation151_spill] sm:$0xff] %v13344_v2  ;;  %6924 = vperm.xlu0 %10298, %v10421_v7   ;;  %v1686_v43 = vadd.f32 %v13359_v38, %v12309_v42  ;;  %v15950_v7 = vld [vmem:[#allocation25_spill] sm:$0xff]  ;;  %v3843_v42 = vmax.f32 %v2945_v15, 0.0 }
 0x28b   :  { %8899 = vmatmul.mubr.msk.f32.gmra.mxu0 %vm2149_vm2, %v3841_v48  ;;  %v1691_v47 = vadd.f32 %v13359_v38, %v15950_v7  ;;  %v15952_v7 = vld [vmem:[#allocation83_spill] sm:$0xff] }
 0x28c   :  { %v13349_v8 = vpop.f32.mrf.mxu1  ;;  %10125 = vmatmul.mubr.msk.f32.gmra.mxu1 %vm2149_vm2, %v2076_v23  ;;  %4870 = vmatprep.mubr.f32.mxu0 %v15906_v50  ;;  %v2079_v23 = vmax.f32 %v1681_v28, 0.0  ;;  %v13380_v28 = vpop.permute.xlu1 %6392  ;;  %v1696_v2 = vadd.f32 %v13359_v38, %v15952_v7  ;;  %v15954_v7 = vld [vmem:[#allocation85_spill] sm:$0xff] }
 0x28d   :  { %10127 = vmatprep.mubr.msk.f32.mxu1 %vm2149_vm2, %v2077_v56  ;;  %v13368_v33 = vpop.permute.xlu0 %6580  ;;  %v2950_v56 = vadd.f32 %v12803_v54, %v13090_v9  ;;  %v2955_v9 = vadd.f32 %v13081_v36, %v12803_v54 }
 0x28e   :  { %v13363_v48 = vpop.f32.mrf.mxu1  ;;  %15951 = vst [vmem:[#allocation25_spill] sm:$0xff] %v13368_v33  ;;  %7024 = vperm.xlu0 %10298, %v10423_v53   ;;  %v2081_v53 = vmax.f32 %v1691_v47, 0.0  ;;  %v1706_v47 = vadd.f32 %v13359_v38, %v15954_v7 }
 0x28f   :  { %8900 = vmatmul.mubr.msk.f32.gmra.mxu0 %vm2149_vm2, %v3842_v17  ;;  %v2080_v17 = vmax.f32 %v1686_v43, 0.0  ;;  %v3844_v43 = vmax.f32 %v2950_v56, 0.0  ;;  %v3845_v36 = vmax.f32 %v2955_v9, 0.0 }
 0x290   :  { %v13373_v29 = vpop.f32.mrf.mxu1  ;;  %10128 = vmatmul.mubr.msk.f32.gmra.mxu1 %vm2149_vm2, %v2078_v39  ;;  %4876 = vmatprep.mubr.f32.mxu0 %v15906_v50  ;;  %v1701_v39 = vadd.f32 %v13359_v38, %v15953_v12  ;;  %v2084_v56 = vmax.f32 %v1706_v47, 0.0 }
 0x291   :  { %10130 = vmatprep.mubr.msk.f32.mxu1 %vm2149_vm2, %v2079_v23  ;;  %v2082_v23 = vmax.f32 %v1696_v2, 0.0  ;;  %v2960_v2 = vadd.f32 %v12803_v54, %v13114_v24  ;;  %v2965_v24 = vadd.f32 %v13103_v14, %v12803_v54 }
 0x292   :  { %v13384_v18 = vpop.f32.mrf.mxu1  ;;  %v2083_v12 = vmax.f32 %v1701_v39, 0.0 }
 0x293   :  { %8901 = vmatmul.mubr.msk.f32.gmra.mxu0 %vm2149_vm2, %v3843_v42  ;;  %v1711_v42 = vadd.f32 %v13359_v38, %v12375_v1  ;;  %v1716_v1 = vadd.f32 %v13359_v38, %v12369_v61  ;;  %v3846_v9 = vmax.f32 %v2960_v2, 0.0  ;;  %v3847_v14 = vmax.f32 %v2965_v24, 0.0 }
 0x294   :  { %v13389_v15 = vpop.f32.mrf.mxu1  ;;  %10131 = vmatmul.mubr.msk.f32.gmra.mxu1 %vm2149_vm2, %v2080_v17  ;;  %4882 = vmatprep.mubr.f32.mxu0 %v15906_v50  ;;  %v13403_v17 = vpop.permute.xlu1 %6688  ;;  %v2970_v2 = vadd.f32 %v12803_v54, %v13136_v22  ;;  %v2975_v22 = vadd.f32 %v13127_v45, %v12803_v54 }
 0x295   :  { %10133 = vmatprep.mubr.msk.f32.mxu1 %vm2149_vm2, %v2081_v53  ;;  %15955 = vst [vmem:[#allocation83_spill] sm:$0xff] %v13403_v17  ;;  %v2085_v39 = vmax.f32 %v1711_v42, 0.0  ;;  %v2086_v47 = vmax.f32 %v1716_v1, 0.0 }
 0x296   :  { %v13398_v33 = vpop.f32.mrf.mxu1  ;;  %v3849_v45 = vmax.f32 %v2975_v22, 0.0 }
 0x297   :  { %8902 = vmatmul.mubr.msk.f32.gmra.mxu0 %vm2149_vm2, %v3844_v43  ;;  %v15956_v43 = vld [vmem:[#allocation30_spill] sm:$0xff] }
 0x298   :  { %v13405_v30 = vpop.f32.mrf.mxu1  ;;  %10134 = vmatmul.mubr.msk.f32.gmra.mxu1 %vm2149_vm2, %v2082_v23  ;;  %4888 = vmatprep.mubr.f32.mxu0 %v15906_v50  ;;  %v1721_v7 = vadd.f32 %v13359_v38, %v15956_v43  ;;  %v13426_v61 = vpop.permute.xlu1 %7080 }
 0x299   :  { %10136 = vmatprep.mubr.msk.f32.mxu1 %vm2149_vm2, %v2083_v12  ;;  %15957 = vst [vmem:[#allocation26_spill] sm:$0xff] %v13426_v61  ;;  %v15958_v12 = vld [vmem:[#allocation87_spill] sm:$0xff] }
 0x29a   :  { %v13414_v53 = vpop.f32.mrf.mxu1  ;;  %v1726_v42 = vadd.f32 %v13359_v38, %v15958_v12 }
 0x29b   :  { %8903 = vmatmul.mubr.msk.f32.gmra.mxu0 %vm2149_vm2, %v3845_v36  ;;  %v2087_v36 = vmax.f32 %v1721_v7, 0.0 }
 0x29c   :  { %v13419_v23 = vpop.f32.mrf.mxu1  ;;  %10137 = vmatmul.mubr.msk.f32.gmra.mxu1 %vm2149_vm2, %v2084_v56  ;;  %4894 = vmatprep.mubr.f32.mxu0 %v15906_v50  ;;  %v1731_v56 = vadd.f32 %v13359_v38, %v12413_v41  ;;  %v2088_v1 = vmax.f32 %v1726_v42, 0.0  ;;  %v3848_v42 = vmax.f32 %v2970_v2, 0.0  ;;  %v2980_v2 = vadd.f32 %v12803_v54, %v13160_v57 }
 0x29d   :  { %10139 = vmatprep.mubr.msk.f32.mxu1 %vm2149_vm2, %v2085_v39  ;;  %v15959_v39 = vld [vmem:[#allocation89_spill] sm:$0xff]  ;;  %v2985_v57 = vadd.f32 %v13151_v62, %v12803_v54 }
 0x29e   :  { %v13430_v43 = vpop.f32.mrf.mxu1  ;;  %v1736_v7 = vadd.f32 %v13359_v38, %v15959_v39  ;;  %v2089_v41 = vmax.f32 %v1731_v56, 0.0  ;;  %v15962_v56 = vld [vmem:[#allocation35_spill] sm:$0xff] }
 0x29f   :  { %8904 = vmatmul.mubr.msk.f32.gmra.mxu0 %vm2149_vm2, %v3846_v9  ;;  %v15960_v9 = vld [vmem:[#allocation34_spill] sm:$0xff]  ;;  %v1746_v39 = vadd.f32 %v13359_v38, %v15962_v56  ;;  %v3850_v56 = vmax.f32 %v2980_v2, 0.0  ;;  %v3851_v62 = vmax.f32 %v2985_v57, 0.0  ;;  %v2990_v2 = vadd.f32 %v12803_v54, %v13184_v10 }
 0x2a0   :  { %v13435_v17 = vpop.f32.mrf.mxu1  ;;  %10140 = vmatmul.mubr.msk.f32.gmra.mxu1 %vm2149_vm2, %v2086_v47  ;;  %4900 = vmatprep.mubr.f32.mxu0 %v15906_v50  ;;  %v1741_v61 = vadd.f32 %v13359_v38, %v15960_v9  ;;  %v13449_v47 = vpop.permute.xlu1 %6788  ;;  %v2995_v10 = vadd.f32 %v13173_v59, %v12803_v54  ;;  %v13534_v59 = vld [vmem:[%s15506_s4] ss:$0 sm:$0xff] }
 0x2a1   :  { %10142 = vmatprep.mubr.msk.f32.mxu1 %vm2149_vm2, %v2087_v36  ;;  %15961 = vst [vmem:[#allocation85_spill] sm:$0xff] %v13449_v47  ;;  %v2090_v36 = vmax.f32 %v1736_v7, 0.0  ;;  %v1751_v47 = vadd.f32 %v13359_v38, %v12451_v26  ;;  %v1756_v26 = vadd.f32 %v13359_v38, %v12445_v11  ;;  %v3852_v57 = vmax.f32 %v2990_v2, 0.0  ;;  %v15971_v2 = vld [vmem:[#allocation99_spill] sm:$0xff] }
 0x2a2   :  { %v13444_v12 = vpop.f32.mrf.mxu1  ;;  %v3853_v54 = vmax.f32 %v2995_v10, 0.0 }
 0x2a3   :  { %8905 = vmatmul.mubr.msk.f32.gmra.mxu0 %vm2149_vm2, %v3847_v14  ;;  %v2091_v14 = vmax.f32 %v1741_v61, 0.0  ;;  %v2092_v61 = vmax.f32 %v1746_v39, 0.0  ;;  %v2094_v11 = vmax.f32 %v1756_v26, 0.0  ;;  %v15963_v39 = vld [vmem:[#allocation93_spill] sm:$0xff] }
 0x2a4   :  { %v13451_v24 = vpop.f32.mrf.mxu1  ;;  %10143 = vmatmul.mubr.msk.f32.gmra.mxu1 %vm2149_vm2, %v2088_v1  ;;  %4906 = vmatprep.mubr.f32.mxu0 %v15906_v50  ;;  %v13472_v7 = vpop.permute.xlu1 %6396 }
 0x2a5   :  { %10145 = vmatprep.mubr.msk.f32.mxu1 %vm2149_vm2, %v2089_v41 }
 0x2a6   :  { %v13460_v9 = vpop.f32.mrf.mxu1 }
 0x2a7   :  { %8906 = vmatmul.mubr.msk.f32.gmra.mxu0 %vm2149_vm2, %v3848_v42  ;;  %v2093_v42 = vmax.f32 %v1751_v47, 0.0  ;;  %v1766_v47 = vadd.f32 %v13359_v38, %v15963_v39 }
 0x2a8   :  { %v13465_v1 = vpop.f32.mrf.mxu1  ;;  %10146 = vmatmul.mubr.msk.f32.gmra.mxu1 %vm2149_vm2, %v2090_v36  ;;  %4912 = vmatprep.mubr.f32.mxu0 %v15906_v50  ;;  %v1761_v36 = vadd.f32 %v13359_v38, %v12469_v55 }
 0x2a9   :  { %10148 = vmatprep.mubr.msk.f32.mxu1 %vm2149_vm2, %v2091_v14  ;;  %v2096_v26 = vmax.f32 %v1766_v47, 0.0 }
 0x2aa   :  { %v13476_v41 = vpop.f32.mrf.mxu1  ;;  %v2095_v55 = vmax.f32 %v1761_v36, 0.0 }
 0x2ab   :  { %8907 = vmatmul.mubr.msk.f32.gmra.mxu0 %vm2149_vm2, %v3849_v45  ;;  %v15964_v45 = vld [vmem:[#allocation38_spill] sm:$0xff] }
 0x2ac   :  { %v13481_v22 = vpop.f32.mrf.mxu1  ;;  %10149 = vmatmul.mubr.msk.f32.gmra.mxu1 %vm2149_vm2, %v2092_v61  ;;  %4918 = vmatprep.mubr.f32.mxu0 %v15906_v50  ;;  %v1771_v34 = vadd.f32 %v13359_v38, %v15964_v45  ;;  %v13495_v61 = vpop.permute.xlu1 %6692  ;;  %v15967_v45 = vld [vmem:[#allocation97_spill] sm:$0xff] }
 0x2ad   :  { %10151 = vmatprep.mubr.msk.f32.mxu1 %vm2149_vm2, %v2093_v42  ;;  %15965 = vst [vmem:[#allocation30_spill] sm:$0xff] %v13495_v61  ;;  %v15966_v42 = vld [vmem:[#allocation39_spill] sm:$0xff]  ;;  %v1781_v61 = vadd.f32 %v13359_v38, %v15967_v45 }
 0x2ae   :  { %v13490_v14 = vpop.f32.mrf.mxu1  ;;  %v1776_v36 = vadd.f32 %v13359_v38, %v15966_v42 }
 0x2af   :  { %8908 = vmatmul.mubr.msk.f32.gmra.mxu0 %vm2149_vm2, %v3850_v56  ;;  %v2097_v56 = vmax.f32 %v1771_v34, 0.0 }
 0x2b0   :  { %v13497_v60 = vpop.f32.mrf.mxu1  ;;  %10152 = vmatmul.mubr.msk.f32.gmra.mxu1 %vm2149_vm2, %v2094_v11  ;;  %4924 = vmatprep.mubr.f32.mxu0 %v15906_v50  ;;  %v13518_v47 = vpop.permute.xlu1 %7084  ;;  %v2098_v34 = vmax.f32 %v1776_v36, 0.0  ;;  %v1796_v36 = vadd.f32 %v13359_v38, %v15971_v2 }
 0x2b1   :  { %10154 = vmatprep.mubr.msk.f32.mxu1 %vm2149_vm2, %v2095_v55  ;;  %15968 = vst [vmem:[#allocation87_spill] sm:$0xff] %v13518_v47  ;;  %v15969_v55 = vld [vmem:[#allocation96_spill] sm:$0xff] }
 0x2b2   :  { %v13506_v39 = vpop.f32.mrf.mxu1  ;;  %v1786_v42 = vadd.f32 %v13359_v38, %v15969_v55 }
 0x2b3   :  { %8909 = vmatmul.mubr.msk.f32.gmra.mxu0 %vm2149_vm2, %v3851_v62  ;;  %v2099_v62 = vmax.f32 %v1781_v61, 0.0  ;;  %v3000_v61 = vadd.f32 %v13534_v59, %v13206_v16  ;;  %v3005_v16 = vadd.f32 %v13534_v59, %v13197_v21 }
 0x2b4   :  { %v13511_v11 = vpop.f32.mrf.mxu1  ;;  %10155 = vmatmul.mubr.msk.f32.gmra.mxu1 %vm2149_vm2, %v2096_v26  ;;  %4930 = vmatprep.mubr.f32.mxu0 %v15906_v50  ;;  %v1791_v26 = vadd.f32 %v13359_v38, %v15970_v4  ;;  %v2100_v4 = vmax.f32 %v1786_v42, 0.0  ;;  %v13544_v10 = vpop.permute.xlu1 %6792 }
 0x2b5   :  { %10157 = vmatprep.mubr.msk.f32.mxu1 %vm2149_vm2, %v2097_v56  ;;  %15973 = vst [vmem:[#allocation89_spill] sm:$0xff] %v13544_v10  ;;  %v3854_v42 = vmax.f32 %v3000_v61, 0.0  ;;  %v13558_v10 = vpop.permute.xlu0 %6972  ;;  %v3855_v21 = vmax.f32 %v3005_v16, 0.0  ;;  %v3010_v61 = vadd.f32 %v13534_v59, %v13230_v6  ;;  %v3015_v6 = vadd.f32 %v13534_v59, %v13221_v35 }
 0x2b6   :  { %v13522_v45 = vpop.f32.mrf.mxu1  ;;  %v2101_v56 = vmax.f32 %v1791_v26, 0.0  ;;  %v15974_v26 = vld [vmem:[#allocation100_spill] sm:$0xff]  ;;  %15976 = vst [vmem:[#allocation34_spill] sm:$0xff] %v13558_v10 }
 0x2b7   :  { %8910 = vmatmul.mubr.msk.f32.gmra.mxu0 %vm2149_vm2, %v3852_v57  ;;  %v15972_v57 = vld [vmem:[#allocation42_spill] sm:$0xff]  ;;  %v1806_v2 = vadd.f32 %v13359_v38, %v15974_v26  ;;  %v3856_v16 = vmax.f32 %v3010_v61, 0.0  ;;  %v3857_v35 = vmax.f32 %v3015_v6, 0.0  ;;  %v3020_v61 = vadd.f32 %v13534_v59, %v13254_v27 }
 0x2b8   :  { %v13527_v63 = vpop.f32.mrf.mxu1  ;;  %10158 = vmatmul.mubr.msk.f32.gmra.mxu1 %vm2149_vm2, %v2098_v34  ;;  %4936 = vmatprep.mubr.f32.mxu0 %v15906_v50  ;;  %v1801_v34 = vadd.f32 %v13359_v38, %v15972_v57  ;;  %v3025_v27 = vadd.f32 %v13534_v59, %v13243_v37 }
 0x2b9   :  { %10160 = vmatprep.mubr.msk.f32.mxu1 %vm2149_vm2, %v2099_v62  ;;  %v2102_v62 = vmax.f32 %v1796_v36, 0.0  ;;  %v13567_v36 = vpop.permute.xlu1 %6400  ;;  %v3858_v6 = vmax.f32 %v3020_v61, 0.0  ;;  %v3030_v61 = vadd.f32 %v13534_v59, %v13276_v5  ;;  %v3035_v5 = vadd.f32 %v13534_v59, %v13267_v46 }
 0x2ba   :  { %v13546_v55 = vpop.f32.mrf.mxu1  ;;  %v2103_v57 = vmax.f32 %v1801_v34, 0.0  ;;  %v15977_v34 = vld [vmem:[#allocation102_spill] sm:$0xff]  ;;  %v3859_v37 = vmax.f32 %v3025_v27, 0.0 }
 0x2bb   :  { %8911 = vmatmul.mubr.msk.f32.gmra.mxu0 %vm2149_vm2, %v3853_v54  ;;  %v15975_v54 = vld [vmem:[#allocation44_spill] sm:$0xff]  ;;  %v3861_v46 = vmax.f32 %v3035_v5, 0.0 }
 0x2bc   :  { %10161 = vmatmul.mubr.msk.f32.gmra.mxu1 %vm2149_vm2, %v2100_v4  ;;  %4942 = vmatprep.mubr.f32.mxu0 %v15906_v50  ;;  %v1811_v47 = vadd.f32 %v13359_v38, %v15975_v54  ;;  %v13560_v4 = vpop.f32.mrf.mxu1  ;;  %v15978_v54 = vld [vmem:[#allocation46_spill] sm:$0xff] }
 0x2bd   :  { %10163 = vmatprep.mubr.msk.f32.mxu1 %vm2149_vm2, %v2101_v56  ;;  %v2104_v56 = vmax.f32 %v1806_v2, 0.0  ;;  %v1821_v10 = vadd.f32 %v13359_v38, %v15978_v54  ;;  %v13581_v2 = vpop.permute.xlu0 %6484 }
 0x2be   :  { %v2105_v26 = vmax.f32 %v1811_v47, 0.0  ;;  %15979 = vst [vmem:[#allocation35_spill] sm:$0xff] %v13581_v2 }
 0x2bf   :  { %8912 = vmatmul.mubr.msk.f32.gmra.mxu0 %vm2149_vm2, %v3854_v42  ;;  %v1816_v42 = vadd.f32 %v13359_v38, %v15977_v34  ;;  %v2107_v54 = vmax.f32 %v1821_v10, 0.0 }
 0x2c0   :  { %10164 = vmatmul.mubr.msk.f32.gmra.mxu1 %vm2149_vm2, %v2102_v62  ;;  %4948 = vmatprep.mubr.f32.mxu0 %v15906_v50  ;;  %v13574_v62 = vpop.f32.mrf.mxu1 }
 0x2c1   :  { %10166 = vmatprep.mubr.msk.f32.mxu1 %vm2149_vm2, %v2103_v57  ;;  %v2106_v47 = vmax.f32 %v1816_v42, 0.0  ;;  %v15980_v57 = vld [vmem:[#allocation104_spill] sm:$0xff]  ;;  %v15983_v42 = vld [vmem:[#allocation105_spill] sm:$0xff] }
 0x2c2   :  { %v1826_v34 = vadd.f32 %v13359_v38, %v15980_v57  ;;  %v13590_v40 = vpop.f32.mrf.mxu1 }
 0x2c3   :  { %8913 = vmatmul.mubr.msk.f32.gmra.mxu0 %vm2149_vm2, %v3855_v21  ;;  %v15981_v21 = vld [vmem:[#allocation48_spill] sm:$0xff] }
 0x2c4   :  { %10167 = vmatmul.mubr.msk.f32.gmra.mxu1 %vm2149_vm2, %v2104_v56  ;;  %4954 = vmatprep.mubr.f32.mxu0 %v15906_v50  ;;  %v1831_v44 = vadd.f32 %v13359_v38, %v15981_v21  ;;  %v13588_v56 = vpop.permute.xlu1 %6696  ;;  %v2108_v10 = vmax.f32 %v1826_v34, 0.0 }
 0x2c5   :  { %10169 = vmatprep.mubr.msk.f32.mxu1 %vm2149_vm2, %v2105_v26  ;;  %15982 = vst [vmem:[#allocation93_spill] sm:$0xff] %v13588_v56  ;;  %v1836_v26 = vadd.f32 %v13359_v38, %v15983_v42  ;;  %v13602_v56 = vpop.permute.xlu0 %6876 }
 0x2c6   :  { %v2109_v57 = vmax.f32 %v1831_v44, 0.0  ;;  %15985 = vst [vmem:[#allocation38_spill] sm:$0xff] %v13602_v56 }
 0x2c7   :  { %8914 = vmatmul.mubr.msk.f32.gmra.mxu0 %vm2149_vm2, %v3856_v16  ;;  %v15984_v16 = vld [vmem:[#allocation50_spill] sm:$0xff]  ;;  %v2110_v34 = vmax.f32 %v1836_v26, 0.0 }
 0x2c8   :  { %10170 = vmatmul.mubr.msk.f32.gmra.mxu1 %vm2149_vm2, %v2106_v47  ;;  %4960 = vmatprep.mubr.f32.mxu0 %v15906_v50  ;;  %v1841_v21 = vadd.f32 %v13359_v38, %v15984_v16  ;;  %v13604_v47 = vpop.f32.mrf.mxu1  ;;  %v13611_v44 = vpop.permute.xlu1 %7088  ;;  %v15988_v16 = vld [vmem:[#allocation52_spill] sm:$0xff] }
 0x2c9   :  { %10172 = vmatprep.mubr.msk.f32.mxu1 %vm2149_vm2, %v2107_v54  ;;  %15986 = vst [vmem:[#allocation39_spill] sm:$0xff] %v13611_v44  ;;  %v15987_v54 = vld [vmem:[#allocation107_spill] sm:$0xff]  ;;  %v1851_v56 = vadd.f32 %v13359_v38, %v15988_v16  ;;  %v13625_v26 = vpop.permute.xlu0 %6584 }
 0x2ca   :  { %v2111_v42 = vmax.f32 %v1841_v21, 0.0  ;;  %15989 = vst [vmem:[#allocation97_spill] sm:$0xff] %v13625_v26  ;;  %v15990_v21 = vld [vmem:[#allocation109_spill] sm:$0xff] }
 0x2cb   :  { %8915 = vmatmul.mubr.msk.f32.gmra.mxu0 %vm2149_vm2, %v3857_v35  ;;  %v1846_v35 = vadd.f32 %v13359_v38, %v15987_v54  ;;  %v1856_v54 = vadd.f32 %v13359_v38, %v15990_v21  ;;  %v2113_v16 = vmax.f32 %v1851_v56, 0.0 }
 0x2cc   :  { %10173 = vmatmul.mubr.msk.f32.gmra.mxu1 %vm2149_vm2, %v2108_v10  ;;  %4966 = vmatprep.mubr.f32.mxu0 %v15906_v50  ;;  %v13618_v10 = vpop.f32.mrf.mxu1 }
 0x2cd   :  { %10175 = vmatprep.mubr.msk.f32.mxu1 %vm2149_vm2, %v2109_v57  ;;  %v2112_v57 = vmax.f32 %v1846_v35, 0.0  ;;  %v3860_v35 = vmax.f32 %v3030_v61, 0.0  ;;  %v2114_v56 = vmax.f32 %v1856_v54, 0.0  ;;  %v13646_v26 = vpop.permute.xlu0 %6976  ;;  %v3040_v61 = vadd.f32 %v13534_v59, %v13297_v32 }
 0x2ce   :  { %v13634_v27 = vpop.f32.mrf.mxu1  ;;  %15995 = vst [vmem:[#allocation40_spill] sm:$0xff] %v13646_v26  ;;  %v3045_v32 = vadd.f32 %v13534_v59, %v13288_v0  ;;  %v4046_v0 = vlaneseq }
 0x2cf   :  { %8916 = vmatmul.mubr.msk.f32.gmra.mxu0 %vm2149_vm2, %v3858_v6  ;;  %v15991_v6 = vld [vmem:[#allocation54_spill] sm:$0xff]  ;;  %v3862_v5 = vmax.f32 %v3040_v61, 0.0 }
 0x2d0   :  { %10176 = vmatmul.mubr.msk.f32.gmra.mxu1 %vm2149_vm2, %v2110_v34  ;;  %4972 = vmatprep.mubr.f32.mxu0 %v15906_v50  ;;  %v1861_v44 = vadd.f32 %v13359_v38, %v15991_v6  ;;  %v13632_v34 = vpop.permute.xlu1 %6796  ;;  %v3863_v61 = vmax.f32 %v3045_v32, 0.0  ;;  %v3055_v32 = vadd.f32 %v13534_v59, %v13307_v31 }
 0x2d1   :  { %10178 = vmatprep.mubr.msk.f32.mxu1 %vm2149_vm2, %v2111_v42  ;;  %15992 = vst [vmem:[#allocation96_spill] sm:$0xff] %v13632_v34  ;;  %v15993_v42 = vld [vmem:[#allocation110_spill] sm:$0xff] }
 0x2d2   :  { %v1866_v21 = vadd.f32 %v13359_v38, %v15993_v42  ;;  %v2115_v6 = vmax.f32 %v1861_v44, 0.0 }
 0x2d3   :  { %8917 = vmatmul.mubr.msk.f32.gmra.mxu0 %vm2149_vm2, %v3859_v37  ;;  %v15994_v37 = vld [vmem:[#allocation56_spill] sm:$0xff] }
 0x2d4   :  { %10179 = vmatmul.mubr.msk.f32.gmra.mxu1 %vm2149_vm2, %v2112_v57  ;;  %4978 = vmatprep.mubr.f32.mxu0 %v15906_v50  ;;  %v1871_v34 = vadd.f32 %v13359_v38, %v15994_v37  ;;  %v13648_v57 = vpop.f32.mrf.mxu1  ;;  %v13655_v44 = vpop.permute.xlu1 %6404  ;;  %v2116_v54 = vmax.f32 %v1866_v21, 0.0  ;;  %v15997_v37 = vld [vmem:[#allocation58_spill] sm:$0xff] }
 0x2d5   :  { %10181 = vmatprep.mubr.msk.f32.mxu1 %vm2149_vm2, %v2113_v16  ;;  %v15996_v16 = vld [vmem:[#allocation112_spill] sm:$0xff]  ;;  %v1881_v26 = vadd.f32 %v13359_v38, %v15997_v37  ;;  %v13669_v21 = vpop.permute.xlu0 %6488 }
 0x2d6   :  { %v2117_v42 = vmax.f32 %v1871_v34, 0.0  ;;  %15998 = vst [vmem:[#allocation99_spill] sm:$0xff] %v13669_v21 }
 0x2d7   :  { %8918 = vmatmul.mubr.msk.f32.gmra.mxu0 %vm2149_vm2, %v3860_v35  ;;  %v1876_v35 = vadd.f32 %v13359_v38, %v15996_v16  ;;  %v2119_v37 = vmax.f32 %v1881_v26, 0.0 }
 0x2d8   :  { %10182 = vmatmul.mubr.msk.f32.gmra.mxu1 %vm2149_vm2, %v2114_v56  ;;  %4984 = vmatprep.mubr.f32.mxu0 %v15906_v50  ;;  %v13662_v56 = vpop.f32.mrf.mxu1 }
 0x2d9   :  { %10184 = vmatprep.mubr.msk.f32.mxu1 %vm2149_vm2, %v2115_v6  ;;  %v2118_v34 = vmax.f32 %v1876_v35, 0.0  ;;  %v15999_v6 = vld [vmem:[#allocation114_spill] sm:$0xff]  ;;  %v3050_v35 = vadd.f32 %v13534_v59, %v13318_v52  ;;  %v4047_v52 = vshrl.u32 %v4046_v0, 7  ;;  %v3865_v0 = vmax.f32 %v3055_v32, 0.0 }
 0x2da   :  { %v1886_v16 = vadd.f32 %v13359_v38, %v15999_v6  ;;  %v13678_v25 = vpop.f32.mrf.mxu1 }
 0x2db   :  { %8919 = vmatmul.mubr.msk.f32.gmra.mxu0 %vm2149_vm2, %v3861_v46  ;;  %v16000_v46 = vld [vmem:[#allocation60_spill] sm:$0xff]  ;;  %16002 = vst [vmem:[#allocation100_spill] sm:$0xff] %v13678_v25  ;;  %v4048_v31 = vsub.s32 0, %v4047_v52 }
 0x2dc   :  { %10185 = vmatmul.mubr.msk.f32.gmra.mxu1 %vm2149_vm2, %v2116_v54  ;;  %4990 = vmatprep.mubr.f32.mxu0 %v15906_v50  ;;  %v1891_v2 = vadd.f32 %v13359_v38, %v16000_v46  ;;  %v13676_v54 = vpop.permute.xlu1 %6700  ;;  %v2120_v26 = vmax.f32 %v1886_v16, 0.0  ;;  %v16004_v46 = vld [vmem:[#allocation61_spill] sm:$0xff]  ;;  %v13692_v21 = vpop.f32.mrf.mxu1  ;;  %v3864_v16 = vmax.f32 %v3050_v35, 0.0  ;;  %v3060_v35 = vadd.f32 %v13534_v59, %v13337_v51 }
 0x2dd   :  { %10187 = vmatprep.mubr.msk.f32.mxu1 %vm2149_vm2, %v2117_v42  ;;  %16001 = vst [vmem:[#allocation42_spill] sm:$0xff] %v13676_v54  ;;  %v16003_v42 = vld [vmem:[#allocation116_spill] sm:$0xff]  ;;  %v1901_v54 = vadd.f32 %v13359_v38, %v16004_v46  ;;  %16006 = vst [vmem:[#allocation102_spill] sm:$0xff] %v13692_v21 }
 0x2de   :  { %v1896_v6 = vadd.f32 %v13359_v38, %v16003_v42  ;;  %v16008_v42 = vld [vmem:[#allocation119_spill] sm:$0xff] }
 0x2df   :  { %8920 = vmatmul.mubr.msk.f32.gmra.mxu0 %vm2149_vm2, %v3862_v5  ;;  %v2121_v5 = vmax.f32 %v1891_v2, 0.0  ;;  %v2123_v46 = vmax.f32 %v1901_v54, 0.0  ;;  %v4044_v54 = vld [vmem:[%s15508_s6] sm:$0x3] }
 0x2e0   :  { %10188 = vmatmul.mubr.msk.f32.gmra.mxu1 %vm2149_vm2, %v2118_v34  ;;  %4996 = vmatprep.mubr.f32.mxu0 %v15906_v50  ;;  %v13690_v34 = vpop.permute.xlu0 %6880  ;;  %v13699_v2 = vpop.permute.xlu1 %7092 }
 0x2e1   :  { %10190 = vmatprep.mubr.msk.f32.mxu1 %vm2149_vm2, %v2119_v37  ;;  %16005 = vst [vmem:[#allocation44_spill] sm:$0xff] %v13690_v34  ;;  %16007 = vst [vmem:[#allocation46_spill] sm:$0xff] %v13699_v2  ;;  %v2122_v37 = vmax.f32 %v1896_v6, 0.0  ;;  %v16009_v34 = vld [vmem:[#allocation62_spill] sm:$0xff]  ;;  %v16013_v2 = vld [vmem:[#allocation64_spill] sm:$0xff] }
 0x2e2   :  { %v1911_v3 = vadd.f32 %v13359_v38, %v16009_v34  ;;  %v16012_v34 = vld [vmem:[#allocation121_spill] sm:$0xff]  ;;  %v1921_v32 = vadd.f32 %v13359_v38, %v16013_v2  ;;  %v16016_v2 = vld [vmem:[#allocation122_spill] sm:$0xff] }
 0x2e3   :  { %8921 = vmatmul.mubr.msk.f32.gmra.mxu0 %vm2149_vm2, %v3863_v61  ;;  %v1906_v61 = vadd.f32 %v13359_v38, %v16008_v42 }
 0x2e4   :  { %10191 = vmatmul.mubr.msk.f32.gmra.mxu1 %vm2149_vm2, %v2120_v26  ;;  %5002 = vmatprep.mubr.f32.mxu0 %v15906_v50  ;;  %v13706_v26 = vpop.f32.mrf.mxu1  ;;  %v13716_v6 = vpop.permute.xlu0 %6588  ;;  %v2125_v42 = vmax.f32 %v1911_v3, 0.0 }
 0x2e5   :  { %10193 = vmatprep.mubr.msk.f32.mxu1 %vm2149_vm2, %v2121_v5  ;;  %16010 = vst [vmem:[#allocation104_spill] sm:$0xff] %v13706_v26  ;;  %16011 = vst [vmem:[#allocation48_spill] sm:$0xff] %v13716_v6  ;;  %v2124_v5 = vmax.f32 %v1906_v61, 0.0  ;;  %v13723_v51 = vpop.permute.xlu1 %6800  ;;  %v13729_v6 = vrot.slane %v4044_v54, %v4048_v31  ;;  %v3065_v61 = vadd.f32 %v13534_v59, %v13328_v49 }
 0x2e6   :  { %16014 = vst [vmem:[#allocation105_spill] sm:$0xff] %v13723_v51  ;;  %v2127_v51 = vmax.f32 %v1921_v32, 0.0 }
 0x2e7   :  { %8922 = vmatmul.mubr.msk.f32.gmra.mxu0 %vm2149_vm2, %v3864_v16  ;;  %v1916_v16 = vadd.f32 %v13359_v38, %v16012_v34  ;;  %v3867_v49 = vmax.f32 %v3065_v61, 0.0 }
 0x2e8   :  { %10194 = vmatmul.mubr.msk.f32.gmra.mxu1 %vm2149_vm2, %v2122_v37  ;;  %5008 = vmatprep.mubr.f32.mxu0 %v15906_v50  ;;  %v4052_v37 = vsub.s32 1, %v4047_v52  ;;  %v3866_v52 = vmax.f32 %v3060_v35, 0.0 }
 0x2e9   :  { %10196 = vmatprep.mubr.msk.f32.mxu1 %vm2149_vm2, %v2123_v46  ;;  %v13725_v46 = vpop.f32.mrf.mxu1  ;;  %v2126_v3 = vmax.f32 %v1916_v16, 0.0 }
 0x2ea   :  { %16015 = vst [vmem:[#allocation50_spill] sm:$0xff] %v13725_v46  ;;  %v13736_v34 = vrot.slane %v4044_v54, %v4052_v37  ;;  %v13749_v54 = vpop.permute.xlu1 %6408 }
 0x2eb   :  { %8923 = vmatmul.mubr.msk.f32.gmra.mxu0 %vm2149_vm2, %v3865_v0  ;;  %v1926_v0 = vadd.f32 %v13359_v38, %v16016_v2  ;;  %v13741_v31 = vpop.f32.mrf.mxu1  ;;  %v3070_v38 = vadd.f32 %v13534_v59, %v13363_v48  ;;  %v3075_v48 = vadd.f32 %v13534_v59, %v13349_v8 }
 0x2ec   :  { %10197 = vmatmul.mubr.msk.f32.gmra.mxu1 %vm2149_vm2, %v2124_v5  ;;  %5014 = vmatprep.mubr.f32.mxu0 %v15906_v50  ;;  %v13739_v5 = vpop.permute.xlu0 %6980  ;;  %16018 = vst [vmem:[#allocation52_spill] sm:$0xff] %v13741_v31 }
 0x2ed   :  { %10199 = vmatprep.mubr.msk.f32.mxu1 %vm2149_vm2, %v2125_v42  ;;  %16017 = vst [vmem:[#allocation107_spill] sm:$0xff] %v13739_v5  ;;  %v2128_v16 = vmax.f32 %v1926_v0, 0.0  ;;  %v16023_v5 = vld [vmem:[#allocation84_spill] sm:$0xff] }
 0x2ef   :  { %v4728_v26 = vpop.f32.mrf.mxu0  ;;  %8924 = vmatmul.mubr.msk.f32.gmra.mxu0 %vm2149_vm2, %v3866_v52 }
 0x2f0   :  { %v4729_v46 = vadd.f32 %v4728_v26, %v13729_v6  ;;  %10200 = vmatmul.mubr.msk.f32.gmra.mxu1 %vm2149_vm2, %v2126_v3  ;;  %5020 = vmatprep.mubr.f32.mxu0 %v15906_v50  ;;  %v13753_v26 = vpop.f32.mrf.mxu1  ;;  %v13760_v2 = vpop.permute.xlu0 %6492 }
 0x2f1   :  { %10202 = vmatprep.mubr.msk.f32.mxu1 %vm2149_vm2, %v2127_v51  ;;  %v4730_v35 = vpop.f32.mrf.mxu0  ;;  %16019 = vst [vmem:[#allocation109_spill] sm:$0xff] %v13753_v26  ;;  %v3868_v51 = vmax.f32 %v3070_v38, 0.0  ;;  %16020 = vst [vmem:[#allocation54_spill] sm:$0xff] %v13760_v2  ;;  %v3869_v38 = vmax.f32 %v3075_v48, 0.0 }
 0x2f2   :  { %v4731_v37 = vadd.f32 %v4730_v35, %v13736_v34  ;;  %v5927_v32 = vmax.f32 %v4729_v46, 0.0  ;;  %v13764_v46 = vpop.permute.xlu1 %6704 }
 0x2f3   :  { %v4734_v42 = vpop.f32.mrf.mxu0  ;;  %8925 = vmatmul.mubr.msk.f32.gmra.mxu0 %vm2149_vm2, %v3867_v49  ;;  %16021 = vst [vmem:[#allocation110_spill] sm:$0xff] %v13764_v46 }
 0x2f4   :  { %v4735_v52 = vadd.f32 %v4734_v42, %v13729_v6  ;;  %10203 = vmatmul.mubr.msk.f32.gmra.mxu1 %vm2149_vm2, %v2128_v16  ;;  %5026 = vmatprep.mubr.f32.mxu0 %v15906_v50  ;;  %v5928_v61 = vmax.f32 %v4731_v37, 0.0  ;;  %v16022_v42 = vld [vmem:[#allocation82_spill] sm:$0xff]  ;;  %v3080_v37 = vadd.f32 %v13534_v59, %v13384_v18 }
 0x2f5   :  { %v4736_v3 = vpop.f32.mrf.mxu0  ;;  %v7127_v16 = vmul.f32 %v16022_v42, %v5927_v32 }
 0x2f6   :  { %v5929_v0 = vmax.f32 %v4735_v52, 0.0  ;;  %v4737_v49 = vadd.f32 %v4736_v3, %v13736_v34  ;;  %v7128_v52 = vmul.f32 %v16022_v42, %v5928_v61  ;;  %v13783_v61 = vpop.permute.xlu1 %7096 }
 0x2f7   :  { %v4740_v35 = vpop.f32.mrf.mxu0  ;;  %8926 = vmatmul.mubr.msk.f32.gmra.mxu0 %vm2149_vm2, %v3868_v51  ;;  %16025 = vst [vmem:[#allocation56_spill] sm:$0xff] %v13783_v61 }
 0x2f8   :  { %v7129_v31 = vmul.f32 %v16023_v5, %v5929_v0  ;;  %v5930_v26 = vmax.f32 %v4737_v49, 0.0  ;;  %v4741_v8 = vadd.f32 %v4740_v35, %v13729_v6  ;;  %5032 = vmatprep.mubr.f32.mxu0 %v15906_v50  ;;  %v13776_v0 = vpop.permute.xlu0 %6884  ;;  %v16024_v35 = vld [vmem:[#allocation31_spill] sm:$0xff] }
 0x2f9   :  { %v4742_v3 = vpop.f32.mrf.mxu0 }
 0x2fa   :  { %v7527_v2 = vadd.f32 %v7129_v31, %v7127_v16  ;;  %v7130_v51 = vmul.f32 %v16023_v5, %v5930_v26  ;;  %v5931_v46 = vmax.f32 %v4741_v8, 0.0  ;;  %v4743_v32 = vadd.f32 %v4742_v3, %v13736_v34 }
 0x2fb   :  { %v4746_v25 = vpop.f32.mrf.mxu0  ;;  %8927 = vmatmul.mubr.msk.f32.gmra.mxu0 %vm2149_vm2, %v3869_v38  ;;  %v3085_v31 = vadd.f32 %v13534_v59, %v13373_v29  ;;  %v3870_v5 = vmax.f32 %v3080_v37, 0.0 }
 0x2fc   :  { %v7557_v49 = vadd.f32 %v7130_v51, %v7128_v52  ;;  %v7131_v48 = vmul.f32 %v16024_v35, %v5931_v46  ;;  %v5932_v21 = vmax.f32 %v4743_v32, 0.0  ;;  %v4747_v18 = vadd.f32 %v4746_v25, %v13729_v6  ;;  %5038 = vmatprep.mubr.f32.mxu0 %v15906_v50  ;;  %v16026_v25 = vld [vmem:[#allocation75_spill] sm:$0xff] }
 0x2fd   :  { %v4748_v26 = vpop.f32.mrf.mxu0  ;;  %v3871_v29 = vmax.f32 %v3085_v31, 0.0 }
 0x2fe   :  { %v7528_v42 = vadd.f32 %v7527_v2, %v7131_v48  ;;  %v7132_v16 = vmul.f32 %v16024_v35, %v5932_v21  ;;  %v5933_v8 = vmax.f32 %v4747_v18, 0.0  ;;  %v4749_v38 = vadd.f32 %v4748_v26, %v13736_v34  ;;  %v13793_v21 = vpop.permute.xlu0 %6592  ;;  %v13798_v26 = vpop.permute.xlu1 %6804 }
 0x2ff   :  { %v4752_v52 = vpop.f32.mrf.mxu0  ;;  %8928 = vmatmul.mubr.msk.f32.gmra.mxu0 %vm2149_vm2, %v3870_v5  ;;  %v3090_v2 = vadd.f32 %v13534_v59, %v13398_v33 }
 0x300   :  { %v7558_v46 = vadd.f32 %v7557_v49, %v7132_v16  ;;  %v7133_v3 = vmul.f32 %v16026_v25, %v5933_v8  ;;  %v5934_v51 = vmax.f32 %v4749_v38, 0.0  ;;  %v4753_v32 = vadd.f32 %v4752_v52, %v13729_v6  ;;  %5044 = vmatprep.mubr.f32.mxu0 %v15906_v50  ;;  %v16027_v8 = vld [vmem:[#allocation43_spill] sm:$0xff] }
 0x301   :  { %v4754_v37 = vpop.f32.mrf.mxu0  ;;  %v3872_v52 = vmax.f32 %v3090_v2, 0.0  ;;  %v3100_v2 = vadd.f32 %v13534_v59, %v13414_v53  ;;  %v3105_v53 = vadd.f32 %v13534_v59, %v13405_v30 }
 0x302   :  { %v7529_v35 = vadd.f32 %v7528_v42, %v7133_v3  ;;  %v7134_v48 = vmul.f32 %v16026_v25, %v5934_v51  ;;  %v5935_v18 = vmax.f32 %v4753_v32, 0.0  ;;  %v4755_v49 = vadd.f32 %v4754_v37, %v13736_v34 }
 0x303   :  { %v4758_v5 = vpop.f32.mrf.mxu0  ;;  %8929 = vmatmul.mubr.msk.f32.gmra.mxu0 %vm2149_vm2, %v3871_v29  ;;  %v3095_v42 = vadd.f32 %v13534_v59, %v13389_v15 }
 0x304   :  { %v7559_v16 = vadd.f32 %v7558_v46, %v7134_v48  ;;  %v7135_v31 = vmul.f32 %v16027_v8, %v5935_v18  ;;  %v5936_v38 = vmax.f32 %v4755_v49, 0.0  ;;  %v4759_v33 = vadd.f32 %v4758_v5, %v13729_v6  ;;  %5050 = vmatprep.mubr.f32.mxu0 %v15906_v50  ;;  %v13808_v46 = vpop.permute.xlu0 %6984  ;;  %v16029_v18 = vld [vmem:[#allocation12_spill] sm:$0xff] }
 0x305   :  { %v4760_v25 = vpop.f32.mrf.mxu0  ;;  %16028 = vst [vmem:[#allocation112_spill] sm:$0xff] %v13808_v46  ;;  %v3873_v15 = vmax.f32 %v3095_v42, 0.0 }
 0x306   :  { %v7530_v3 = vadd.f32 %v7529_v35, %v7135_v31  ;;  %v7136_v51 = vmul.f32 %v16027_v8, %v5936_v38  ;;  %v5937_v32 = vmax.f32 %v4759_v33, 0.0  ;;  %v4761_v29 = vadd.f32 %v4760_v25, %v13736_v34  ;;  %v13815_v8 = vpop.permute.xlu1 %6412 }
 0x307   :  { %v4764_v37 = vpop.f32.mrf.mxu0  ;;  %8930 = vmatmul.mubr.msk.f32.gmra.mxu0 %vm2149_vm2, %v3872_v52 }
 0x308   :  { %v7560_v48 = vadd.f32 %v7559_v16, %v7136_v51  ;;  %v7137_v49 = vmul.f32 %v16029_v18, %v5937_v32  ;;  %v5938_v5 = vmax.f32 %v4761_v29, 0.0  ;;  %v4765_v61 = vadd.f32 %v4764_v37, %v13729_v6  ;;  %5056 = vmatprep.mubr.f32.mxu0 %v15906_v50  ;;  %v16030_v51 = vld [vmem:[#allocation23_spill] sm:$0xff] }
 0x309   :  { %v4766_v35 = vpop.f32.mrf.mxu0 }
 0x30a   :  { %v7531_v31 = vadd.f32 %v7530_v3, %v7137_v49  ;;  %v7138_v38 = vmul.f32 %v16029_v18, %v5938_v5  ;;  %v5939_v33 = vmax.f32 %v4765_v61, 0.0  ;;  %v4767_v16 = vadd.f32 %v4766_v35, %v13736_v34  ;;  %v13825_v18 = vpop.permute.xlu0 %6496  ;;  %v13830_v35 = vpop.permute.xlu1 %6708 }
 0x30b   :  { %v4770_v52 = vpop.f32.mrf.mxu0  ;;  %8931 = vmatmul.mubr.msk.f32.gmra.mxu0 %vm2149_vm2, %v3873_v15  ;;  %v3874_v3 = vmax.f32 %v3100_v2, 0.0  ;;  %v3875_v2 = vmax.f32 %v3105_v53, 0.0 }
 0x30c   :  { %v7561_v25 = vadd.f32 %v7560_v48, %v7138_v38  ;;  %v7139_v32 = vmul.f32 %v16030_v51, %v5939_v33  ;;  %v5940_v29 = vmax.f32 %v4767_v16, 0.0  ;;  %v4771_v42 = vadd.f32 %v4770_v52, %v13729_v6  ;;  %5062 = vmatprep.mubr.f32.mxu0 %v15906_v50  ;;  %v16031_v33 = vld [vmem:[#allocation80_spill] sm:$0xff] }
 0x30d   :  { %v4772_v37 = vpop.f32.mrf.mxu0 }
 0x30e   :  { %v7532_v61 = vadd.f32 %v7531_v31, %v7139_v32  ;;  %v7140_v49 = vmul.f32 %v16030_v51, %v5940_v29  ;;  %v5941_v5 = vmax.f32 %v4771_v42, 0.0  ;;  %v4773_v48 = vadd.f32 %v4772_v37, %v13736_v34 }
 0x30f   :  { %v4776_v15 = vpop.f32.mrf.mxu0  ;;  %8932 = vmatmul.mubr.msk.f32.gmra.mxu0 %vm2149_vm2, %v3874_v3  ;;  %v3110_v31 = vadd.f32 %v13534_v59, %v13430_v43  ;;  %v3115_v43 = vadd.f32 %v13534_v59, %v13419_v23 }
 0x310   :  { %v7562_v38 = vadd.f32 %v7561_v25, %v7140_v49  ;;  %v7141_v16 = vmul.f32 %v16031_v33, %v5941_v5  ;;  %v5942_v52 = vmax.f32 %v4773_v48, 0.0  ;;  %v4777_v30 = vadd.f32 %v4776_v15, %v13729_v6  ;;  %5068 = vmatprep.mubr.f32.mxu0 %v15906_v50  ;;  %v13840_v25 = vpop.permute.xlu0 %6888  ;;  %v16032_v5 = vld [vmem:[#allocation28_spill] sm:$0xff] }
 0x311   :  { %v4778_v51 = vpop.f32.mrf.mxu0  ;;  %v3877_v23 = vmax.f32 %v3115_v43, 0.0 }
 0x312   :  { %v7533_v32 = vadd.f32 %v7532_v61, %v7141_v16  ;;  %v7142_v29 = vmul.f32 %v16031_v33, %v5942_v52  ;;  %v5943_v42 = vmax.f32 %v4777_v30, 0.0  ;;  %v4779_v3 = vadd.f32 %v4778_v51, %v13736_v34  ;;  %v13847_v16 = vpop.permute.xlu1 %7100 }
 0x313   :  { %v4782_v37 = vpop.f32.mrf.mxu0  ;;  %8933 = vmatmul.mubr.msk.f32.gmra.mxu0 %vm2149_vm2, %v3875_v2  ;;  %v3876_v61 = vmax.f32 %v3110_v31, 0.0  ;;  %16033 = vst [vmem:[#allocation58_spill] sm:$0xff] %v13847_v16  ;;  %v3120_v31 = vadd.f32 %v13534_v59, %v13444_v12 }
 0x314   :  { %v7563_v49 = vadd.f32 %v7562_v38, %v7142_v29  ;;  %v7143_v48 = vmul.f32 %v16032_v5, %v5943_v42  ;;  %v5944_v15 = vmax.f32 %v4779_v3, 0.0  ;;  %v4783_v53 = vadd.f32 %v4782_v37, %v13729_v6  ;;  %5074 = vmatprep.mubr.f32.mxu0 %v15906_v50  ;;  %v16034_v42 = vld [vmem:[#allocation94_spill] sm:$0xff] }
 0x315   :  { %v4784_v33 = vpop.f32.mrf.mxu0 }
 0x316   :  { %v7534_v52 = vadd.f32 %v7533_v32, %v7143_v48  ;;  %v7144_v30 = vmul.f32 %v16032_v5, %v5944_v15  ;;  %v5945_v2 = vmax.f32 %v4783_v53, 0.0  ;;  %v4785_v38 = vadd.f32 %v4784_v33, %v13736_v34  ;;  %v13857_v5 = vpop.permute.xlu0 %6596  ;;  %v13862_v33 = vpop.permute.xlu1 %6808 }
 0x317   :  { %v4788_v51 = vpop.f32.mrf.mxu0  ;;  %8934 = vmatmul.mubr.msk.f32.gmra.mxu0 %vm2149_vm2, %v3876_v61 }
 0x318   :  { %v7564_v29 = vadd.f32 %v7563_v49, %v7144_v30  ;;  %v7145_v3 = vmul.f32 %v16034_v42, %v5945_v2  ;;  %v5946_v37 = vmax.f32 %v4785_v38, 0.0  ;;  %v4789_v46 = vadd.f32 %v4788_v51, %v13729_v6  ;;  %5080 = vmatprep.mubr.f32.mxu0 %v15906_v50  ;;  %v16035_v2 = vld [vmem:[#allocation106_spill] sm:$0xff] }
 0x319   :  { %v4790_v32 = vpop.f32.mrf.mxu0  ;;  %v3878_v51 = vmax.f32 %v3120_v31, 0.0  ;;  %v3130_v31 = vadd.f32 %v13534_v59, %v13460_v9  ;;  %v3135_v9 = vadd.f32 %v13534_v59, %v13451_v24 }
 0x31a   :  { %v7535_v48 = vadd.f32 %v7534_v52, %v7145_v3  ;;  %v7146_v15 = vmul.f32 %v16034_v42, %v5946_v37  ;;  %v5947_v53 = vmax.f32 %v4789_v46, 0.0  ;;  %v4791_v49 = vadd.f32 %v4790_v32, %v13736_v34 }
 0x31b   :  { %v4794_v61 = vpop.f32.mrf.mxu0  ;;  %8935 = vmatmul.mubr.msk.f32.gmra.mxu0 %vm2149_vm2, %v3877_v23  ;;  %v3125_v52 = vadd.f32 %v13534_v59, %v13435_v17 }
 0x31c   :  { %v7565_v30 = vadd.f32 %v7564_v29, %v7146_v15  ;;  %v7147_v43 = vmul.f32 %v16035_v2, %v5947_v53  ;;  %v5948_v38 = vmax.f32 %v4791_v49, 0.0  ;;  %v4795_v12 = vadd.f32 %v4794_v61, %v13729_v6  ;;  %5086 = vmatprep.mubr.f32.mxu0 %v15906_v50  ;;  %v13872_v29 = vpop.permute.xlu0 %6988  ;;  %v16036_v53 = vld [vmem:[#allocation117_spill] sm:$0xff] }
 0x31d   :  { %v4796_v46 = vpop.f32.mrf.mxu0  ;;  %v3879_v17 = vmax.f32 %v3125_v52, 0.0 }
 0x31e   :  { %v7536_v42 = vadd.f32 %v7535_v48, %v7147_v43  ;;  %v7148_v3 = vmul.f32 %v16035_v2, %v5948_v38  ;;  %v5949_v37 = vmax.f32 %v4795_v12, 0.0  ;;  %v4797_v23 = vadd.f32 %v4796_v46, %v13736_v34  ;;  %v13879_v2 = vpop.permute.xlu1 %6416 }
 0x31f   :  { %v4800_v32 = vpop.f32.mrf.mxu0  ;;  %8936 = vmatmul.mubr.msk.f32.gmra.mxu0 %vm2149_vm2, %v3878_v51 }
 0x320   :  { %v7566_v15 = vadd.f32 %v7565_v30, %v7148_v3  ;;  %v7149_v49 = vmul.f32 %v16036_v53, %v5949_v37  ;;  %v5950_v61 = vmax.f32 %v4797_v23, 0.0  ;;  %v4801_v16 = vadd.f32 %v4800_v32, %v13729_v6  ;;  %5092 = vmatprep.mubr.f32.mxu0 %v15906_v50  ;;  %v13889_v32 = vpop.permute.xlu0 %6500 }
 0x321   :  { %v4802_v48 = vpop.f32.mrf.mxu0 }
 0x322   :  { %v7537_v43 = vadd.f32 %v7536_v42, %v7149_v49  ;;  %v7150_v38 = vmul.f32 %v16036_v53, %v5950_v61  ;;  %v5951_v12 = vmax.f32 %v4801_v16, 0.0  ;;  %v4803_v30 = vadd.f32 %v4802_v48, %v13736_v34 }
 0x323   :  { %v4806_v51 = vpop.f32.mrf.mxu0  ;;  %8937 = vmatmul.mubr.msk.f32.gmra.mxu0 %vm2149_vm2, %v3879_v17  ;;  %v3880_v42 = vmax.f32 %v3130_v31, 0.0  ;;  %v13894_v17 = vpop.permute.xlu1 %6712  ;;  %v3881_v31 = vmax.f32 %v3135_v9, 0.0 }
 0x324   :  { %v7567_v46 = vadd.f32 %v7566_v15, %v7150_v38  ;;  %v7151_v3 = vmul.f32 %v12838_v13, %v5951_v12  ;;  %v5952_v37 = vmax.f32 %v4803_v30, 0.0  ;;  %v4807_v52 = vadd.f32 %v4806_v51, %v13729_v6  ;;  %5098 = vmatprep.mubr.f32.mxu0 %v15906_v50 }
 0x325   :  { %v4808_v23 = vpop.f32.mrf.mxu0 }
 0x326   :  { %v7538_v16 = vadd.f32 %v7537_v43, %v7151_v3  ;;  %v7152_v53 = vmul.f32 %v12838_v13, %v5952_v37  ;;  %v5953_v49 = vmax.f32 %v4807_v52, 0.0  ;;  %v4809_v15 = vadd.f32 %v4808_v23, %v13736_v34 }
 0x327   :  { %v4812_v61 = vpop.f32.mrf.mxu0  ;;  %8938 = vmatmul.mubr.msk.f32.gmra.mxu0 %vm2149_vm2, %v3880_v42  ;;  %v3140_v13 = vadd.f32 %v13534_v59, %v13476_v41  ;;  %v3145_v41 = vadd.f32 %v13534_v59, %v13465_v1 }
 0x328   :  { %v7568_v48 = vadd.f32 %v7567_v46, %v7152_v53  ;;  %v7153_v38 = vmul.f32 %v12970_v58, %v5953_v49  ;;  %v5954_v12 = vmax.f32 %v4809_v15, 0.0  ;;  %v4813_v24 = vadd.f32 %v4812_v61, %v13729_v6  ;;  %5104 = vmatprep.mubr.f32.mxu0 %v15906_v50  ;;  %v13904_v46 = vpop.permute.xlu0 %6892  ;;  %v13911_v49 = vpop.permute.xlu1 %7104 }
 0x329   :  { %v4814_v43 = vpop.f32.mrf.mxu0  ;;  %16037 = vst [vmem:[#allocation114_spill] sm:$0xff] %v13911_v49  ;;  %v3883_v1 = vmax.f32 %v3145_v41, 0.0 }
 0x32a   :  { %v7539_v30 = vadd.f32 %v7538_v16, %v7153_v38  ;;  %v7154_v51 = vmul.f32 %v12970_v58, %v5954_v12  ;;  %v5955_v3 = vmax.f32 %v4813_v24, 0.0  ;;  %v4815_v37 = vadd.f32 %v4814_v43, %v13736_v34 }
 0x32b   :  { %v4818_v52 = vpop.f32.mrf.mxu0  ;;  %8939 = vmatmul.mubr.msk.f32.gmra.mxu0 %vm2149_vm2, %v3881_v31  ;;  %v3882_v58 = vmax.f32 %v3140_v13, 0.0  ;;  %v3150_v13 = vadd.f32 %v13534_v59, %v13490_v14 }
 0x32c   :  { %v7569_v42 = vadd.f32 %v7568_v48, %v7154_v51  ;;  %v7155_v23 = vmul.f32 %v13110_v19, %v5955_v3  ;;  %v5956_v53 = vmax.f32 %v4815_v37, 0.0  ;;  %v4819_v9 = vadd.f32 %v4818_v52, %v13729_v6  ;;  %5110 = vmatprep.mubr.f32.mxu0 %v15906_v50 }
 0x32d   :  { %v4820_v16 = vpop.f32.mrf.mxu0 }
 0x32e   :  { %v7540_v15 = vadd.f32 %v7539_v30, %v7155_v23  ;;  %v7156_v61 = vmul.f32 %v13110_v19, %v5956_v53  ;;  %v5957_v38 = vmax.f32 %v4819_v9, 0.0  ;;  %v4821_v48 = vadd.f32 %v4820_v16, %v13736_v34  ;;  %v13921_v19 = vpop.permute.xlu0 %6600  ;;  %v13926_v53 = vpop.permute.xlu1 %6812 }
 0x32f   :  { %v4824_v12 = vpop.f32.mrf.mxu0  ;;  %8940 = vmatmul.mubr.msk.f32.gmra.mxu0 %vm2149_vm2, %v3882_v58  ;;  %v3155_v16 = vadd.f32 %v13534_v59, %v13481_v22 }
 0x330   :  { %v7570_v24 = vadd.f32 %v7569_v42, %v7156_v61  ;;  %v7157_v31 = vmul.f32 %v13250_v20, %v5957_v38  ;;  %v5958_v43 = vmax.f32 %v4821_v48, 0.0  ;;  %v4825_v51 = vadd.f32 %v4824_v12, %v13729_v6  ;;  %5116 = vmatprep.mubr.f32.mxu0 %v15906_v50 }
 0x331   :  { %v4826_v30 = vpop.f32.mrf.mxu0  ;;  %v3885_v22 = vmax.f32 %v3155_v16, 0.0 }
 0x332   :  { %v7541_v3 = vadd.f32 %v7540_v15, %v7157_v31  ;;  %v7158_v37 = vmul.f32 %v13250_v20, %v5958_v43  ;;  %v5959_v52 = vmax.f32 %v4825_v51, 0.0  ;;  %v4827_v42 = vadd.f32 %v4826_v30, %v13736_v34 }
 0x333   :  { %v4830_v23 = vpop.f32.mrf.mxu0  ;;  %8941 = vmatmul.mubr.msk.f32.gmra.mxu0 %vm2149_vm2, %v3883_v1  ;;  %v3884_v20 = vmax.f32 %v3150_v13, 0.0 }
 0x334   :  { %v7571_v9 = vadd.f32 %v7570_v24, %v7158_v37  ;;  %v7159_v41 = vmul.f32 %v13380_v28, %v5959_v52  ;;  %v5960_v58 = vmax.f32 %v4827_v42, 0.0  ;;  %v4831_v14 = vadd.f32 %v4830_v23, %v13729_v6  ;;  %5122 = vmatprep.mubr.f32.mxu0 %v15906_v50  ;;  %v13936_v24 = vpop.permute.xlu0 %6992 }
 0x335   :  { %v4832_v15 = vpop.f32.mrf.mxu0 }
 0x336   :  { %v7542_v61 = vadd.f32 %v7541_v3, %v7159_v41  ;;  %v7160_v38 = vmul.f32 %v13380_v28, %v5960_v58  ;;  %v5961_v48 = vmax.f32 %v4831_v14, 0.0  ;;  %v4833_v12 = vadd.f32 %v4832_v15, %v13736_v34  ;;  %v13943_v3 = vpop.permute.xlu1 %6420 }
 0x337   :  { %v4836_v31 = vpop.f32.mrf.mxu0  ;;  %8942 = vmatmul.mubr.msk.f32.gmra.mxu0 %vm2149_vm2, %v3884_v20  ;;  %v3160_v28 = vadd.f32 %v13534_v59, %v13506_v39  ;;  %v3165_v39 = vadd.f32 %v13534_v59, %v13497_v60 }
 0x338   :  { %v7572_v43 = vadd.f32 %v7571_v9, %v7160_v38  ;;  %v7161_v51 = vmul.f32 %v13472_v7, %v5961_v48  ;;  %v5962_v1 = vmax.f32 %v4833_v12, 0.0  ;;  %v4837_v30 = vadd.f32 %v4836_v31, %v13729_v6  ;;  %5128 = vmatprep.mubr.f32.mxu0 %v15906_v50 }
 0x339   :  { %v4838_v13 = vpop.f32.mrf.mxu0  ;;  %v3886_v20 = vmax.f32 %v3160_v28, 0.0 }
 0x33a   :  { %v7543_v37 = vadd.f32 %v7542_v61, %v7161_v51  ;;  %v7162_v52 = vmul.f32 %v13472_v7, %v5962_v1  ;;  %v5963_v42 = vmax.f32 %v4837_v30, 0.0  ;;  %v4839_v23 = vadd.f32 %v4838_v13, %v13736_v34  ;;  %v13953_v7 = vpop.permute.xlu0 %6504 }
 0x33b   :  { %v4842_v9 = vpop.f32.mrf.mxu0  ;;  %8943 = vmatmul.mubr.msk.f32.gmra.mxu0 %vm2149_vm2, %v3885_v22  ;;  %v3887_v22 = vmax.f32 %v3165_v39, 0.0 }
 0x33c   :  { %v7573_v41 = vadd.f32 %v7572_v43, %v7162_v52  ;;  %v7163_v58 = vmul.f32 %v13567_v36, %v5963_v42  ;;  %v5964_v14 = vmax.f32 %v4839_v23, 0.0  ;;  %v4843_v16 = vadd.f32 %v4842_v9, %v13729_v6  ;;  %5134 = vmatprep.mubr.f32.mxu0 %v15906_v50  ;;  %v13958_v43 = vpop.permute.xlu1 %6716 }
 0x33d   :  { %v4844_v15 = vpop.f32.mrf.mxu0 }
 0x33e   :  { %v7544_v61 = vadd.f32 %v7543_v37, %v7163_v58  ;;  %v7164_v38 = vmul.f32 %v13567_v36, %v5964_v14  ;;  %v5965_v48 = vmax.f32 %v4843_v16, 0.0  ;;  %v4845_v12 = vadd.f32 %v4844_v15, %v13736_v34  ;;  %v13968_v9 = vpop.permute.xlu0 %6896 }
 0x33f   :  { %v4848_v31 = vpop.f32.mrf.mxu0  ;;  %8944 = vmatmul.mubr.msk.f32.gmra.mxu0 %vm2149_vm2, %v3886_v20  ;;  %v3170_v36 = vadd.f32 %v13534_v59, %v13522_v45  ;;  %v3175_v45 = vadd.f32 %v13534_v59, %v13511_v11  ;;  %v13986_v59 = vld [vmem:[%s15506_s4] ss:$0 sm:$0xff] }
 0x340   :  { %v7574_v51 = vadd.f32 %v7573_v41, %v7164_v38  ;;  %v7165_v1 = vmul.f32 %v13655_v44, %v5965_v48  ;;  %v5966_v30 = vmax.f32 %v4845_v12, 0.0  ;;  %v4849_v60 = vadd.f32 %v4848_v31, %v13729_v6  ;;  %5140 = vmatprep.mubr.f32.mxu0 %v15906_v50  ;;  %v13975_v20 = vpop.permute.xlu1 %7108 }
 0x341   :  { %v4850_v28 = vpop.f32.mrf.mxu0  ;;  %16038 = vst [vmem:[#allocation60_spill] sm:$0xff] %v13975_v20  ;;  %v3889_v11 = vmax.f32 %v3175_v45, 0.0 }
 0x342   :  { %v7545_v13 = vadd.f32 %v7544_v61, %v7165_v1  ;;  %v7166_v37 = vmul.f32 %v13655_v44, %v5966_v30  ;;  %v5967_v52 = vmax.f32 %v4849_v60, 0.0  ;;  %v4851_v42 = vadd.f32 %v4850_v28, %v13736_v34 }
 0x343   :  { %v4854_v23 = vpop.f32.mrf.mxu0  ;;  %8945 = vmatmul.mubr.msk.f32.gmra.mxu0 %vm2149_vm2, %v3887_v22  ;;  %v3888_v44 = vmax.f32 %v3170_v36, 0.0  ;;  %v13990_v22 = vpop.permute.xlu0 %6604 }
 0x344   :  { %v7575_v41 = vadd.f32 %v7574_v51, %v7166_v37  ;;  %v7167_v58 = vmul.f32 %v13749_v54, %v5967_v52  ;;  %v5968_v14 = vmax.f32 %v4851_v42, 0.0  ;;  %v4855_v16 = vadd.f32 %v4854_v23, %v13729_v6  ;;  %5146 = vmatprep.mubr.f32.mxu0 %v15906_v50  ;;  %v13995_v42 = vpop.permute.xlu1 %6816 }
 0x345   :  { %v4856_v39 = vpop.f32.mrf.mxu0 }
 0x346   :  { %v7546_v15 = vadd.f32 %v7545_v13, %v7167_v58  ;;  %v7168_v61 = vmul.f32 %v13749_v54, %v5968_v14  ;;  %v5969_v38 = vmax.f32 %v4855_v16, 0.0  ;;  %v4857_v48 = vadd.f32 %v4856_v39, %v13736_v34 }
 0x347   :  { %v4860_v12 = vpop.f32.mrf.mxu0  ;;  %8946 = vmatmul.mubr.msk.f32.gmra.mxu0 %vm2149_vm2, %v3888_v44  ;;  %v3180_v54 = vadd.f32 %v13986_v59, %v13546_v55  ;;  %v3185_v14 = vadd.f32 %v13986_v59, %v13527_v63 }
 0x348   :  { %v7576_v31 = vadd.f32 %v7575_v41, %v7168_v61  ;;  %v7169_v51 = vmul.f32 %v13815_v8, %v5969_v38  ;;  %v5970_v1 = vmax.f32 %v4857_v48, 0.0  ;;  %v4861_v30 = vadd.f32 %v4860_v12, %v13729_v6  ;;  %5152 = vmatprep.mubr.f32.mxu0 %v15906_v50  ;;  %v14005_v38 = vpop.permute.xlu0 %6996 }
 0x349   :  { %v4862_v60 = vpop.f32.mrf.mxu0  ;;  %v3891_v63 = vmax.f32 %v3185_v14, 0.0 }
 0x34a   :  { %v7547_v36 = vadd.f32 %v7546_v15, %v7169_v51  ;;  %v7170_v28 = vmul.f32 %v13815_v8, %v5970_v1  ;;  %v5971_v13 = vmax.f32 %v4861_v30, 0.0  ;;  %v4863_v37 = vadd.f32 %v4862_v60, %v13736_v34  ;;  %v6425_v30 = vpop.permute.xlu1 %6424 }
 0x34b   :  { %v4866_v52 = vpop.f32.mrf.mxu0  ;;  %8947 = vmatmul.mubr.msk.f32.gmra.mxu0 %vm2149_vm2, %v3889_v11  ;;  %v3890_v8 = vmax.f32 %v3180_v54, 0.0 }
 0x34c   :  { %v7577_v23 = vadd.f32 %v7576_v31, %v7170_v28  ;;  %v7171_v41 = vmul.f32 %v13879_v2, %v5971_v13  ;;  %v5972_v58 = vmax.f32 %v4863_v37, 0.0  ;;  %v4867_v55 = vadd.f32 %v4866_v52, %v13729_v6  ;;  %5158 = vmatprep.mubr.f32.mxu0 %v15906_v50 }
 0x34d   :  { %v4868_v16 = vpop.f32.mrf.mxu0 }
 0x34e   :  { %v7548_v45 = vadd.f32 %v7547_v36, %v7171_v41  ;;  %v7172_v44 = vmul.f32 %v13879_v2, %v5972_v58  ;;  %v5973_v39 = vmax.f32 %v4867_v55, 0.0  ;;  %v4869_v15 = vadd.f32 %v4868_v16, %v13736_v34  ;;  %v14019_v55 = vpop.permute.xlu0 %6508 }
 0x34f   :  { %v4872_v61 = vpop.f32.mrf.mxu0  ;;  %8948 = vmatmul.mubr.msk.f32.gmra.mxu0 %vm2149_vm2, %v3890_v8  ;;  %v3190_v2 = vadd.f32 %v13986_v59, %v13574_v62 }
 0x350   :  { %v7578_v48 = vadd.f32 %v7577_v23, %v7172_v44  ;;  %v7173_v12 = vmul.f32 %v13943_v3, %v5973_v39  ;;  %v5974_v31 = vmax.f32 %v4869_v15, 0.0  ;;  %v4873_v51 = vadd.f32 %v4872_v61, %v13729_v6  ;;  %5164 = vmatprep.mubr.f32.mxu0 %v15906_v50 }
 0x351   :  { %v4874_v1 = vpop.f32.mrf.mxu0  ;;  %v3195_v23 = vadd.f32 %v13986_v59, %v13560_v4  ;;  %v3892_v62 = vmax.f32 %v3190_v2, 0.0  ;;  %v3200_v4 = vadd.f32 %v13986_v59, %v13604_v47  ;;  %v3205_v47 = vadd.f32 %v13986_v59, %v13590_v40 }
 0x352   :  { %v7549_v11 = vadd.f32 %v7548_v45, %v7173_v12  ;;  %v7174_v54 = vmul.f32 %v13943_v3, %v5974_v31  ;;  %v5975_v60 = vmax.f32 %v4873_v51, 0.0  ;;  %v4875_v36 = vadd.f32 %v4874_v1, %v13736_v34 }
 0x353   :  { %v4878_v28 = vpop.f32.mrf.mxu0  ;;  %8949 = vmatmul.mubr.msk.f32.gmra.mxu0 %vm2149_vm2, %v3891_v63  ;;  %v3893_v44 = vmax.f32 %v3195_v23, 0.0  ;;  %v14033_v63 = vpop.permute.xlu0 %6900 }
 0x354   :  { %v5976_v13 = vmax.f32 %v4875_v36, 0.0  ;;  %v7175_v37 = vmul.f32 %v6425_v30, %v5975_v60  ;;  %v7579_v52 = vadd.f32 %v7578_v48, %v7174_v54  ;;  %5170 = vmatprep.mubr.f32.mxu0 %v15906_v50  ;;  %v4879_v41 = vadd.f32 %v4878_v28, %v13729_v6  ;;  %v16040_v60 = vld [vmem:[#allocation70_spill] sm:$0xff] }
 0x355   :  { %v4880_v58 = vpop.f32.mrf.mxu0 }
 0x356   :  { %v7176_v3 = vmul.f32 %v6425_v30, %v5976_v13  ;;  %v14021_v14 = vadd.f32 %v7549_v11, %v7175_v37  ;;  %v4881_v8 = vadd.f32 %v4880_v58, %v13736_v34  ;;  %v5977_v39 = vmax.f32 %v4879_v41, 0.0  ;;  %v16039_v11 = vld [vmem:[#allocation69_spill] sm:$0xff] }
 0x357   :  { %v4884_v16 = vpop.f32.mrf.mxu0  ;;  %8950 = vmatmul.mubr.msk.f32.gmra.mxu0 %vm2149_vm2, %v3892_v62  ;;  %v3894_v30 = vmax.f32 %v3200_v4, 0.0 }
 0x358   :  { %v14025_v45 = vadd.f32 %v7579_v52, %v7176_v3  ;;  %5176 = vmatprep.mubr.f32.mxu0 %v15906_v50  ;;  %v4885_v15 = vadd.f32 %v4884_v16, %v13729_v6  ;;  %v5978_v48 = vmax.f32 %v4881_v8, 0.0  ;;  %v7177_v54 = vmul.f32 %v16039_v11, %v5977_v39  ;;  %v16041_v3 = vld [vmem:[#allocation72_spill] sm:$0xff] }
 0x359   :  { %v4886_v61 = vpop.f32.mrf.mxu0  ;;  %v3895_v8 = vmax.f32 %v3205_v47, 0.0  ;;  %v3210_v16 = vadd.f32 %v13986_v59, %v13634_v27  ;;  %v3215_v27 = vadd.f32 %v13986_v59, %v13618_v10 }
 0x35a   :  { %v4887_v12 = vadd.f32 %v4886_v61, %v13736_v34  ;;  %v5979_v31 = vmax.f32 %v4885_v15, 0.0  ;;  %v7178_v13 = vmul.f32 %v16039_v11, %v5978_v48  ;;  %v14050_v15 = vpop.permute.xlu0 %6608  ;;  %v16042_v11 = vld [vmem:[#allocation92_spill] sm:$0xff] }
 0x35b   :  { %v4890_v51 = vpop.f32.mrf.mxu0  ;;  %8951 = vmatmul.mubr.msk.f32.gmra.mxu0 %vm2149_vm2, %v3893_v44  ;;  %v3896_v47 = vmax.f32 %v3210_v16, 0.0 }
 0x35c   :  { %v5980_v2 = vmax.f32 %v4887_v12, 0.0  ;;  %v4891_v1 = vadd.f32 %v4890_v51, %v13729_v6  ;;  %5182 = vmatprep.mubr.f32.mxu0 %v15906_v50  ;;  %v7179_v36 = vmul.f32 %v16040_v60, %v5979_v31 }
 0x35d   :  { %v4892_v28 = vpop.f32.mrf.mxu0 }
 0x35e   :  { %v7180_v37 = vmul.f32 %v16040_v60, %v5980_v2  ;;  %v5981_v52 = vmax.f32 %v4891_v1, 0.0  ;;  %v7587_v23 = vadd.f32 %v7179_v36, %v7177_v54  ;;  %v4893_v62 = vadd.f32 %v4892_v28, %v13736_v34 }
 0x35f   :  { %v4896_v41 = vpop.f32.mrf.mxu0  ;;  %8952 = vmatmul.mubr.msk.f32.gmra.mxu0 %vm2149_vm2, %v3894_v30 }
 0x360   :  { %v7617_v58 = vadd.f32 %v7180_v37, %v7178_v13  ;;  %v7181_v40 = vmul.f32 %v16041_v3, %v5981_v52  ;;  %5188 = vmatprep.mubr.f32.mxu0 %v15906_v50  ;;  %v5982_v44 = vmax.f32 %v4893_v62, 0.0  ;;  %v4897_v4 = vadd.f32 %v4896_v41, %v13729_v6  ;;  %v16043_v41 = vld [vmem:[#allocation6_spill] sm:$0xff] }
 0x361   :  { %v4898_v39 = vpop.f32.mrf.mxu0 }
 0x362   :  { %v7588_v61 = vadd.f32 %v7587_v23, %v7181_v40  ;;  %v4899_v48 = vadd.f32 %v4898_v39, %v13736_v34  ;;  %v7182_v12 = vmul.f32 %v16041_v3, %v5982_v44  ;;  %v5983_v31 = vmax.f32 %v4897_v4, 0.0  ;;  %v14063_v23 = vpop.permute.xlu0 %7000 }
 0x363   :  { %v4902_v51 = vpop.f32.mrf.mxu0  ;;  %8953 = vmatmul.mubr.msk.f32.gmra.mxu0 %vm2149_vm2, %v3895_v8  ;;  %v3897_v40 = vmax.f32 %v3215_v27, 0.0  ;;  %v3220_v8 = vadd.f32 %v13986_v59, %v13662_v56  ;;  %v3225_v56 = vadd.f32 %v13986_v59, %v13648_v57 }
 0x364   :  { %v5984_v2 = vmax.f32 %v4899_v48, 0.0  ;;  %v4903_v1 = vadd.f32 %v4902_v51, %v13729_v6  ;;  %5194 = vmatprep.mubr.f32.mxu0 %v15906_v50  ;;  %v7618_v30 = vadd.f32 %v7617_v58, %v7182_v12  ;;  %v7183_v54 = vmul.f32 %v16042_v11, %v5983_v31  ;;  %v16044_v31 = vld [vmem:[#allocation108_spill] sm:$0xff] }
 0x365   :  { %v4904_v60 = vpop.f32.mrf.mxu0  ;;  %v3898_v27 = vmax.f32 %v3220_v8, 0.0  ;;  %v3899_v57 = vmax.f32 %v3225_v56, 0.0 }
 0x366   :  { %v7184_v36 = vmul.f32 %v16042_v11, %v5984_v2  ;;  %v5985_v28 = vmax.f32 %v4903_v1, 0.0  ;;  %v4905_v13 = vadd.f32 %v4904_v60, %v13736_v34  ;;  %v7589_v37 = vadd.f32 %v7588_v61, %v7183_v54 }
 0x367   :  { %v4908_v52 = vpop.f32.mrf.mxu0  ;;  %8954 = vmatmul.mubr.msk.f32.gmra.mxu0 %vm2149_vm2, %v3896_v47 }
 0x368   :  { %v7619_v62 = vadd.f32 %v7618_v30, %v7184_v36  ;;  %v7185_v3 = vmul.f32 %v16043_v41, %v5985_v28  ;;  %v5986_v10 = vmax.f32 %v4905_v13, 0.0  ;;  %v4909_v58 = vadd.f32 %v4908_v52, %v13729_v6  ;;  %5200 = vmatprep.mubr.f32.mxu0 %v15906_v50  ;;  %v14078_v30 = vpop.permute.xlu0 %6512 }
 0x369   :  { %v4910_v16 = vpop.f32.mrf.mxu0 }
 0x36a   :  { %v7590_v44 = vadd.f32 %v7589_v37, %v7185_v3  ;;  %v7186_v4 = vmul.f32 %v16043_v41, %v5986_v10  ;;  %v5987_v39 = vmax.f32 %v4909_v58, 0.0  ;;  %v4911_v61 = vadd.f32 %v4910_v16, %v13736_v34  ;;  %v16045_v37 = vld [vmem:[#allocation115_spill] sm:$0xff]  ;;  %v16046_v3 = vld [vmem:[#allocation102_spill] sm:$0xff] }
 0x36b   :  { %v4914_v48 = vpop.f32.mrf.mxu0  ;;  %8955 = vmatmul.mubr.msk.f32.gmra.mxu0 %vm2149_vm2, %v3897_v40  ;;  %v3230_v10 = vadd.f32 %v13986_v59, %v16046_v3 }
 0x36c   :  { %v7620_v12 = vadd.f32 %v7619_v62, %v7186_v4  ;;  %v7187_v51 = vmul.f32 %v16044_v31, %v5987_v39  ;;  %v5988_v2 = vmax.f32 %v4911_v61, 0.0  ;;  %v4915_v1 = vadd.f32 %v4914_v48, %v13729_v6  ;;  %5206 = vmatprep.mubr.f32.mxu0 %v15906_v50  ;;  %v14091_v39 = vpop.permute.xlu0 %6904  ;;  %v16047_v48 = vld [vmem:[#allocation67_spill] sm:$0xff] }
 0x36d   :  { %v4916_v47 = vpop.f32.mrf.mxu0  ;;  %v3900_v56 = vmax.f32 %v3230_v10, 0.0 }
 0x36e   :  { %v7591_v11 = vadd.f32 %v7590_v44, %v7187_v51  ;;  %v7188_v54 = vmul.f32 %v16044_v31, %v5988_v2  ;;  %v5989_v60 = vmax.f32 %v4915_v1, 0.0  ;;  %v4917_v36 = vadd.f32 %v4916_v47, %v13736_v34  ;;  %v16048_v2 = vld [vmem:[#allocation100_spill] sm:$0xff] }
 0x36f   :  { %v4920_v28 = vpop.f32.mrf.mxu0  ;;  %8956 = vmatmul.mubr.msk.f32.gmra.mxu0 %vm2149_vm2, %v3898_v27  ;;  %v3235_v1 = vadd.f32 %v13986_v59, %v16048_v2  ;;  %v16052_v2 = vld [vmem:[#allocation104_spill] sm:$0xff] }
 0x370   :  { %v7621_v13 = vadd.f32 %v7620_v12, %v7188_v54  ;;  %v7189_v52 = vmul.f32 %v16045_v37, %v5989_v60  ;;  %v5990_v62 = vmax.f32 %v4917_v36, 0.0  ;;  %v4921_v41 = vadd.f32 %v4920_v28, %v13729_v6  ;;  %5212 = vmatprep.mubr.f32.mxu0 %v15906_v50 }
 0x371   :  { %v4922_v58 = vpop.f32.mrf.mxu0 }
 0x372   :  { %v7592_v40 = vadd.f32 %v7591_v11, %v7189_v52  ;;  %v7190_v8 = vmul.f32 %v16045_v37, %v5990_v62  ;;  %v5991_v16 = vmax.f32 %v4921_v41, 0.0  ;;  %v4923_v44 = vadd.f32 %v4922_v58, %v13736_v34  ;;  %v14106_v58 = vpop.permute.xlu0 %6612 }
 0x373   :  { %v4926_v4 = vpop.f32.mrf.mxu0  ;;  %8957 = vmatmul.mubr.msk.f32.gmra.mxu0 %vm2149_vm2, %v3899_v57  ;;  %v3901_v41 = vmax.f32 %v3235_v1, 0.0  ;;  %v16050_v57 = vld [vmem:[#allocation50_spill] sm:$0xff]  ;;  %v3245_v1 = vadd.f32 %v13986_v59, %v16052_v2 }
 0x374   :  { %v7622_v61 = vadd.f32 %v7621_v13, %v7190_v8  ;;  %v7191_v12 = vmul.f32 %v16047_v48, %v5991_v16  ;;  %v5992_v31 = vmax.f32 %v4923_v44, 0.0  ;;  %v4927_v51 = vadd.f32 %v4926_v4, %v13729_v6  ;;  %5218 = vmatprep.mubr.f32.mxu0 %v15906_v50  ;;  %v16049_v13 = vld [vmem:[#allocation127_spill] sm:$0xff] }
 0x375   :  { %v4928_v27 = vpop.f32.mrf.mxu0  ;;  %v3240_v3 = vadd.f32 %v13986_v59, %v16050_v57 }
 0x376   :  { %v7593_v47 = vadd.f32 %v7592_v40, %v7191_v12  ;;  %v7192_v11 = vmul.f32 %v16047_v48, %v5992_v31  ;;  %v5993_v54 = vmax.f32 %v4927_v51, 0.0  ;;  %v4929_v60 = vadd.f32 %v4928_v27, %v13736_v34  ;;  %v16051_v48 = vld [vmem:[#allocation133_spill] sm:$0xff] }
 0x377   :  { %v4932_v36 = vpop.f32.mrf.mxu0  ;;  %8958 = vmatmul.mubr.msk.f32.gmra.mxu0 %vm2149_vm2, %v3900_v56  ;;  %v3902_v56 = vmax.f32 %v3240_v3, 0.0  ;;  %v3903_v3 = vmax.f32 %v3245_v1, 0.0 }
 0x378   :  { %v7623_v28 = vadd.f32 %v7622_v61, %v7192_v11  ;;  %v7193_v37 = vmul.f32 %v16049_v13, %v5993_v54  ;;  %v5994_v52 = vmax.f32 %v4929_v60, 0.0  ;;  %v4933_v62 = vadd.f32 %v4932_v36, %v13729_v6  ;;  %5224 = vmatprep.mubr.f32.mxu0 %v15906_v50 }
 0x379   :  { %v4934_v10 = vpop.f32.mrf.mxu0 }
 0x37a   :  { %v7594_v40 = vadd.f32 %v7593_v47, %v7193_v37  ;;  %v7194_v8 = vmul.f32 %v16049_v13, %v5994_v52  ;;  %v5995_v16 = vmax.f32 %v4933_v62, 0.0  ;;  %v4935_v44 = vadd.f32 %v4934_v10, %v13736_v34  ;;  %v10039_v13 = vpop.f32.mrf.mxu1  ;;  %v16053_v52 = vld [vmem:[#allocation139_spill] sm:$0xff]  ;;  %v16054_v10 = vld [vmem:[#allocation109_spill] sm:$0xff] }
 0x37b   :  { %v4938_v4 = vpop.f32.mrf.mxu0  ;;  %8959 = vmatmul.mubr.msk.f32.gmra.mxu0 %vm2149_vm2, %v3901_v41 }
 0x37c   :  { %v7624_v61 = vadd.f32 %v7623_v28, %v7194_v8  ;;  %v7195_v12 = vmul.f32 %v16051_v48, %v5995_v16  ;;  %v5996_v31 = vmax.f32 %v4935_v44, 0.0  ;;  %v4939_v51 = vadd.f32 %v4938_v4, %v13729_v6  ;;  %5230 = vmatprep.mubr.f32.mxu0 %v15906_v50  ;;  %v14119_v28 = vpop.permute.xlu0 %7004 }
 0x37d   :  { %v4940_v27 = vpop.f32.mrf.mxu0 }
 0x37e   :  { %v7595_v47 = vadd.f32 %v7594_v40, %v7195_v12  ;;  %v7196_v11 = vmul.f32 %v16051_v48, %v5996_v31  ;;  %v5997_v54 = vmax.f32 %v4939_v51, 0.0  ;;  %v4941_v60 = vadd.f32 %v4940_v27, %v13736_v34  ;;  %v16055_v51 = vld [vmem:[#allocation8_spill] sm:$0xff] }
 0x37f   :  { %v4944_v36 = vpop.f32.mrf.mxu0  ;;  %8960 = vmatmul.mubr.msk.f32.gmra.mxu0 %vm2149_vm2, %v3902_v56  ;;  %v3250_v40 = vadd.f32 %v13986_v59, %v16054_v10  ;;  %v16056_v27 = vld [vmem:[#allocation52_spill] sm:$0xff] }
 0x380   :  { %v7625_v37 = vadd.f32 %v7624_v61, %v7196_v11  ;;  %v7197_v62 = vmul.f32 %v16053_v52, %v5997_v54  ;;  %v5998_v41 = vmax.f32 %v4941_v60, 0.0  ;;  %v4945_v57 = vadd.f32 %v4944_v36, %v13729_v6  ;;  %5236 = vmatprep.mubr.f32.mxu0 %v15906_v50  ;;  %v3259_v61 = vpop.f32.mrf.mxu1  ;;  %v14134_v60 = vpop.permute.xlu0 %6516  ;;  %v16057_v10 = vld [vmem:[#allocation16_spill] sm:$0xff] }
 0x381   :  { %v4946_v8 = vpop.f32.mrf.mxu0  ;;  %v3904_v11 = vmax.f32 %v3250_v40, 0.0 }
 0x382   :  { %v7596_v16 = vadd.f32 %v7595_v47, %v7197_v62  ;;  %v7198_v44 = vmul.f32 %v16053_v52, %v5998_v41  ;;  %v5999_v4 = vmax.f32 %v4945_v57, 0.0  ;;  %v4947_v48 = vadd.f32 %v4946_v8, %v13736_v34  ;;  %v10042_v57 = vpop.f32.mrf.mxu1 }
 0x383   :  { %v4950_v12 = vpop.f32.mrf.mxu0  ;;  %8961 = vmatmul.mubr.msk.f32.gmra.mxu0 %vm2149_vm2, %v3903_v3  ;;  %v3255_v47 = vadd.f32 %v13986_v59, %v16056_v27 }
 0x384   :  { %v7626_v31 = vadd.f32 %v7625_v37, %v7198_v44  ;;  %v7199_v2 = vmul.f32 %v16055_v51, %v5999_v4  ;;  %v6000_v56 = vmax.f32 %v4947_v48, 0.0  ;;  %v4951_v1 = vadd.f32 %v4950_v12, %v13729_v6  ;;  %5242 = vmatprep.mubr.f32.mxu0 %v15906_v50  ;;  %v3269_v27 = vpop.f32.mrf.mxu1 }
 0x385   :  { %v4952_v54 = vpop.f32.mrf.mxu0  ;;  %v3905_v40 = vmax.f32 %v3255_v47, 0.0 }
 0x386   :  { %v7597_v36 = vadd.f32 %v7596_v16, %v7199_v2  ;;  %v7200_v52 = vmul.f32 %v16055_v51, %v6000_v56  ;;  %v6001_v62 = vmax.f32 %v4951_v1, 0.0  ;;  %v4953_v37 = vadd.f32 %v4952_v54, %v13736_v34  ;;  %v16058_v54 = vld [vmem:[#allocation149_spill] sm:$0xff] }
 0x387   :  { %v4956_v41 = vpop.f32.mrf.mxu0  ;;  %8962 = vmatmul.mubr.msk.f32.gmra.mxu0 %vm2149_vm2, %v3904_v11  ;;  %v3260_v16 = vadd.f32 %v13986_v59, %v3259_v61  ;;  %v3265_v61 = vadd.f32 %v13986_v59, %v10039_v13 }
 0x388   :  { %v7627_v3 = vadd.f32 %v7626_v31, %v7200_v52  ;;  %v7201_v8 = vmul.f32 %v16057_v10, %v6001_v62  ;;  %v6002_v44 = vmax.f32 %v4953_v37, 0.0  ;;  %v4957_v4 = vadd.f32 %v4956_v41, %v13729_v6  ;;  %5248 = vmatprep.mubr.f32.mxu0 %v15906_v50  ;;  %v14146_v31 = vpop.permute.xlu0 %6908 }
 0x389   :  { %v4958_v48 = vpop.f32.mrf.mxu0  ;;  %v3907_v13 = vmax.f32 %v3265_v61, 0.0 }
 0x38a   :  { %v7598_v12 = vadd.f32 %v7597_v36, %v7201_v8  ;;  %v7202_v51 = vmul.f32 %v16057_v10, %v6002_v44  ;;  %v6003_v2 = vmax.f32 %v4957_v4, 0.0  ;;  %v4959_v56 = vadd.f32 %v4958_v48, %v13736_v34  ;;  %v16059_v48 = vld [vmem:[#allocation35_spill] sm:$0xff] }
 0x38b   :  { %v4962_v1 = vpop.f32.mrf.mxu0  ;;  %8963 = vmatmul.mubr.msk.f32.gmra.mxu0 %vm2149_vm2, %v3905_v40  ;;  %v3906_v36 = vmax.f32 %v3260_v16, 0.0  ;;  %v3270_v16 = vadd.f32 %v13986_v59, %v3269_v27  ;;  %v3275_v27 = vadd.f32 %v13986_v59, %v10042_v57 }
 0x38c   :  { %v7628_v11 = vadd.f32 %v7627_v3, %v7202_v51  ;;  %v7203_v52 = vmul.f32 %v16058_v54, %v6003_v2  ;;  %v6004_v62 = vmax.f32 %v4959_v56, 0.0  ;;  %v4963_v47 = vadd.f32 %v4962_v1, %v13729_v6  ;;  %5254 = vmatprep.mubr.f32.mxu0 %v15906_v50  ;;  %v10045_v3 = vpop.f32.mrf.mxu1  ;;  %v14159_v1 = vpop.permute.xlu0 %6616 }
 0x38d   :  { %v4964_v37 = vpop.f32.mrf.mxu0 }
 0x38e   :  { %v7599_v41 = vadd.f32 %v7598_v12, %v7203_v52  ;;  %v7204_v10 = vmul.f32 %v16058_v54, %v6004_v62  ;;  %v6005_v8 = vmax.f32 %v4963_v47, 0.0  ;;  %v4965_v44 = vadd.f32 %v4964_v37, %v13736_v34 }
 0x38f   :  { %v4968_v4 = vpop.f32.mrf.mxu0  ;;  %8964 = vmatmul.mubr.msk.f32.gmra.mxu0 %vm2149_vm2, %v3906_v36  ;;  %v3279_v36 = vpop.f32.mrf.mxu1 }
 0x390   :  { %v7629_v40 = vadd.f32 %v7628_v11, %v7204_v10  ;;  %v7205_v51 = vmul.f32 %v16059_v48, %v6005_v8  ;;  %v6006_v2 = vmax.f32 %v4965_v44, 0.0  ;;  %v4969_v56 = vadd.f32 %v4968_v4, %v13729_v6  ;;  %5260 = vmatprep.mubr.f32.mxu0 %v15906_v50  ;;  %v16060_v10 = vld [vmem:[#allocation99_spill] sm:$0xff] }
 0x391   :  { %v4970_v12 = vpop.f32.mrf.mxu0 }
 0x392   :  { %v7600_v54 = vadd.f32 %v7599_v41, %v7205_v51  ;;  %v7206_v52 = vmul.f32 %v16059_v48, %v6006_v2  ;;  %v6007_v62 = vmax.f32 %v4969_v56, 0.0  ;;  %v4971_v47 = vadd.f32 %v4970_v12, %v13736_v34  ;;  %v10048_v12 = vpop.f32.mrf.mxu1 }
 0x393   :  { %v4974_v11 = vpop.f32.mrf.mxu0  ;;  %8965 = vmatmul.mubr.msk.f32.gmra.mxu0 %vm2149_vm2, %v3907_v13  ;;  %v3908_v41 = vmax.f32 %v3270_v16, 0.0  ;;  %v3909_v16 = vmax.f32 %v3275_v27, 0.0 }
 0x394   :  { %v7630_v37 = vadd.f32 %v7629_v40, %v7206_v52  ;;  %v7207_v8 = vmul.f32 %v16060_v10, %v6007_v62  ;;  %v6008_v44 = vmax.f32 %v4971_v47, 0.0  ;;  %v4975_v61 = vadd.f32 %v4974_v11, %v13729_v6  ;;  %5266 = vmatprep.mubr.f32.mxu0 %v15906_v50  ;;  %v14171_v40 = vpop.permute.xlu0 %7008  ;;  %v16061_v62 = vld [vmem:[#allocation54_spill] sm:$0xff] }
 0x395   :  { %v4976_v4 = vpop.f32.mrf.mxu0 }
 0x396   :  { %v7601_v48 = vadd.f32 %v7600_v54, %v7207_v8  ;;  %v7208_v51 = vmul.f32 %v16060_v10, %v6008_v44  ;;  %v6009_v2 = vmax.f32 %v4975_v61, 0.0  ;;  %v4977_v56 = vadd.f32 %v4976_v4, %v13736_v34 }
 0x397   :  { %v4980_v13 = vpop.f32.mrf.mxu0  ;;  %8966 = vmatmul.mubr.msk.f32.gmra.mxu0 %vm2149_vm2, %v3908_v41  ;;  %v3280_v54 = vadd.f32 %v13986_v59, %v3279_v36  ;;  %v3285_v36 = vadd.f32 %v13986_v59, %v10045_v3 }
 0x398   :  { %v7631_v52 = vadd.f32 %v7630_v37, %v7208_v51  ;;  %v7209_v47 = vmul.f32 %v16061_v62, %v6009_v2  ;;  %v6010_v11 = vmax.f32 %v4977_v56, 0.0  ;;  %v4981_v57 = vadd.f32 %v4980_v13, %v13729_v6  ;;  %5272 = vmatprep.mubr.f32.mxu0 %v15906_v50  ;;  %v3289_v37 = vpop.f32.mrf.mxu1 }
 0x399   :  { %v4982_v10 = vpop.f32.mrf.mxu0  ;;  %v3910_v27 = vmax.f32 %v3280_v54, 0.0  ;;  %v3911_v54 = vmax.f32 %v3285_v36, 0.0 }
 0x39a   :  { %v7602_v8 = vadd.f32 %v7601_v48, %v7209_v47  ;;  %v7210_v44 = vmul.f32 %v16061_v62, %v6010_v11  ;;  %v6011_v61 = vmax.f32 %v4981_v57, 0.0  ;;  %v4983_v41 = vadd.f32 %v4982_v10, %v13736_v34  ;;  %v14184_v62 = vpop.permute.xlu0 %6520  ;;  %v10051_v10 = vpop.f32.mrf.mxu1 }
 0x39b   :  { %v4986_v4 = vpop.f32.mrf.mxu0  ;;  %8967 = vmatmul.mubr.msk.f32.gmra.mxu0 %vm2149_vm2, %v3909_v16 }
 0x39c   :  { %v7632_v51 = vadd.f32 %v7631_v52, %v7210_v44  ;;  %v7211_v2 = vmul.f32 %v13825_v18, %v6011_v61  ;;  %v6012_v56 = vmax.f32 %v4983_v41, 0.0  ;;  %v4987_v13 = vadd.f32 %v4986_v4, %v13729_v6  ;;  %5278 = vmatprep.mubr.f32.mxu0 %v15906_v50 }
 0x39d   :  { %v4988_v48 = vpop.f32.mrf.mxu0 }
 0x39e   :  { %v7603_v47 = vadd.f32 %v7602_v8, %v7211_v2  ;;  %v7212_v11 = vmul.f32 %v13825_v18, %v6012_v56  ;;  %v6013_v57 = vmax.f32 %v4987_v13, 0.0  ;;  %v4989_v16 = vadd.f32 %v4988_v48, %v13736_v34  ;;  %v3299_v48 = vpop.f32.mrf.mxu1 }
 0x39f   :  { %v4992_v52 = vpop.f32.mrf.mxu0  ;;  %8968 = vmatmul.mubr.msk.f32.gmra.mxu0 %vm2149_vm2, %v3910_v27  ;;  %v3290_v8 = vadd.f32 %v13986_v59, %v3289_v37  ;;  %v3295_v37 = vadd.f32 %v13986_v59, %v10048_v12 }
 0x3a0   :  { %v7633_v44 = vadd.f32 %v7632_v51, %v7212_v11  ;;  %v7213_v61 = vmul.f32 %v13889_v32, %v6013_v57  ;;  %v6014_v41 = vmax.f32 %v4989_v16, 0.0  ;;  %v4993_v3 = vadd.f32 %v4992_v52, %v13729_v6  ;;  %5284 = vmatprep.mubr.f32.mxu0 %v15906_v50  ;;  %v14196_v51 = vpop.permute.xlu0 %6912 }
 0x3a1   :  { %v4994_v4 = vpop.f32.mrf.mxu0  ;;  %v3913_v12 = vmax.f32 %v3295_v37, 0.0 }
 0x3a2   :  { %v7604_v18 = vadd.f32 %v7603_v47, %v7213_v61  ;;  %v7214_v2 = vmul.f32 %v13889_v32, %v6014_v41  ;;  %v6015_v56 = vmax.f32 %v4993_v3, 0.0  ;;  %v4995_v13 = vadd.f32 %v4994_v4, %v13736_v34 }
 0x3a3   :  { %v4998_v27 = vpop.f32.mrf.mxu0  ;;  %8969 = vmatmul.mubr.msk.f32.gmra.mxu0 %vm2149_vm2, %v3911_v54  ;;  %v3912_v32 = vmax.f32 %v3290_v8, 0.0  ;;  %v3300_v8 = vadd.f32 %v13986_v59, %v3299_v48  ;;  %v3305_v48 = vadd.f32 %v13986_v59, %v10051_v10 }
 0x3a4   :  { %v7634_v11 = vadd.f32 %v7633_v44, %v7214_v2  ;;  %v7215_v57 = vmul.f32 %v13953_v7, %v6015_v56  ;;  %v6016_v16 = vmax.f32 %v4995_v13, 0.0  ;;  %v4999_v36 = vadd.f32 %v4998_v27, %v13729_v6  ;;  %5290 = vmatprep.mubr.f32.mxu0 %v15906_v50  ;;  %v10054_v44 = vpop.f32.mrf.mxu1 }
 0x3a5   :  { %v5000_v47 = vpop.f32.mrf.mxu0 }
 0x3a6   :  { %v7605_v52 = vadd.f32 %v7604_v18, %v7215_v57  ;;  %v7216_v61 = vmul.f32 %v13953_v7, %v6016_v16  ;;  %v6017_v41 = vmax.f32 %v4999_v36, 0.0  ;;  %v5001_v3 = vadd.f32 %v5000_v47, %v13736_v34  ;;  %v14209_v7 = vpop.permute.xlu0 %6620 }
 0x3a7   :  { %v5004_v54 = vpop.f32.mrf.mxu0  ;;  %8970 = vmatmul.mubr.msk.f32.gmra.mxu0 %vm2149_vm2, %v3912_v32  ;;  %v3309_v32 = vpop.f32.mrf.mxu1 }
 0x3a8   :  { %v7635_v4 = vadd.f32 %v7634_v11, %v7216_v61  ;;  %v7217_v2 = vmul.f32 %v14019_v55, %v6017_v41  ;;  %v6018_v56 = vmax.f32 %v5001_v3, 0.0  ;;  %v5005_v13 = vadd.f32 %v5004_v54, %v13729_v6  ;;  %5296 = vmatprep.mubr.f32.mxu0 %v15906_v50 }
 0x3a9   :  { %v5006_v18 = vpop.f32.mrf.mxu0 }
 0x3aa   :  { %v7606_v27 = vadd.f32 %v7605_v52, %v7217_v2  ;;  %v7218_v57 = vmul.f32 %v14019_v55, %v6018_v56  ;;  %v6019_v16 = vmax.f32 %v5005_v13, 0.0  ;;  %v5007_v36 = vadd.f32 %v5006_v18, %v13736_v34 }
 0x3ab   :  { %v5010_v11 = vpop.f32.mrf.mxu0  ;;  %8971 = vmatmul.mubr.msk.f32.gmra.mxu0 %vm2149_vm2, %v3913_v12  ;;  %v3914_v52 = vmax.f32 %v3300_v8, 0.0  ;;  %v10057_v12 = vpop.f32.mrf.mxu1  ;;  %v3915_v8 = vmax.f32 %v3305_v48, 0.0 }
 0x3ac   :  { %v7636_v47 = vadd.f32 %v7635_v4, %v7218_v57  ;;  %v7219_v61 = vmul.f32 %v14078_v30, %v6019_v16  ;;  %v6020_v41 = vmax.f32 %v5007_v36, 0.0  ;;  %v5011_v37 = vadd.f32 %v5010_v11, %v13729_v6  ;;  %5302 = vmatprep.mubr.f32.mxu0 %v15906_v50  ;;  %v14221_v4 = vpop.permute.xlu0 %7012 }
 0x3ad   :  { %v5012_v3 = vpop.f32.mrf.mxu0  ;;  %16062 = vst [vmem:[#allocation116_spill] sm:$0xff] %v14221_v4 }
 0x3ae   :  { %v7607_v55 = vadd.f32 %v7606_v27, %v7219_v61  ;;  %v7220_v54 = vmul.f32 %v14078_v30, %v6020_v41  ;;  %v6021_v2 = vmax.f32 %v5011_v37, 0.0  ;;  %v5013_v56 = vadd.f32 %v5012_v3, %v13736_v34  ;;  %v3319_v3 = vpop.f32.mrf.mxu1 }
 0x3af   :  { %v5016_v13 = vpop.f32.mrf.mxu0  ;;  %8972 = vmatmul.mubr.msk.f32.gmra.mxu0 %vm2149_vm2, %v3914_v52  ;;  %v3310_v30 = vadd.f32 %v13986_v59, %v3309_v32  ;;  %v7551_v27 = vrot.slane %v14021_v14, 4 }
 0x3b0   :  { %v7637_v18 = vadd.f32 %v7636_v47, %v7220_v54  ;;  %v7221_v57 = vmul.f32 %v14134_v60, %v6021_v2  ;;  %v6022_v16 = vmax.f32 %v5013_v56, 0.0  ;;  %v5017_v10 = vadd.f32 %v5016_v13, %v13729_v6  ;;  %5308 = vmatprep.mubr.f32.mxu0 %v15906_v50 }
 0x3b1   :  { %v5018_v36 = vpop.f32.mrf.mxu0  ;;  %v7581_v47 = vrot.slane %v14025_v45, 4  ;;  %v7552_v56 = vadd.f32 %v7551_v27, %v14021_v14 }
 0x3b2   :  { %v7608_v11 = vadd.f32 %v7607_v55, %v7221_v57  ;;  %v7222_v61 = vmul.f32 %v14134_v60, %v6022_v16  ;;  %v6023_v41 = vmax.f32 %v5017_v10, 0.0  ;;  %v5019_v37 = vadd.f32 %v5018_v36, %v13736_v34  ;;  %v6525_v57 = vpop.permute.xlu0 %6524 }
 0x3b3   :  { %v5022_v52 = vpop.f32.mrf.mxu0  ;;  %8973 = vmatmul.mubr.msk.f32.gmra.mxu0 %vm2149_vm2, %v3915_v8  ;;  %v3315_v55 = vadd.f32 %v13986_v59, %v10054_v44  ;;  %v3916_v60 = vmax.f32 %v3310_v30, 0.0  ;;  %v7582_v36 = vadd.f32 %v7581_v47, %v14025_v45  ;;  %v7553_v27 = vrot.slane %v7552_v56, 2 }
 0x3b4   :  { %v7638_v54 = vadd.f32 %v7637_v18, %v7222_v61  ;;  %v7223_v48 = vmul.f32 %v14184_v62, %v6023_v41  ;;  %v6024_v2 = vmax.f32 %v5019_v37, 0.0  ;;  %v5023_v32 = vadd.f32 %v5022_v52, %v13729_v6  ;;  %5314 = vmatprep.mubr.f32.mxu0 %v15906_v50  ;;  %v10060_v37 = vpop.f32.mrf.mxu1 }
 0x3b5   :  { %v5024_v13 = vpop.f32.mrf.mxu0  ;;  %v3320_v41 = vadd.f32 %v13986_v59, %v3319_v3  ;;  %v3917_v14 = vmax.f32 %v3315_v55, 0.0  ;;  %v7554_v55 = vadd.f32 %v7553_v27, %v7552_v56 }
 0x3b6   :  { %v7609_v16 = vadd.f32 %v7608_v11, %v7223_v48  ;;  %v7224_v10 = vmul.f32 %v14184_v62, %v6024_v2  ;;  %v6025_v8 = vmax.f32 %v5023_v32, 0.0  ;;  %v5025_v18 = vadd.f32 %v5024_v13, %v13736_v34  ;;  %v3329_v13 = vpop.f32.mrf.mxu1 }
 0x3b7   :  { %v5028_v61 = vpop.f32.mrf.mxu0  ;;  %8974 = vmatmul.mubr.msk.f32.gmra.mxu0 %vm2149_vm2, %v3916_v60  ;;  %v3325_v48 = vadd.f32 %v13986_v59, %v10057_v12  ;;  %v7583_v32 = vrot.slane %v7582_v36, 2  ;;  %v3918_v3 = vmax.f32 %v3320_v41, 0.0  ;;  %v3330_v41 = vadd.f32 %v13986_v59, %v3329_v13 }
 0x3b8   :  { %v6026_v44 = vmax.f32 %v5025_v18, 0.0  ;;  %v7225_v30 = vmul.f32 %v6525_v57, %v6025_v8  ;;  %v7639_v52 = vadd.f32 %v7638_v54, %v7224_v10  ;;  %5320 = vmatprep.mubr.f32.mxu0 %v15906_v50  ;;  %v5029_v62 = vadd.f32 %v5028_v61, %v13729_v6 }
 0x3b9   :  { %v5030_v11 = vpop.f32.mrf.mxu0 }
 0x3ba   :  { %v7226_v2 = vmul.f32 %v6525_v57, %v6026_v44  ;;  %v7610_v45 = vadd.f32 %v7609_v16, %v7225_v30  ;;  %v5031_v47 = vadd.f32 %v5030_v11, %v13736_v34  ;;  %v6027_v8 = vmax.f32 %v5029_v62, 0.0 }
 0x3bb   :  { %v5034_v60 = vpop.f32.mrf.mxu0  ;;  %8975 = vmatmul.mubr.msk.f32.gmra.mxu0 %vm2149_vm2, %v3917_v14  ;;  %v3919_v57 = vmax.f32 %v3325_v48, 0.0  ;;  %v14251_v11 = vadd.f32 %v13986_v59, %v10060_v37  ;;  %v7584_v14 = vadd.f32 %v7583_v32, %v7582_v36  ;;  %v7555_v48 = vrot.slane %v7554_v55, 1  ;;  %v10063_v36 = vpop.f32.mrf.mxu1 }
 0x3bc   :  { %v7611_v54 = vrot.slane %v7610_v45, 4  ;;  %v7640_v10 = vadd.f32 %v7639_v52, %v7226_v2  ;;  %5326 = vmatprep.mubr.f32.mxu0 %v15906_v50  ;;  %v6028_v18 = vmax.f32 %v5031_v47, 0.0  ;;  %v5035_v61 = vadd.f32 %v5034_v60, %v13729_v6 }
 0x3bd   :  { %v5036_v12 = vpop.f32.mrf.mxu0 }
 0x3be   :  { %v7612_v16 = vadd.f32 %v7611_v54, %v7610_v45  ;;  %v7641_v44 = vrot.slane %v7640_v10, 4  ;;  %v5037_v30 = vadd.f32 %v5036_v12, %v13736_v34  ;;  %v6029_v52 = vmax.f32 %v5035_v61, 0.0  ;;  %v16063_v45 = vld [vmem:[#allocation86_spill] sm:$0xff]  ;;  %v16064_v54 = vld [vmem:[#allocation71_spill] sm:$0xff] }
 0x3bf   :  { %v5040_v2 = vpop.f32.mrf.mxu0  ;;  %8976 = vmatmul.mubr.msk.f32.gmra.mxu0 %vm2149_vm2, %v3918_v3  ;;  %v7227_v60 = vmul.f32 %v16063_v45, %v6027_v8  ;;  %v7228_v37 = vmul.f32 %v16063_v45, %v6028_v18  ;;  %v16065_v45 = vld [vmem:[#allocation32_spill] sm:$0xff] }
 0x3c0   :  { %v7613_v56 = vrot.slane %v7612_v16, 2  ;;  %v7642_v27 = vadd.f32 %v7641_v44, %v7640_v10  ;;  %v6030_v62 = vmax.f32 %v5037_v30, 0.0  ;;  %v5041_v47 = vadd.f32 %v5040_v2, %v13729_v6  ;;  %5332 = vmatprep.mubr.f32.mxu0 %v15906_v50 }
 0x3c1   :  { %v7229_v12 = vmul.f32 %v16064_v54, %v6029_v52  ;;  %v5042_v13 = vpop.f32.mrf.mxu0  ;;  %v3920_v10 = vmax.f32 %v3330_v41, 0.0  ;;  %v7585_v44 = vrot.slane %v7584_v14, 1 }
 0x3c2   :  { %v7614_v32 = vadd.f32 %v7613_v56, %v7612_v16  ;;  %v7643_v61 = vrot.slane %v7642_v27, 2  ;;  %v7230_v3 = vmul.f32 %v16064_v54, %v6030_v62  ;;  %v6031_v20 = vmax.f32 %v5041_v47, 0.0  ;;  %v3339_v47 = vpop.f32.mrf.mxu1 }
 0x3c3   :  { %v7647_v30 = vadd.f32 %v7229_v12, %v7227_v60  ;;  %v5043_v2 = vadd.f32 %v5042_v13, %v13736_v34  ;;  %v5046_v49 = vpop.f32.mrf.mxu0  ;;  %8977 = vmatmul.mubr.msk.f32.gmra.mxu0 %vm2149_vm2, %v3919_v57  ;;  %v7556_v16 = vadd.f32 %v7555_v48, %v7554_v55  ;;  %v7586_v57 = vadd.f32 %v7585_v44, %v7584_v14  ;;  %v16066_v44 = vld [vmem:[#allocation95_spill] sm:$0xff] }
 0x3c4   :  { %v7615_v8 = vrot.slane %v7614_v32, 1  ;;  %v7644_v4 = vadd.f32 %v7643_v61, %v7642_v27  ;;  %v7677_v18 = vadd.f32 %v7230_v3, %v7228_v37  ;;  %v7231_v52 = vmul.f32 %v16065_v45, %v6031_v20  ;;  %5338 = vmatprep.mubr.f32.mxu0 %v15906_v50 }
 0x3c5   :  { %v6032_v56 = vmax.f32 %v5043_v2, 0.0  ;;  %v5047_v62 = vadd.f32 %v5046_v49, %v13729_v6  ;;  %v5048_v41 = vpop.f32.mrf.mxu0  ;;  %v3340_v3 = vadd.f32 %v13986_v59, %v3339_v47  ;;  %v14289_v47 = vld [vmem:[%s15506_s4] ss:$0 sm:$0xff] }
 0x3c6   :  { %v7616_v60 = vadd.f32 %v7615_v8, %v7614_v32  ;;  %v7645_v54 = vrot.slane %v7644_v4, 1  ;;  %v7648_v12 = vadd.f32 %v7647_v30, %v7231_v52  ;;  %v5049_v13 = vadd.f32 %v5048_v41, %v13736_v34  ;;  %v10066_v8 = vpop.f32.mrf.mxu1 }
 0x3c7   :  { %v7232_v27 = vmul.f32 %v16065_v45, %v6032_v56  ;;  %v6033_v37 = vmax.f32 %v5047_v62, 0.0  ;;  %v5052_v61 = vpop.f32.mrf.mxu0  ;;  %8978 = vmatmul.mubr.msk.f32.gmra.mxu0 %vm2149_vm2, %v3920_v10  ;;  %v3921_v32 = vmax.f32 %v14251_v11, 0.0  ;;  %v16067_v62 = vld [vmem:[#allocation49_spill] sm:$0xff] }
 0x3c8   :  { %v7646_v20 = vadd.f32 %v7645_v54, %v7644_v4  ;;  %v14270_v55 = vsel %vm8062_vm3, %v7616_v60, %v7556_v16  ;;  %v6034_v48 = vmax.f32 %v5049_v13, 0.0  ;;  %v5053_v49 = vadd.f32 %v5052_v61, %v13729_v6  ;;  %5344 = vmatprep.mubr.f32.mxu0 %v15906_v50  ;;  %v3349_v13 = vpop.f32.mrf.mxu1 }
 0x3c9   :  { %v7678_v14 = vadd.f32 %v7677_v18, %v7232_v27  ;;  %v7233_v30 = vmul.f32 %v16066_v44, %v6033_v37  ;;  %v5054_v2 = vpop.f32.mrf.mxu0  ;;  %v3345_v60 = vadd.f32 %v14289_v47, %v10063_v36  ;;  %v3922_v54 = vmax.f32 %v3340_v3, 0.0 }
 0x3ca   :  { %v14278_v10 = vsel %vm8062_vm3, %v7646_v20, %v7586_v57  ;;  %v7234_v4 = vmul.f32 %v16066_v44, %v6034_v48  ;;  %v6035_v45 = vmax.f32 %v5053_v49, 0.0  ;;  %v5055_v52 = vadd.f32 %v5054_v2, %v13736_v34  ;;  %v16068_v49 = vld [vmem:[#allocation57_spill] sm:$0xff]  ;;  %v10069_v2 = vpop.f32.mrf.mxu1 }
 0x3cb   :  { %v7649_v16 = vadd.f32 %v7648_v12, %v7233_v30  ;;  %v5058_v56 = vpop.f32.mrf.mxu0  ;;  %8979 = vmatmul.mubr.msk.f32.gmra.mxu0 %vm2149_vm2, %v3921_v32  ;;  %v3923_v36 = vmax.f32 %v3345_v60, 0.0  ;;  %v3350_v3 = vadd.f32 %v14289_v47, %v3349_v13  ;;  %v3355_v60 = vadd.f32 %v14289_v47, %v10066_v8 }
 0x3cc   :  { %v7679_v11 = vadd.f32 %v7678_v14, %v7234_v4  ;;  %v7235_v59 = vmul.f32 %v16067_v62, %v6035_v45  ;;  %v6036_v18 = vmax.f32 %v5055_v52, 0.0  ;;  %v5059_v41 = vadd.f32 %v5058_v56, %v13729_v6  ;;  %5350 = vmatprep.mubr.f32.mxu0 %v15906_v50  ;;  %v3359_v13 = vpop.f32.mrf.mxu1 }
 0x3cd   :  { %v5060_v12 = vpop.f32.mrf.mxu0  ;;  %v3925_v8 = vmax.f32 %v3355_v60, 0.0  ;;  %v3365_v60 = vadd.f32 %v14289_v47, %v10069_v2 }
 0x3ce   :  { %v7650_v57 = vadd.f32 %v7649_v16, %v7235_v59  ;;  %v7236_v27 = vmul.f32 %v16067_v62, %v6036_v18  ;;  %v6037_v37 = vmax.f32 %v5059_v41, 0.0  ;;  %v5061_v61 = vadd.f32 %v5060_v12, %v13736_v34  ;;  %v16069_v62 = vld [vmem:[#allocation120_spill] sm:$0xff] }
 0x3cf   :  { %v5064_v20 = vpop.f32.mrf.mxu0  ;;  %8980 = vmatmul.mubr.msk.f32.gmra.mxu0 %vm2149_vm2, %v3922_v54  ;;  %v3924_v54 = vmax.f32 %v3350_v3, 0.0  ;;  %v3927_v2 = vmax.f32 %v3365_v60, 0.0 }
 0x3d0   :  { %v7680_v48 = vadd.f32 %v7679_v11, %v7236_v27  ;;  %v7237_v32 = vmul.f32 %v16068_v49, %v6037_v37  ;;  %v6038_v14 = vmax.f32 %v5061_v61, 0.0  ;;  %v5065_v44 = vadd.f32 %v5064_v20, %v13729_v6  ;;  %5356 = vmatprep.mubr.f32.mxu0 %v15906_v50 }
 0x3d1   :  { %v5066_v30 = vpop.f32.mrf.mxu0 }
 0x3d2   :  { %v7651_v4 = vadd.f32 %v7650_v57, %v7237_v32  ;;  %v7238_v45 = vmul.f32 %v16068_v49, %v6038_v14  ;;  %v6039_v52 = vmax.f32 %v5065_v44, 0.0  ;;  %v5067_v16 = vadd.f32 %v5066_v30, %v13736_v34  ;;  %v16070_v49 = vld [vmem:[#allocation68_spill] sm:$0xff]  ;;  %v10072_v30 = vpop.f32.mrf.mxu1 }
 0x3d3   :  { %v5070_v56 = vpop.f32.mrf.mxu0  ;;  %8981 = vmatmul.mubr.msk.f32.gmra.mxu0 %vm2149_vm2, %v3923_v36  ;;  %v3360_v36 = vadd.f32 %v14289_v47, %v3359_v13  ;;  %v3375_v60 = vadd.f32 %v14289_v47, %v10072_v30 }
 0x3d4   :  { %v7681_v11 = vadd.f32 %v7680_v48, %v7238_v45  ;;  %v7239_v59 = vmul.f32 %v16069_v62, %v6039_v52  ;;  %v6040_v18 = vmax.f32 %v5067_v16, 0.0  ;;  %v5071_v41 = vadd.f32 %v5070_v56, %v13729_v6  ;;  %5362 = vmatprep.mubr.f32.mxu0 %v15906_v50  ;;  %v3369_v13 = vpop.f32.mrf.mxu1 }
 0x3d5   :  { %v5072_v12 = vpop.f32.mrf.mxu0  ;;  %v3929_v30 = vmax.f32 %v3375_v60, 0.0 }
 0x3d6   :  { %v7652_v57 = vadd.f32 %v7651_v4, %v7239_v59  ;;  %v7240_v27 = vmul.f32 %v16069_v62, %v6040_v18  ;;  %v6041_v37 = vmax.f32 %v5071_v41, 0.0  ;;  %v5073_v61 = vadd.f32 %v5072_v12, %v13736_v34  ;;  %v16071_v62 = vld [vmem:[#allocation130_spill] sm:$0xff] }
 0x3d7   :  { %v5076_v20 = vpop.f32.mrf.mxu0  ;;  %8982 = vmatmul.mubr.msk.f32.gmra.mxu0 %vm2149_vm2, %v3924_v54  ;;  %v3926_v54 = vmax.f32 %v3360_v36, 0.0 }
 0x3d8   :  { %v7682_v48 = vadd.f32 %v7681_v11, %v7240_v27  ;;  %v7241_v32 = vmul.f32 %v16070_v49, %v6041_v37  ;;  %v6042_v14 = vmax.f32 %v5073_v61, 0.0  ;;  %v5077_v44 = vadd.f32 %v5076_v20, %v13729_v6  ;;  %5368 = vmatprep.mubr.f32.mxu0 %v15906_v50 }
 0x3d9   :  { %v5078_v3 = vpop.f32.mrf.mxu0 }
 0x3da   :  { %v7653_v4 = vadd.f32 %v7652_v57, %v7241_v32  ;;  %v7242_v45 = vmul.f32 %v16070_v49, %v6042_v14  ;;  %v6043_v52 = vmax.f32 %v5077_v44, 0.0  ;;  %v5079_v16 = vadd.f32 %v5078_v3, %v13736_v34  ;;  %v16072_v49 = vld [vmem:[#allocation136_spill] sm:$0xff]  ;;  %v10075_v3 = vpop.f32.mrf.mxu1 }
 0x3db   :  { %v5082_v56 = vpop.f32.mrf.mxu0  ;;  %8983 = vmatmul.mubr.msk.f32.gmra.mxu0 %vm2149_vm2, %v3925_v8  ;;  %v3370_v8 = vadd.f32 %v14289_v47, %v3369_v13  ;;  %v3385_v60 = vadd.f32 %v14289_v47, %v10075_v3 }
 0x3dc   :  { %v7683_v11 = vadd.f32 %v7682_v48, %v7242_v45  ;;  %v7243_v59 = vmul.f32 %v16071_v62, %v6043_v52  ;;  %v6044_v18 = vmax.f32 %v5079_v16, 0.0  ;;  %v5083_v41 = vadd.f32 %v5082_v56, %v13729_v6  ;;  %5374 = vmatprep.mubr.f32.mxu0 %v15906_v50  ;;  %v3379_v13 = vpop.f32.mrf.mxu1 }
 0x3dd   :  { %v5084_v12 = vpop.f32.mrf.mxu0  ;;  %v3931_v3 = vmax.f32 %v3385_v60, 0.0 }
 0x3de   :  { %v7654_v57 = vadd.f32 %v7653_v4, %v7243_v59  ;;  %v7244_v27 = vmul.f32 %v16071_v62, %v6044_v18  ;;  %v6045_v37 = vmax.f32 %v5083_v41, 0.0  ;;  %v5085_v61 = vadd.f32 %v5084_v12, %v13736_v34  ;;  %v16073_v62 = vld [vmem:[#allocation142_spill] sm:$0xff] }
 0x3df   :  { %v5088_v20 = vpop.f32.mrf.mxu0  ;;  %8984 = vmatmul.mubr.msk.f32.gmra.mxu0 %vm2149_vm2, %v3926_v54  ;;  %v3928_v54 = vmax.f32 %v3370_v8, 0.0 }
 0x3e0   :  { %v7684_v48 = vadd.f32 %v7683_v11, %v7244_v27  ;;  %v7245_v32 = vmul.f32 %v16072_v49, %v6045_v37  ;;  %v6046_v14 = vmax.f32 %v5085_v61, 0.0  ;;  %v5089_v44 = vadd.f32 %v5088_v20, %v13729_v6  ;;  %5380 = vmatprep.mubr.f32.mxu0 %v15906_v50 }
 0x3e1   :  { %v5090_v36 = vpop.f32.mrf.mxu0 }
 0x3e2   :  { %v7655_v4 = vadd.f32 %v7654_v57, %v7245_v32  ;;  %v7246_v45 = vmul.f32 %v16072_v49, %v6046_v14  ;;  %v6047_v52 = vmax.f32 %v5089_v44, 0.0  ;;  %v5091_v16 = vadd.f32 %v5090_v36, %v13736_v34  ;;  %v16074_v49 = vld [vmem:[#allocation15_spill] sm:$0xff]  ;;  %v10078_v36 = vpop.f32.mrf.mxu1 }
 0x3e3   :  { %v5094_v56 = vpop.f32.mrf.mxu0  ;;  %8985 = vmatmul.mubr.msk.f32.gmra.mxu0 %vm2149_vm2, %v3927_v2  ;;  %v3380_v2 = vadd.f32 %v14289_v47, %v3379_v13  ;;  %v3395_v60 = vadd.f32 %v14289_v47, %v10078_v36 }
 0x3e4   :  { %v7685_v11 = vadd.f32 %v7684_v48, %v7246_v45  ;;  %v7247_v59 = vmul.f32 %v16073_v62, %v6047_v52  ;;  %v6048_v18 = vmax.f32 %v5091_v16, 0.0  ;;  %v5095_v41 = vadd.f32 %v5094_v56, %v13729_v6  ;;  %5386 = vmatprep.mubr.f32.mxu0 %v15906_v50  ;;  %v3389_v13 = vpop.f32.mrf.mxu1 }
 0x3e5   :  { %v5096_v12 = vpop.f32.mrf.mxu0  ;;  %v3933_v36 = vmax.f32 %v3395_v60, 0.0 }
 0x3e6   :  { %v7656_v57 = vadd.f32 %v7655_v4, %v7247_v59  ;;  %v7248_v27 = vmul.f32 %v16073_v62, %v6048_v18  ;;  %v6049_v37 = vmax.f32 %v5095_v41, 0.0  ;;  %v5097_v61 = vadd.f32 %v5096_v12, %v13736_v34  ;;  %v16075_v62 = vld [vmem:[#allocation146_spill] sm:$0xff] }
 0x3e7   :  { %v5100_v20 = vpop.f32.mrf.mxu0  ;;  %8986 = vmatmul.mubr.msk.f32.gmra.mxu0 %vm2149_vm2, %v3928_v54  ;;  %v3930_v54 = vmax.f32 %v3380_v2, 0.0 }
 0x3e8   :  { %v7686_v48 = vadd.f32 %v7685_v11, %v7248_v27  ;;  %v7249_v32 = vmul.f32 %v16074_v49, %v6049_v37  ;;  %v6050_v14 = vmax.f32 %v5097_v61, 0.0  ;;  %v5101_v44 = vadd.f32 %v5100_v20, %v13729_v6  ;;  %5392 = vmatprep.mubr.f32.mxu0 %v15906_v50 }
 0x3e9   :  { %v5102_v8 = vpop.f32.mrf.mxu0 }
 0x3ea   :  { %v7657_v4 = vadd.f32 %v7656_v57, %v7249_v32  ;;  %v7250_v45 = vmul.f32 %v16074_v49, %v6050_v14  ;;  %v6051_v52 = vmax.f32 %v5101_v44, 0.0  ;;  %v5103_v16 = vadd.f32 %v5102_v8, %v13736_v34  ;;  %v16076_v49 = vld [vmem:[#allocation25_spill] sm:$0xff]  ;;  %v10081_v8 = vpop.f32.mrf.mxu1 }
 0x3eb   :  { %v5106_v56 = vpop.f32.mrf.mxu0  ;;  %8987 = vmatmul.mubr.msk.f32.gmra.mxu0 %vm2149_vm2, %v3929_v30  ;;  %v3390_v30 = vadd.f32 %v14289_v47, %v3389_v13 }
 0x3ec   :  { %v7687_v11 = vadd.f32 %v7686_v48, %v7250_v45  ;;  %v7251_v59 = vmul.f32 %v16075_v62, %v6051_v52  ;;  %v6052_v18 = vmax.f32 %v5103_v16, 0.0  ;;  %v5107_v41 = vadd.f32 %v5106_v56, %v13729_v6  ;;  %5398 = vmatprep.mubr.f32.mxu0 %v15906_v50  ;;  %v3399_v13 = vpop.f32.mrf.mxu1 }
 0x3ed   :  { %v5108_v12 = vpop.f32.mrf.mxu0 }
 0x3ee   :  { %v7658_v57 = vadd.f32 %v7657_v4, %v7251_v59  ;;  %v7252_v27 = vmul.f32 %v16075_v62, %v6052_v18  ;;  %v6053_v37 = vmax.f32 %v5107_v41, 0.0  ;;  %v5109_v61 = vadd.f32 %v5108_v12, %v13736_v34  ;;  %v16077_v62 = vld [vmem:[#allocation97_spill] sm:$0xff] }
 0x3ef   :  { %v5112_v20 = vpop.f32.mrf.mxu0  ;;  %8988 = vmatmul.mubr.msk.f32.gmra.mxu0 %vm2149_vm2, %v3930_v54  ;;  %v3932_v54 = vmax.f32 %v3390_v30, 0.0 }
 0x3f0   :  { %v7688_v48 = vadd.f32 %v7687_v11, %v7252_v27  ;;  %v7253_v32 = vmul.f32 %v16076_v49, %v6053_v37  ;;  %v6054_v14 = vmax.f32 %v5109_v61, 0.0  ;;  %v5113_v44 = vadd.f32 %v5112_v20, %v13729_v6  ;;  %5404 = vmatprep.mubr.f32.mxu0 %v15906_v50 }
 0x3f1   :  { %v5114_v2 = vpop.f32.mrf.mxu0 }
 0x3f2   :  { %v7659_v4 = vadd.f32 %v7658_v57, %v7253_v32  ;;  %v7254_v45 = vmul.f32 %v16076_v49, %v6054_v14  ;;  %v6055_v52 = vmax.f32 %v5113_v44, 0.0  ;;  %v5115_v16 = vadd.f32 %v5114_v2, %v13736_v34  ;;  %v16078_v49 = vld [vmem:[#allocation48_spill] sm:$0xff]  ;;  %v10084_v2 = vpop.f32.mrf.mxu1 }
 0x3f3   :  { %v5118_v56 = vpop.f32.mrf.mxu0  ;;  %8989 = vmatmul.mubr.msk.f32.gmra.mxu0 %vm2149_vm2, %v3931_v3  ;;  %v3400_v3 = vadd.f32 %v14289_v47, %v3399_v13 }
 0x3f4   :  { %v7689_v11 = vadd.f32 %v7688_v48, %v7254_v45  ;;  %v7255_v59 = vmul.f32 %v16077_v62, %v6055_v52  ;;  %v6056_v18 = vmax.f32 %v5115_v16, 0.0  ;;  %v5119_v41 = vadd.f32 %v5118_v56, %v13729_v6  ;;  %5410 = vmatprep.mubr.f32.mxu0 %v15906_v50 }
 0x3f5   :  { %v5120_v12 = vpop.f32.mrf.mxu0  ;;  %v3934_v60 = vmax.f32 %v3400_v3, 0.0 }
 0x3f6   :  { %v7660_v57 = vadd.f32 %v7659_v4, %v7255_v59  ;;  %v7256_v27 = vmul.f32 %v16077_v62, %v6056_v18  ;;  %v6057_v37 = vmax.f32 %v5119_v41, 0.0  ;;  %v5121_v61 = vadd.f32 %v5120_v12, %v13736_v34  ;;  %v3409_v12 = vpop.f32.mrf.mxu1 }
 0x3f7   :  { %v5124_v20 = vpop.f32.mrf.mxu0  ;;  %8990 = vmatmul.mubr.msk.f32.gmra.mxu0 %vm2149_vm2, %v3932_v54  ;;  %v3405_v41 = vadd.f32 %v14289_v47, %v10081_v8 }
 0x3f8   :  { %v7690_v48 = vadd.f32 %v7689_v11, %v7256_v27  ;;  %v7257_v32 = vmul.f32 %v16078_v49, %v6057_v37  ;;  %v6058_v14 = vmax.f32 %v5121_v61, 0.0  ;;  %v5125_v44 = vadd.f32 %v5124_v20, %v13729_v6  ;;  %5416 = vmatprep.mubr.f32.mxu0 %v15906_v50 }
 0x3f9   :  { %v5126_v30 = vpop.f32.mrf.mxu0  ;;  %v3935_v8 = vmax.f32 %v3405_v41, 0.0 }
 0x3fa   :  { %v7661_v4 = vadd.f32 %v7660_v57, %v7257_v32  ;;  %v7258_v45 = vmul.f32 %v16078_v49, %v6058_v14  ;;  %v6059_v52 = vmax.f32 %v5125_v44, 0.0  ;;  %v5127_v16 = vadd.f32 %v5126_v30, %v13736_v34 }
 0x3fb   :  { %v5130_v56 = vpop.f32.mrf.mxu0  ;;  %8991 = vmatmul.mubr.msk.f32.gmra.mxu0 %vm2149_vm2, %v3933_v36  ;;  %v3410_v14 = vadd.f32 %v14289_v47, %v3409_v12  ;;  %v10087_v36 = vpop.f32.mrf.mxu1 }
 0x3fc   :  { %v7691_v11 = vadd.f32 %v7690_v48, %v7258_v45  ;;  %v7259_v62 = vmul.f32 %v13793_v21, %v6059_v52  ;;  %v6060_v59 = vmax.f32 %v5127_v16, 0.0  ;;  %v5131_v18 = vadd.f32 %v5130_v56, %v13729_v6  ;;  %5422 = vmatprep.mubr.f32.mxu0 %v15906_v50 }
 0x3fd   :  { %v5132_v54 = vpop.f32.mrf.mxu0  ;;  %v3419_v41 = vpop.f32.mrf.mxu1 }
 0x3fe   :  { %v7662_v13 = vadd.f32 %v7661_v4, %v7259_v62  ;;  %v7260_v57 = vmul.f32 %v13793_v21, %v6060_v59  ;;  %v6061_v27 = vmax.f32 %v5131_v18, 0.0  ;;  %v5133_v37 = vadd.f32 %v5132_v54, %v13736_v34 }
 0x3ff   :  { %v5136_v61 = vpop.f32.mrf.mxu0  ;;  %8992 = vmatmul.mubr.msk.f32.gmra.mxu0 %vm2149_vm2, %v3934_v60  ;;  %v3415_v62 = vadd.f32 %v14289_v47, %v10084_v2  ;;  %v3936_v59 = vmax.f32 %v3410_v14, 0.0 }
 0x400   :  { %v7692_v20 = vadd.f32 %v7691_v11, %v7260_v57  ;;  %v7261_v48 = vmul.f32 %v13857_v5, %v6061_v27  ;;  %v6062_v49 = vmax.f32 %v5133_v37, 0.0  ;;  %v5137_v32 = vadd.f32 %v5136_v61, %v13729_v6  ;;  %5428 = vmatprep.mubr.f32.mxu0 %v15906_v50 }
 0x401   :  { %v5138_v44 = vpop.f32.mrf.mxu0  ;;  %v3937_v2 = vmax.f32 %v3415_v62, 0.0 }
 0x402   :  { %v7663_v21 = vadd.f32 %v7662_v13, %v7261_v48  ;;  %v7262_v3 = vmul.f32 %v13857_v5, %v6062_v49  ;;  %v6063_v30 = vmax.f32 %v5137_v32, 0.0  ;;  %v5139_v4 = vadd.f32 %v5138_v44, %v13736_v34  ;;  %v10090_v49 = vpop.f32.mrf.mxu1 }
 0x403   :  { %v5142_v45 = vpop.f32.mrf.mxu0  ;;  %8993 = vmatmul.mubr.msk.f32.gmra.mxu0 %vm2149_vm2, %v3935_v8 }
 0x404   :  { %v7693_v52 = vadd.f32 %v7692_v20, %v7262_v3  ;;  %v7263_v16 = vmul.f32 %v13921_v19, %v6063_v30  ;;  %v6064_v56 = vmax.f32 %v5139_v4, 0.0  ;;  %v5143_v11 = vadd.f32 %v5142_v45, %v13729_v6  ;;  %5434 = vmatprep.mubr.f32.mxu0 %v15906_v50 }
 0x405   :  { %v5144_v18 = vpop.f32.mrf.mxu0  ;;  %v3420_v20 = vadd.f32 %v14289_v47, %v3419_v41  ;;  %v3425_v45 = vadd.f32 %v14289_v47, %v10087_v36 }
 0x406   :  { %v7664_v5 = vadd.f32 %v7663_v21, %v7263_v16  ;;  %v7264_v60 = vmul.f32 %v13921_v19, %v6064_v56  ;;  %v6065_v54 = vmax.f32 %v5143_v11, 0.0  ;;  %v5145_v12 = vadd.f32 %v5144_v18, %v13736_v34  ;;  %v3429_v56 = vpop.f32.mrf.mxu1 }
 0x407   :  { %v5148_v13 = vpop.f32.mrf.mxu0  ;;  %8994 = vmatmul.mubr.msk.f32.gmra.mxu0 %vm2149_vm2, %v3936_v59  ;;  %v3939_v36 = vmax.f32 %v3425_v45, 0.0 }
 0x408   :  { %v7694_v57 = vadd.f32 %v7693_v52, %v7264_v60  ;;  %v7265_v27 = vmul.f32 %v13990_v22, %v6065_v54  ;;  %v6066_v37 = vmax.f32 %v5145_v12, 0.0  ;;  %v5149_v61 = vadd.f32 %v5148_v13, %v13729_v6  ;;  %5440 = vmatprep.mubr.f32.mxu0 %v15906_v50 }
 0x409   :  { %v5150_v48 = vpop.f32.mrf.mxu0  ;;  %v3938_v52 = vmax.f32 %v3420_v20, 0.0  ;;  %v3430_v12 = vadd.f32 %v14289_v47, %v3429_v56  ;;  %v14414_v20 = vpop.permute.xlu0 %6916 }
 0x40a   :  { %v7665_v19 = vadd.f32 %v7664_v5, %v7265_v27  ;;  %v7266_v32 = vmul.f32 %v13990_v22, %v6066_v37  ;;  %v6067_v8 = vmax.f32 %v5149_v61, 0.0  ;;  %v5151_v14 = vadd.f32 %v5150_v48, %v13736_v34 }
 0x40b   :  { %v5154_v44 = vpop.f32.mrf.mxu0  ;;  %8995 = vmatmul.mubr.msk.f32.gmra.mxu0 %vm2149_vm2, %v3937_v2 }
 0x40c   :  { %v7695_v21 = vadd.f32 %v7694_v57, %v7266_v32  ;;  %v7267_v3 = vmul.f32 %v14050_v15, %v6067_v8  ;;  %v6068_v30 = vmax.f32 %v5151_v14, 0.0  ;;  %v5155_v4 = vadd.f32 %v5154_v44, %v13729_v6  ;;  %5446 = vmatprep.mubr.f32.mxu0 %v15906_v50  ;;  %v10093_v57 = vpop.f32.mrf.mxu1 }
 0x40d   :  { %v5156_v16 = vpop.f32.mrf.mxu0  ;;  %v3435_v14 = vadd.f32 %v14289_v47, %v10090_v49  ;;  %v3940_v44 = vmax.f32 %v3430_v12, 0.0 }
 0x40e   :  { %v7666_v22 = vadd.f32 %v7665_v19, %v7267_v3  ;;  %v7268_v11 = vmul.f32 %v14050_v15, %v6068_v30  ;;  %v6069_v62 = vmax.f32 %v5155_v4, 0.0  ;;  %v5157_v59 = vadd.f32 %v5156_v16, %v13736_v34 }
 0x40f   :  { %v5160_v18 = vpop.f32.mrf.mxu0  ;;  %8996 = vmatmul.mubr.msk.f32.gmra.mxu0 %vm2149_vm2, %v3938_v52  ;;  %v3941_v49 = vmax.f32 %v3435_v14, 0.0 }
 0x410   :  { %v7696_v41 = vadd.f32 %v7695_v21, %v7268_v11  ;;  %v7269_v5 = vmul.f32 %v14106_v58, %v6069_v62  ;;  %v6070_v60 = vmax.f32 %v5157_v59, 0.0  ;;  %v5161_v54 = vadd.f32 %v5160_v18, %v13729_v6  ;;  %5452 = vmatprep.mubr.f32.mxu0 %v15906_v50  ;;  %v3439_v21 = vpop.f32.mrf.mxu1  ;;  %v6625_v18 = vpop.permute.xlu0 %6624 }
 0x411   :  { %v5162_v13 = vpop.f32.mrf.mxu0  ;;  %v3440_v62 = vadd.f32 %v14289_v47, %v3439_v21 }
 0x412   :  { %v7667_v15 = vadd.f32 %v7666_v22, %v7269_v5  ;;  %v7270_v27 = vmul.f32 %v14106_v58, %v6070_v60  ;;  %v6071_v37 = vmax.f32 %v5161_v54, 0.0  ;;  %v5163_v61 = vadd.f32 %v5162_v13, %v13736_v34 }
 0x413   :  { %v5166_v2 = vpop.f32.mrf.mxu0  ;;  %8997 = vmatmul.mubr.msk.f32.gmra.mxu0 %vm2149_vm2, %v3939_v36  ;;  %v8038_v36 = vld [vmem:[%s15509_s7 + $0xf8] sm:$0xff]  ;;  %v3445_v13 = vadd.f32 %v14289_v47, %v10093_v57 }
 0x414   :  { %v7697_v48 = vadd.f32 %v7696_v41, %v7270_v27  ;;  %v7271_v19 = vmul.f32 %v14159_v1, %v6071_v37  ;;  %v6072_v32 = vmax.f32 %v5163_v61, 0.0  ;;  %v5167_v8 = vadd.f32 %v5166_v2, %v13729_v6  ;;  %5458 = vmatprep.mubr.f32.mxu0 %v15906_v50  ;;  %9500 = vmatprep.subr.mxu1 %v8038_v36  ;;  %v16079_v36 = vld [vmem:[#allocation88_spill] sm:$0xff] }
 0x415   :  { %v5168_v58 = vpop.f32.mrf.mxu0  ;;  %v3942_v61 = vmax.f32 %v3440_v62, 0.0 }
 0x416   :  { %v7668_v3 = vadd.f32 %v7667_v15, %v7271_v19  ;;  %v7272_v30 = vmul.f32 %v14159_v1, %v6072_v32  ;;  %v6073_v4 = vmax.f32 %v5167_v8, 0.0  ;;  %v5169_v45 = vadd.f32 %v5168_v58, %v13736_v34  ;;  %v10096_v1 = vpop.f32.mrf.mxu1 }
 0x417   :  { %v5172_v52 = vpop.f32.mrf.mxu0  ;;  %8998 = vmatmul.mubr.msk.f32.gmra.mxu0 %vm2149_vm2, %v3940_v44  ;;  %v3943_v44 = vmax.f32 %v3445_v13, 0.0 }
 0x418   :  { %v7698_v16 = vadd.f32 %v7697_v48, %v7272_v30  ;;  %v7273_v56 = vmul.f32 %v14209_v7, %v6073_v4  ;;  %v6074_v22 = vmax.f32 %v5169_v45, 0.0  ;;  %v5173_v11 = vadd.f32 %v5172_v52, %v13729_v6  ;;  %5464 = vmatprep.mubr.f32.mxu0 %v15906_v50  ;;  %v3449_v19 = vpop.f32.mrf.mxu1 }
 0x419   :  { %v5174_v59 = vpop.f32.mrf.mxu0 }
 0x41a   :  { %v7669_v41 = vadd.f32 %v7668_v3, %v7273_v56  ;;  %v7274_v5 = vmul.f32 %v14209_v7, %v6074_v22  ;;  %v6075_v60 = vmax.f32 %v5173_v11, 0.0  ;;  %v5175_v54 = vadd.f32 %v5174_v59, %v13736_v34  ;;  %v8022_v7 = vld [vmem:[%s15509_s7 + $0x78] sm:$0xff] }
 0x41b   :  { %v5178_v12 = vpop.f32.mrf.mxu0  ;;  %8999 = vmatmul.mubr.msk.f32.gmra.mxu0 %vm2149_vm2, %v3941_v49  ;;  %9501 = vmatpush3.msra.mxu1 %v8022_v7  ;;  %v3450_v3 = vadd.f32 %v14289_v47, %v3449_v19  ;;  %v3455_v49 = vadd.f32 %v14289_v47, %v10096_v1 }
 0x41c   :  { %v6076_v15 = vmax.f32 %v5175_v54, 0.0  ;;  %v7275_v27 = vmul.f32 %v6625_v18, %v6075_v60  ;;  %v7699_v37 = vadd.f32 %v7698_v16, %v7274_v5  ;;  %5470 = vmatprep.mubr.f32.mxu0 %v15906_v50  ;;  %v5179_v2 = vadd.f32 %v5178_v12, %v13729_v6  ;;  %v10099_v16 = vpop.f32.mrf.mxu1 }
 0x41d   :  { %v5180_v48 = vpop.f32.mrf.mxu0  ;;  %v3944_v54 = vmax.f32 %v3450_v3, 0.0  ;;  %v3945_v19 = vmax.f32 %v3455_v49, 0.0 }
 0x41e   :  { %v7276_v32 = vmul.f32 %v6625_v18, %v6076_v15  ;;  %v7670_v8 = vadd.f32 %v7669_v41, %v7275_v27  ;;  %v5181_v14 = vadd.f32 %v5180_v48, %v13736_v34  ;;  %v6077_v30 = vmax.f32 %v5179_v2, 0.0  ;;  %v16080_v15 = vld [vmem:[#allocation73_spill] sm:$0xff]  ;;  %v3459_v1 = vpop.f32.mrf.mxu1 }
 0x41f   :  { %v5184_v57 = vpop.f32.mrf.mxu0  ;;  %9000 = vmatmul.mubr.msk.f32.gmra.mxu0 %vm2149_vm2, %v3942_v61 }
 0x420   :  { %v7671_v58 = vrot.slane %v7670_v8, 4  ;;  %v7700_v21 = vadd.f32 %v7699_v37, %v7276_v32  ;;  %5476 = vmatprep.mubr.f32.mxu0 %v15906_v50  ;;  %v6078_v4 = vmax.f32 %v5181_v14, 0.0  ;;  %v5185_v45 = vadd.f32 %v5184_v57, %v13729_v6 }
 0x421   :  { %v5186_v52 = vpop.f32.mrf.mxu0  ;;  %v7277_v12 = vmul.f32 %v16079_v36, %v6077_v30  ;;  %v3460_v30 = vadd.f32 %v14289_v47, %v3459_v1 }
 0x422   :  { %v7672_v56 = vadd.f32 %v7671_v58, %v7670_v8  ;;  %v7701_v22 = vrot.slane %v7700_v21, 4  ;;  %v5187_v11 = vadd.f32 %v5186_v52, %v13736_v34  ;;  %v6079_v62 = vmax.f32 %v5185_v45, 0.0 }
 0x423   :  { %v5190_v59 = vpop.f32.mrf.mxu0  ;;  %9001 = vmatmul.mubr.msk.f32.gmra.mxu0 %vm2149_vm2, %v3943_v44  ;;  %v7278_v13 = vmul.f32 %v16079_v36, %v6078_v4 }
 0x424   :  { %v7673_v18 = vrot.slane %v7672_v56, 2  ;;  %v7702_v41 = vadd.f32 %v7701_v22, %v7700_v21  ;;  %v6080_v5 = vmax.f32 %v5187_v11, 0.0  ;;  %v5191_v60 = vadd.f32 %v5190_v59, %v13729_v6  ;;  %5482 = vmatprep.mubr.f32.mxu0 %v15906_v50  ;;  %v16081_v21 = vld [vmem:[#allocation76_spill] sm:$0xff] }
 0x425   :  { %v7279_v27 = vmul.f32 %v16080_v15, %v6079_v62  ;;  %v5192_v37 = vpop.f32.mrf.mxu0 }
 0x426   :  { %v7674_v7 = vadd.f32 %v7673_v18, %v7672_v56  ;;  %v7703_v61 = vrot.slane %v7702_v41, 2  ;;  %v7280_v2 = vmul.f32 %v16080_v15, %v6080_v5  ;;  %v6081_v48 = vmax.f32 %v5191_v60, 0.0  ;;  %v10102_v56 = vpop.f32.mrf.mxu1 }
 0x427   :  { %v7707_v32 = vadd.f32 %v7279_v27, %v7277_v12  ;;  %v5193_v8 = vadd.f32 %v5192_v37, %v13736_v34  ;;  %v5196_v14 = vpop.f32.mrf.mxu0  ;;  %9002 = vmatmul.mubr.msk.f32.gmra.mxu0 %vm2149_vm2, %v3944_v54  ;;  %v3465_v12 = vadd.f32 %v14289_v47, %v10099_v16  ;;  %v16082_v27 = vld [vmem:[#allocation45_spill] sm:$0xff] }
 0x428   :  { %v7675_v57 = vrot.slane %v7674_v7, 1  ;;  %v7704_v44 = vadd.f32 %v7703_v61, %v7702_v41  ;;  %v7737_v58 = vadd.f32 %v7280_v2, %v7278_v13  ;;  %v7281_v3 = vmul.f32 %v16081_v21, %v6081_v48  ;;  %5488 = vmatprep.mubr.f32.mxu0 %v15906_v50 }
 0x429   :  { %v6082_v4 = vmax.f32 %v5193_v8, 0.0  ;;  %v5197_v45 = vadd.f32 %v5196_v14, %v13729_v6  ;;  %v5198_v52 = vpop.f32.mrf.mxu0  ;;  %v3946_v13 = vmax.f32 %v3460_v30, 0.0  ;;  %v16083_v8 = vld [vmem:[#allocation14_spill] sm:$0xff] }
 0x42a   :  { %v7676_v22 = vadd.f32 %v7675_v57, %v7674_v7  ;;  %v7705_v11 = vrot.slane %v7704_v44, 1  ;;  %v7708_v49 = vadd.f32 %v7707_v32, %v7281_v3  ;;  %v5199_v62 = vadd.f32 %v5198_v52, %v13736_v34  ;;  %v3469_v7 = vpop.f32.mrf.mxu1 }
 0x42b   :  { %v7282_v59 = vmul.f32 %v16081_v21, %v6082_v4  ;;  %v6083_v18 = vmax.f32 %v5197_v45, 0.0  ;;  %v5202_v41 = vpop.f32.mrf.mxu0  ;;  %9003 = vmatmul.mubr.msk.f32.gmra.mxu0 %vm2149_vm2, %v3945_v19  ;;  %v3470_v21 = vadd.f32 %v14289_v47, %v3469_v7 }
 0x42c   :  { %v7706_v5 = vadd.f32 %v7705_v11, %v7704_v44  ;;  %v14464_v60 = vsel %vm8064_vm4, %v7676_v22, %v14270_v55  ;;  %v6084_v54 = vmax.f32 %v5199_v62, 0.0  ;;  %v5203_v36 = vadd.f32 %v5202_v41, %v13729_v6  ;;  %5494 = vmatprep.mubr.f32.mxu0 %v15906_v50  ;;  %v10105_v30 = vpop.f32.mrf.mxu1  ;;  %v8037_v41 = vld [vmem:[%s15509_s7 + $0xf0] sm:$0xff] }
 0x42d   :  { %v7738_v15 = vadd.f32 %v7737_v58, %v7282_v59  ;;  %v7283_v37 = vmul.f32 %v16082_v27, %v6083_v18  ;;  %v5204_v1 = vpop.f32.mrf.mxu0  ;;  %v3947_v58 = vmax.f32 %v3465_v12, 0.0  ;;  %9502 = vmatprep.subr.mxu1 %v8037_v41 }
 0x42e   :  { %v7284_v61 = vmul.f32 %v16082_v27, %v6084_v54  ;;  %v6085_v2 = vmax.f32 %v5203_v36, 0.0  ;;  %v5205_v48 = vadd.f32 %v5204_v1, %v13736_v34  ;;  %v14474_v55 = vsel %vm8064_vm4, %v7706_v5, %v14278_v10  ;;  %v8021_v5 = vld [vmem:[%s15509_s7 + $0x70] sm:$0xff] }
 0x42f   :  { %v7709_v19 = vadd.f32 %v7708_v49, %v7283_v37  ;;  %v5208_v32 = vpop.f32.mrf.mxu0  ;;  %9004 = vmatmul.mubr.msk.f32.gmra.mxu0 %vm2149_vm2, %v3946_v13  ;;  %v16084_v49 = vld [vmem:[#allocation22_spill] sm:$0xff]  ;;  %v3475_v54 = vadd.f32 %v14289_v47, %v10102_v56  ;;  %v3948_v36 = vmax.f32 %v3470_v21, 0.0  ;;  %v3479_v13 = vpop.f32.mrf.mxu1  ;;  %9503 = vmatpush3.msra.mxu1 %v8021_v5 }
 0x430   :  { %v7739_v16 = vadd.f32 %v7738_v15, %v7284_v61  ;;  %v7285_v14 = vmul.f32 %v16083_v8, %v6085_v2  ;;  %v6086_v57 = vmax.f32 %v5205_v48, 0.0  ;;  %v5209_v44 = vadd.f32 %v5208_v32, %v13729_v6  ;;  %5500 = vmatprep.mubr.f32.mxu0 %v15906_v50  ;;  %v16085_v2 = vld [vmem:[#allocation81_spill] sm:$0xff] }
 0x431   :  { %v5210_v3 = vpop.f32.mrf.mxu0  ;;  %v3949_v32 = vmax.f32 %v3475_v54, 0.0 }
 0x432   :  { %v7710_v4 = vadd.f32 %v7709_v19, %v7285_v14  ;;  %v7286_v10 = vmul.f32 %v16083_v8, %v6086_v57  ;;  %v6087_v45 = vmax.f32 %v5209_v44, 0.0  ;;  %v5211_v52 = vadd.f32 %v5210_v3, %v13736_v34  ;;  %v10108_v14 = vpop.f32.mrf.mxu1 }
 0x433   :  { %v5214_v22 = vpop.f32.mrf.mxu0  ;;  %9005 = vmatmul.mubr.msk.f32.gmra.mxu0 %vm2149_vm2, %v3947_v58 }
 0x434   :  { %v7740_v11 = vadd.f32 %v7739_v16, %v7286_v10  ;;  %v7287_v62 = vmul.f32 %v16084_v49, %v6087_v45  ;;  %v6088_v59 = vmax.f32 %v5211_v52, 0.0  ;;  %v5215_v18 = vadd.f32 %v5214_v22, %v13729_v6  ;;  %5506 = vmatprep.mubr.f32.mxu0 %v15906_v50  ;;  %v16086_v10 = vld [vmem:[#allocation33_spill] sm:$0xff] }
 0x435   :  { %v5216_v12 = vpop.f32.mrf.mxu0  ;;  %v3480_v16 = vadd.f32 %v14289_v47, %v3479_v13  ;;  %v16087_v13 = vld [vmem:[#allocation41_spill] sm:$0xff] }
 0x436   :  { %v7711_v15 = vadd.f32 %v7710_v4, %v7287_v62  ;;  %v7288_v27 = vmul.f32 %v16084_v49, %v6088_v59  ;;  %v6089_v37 = vmax.f32 %v5215_v18, 0.0  ;;  %v5217_v1 = vadd.f32 %v5216_v12, %v13736_v34  ;;  %v3489_v59 = vpop.f32.mrf.mxu1 }
 0x437   :  { %v5220_v7 = vpop.f32.mrf.mxu0  ;;  %9006 = vmatmul.mubr.msk.f32.gmra.mxu0 %vm2149_vm2, %v3948_v36  ;;  %v3950_v49 = vmax.f32 %v3480_v16, 0.0 }
 0x438   :  { %v7741_v61 = vadd.f32 %v7740_v11, %v7288_v27  ;;  %v7289_v48 = vmul.f32 %v16085_v2, %v6089_v37  ;;  %v6090_v19 = vmax.f32 %v5217_v1, 0.0  ;;  %v5221_v56 = vadd.f32 %v5220_v7, %v13729_v6  ;;  %5512 = vmatprep.mubr.f32.mxu0 %v15906_v50 }
 0x439   :  { %v5222_v8 = vpop.f32.mrf.mxu0  ;;  %v3485_v11 = vadd.f32 %v14289_v47, %v10105_v30  ;;  %v3490_v1 = vadd.f32 %v14289_v47, %v3489_v59  ;;  %v16089_v59 = vld [vmem:[#allocation63_spill] sm:$0xff] }
 0x43a   :  { %v7712_v57 = vadd.f32 %v7711_v15, %v7289_v48  ;;  %v7290_v44 = vmul.f32 %v16085_v2, %v6090_v19  ;;  %v6091_v58 = vmax.f32 %v5221_v56, 0.0  ;;  %v5223_v21 = vadd.f32 %v5222_v8, %v13736_v34  ;;  %v16088_v8 = vld [vmem:[#allocation53_spill] sm:$0xff] }
 0x43b   :  { %v5226_v3 = vpop.f32.mrf.mxu0  ;;  %9007 = vmatmul.mubr.msk.f32.gmra.mxu0 %vm2149_vm2, %v3949_v32  ;;  %v3951_v30 = vmax.f32 %v3485_v11, 0.0 }
 0x43c   :  { %v7742_v4 = vadd.f32 %v7741_v61, %v7290_v44  ;;  %v7291_v45 = vmul.f32 %v16086_v10, %v6091_v58  ;;  %v6092_v52 = vmax.f32 %v5223_v21, 0.0  ;;  %v5227_v22 = vadd.f32 %v5226_v3, %v13729_v6  ;;  %5518 = vmatprep.mubr.f32.mxu0 %v15906_v50  ;;  %v10111_v61 = vpop.f32.mrf.mxu1 }
 0x43d   :  { %v5228_v62 = vpop.f32.mrf.mxu0  ;;  %v3495_v21 = vadd.f32 %v14289_v47, %v10108_v14  ;;  %v3952_v3 = vmax.f32 %v3490_v1, 0.0 }
 0x43e   :  { %v7713_v18 = vadd.f32 %v7712_v57, %v7291_v45  ;;  %v7292_v41 = vmul.f32 %v16086_v10, %v6092_v52  ;;  %v6093_v5 = vmax.f32 %v5227_v22, 0.0  ;;  %v5229_v54 = vadd.f32 %v5228_v62, %v13736_v34  ;;  %v3499_v10 = vpop.f32.mrf.mxu1 }
 0x43f   :  { %v5232_v36 = vpop.f32.mrf.mxu0  ;;  %9008 = vmatmul.mubr.msk.f32.gmra.mxu0 %vm2149_vm2, %v3950_v49  ;;  %v3953_v14 = vmax.f32 %v3495_v21, 0.0 }
 0x440   :  { %v7743_v12 = vadd.f32 %v7742_v4, %v7292_v41  ;;  %v7293_v15 = vmul.f32 %v16087_v13, %v6093_v5  ;;  %v6094_v27 = vmax.f32 %v5229_v54, 0.0  ;;  %v5233_v37 = vadd.f32 %v5232_v36, %v13729_v6  ;;  %5524 = vmatprep.mubr.f32.mxu0 %v15906_v50 }
 0x441   :  { %v5234_v7 = vpop.f32.mrf.mxu0  ;;  %v3500_v54 = vadd.f32 %v14289_v47, %v3499_v10 }
 0x442   :  { %v7714_v2 = vadd.f32 %v7713_v18, %v7293_v15  ;;  %v7294_v48 = vmul.f32 %v16087_v13, %v6094_v27  ;;  %v6095_v19 = vmax.f32 %v5233_v37, 0.0  ;;  %v5235_v56 = vadd.f32 %v5234_v7, %v13736_v34  ;;  %v16090_v7 = vld [vmem:[#allocation126_spill] sm:$0xff] }
 0x443   :  { %v5238_v32 = vpop.f32.mrf.mxu0  ;;  %9009 = vmatmul.mubr.msk.f32.gmra.mxu0 %vm2149_vm2, %v3951_v30 }
 0x444   :  { %v7744_v16 = vadd.f32 %v7743_v12, %v7294_v48  ;;  %v7295_v57 = vmul.f32 %v16088_v8, %v6095_v19  ;;  %v6096_v44 = vmax.f32 %v5235_v56, 0.0  ;;  %v5239_v58 = vadd.f32 %v5238_v32, %v13729_v6  ;;  %5530 = vmatprep.mubr.f32.mxu0 %v15906_v50  ;;  %v10114_v12 = vpop.f32.mrf.mxu1  ;;  %v8036_v56 = vld [vmem:[%s15509_s7 + $0xe8] sm:$0xff] }
 0x445   :  { %v5240_v4 = vpop.f32.mrf.mxu0  ;;  %v3505_v32 = vadd.f32 %v14289_v47, %v10111_v61  ;;  %9504 = vmatprep.subr.mxu1 %v8036_v56  ;;  %v16091_v47 = vld [vmem:[#allocation135_spill] sm:$0xff] }
 0x446   :  { %v7715_v45 = vadd.f32 %v7714_v2, %v7295_v57  ;;  %v7296_v52 = vmul.f32 %v16088_v8, %v6096_v44  ;;  %v6097_v22 = vmax.f32 %v5239_v58, 0.0  ;;  %v5241_v11 = vadd.f32 %v5240_v4, %v13736_v34  ;;  %v3509_v57 = vpop.f32.mrf.mxu1  ;;  %v8020_v4 = vld [vmem:[%s15509_s7 + $0x68] sm:$0xff] }
 0x447   :  { %v5244_v49 = vpop.f32.mrf.mxu0  ;;  %9010 = vmatmul.mubr.msk.f32.gmra.mxu0 %vm2149_vm2, %v3952_v3  ;;  %9505 = vmatpush3.msra.mxu1 %v8020_v4 }
 0x448   :  { %v7745_v62 = vadd.f32 %v7744_v16, %v7296_v52  ;;  %v7297_v18 = vmul.f32 %v16089_v59, %v6097_v22  ;;  %v6098_v41 = vmax.f32 %v5241_v11, 0.0  ;;  %v5245_v5 = vadd.f32 %v5244_v49, %v13729_v6  ;;  %5536 = vmatprep.mubr.f32.mxu0 %v15906_v50  ;;  %v14551_v49 = vld [vmem:[%s15506_s4] ss:$0 sm:$0xff] }
 0x449   :  { %v5246_v36 = vpop.f32.mrf.mxu0  ;;  %v3954_v16 = vmax.f32 %v3500_v54, 0.0  ;;  %v3955_v11 = vmax.f32 %v3505_v32, 0.0 }
 0x44a   :  { %v7716_v13 = vadd.f32 %v7715_v45, %v7297_v18  ;;  %v7298_v15 = vmul.f32 %v16089_v59, %v6098_v41  ;;  %v6099_v27 = vmax.f32 %v5245_v5, 0.0  ;;  %v5247_v37 = vadd.f32 %v5246_v36, %v13736_v34  ;;  %v10117_v18 = vpop.f32.mrf.mxu1 }
 0x44b   :  { %v5250_v30 = vpop.f32.mrf.mxu0  ;;  %9011 = vmatmul.mubr.msk.f32.gmra.mxu0 %vm2149_vm2, %v3953_v14 }
 0x44c   :  { %v7746_v1 = vadd.f32 %v7745_v62, %v7298_v15  ;;  %v7299_v2 = vmul.f32 %v16090_v7, %v6099_v27  ;;  %v6100_v48 = vmax.f32 %v5247_v37, 0.0  ;;  %v5251_v19 = vadd.f32 %v5250_v30, %v13729_v6  ;;  %5542 = vmatprep.mubr.f32.mxu0 %v15906_v50  ;;  %v16092_v15 = vld [vmem:[#allocation11_spill] sm:$0xff] }
 0x44d   :  { %v5252_v8 = vpop.f32.mrf.mxu0  ;;  %v3510_v62 = vadd.f32 %v14551_v49, %v3509_v57 }
 0x44e   :  { %v7717_v44 = vadd.f32 %v7716_v13, %v7299_v2  ;;  %v7300_v58 = vmul.f32 %v16090_v7, %v6100_v48  ;;  %v6101_v21 = vmax.f32 %v5251_v19, 0.0  ;;  %v5253_v3 = vadd.f32 %v5252_v8, %v13736_v34  ;;  %v3519_v48 = vpop.f32.mrf.mxu1 }
 0x44f   :  { %v5256_v10 = vpop.f32.mrf.mxu0  ;;  %9012 = vmatmul.mubr.msk.f32.gmra.mxu0 %vm2149_vm2, %v3954_v16  ;;  %v3956_v7 = vmax.f32 %v3510_v62, 0.0  ;;  %v3520_v4 = vadd.f32 %v14551_v49, %v3519_v48  ;;  %v16095_v48 = vld [vmem:[#allocation30_spill] sm:$0xff] }
 0x450   :  { %v7747_v45 = vadd.f32 %v7746_v1, %v7300_v58  ;;  %v7301_v61 = vmul.f32 %v16091_v47, %v6101_v21  ;;  %v6102_v52 = vmax.f32 %v5253_v3, 0.0  ;;  %v5257_v22 = vadd.f32 %v5256_v10, %v13729_v6  ;;  %5548 = vmatprep.mubr.f32.mxu0 %v15906_v50 }
 0x451   :  { %v5258_v59 = vpop.f32.mrf.mxu0  ;;  %v3515_v1 = vadd.f32 %v14551_v49, %v10114_v12 }
 0x452   :  { %v7718_v41 = vadd.f32 %v7717_v44, %v7301_v61  ;;  %v7302_v5 = vmul.f32 %v16091_v47, %v6102_v52  ;;  %v6103_v14 = vmax.f32 %v5257_v22, 0.0  ;;  %v5259_v54 = vadd.f32 %v5258_v59, %v13736_v34  ;;  %v16093_v44 = vld [vmem:[#allocation145_spill] sm:$0xff]  ;;  %v16094_v59 = vld [vmem:[#allocation83_spill] sm:$0xff] }
 0x453   :  { %v5262_v36 = vpop.f32.mrf.mxu0  ;;  %9013 = vmatmul.mubr.msk.f32.gmra.mxu0 %vm2149_vm2, %v3955_v11  ;;  %v3957_v12 = vmax.f32 %v3515_v1, 0.0 }
 0x454   :  { %v7748_v13 = vadd.f32 %v7747_v45, %v7302_v5  ;;  %v7303_v27 = vmul.f32 %v16092_v15, %v6103_v14  ;;  %v6104_v37 = vmax.f32 %v5259_v54, 0.0  ;;  %v5263_v30 = vadd.f32 %v5262_v36, %v13729_v6  ;;  %5554 = vmatprep.mubr.f32.mxu0 %v15906_v50  ;;  %v10120_v45 = vpop.f32.mrf.mxu1 }
 0x455   :  { %v5264_v2 = vpop.f32.mrf.mxu0  ;;  %v3525_v54 = vadd.f32 %v14551_v49, %v10117_v18  ;;  %v3958_v36 = vmax.f32 %v3520_v4, 0.0 }
 0x456   :  { %v7719_v19 = vadd.f32 %v7718_v41, %v7303_v27  ;;  %v7304_v56 = vmul.f32 %v16092_v15, %v6104_v37  ;;  %v6105_v32 = vmax.f32 %v5263_v30, 0.0  ;;  %v5265_v16 = vadd.f32 %v5264_v2, %v13736_v34  ;;  %v3529_v15 = vpop.f32.mrf.mxu1 }
 0x457   :  { %v5268_v8 = vpop.f32.mrf.mxu0  ;;  %9014 = vmatmul.mubr.msk.f32.gmra.mxu0 %vm2149_vm2, %v3956_v7  ;;  %v3959_v18 = vmax.f32 %v3525_v54, 0.0 }
 0x458   :  { %v7749_v57 = vadd.f32 %v7748_v13, %v7304_v56  ;;  %v7305_v58 = vmul.f32 %v16093_v44, %v6105_v32  ;;  %v6106_v21 = vmax.f32 %v5265_v16, 0.0  ;;  %v5269_v3 = vadd.f32 %v5268_v8, %v13729_v6  ;;  %5560 = vmatprep.mubr.f32.mxu0 %v15906_v50 }
 0x459   :  { %v5270_v10 = vpop.f32.mrf.mxu0  ;;  %v3530_v16 = vadd.f32 %v14551_v49, %v3529_v15  ;;  %v16097_v15 = vld [vmem:[#allocation42_spill] sm:$0xff] }
 0x45a   :  { %v7720_v47 = vadd.f32 %v7719_v19, %v7305_v58  ;;  %v7306_v61 = vmul.f32 %v16093_v44, %v6106_v21  ;;  %v6107_v52 = vmax.f32 %v5269_v3, 0.0  ;;  %v5271_v22 = vadd.f32 %v5270_v10, %v13736_v34  ;;  %v16096_v10 = vld [vmem:[#allocation93_spill] sm:$0xff] }
 0x45b   :  { %v5274_v11 = vpop.f32.mrf.mxu0  ;;  %9015 = vmatmul.mubr.msk.f32.gmra.mxu0 %vm2149_vm2, %v3957_v12 }
 0x45c   :  { %v7750_v62 = vadd.f32 %v7749_v57, %v7306_v61  ;;  %v7307_v41 = vmul.f32 %v16094_v59, %v6107_v52  ;;  %v6108_v5 = vmax.f32 %v5271_v22, 0.0  ;;  %v5275_v14 = vadd.f32 %v5274_v11, %v13729_v6  ;;  %5566 = vmatprep.mubr.f32.mxu0 %v15906_v50  ;;  %v10123_v57 = vpop.f32.mrf.mxu1 }
 0x45d   :  { %v5276_v13 = vpop.f32.mrf.mxu0  ;;  %v3535_v22 = vadd.f32 %v14551_v49, %v10120_v45  ;;  %v3960_v11 = vmax.f32 %v3530_v16, 0.0 }
 0x45e   :  { %v7721_v27 = vadd.f32 %v7720_v47, %v7307_v41  ;;  %v7308_v37 = vmul.f32 %v16094_v59, %v6108_v5  ;;  %v6109_v30 = vmax.f32 %v5275_v14, 0.0  ;;  %v5277_v1 = vadd.f32 %v5276_v13, %v13736_v34  ;;  %v3539_v59 = vpop.f32.mrf.mxu1 }
 0x45f   :  { %v5280_v7 = vpop.f32.mrf.mxu0  ;;  %9016 = vmatmul.mubr.msk.f32.gmra.mxu0 %vm2149_vm2, %v3958_v36  ;;  %v3961_v45 = vmax.f32 %v3535_v22, 0.0 }
 0x460   :  { %v7751_v2 = vadd.f32 %v7750_v62, %v7308_v37  ;;  %v7309_v19 = vmul.f32 %v16095_v48, %v6109_v30  ;;  %v6110_v56 = vmax.f32 %v5277_v1, 0.0  ;;  %v5281_v32 = vadd.f32 %v5280_v7, %v13729_v6  ;;  %5572 = vmatprep.mubr.f32.mxu0 %v15906_v50 }
 0x461   :  { %v5282_v8 = vpop.f32.mrf.mxu0  ;;  %v3540_v1 = vadd.f32 %v14551_v49, %v3539_v59 }
 0x462   :  { %v7722_v44 = vadd.f32 %v7721_v27, %v7309_v19  ;;  %v7310_v58 = vmul.f32 %v16095_v48, %v6110_v56  ;;  %v6111_v21 = vmax.f32 %v5281_v32, 0.0  ;;  %v5283_v3 = vadd.f32 %v5282_v8, %v13736_v34  ;;  %v16098_v8 = vld [vmem:[#allocation110_spill] sm:$0xff] }
 0x463   :  { %v5286_v12 = vpop.f32.mrf.mxu0  ;;  %9017 = vmatmul.mubr.msk.f32.gmra.mxu0 %vm2149_vm2, %v3959_v18 }
 0x464   :  { %v7752_v4 = vadd.f32 %v7751_v2, %v7310_v58  ;;  %v7311_v47 = vmul.f32 %v16096_v10, %v6111_v21  ;;  %v6112_v61 = vmax.f32 %v5283_v3, 0.0  ;;  %v5287_v52 = vadd.f32 %v5286_v12, %v13729_v6  ;;  %5578 = vmatprep.mubr.f32.mxu0 %v15906_v50  ;;  %v10126_v2 = vpop.f32.mrf.mxu1 }
 0x465   :  { %v5288_v62 = vpop.f32.mrf.mxu0  ;;  %v3545_v3 = vadd.f32 %v14551_v49, %v10123_v57  ;;  %v3962_v12 = vmax.f32 %v3540_v1, 0.0  ;;  %v8019_v1 = vld [vmem:[%s15509_s7 + $0x60] sm:$0xff] }
 0x466   :  { %v7723_v41 = vadd.f32 %v7722_v44, %v7311_v47  ;;  %v7312_v5 = vmul.f32 %v16096_v10, %v6112_v61  ;;  %v6113_v14 = vmax.f32 %v5287_v52, 0.0  ;;  %v5289_v54 = vadd.f32 %v5288_v62, %v13736_v34  ;;  %v3549_v47 = vpop.f32.mrf.mxu1 }
 0x467   :  { %v5292_v36 = vpop.f32.mrf.mxu0  ;;  %9018 = vmatmul.mubr.msk.f32.gmra.mxu0 %vm2149_vm2, %v3960_v11 }
 0x468   :  { %v7753_v13 = vadd.f32 %v7752_v4, %v7312_v5  ;;  %v7313_v27 = vmul.f32 %v16097_v15, %v6113_v14  ;;  %v6114_v37 = vmax.f32 %v5289_v54, 0.0  ;;  %v5293_v30 = vadd.f32 %v5292_v36, %v13729_v6  ;;  %5584 = vmatprep.mubr.f32.mxu0 %v15906_v50  ;;  %v14603_v4 = vpop.permute.xlu1 %6720 }
 0x469   :  { %v5294_v7 = vpop.f32.mrf.mxu0  ;;  %v3963_v14 = vmax.f32 %v3545_v3, 0.0  ;;  %v3550_v54 = vadd.f32 %v14551_v49, %v3549_v47 }
 0x46a   :  { %v7724_v48 = vadd.f32 %v7723_v41, %v7313_v27  ;;  %v7314_v19 = vmul.f32 %v16097_v15, %v6114_v37  ;;  %v6115_v56 = vmax.f32 %v5293_v30, 0.0  ;;  %v5295_v32 = vadd.f32 %v5294_v7, %v13736_v34 }
 0x46b   :  { %v5298_v18 = vpop.f32.mrf.mxu0  ;;  %9019 = vmatmul.mubr.msk.f32.gmra.mxu0 %vm2149_vm2, %v3961_v45  ;;  %v8035_v45 = vld [vmem:[%s15509_s7 + $0xe0] sm:$0xff] }
 0x46c   :  { %v7754_v16 = vadd.f32 %v7753_v13, %v7314_v19  ;;  %v7315_v44 = vmul.f32 %v16098_v8, %v6115_v56  ;;  %v6116_v58 = vmax.f32 %v5295_v32, 0.0  ;;  %v5299_v21 = vadd.f32 %v5298_v18, %v13729_v6  ;;  %5590 = vmatprep.mubr.f32.mxu0 %v15906_v50  ;;  %v10129_v13 = vpop.f32.mrf.mxu1  ;;  %v14620_v7 = vpop.permute.xlu1 %7112  ;;  %9506 = vmatprep.subr.mxu1 %v8035_v45 }
 0x46d   :  { %v5300_v10 = vpop.f32.mrf.mxu0  ;;  %9507 = vmatpush3.msra.mxu1 %v8019_v1  ;;  %v3555_v18 = vadd.f32 %v14551_v49, %v10126_v2 }
 0x46e   :  { %v7725_v61 = vadd.f32 %v7724_v48, %v7315_v44  ;;  %v7316_v52 = vmul.f32 %v16098_v8, %v6116_v58  ;;  %v6117_v22 = vmax.f32 %v5299_v21, 0.0  ;;  %v5301_v11 = vadd.f32 %v5300_v10, %v13736_v34  ;;  %v3559_v44 = vpop.f32.mrf.mxu1 }
 0x46f   :  { %v5304_v62 = vpop.f32.mrf.mxu0  ;;  %9020 = vmatmul.mubr.msk.f32.gmra.mxu0 %vm2149_vm2, %v3962_v12  ;;  %v3965_v2 = vmax.f32 %v3555_v18, 0.0 }
 0x470   :  { %v7755_v59 = vadd.f32 %v7754_v16, %v7316_v52  ;;  %v7317_v41 = vmul.f32 %v13830_v35, %v6117_v22  ;;  %v6118_v5 = vmax.f32 %v5301_v11, 0.0  ;;  %v5305_v57 = vadd.f32 %v5304_v62, %v13729_v6  ;;  %5596 = vmatprep.mubr.f32.mxu0 %v15906_v50  ;;  %v14634_v62 = vpop.permute.xlu1 %6820 }
 0x471   :  { %v5306_v36 = vpop.f32.mrf.mxu0  ;;  %v3964_v16 = vmax.f32 %v3550_v54, 0.0  ;;  %v3560_v11 = vadd.f32 %v14551_v49, %v3559_v44 }
 0x472   :  { %v7726_v15 = vadd.f32 %v7725_v61, %v7317_v41  ;;  %v7318_v27 = vmul.f32 %v13830_v35, %v6118_v5  ;;  %v6119_v37 = vmax.f32 %v5305_v57, 0.0  ;;  %v5307_v30 = vadd.f32 %v5306_v36, %v13736_v34 }
 0x473   :  { %v5310_v48 = vpop.f32.mrf.mxu0  ;;  %9021 = vmatmul.mubr.msk.f32.gmra.mxu0 %vm2149_vm2, %v3963_v14  ;;  %v3966_v45 = vmax.f32 %v3560_v11, 0.0 }
 0x474   :  { %v7756_v19 = vadd.f32 %v7755_v59, %v7318_v27  ;;  %v7319_v35 = vmul.f32 %v13894_v17, %v6119_v37  ;;  %v6120_v56 = vmax.f32 %v5307_v30, 0.0  ;;  %v5311_v32 = vadd.f32 %v5310_v48, %v13729_v6  ;;  %5602 = vmatprep.mubr.f32.mxu0 %v15906_v50  ;;  %v10132_v59 = vpop.f32.mrf.mxu1  ;;  %v6725_v18 = vpop.permute.xlu1 %6724 }
 0x475   :  { %v5312_v8 = vpop.f32.mrf.mxu0  ;;  %v3565_v30 = vadd.f32 %v14551_v49, %v10129_v13 }
 0x476   :  { %v7727_v58 = vadd.f32 %v7726_v15, %v7319_v35  ;;  %v7320_v21 = vmul.f32 %v13894_v17, %v6120_v56  ;;  %v6121_v3 = vmax.f32 %v5311_v32, 0.0  ;;  %v5313_v12 = vadd.f32 %v5312_v8, %v13736_v34  ;;  %v3569_v48 = vpop.f32.mrf.mxu1  ;;  %v8034_v32 = vld [vmem:[%s15509_s7 + $0xd8] sm:$0xff] }
 0x477   :  { %v5316_v10 = vpop.f32.mrf.mxu0  ;;  %9022 = vmatmul.mubr.msk.f32.gmra.mxu0 %vm2149_vm2, %v3964_v16  ;;  %9508 = vmatprep.subr.mxu1 %v8034_v32 }
 0x478   :  { %v7757_v47 = vadd.f32 %v7756_v19, %v7320_v21  ;;  %v7321_v61 = vmul.f32 %v13958_v43, %v6121_v3  ;;  %v6122_v52 = vmax.f32 %v5313_v12, 0.0  ;;  %v5317_v22 = vadd.f32 %v5316_v10, %v13729_v6  ;;  %5608 = vmatprep.mubr.f32.mxu0 %v15906_v50  ;;  %v10135_v10 = vpop.f32.mrf.mxu1 }
 0x479   :  { %v5318_v17 = vpop.f32.mrf.mxu0  ;;  %v3570_v21 = vadd.f32 %v14551_v49, %v3569_v48 }
 0x47a   :  { %v7728_v41 = vadd.f32 %v7727_v58, %v7321_v61  ;;  %v7322_v5 = vmul.f32 %v13958_v43, %v6122_v52  ;;  %v6123_v57 = vmax.f32 %v5317_v22, 0.0  ;;  %v5319_v14 = vadd.f32 %v5318_v17, %v13736_v34 }
 0x47b   :  { %v5322_v54 = vpop.f32.mrf.mxu0  ;;  %9023 = vmatmul.mubr.msk.f32.gmra.mxu0 %vm2149_vm2, %v3965_v2  ;;  %v3967_v58 = vmax.f32 %v3565_v30, 0.0  ;;  %v3575_v22 = vadd.f32 %v14551_v49, %v10132_v59 }
 0x47c   :  { %v7758_v36 = vadd.f32 %v7757_v47, %v7322_v5  ;;  %v7323_v15 = vmul.f32 %v14603_v4, %v6123_v57  ;;  %v6124_v27 = vmax.f32 %v5319_v14, 0.0  ;;  %v5323_v37 = vadd.f32 %v5322_v54, %v13729_v6  ;;  %5614 = vmatprep.mubr.f32.mxu0 %v15906_v50 }
 0x47d   :  { %v5324_v1 = vpop.f32.mrf.mxu0  ;;  %v3969_v30 = vmax.f32 %v3575_v22, 0.0 }
 0x47e   :  { %v7729_v43 = vadd.f32 %v7728_v41, %v7323_v15  ;;  %v7324_v19 = vmul.f32 %v14603_v4, %v6124_v27  ;;  %v6125_v35 = vmax.f32 %v5323_v37, 0.0  ;;  %v5325_v56 = vadd.f32 %v5324_v1, %v13736_v34  ;;  %v8018_v4 = vld [vmem:[%s15509_s7 + $0x58] sm:$0xff] }
 0x47f   :  { %v5328_v16 = vpop.f32.mrf.mxu0  ;;  %9024 = vmatmul.mubr.msk.f32.gmra.mxu0 %vm2149_vm2, %v3966_v45  ;;  %9509 = vmatpush3.msra.mxu1 %v8018_v4  ;;  %v3968_v41 = vmax.f32 %v3570_v21, 0.0 }
 0x480   :  { %v7759_v8 = vadd.f32 %v7758_v36, %v7324_v19  ;;  %v7325_v13 = vmul.f32 %v6725_v18, %v6125_v35  ;;  %v6126_v44 = vmax.f32 %v5325_v56, 0.0  ;;  %5620 = vmatprep.mubr.f32.mxu0 %v15906_v50  ;;  %v5329_v3 = vadd.f32 %v5328_v16, %v13729_v6  ;;  %v3579_v36 = vpop.f32.mrf.mxu1  ;;  %v16099_v56 = vld [vmem:[#allocation74_spill] sm:$0xff]  ;;  %v16100_v16 = vld [vmem:[#allocation91_spill] sm:$0xff] }
 0x481   :  { %v5330_v12 = vpop.f32.mrf.mxu0  ;;  %v3580_v35 = vadd.f32 %v14551_v49, %v3579_v36 }
 0x482   :  { %v7730_v47 = vadd.f32 %v7729_v43, %v7325_v13  ;;  %v7326_v61 = vmul.f32 %v6725_v18, %v6126_v44  ;;  %v5331_v52 = vadd.f32 %v5330_v12, %v13736_v34  ;;  %v6127_v5 = vmax.f32 %v5329_v3, 0.0  ;;  %v10138_v44 = vpop.f32.mrf.mxu1 }
 0x483   :  { %v5334_v2 = vpop.f32.mrf.mxu0  ;;  %9025 = vmatmul.mubr.msk.f32.gmra.mxu0 %vm2149_vm2, %v3967_v58  ;;  %v3585_v12 = vadd.f32 %v14551_v49, %v10135_v10 }
 0x484   :  { %v7731_v11 = vrot.slane %v7730_v47, 4  ;;  %v7760_v17 = vadd.f32 %v7759_v8, %v7326_v61  ;;  %5626 = vmatprep.mubr.f32.mxu0 %v15906_v50  ;;  %v6128_v57 = vmax.f32 %v5331_v52, 0.0  ;;  %v5335_v14 = vadd.f32 %v5334_v2, %v13729_v6  ;;  %v3589_v10 = vpop.f32.mrf.mxu1 }
 0x485   :  { %v5336_v54 = vpop.f32.mrf.mxu0  ;;  %v7327_v32 = vmul.f32 %v16099_v56, %v6127_v5  ;;  %v3970_v5 = vmax.f32 %v3580_v35, 0.0  ;;  %v3971_v35 = vmax.f32 %v3585_v12, 0.0 }
 0x486   :  { %v7732_v15 = vadd.f32 %v7731_v11, %v7730_v47  ;;  %v7761_v27 = vrot.slane %v7760_v17, 4  ;;  %v5337_v37 = vadd.f32 %v5336_v54, %v13736_v34  ;;  %v6129_v59 = vmax.f32 %v5335_v14, 0.0 }
 0x487   :  { %v5340_v45 = vpop.f32.mrf.mxu0  ;;  %9026 = vmatmul.mubr.msk.f32.gmra.mxu0 %vm2149_vm2, %v3968_v41  ;;  %v7328_v18 = vmul.f32 %v16099_v56, %v6128_v57  ;;  %v3590_v56 = vadd.f32 %v14551_v49, %v3589_v10 }
 0x488   :  { %v7733_v1 = vrot.slane %v7732_v15, 2  ;;  %v7762_v48 = vadd.f32 %v7761_v27, %v7760_v17  ;;  %v6130_v43 = vmax.f32 %v5337_v37, 0.0  ;;  %v5341_v19 = vadd.f32 %v5340_v45, %v13729_v6  ;;  %5632 = vmatprep.mubr.f32.mxu0 %v15906_v50  ;;  %v16101_v17 = vld [vmem:[#allocation78_spill] sm:$0xff] }
 0x489   :  { %v7329_v8 = vmul.f32 %v16100_v16, %v6129_v59  ;;  %v5342_v13 = vpop.f32.mrf.mxu0 }
 0x48a   :  { %v7734_v4 = vadd.f32 %v7733_v1, %v7732_v15  ;;  %v7763_v58 = vrot.slane %v7762_v48, 2  ;;  %v7330_v21 = vmul.f32 %v16100_v16, %v6130_v43  ;;  %v6131_v3 = vmax.f32 %v5341_v19, 0.0 }
 0x48b   :  { %v7767_v47 = vadd.f32 %v7329_v8, %v7327_v32  ;;  %v5343_v61 = vadd.f32 %v5342_v13, %v13736_v34  ;;  %v5346_v52 = vpop.f32.mrf.mxu0  ;;  %9027 = vmatmul.mubr.msk.f32.gmra.mxu0 %vm2149_vm2, %v3969_v30  ;;  %v10141_v13 = vpop.f32.mrf.mxu1 }
 0x48c   :  { %v7735_v22 = vrot.slane %v7734_v4, 1  ;;  %v7764_v2 = vadd.f32 %v7763_v58, %v7762_v48  ;;  %v7797_v11 = vadd.f32 %v7330_v21, %v7328_v18  ;;  %v7331_v41 = vmul.f32 %v16101_v17, %v6131_v3  ;;  %5638 = vmatprep.mubr.f32.mxu0 %v15906_v50  ;;  %v16102_v18 = vld [vmem:[#allocation10_spill] sm:$0xff] }
 0x48d   :  { %v6132_v57 = vmax.f32 %v5343_v61, 0.0  ;;  %v5347_v14 = vadd.f32 %v5346_v52, %v13729_v6  ;;  %v5348_v54 = vpop.f32.mrf.mxu0  ;;  %v16103_v61 = vld [vmem:[#allocation19_spill] sm:$0xff] }
 0x48e   :  { %v7736_v36 = vadd.f32 %v7735_v22, %v7734_v4  ;;  %v7765_v15 = vrot.slane %v7764_v2, 1  ;;  %v7768_v27 = vadd.f32 %v7767_v47, %v7331_v41  ;;  %v5349_v37 = vadd.f32 %v5348_v54, %v13736_v34 }
 0x48f   :  { %v7332_v30 = vmul.f32 %v16101_v17, %v6132_v57  ;;  %v6133_v59 = vmax.f32 %v5347_v14, 0.0  ;;  %v5352_v45 = vpop.f32.mrf.mxu0  ;;  %9028 = vmatmul.mubr.msk.f32.gmra.mxu0 %vm2149_vm2, %v3970_v5  ;;  %v3972_v17 = vmax.f32 %v3590_v56, 0.0  ;;  %v3599_v5 = vpop.f32.mrf.mxu1 }
 0x490   :  { %v7766_v1 = vadd.f32 %v7765_v15, %v7764_v2  ;;  %v6134_v48 = vmax.f32 %v5349_v37, 0.0  ;;  %v5353_v43 = vadd.f32 %v5352_v45, %v13729_v6  ;;  %5644 = vmatprep.mubr.f32.mxu0 %v15906_v50  ;;  %v14682_v19 = vsel %vm8066_vm5, %v7736_v36, %v14464_v60  ;;  %v16104_v15 = vld [vmem:[#allocation79_spill] sm:$0xff] }
 0x491   :  { %v7798_v32 = vadd.f32 %v7797_v11, %v7332_v30  ;;  %v7333_v16 = vmul.f32 %v16102_v18, %v6133_v59  ;;  %v5354_v8 = vpop.f32.mrf.mxu0  ;;  %v3595_v11 = vadd.f32 %v14551_v49, %v10138_v44  ;;  %v8033_v44 = vld [vmem:[%s15509_s7 + $0xd0] sm:$0xff] }
 0x492   :  { %v7334_v4 = vmul.f32 %v16102_v18, %v6134_v48  ;;  %v6135_v58 = vmax.f32 %v5353_v43, 0.0  ;;  %v5355_v21 = vadd.f32 %v5354_v8, %v13736_v34  ;;  %v14690_v3 = vsel %vm8066_vm5, %v7766_v1, %v14474_v55  ;;  %v8017_v59 = vld [vmem:[%s15509_s7 + $0x50] sm:$0xff]  ;;  %9510 = vmatprep.subr.mxu1 %v8033_v44  ;;  %v10144_v43 = vpop.f32.mrf.mxu1 }
 0x493   :  { %v7769_v47 = vadd.f32 %v7768_v27, %v7333_v16  ;;  %v5358_v60 = vpop.f32.mrf.mxu0  ;;  %9029 = vmatmul.mubr.msk.f32.gmra.mxu0 %vm2149_vm2, %v3971_v35  ;;  %v3973_v45 = vmax.f32 %v3595_v11, 0.0  ;;  %v3600_v1 = vadd.f32 %v14551_v49, %v3599_v5  ;;  %9511 = vmatpush3.msra.mxu1 %v8017_v59 }
 0x494   :  { %v7799_v12 = vadd.f32 %v7798_v32, %v7334_v4  ;;  %v7335_v52 = vmul.f32 %v16103_v61, %v6135_v58  ;;  %v6136_v22 = vmax.f32 %v5355_v21, 0.0  ;;  %v5359_v2 = vadd.f32 %v5358_v60, %v13729_v6  ;;  %5650 = vmatprep.mubr.f32.mxu0 %v15906_v50  ;;  %v16105_v4 = vld [vmem:[#allocation29_spill] sm:$0xff] }
 0x495   :  { %v5360_v41 = vpop.f32.mrf.mxu0  ;;  %v3605_v60 = vadd.f32 %v14551_v49, %v10141_v13 }
 0x496   :  { %v7770_v57 = vadd.f32 %v7769_v47, %v7335_v52  ;;  %v7336_v55 = vmul.f32 %v16103_v61, %v6136_v22  ;;  %v6137_v14 = vmax.f32 %v5359_v2, 0.0  ;;  %v5361_v54 = vadd.f32 %v5360_v41, %v13736_v34  ;;  %v3609_v52 = vpop.f32.mrf.mxu1 }
 0x497   :  { %v5364_v10 = vpop.f32.mrf.mxu0  ;;  %9030 = vmatmul.mubr.msk.f32.gmra.mxu0 %vm2149_vm2, %v3972_v17  ;;  %v3975_v13 = vmax.f32 %v3605_v60, 0.0 }
 0x498   :  { %v7800_v36 = vadd.f32 %v7799_v12, %v7336_v55  ;;  %v7337_v27 = vmul.f32 %v16104_v15, %v6137_v14  ;;  %v6138_v37 = vmax.f32 %v5361_v54, 0.0  ;;  %v5365_v30 = vadd.f32 %v5364_v10, %v13729_v6  ;;  %5656 = vmatprep.mubr.f32.mxu0 %v15906_v50 }
 0x499   :  { %v5366_v48 = vpop.f32.mrf.mxu0  ;;  %v3974_v12 = vmax.f32 %v3600_v1, 0.0  ;;  %v3610_v10 = vadd.f32 %v14551_v49, %v3609_v52  ;;  %v16107_v1 = vld [vmem:[#allocation47_spill] sm:$0xff] }
 0x49a   :  { %v7771_v35 = vadd.f32 %v7770_v57, %v7337_v27  ;;  %v7338_v56 = vmul.f32 %v16104_v15, %v6138_v37  ;;  %v6139_v32 = vmax.f32 %v5365_v30, 0.0  ;;  %v5367_v18 = vadd.f32 %v5366_v48, %v13736_v34  ;;  %v16106_v57 = vld [vmem:[#allocation37_spill] sm:$0xff]  ;;  %v10147_v15 = vpop.f32.mrf.mxu1 }
 0x49b   :  { %v5370_v16 = vpop.f32.mrf.mxu0  ;;  %9031 = vmatmul.mubr.msk.f32.gmra.mxu0 %vm2149_vm2, %v3973_v45 }
 0x49c   :  { %v7801_v8 = vadd.f32 %v7800_v36, %v7338_v56  ;;  %v7339_v58 = vmul.f32 %v16105_v4, %v6139_v32  ;;  %v6140_v21 = vmax.f32 %v5367_v18, 0.0  ;;  %v5371_v47 = vadd.f32 %v5370_v16, %v13729_v6  ;;  %5662 = vmatprep.mubr.f32.mxu0 %v15906_v50 }
 0x49d   :  { %v5372_v61 = vpop.f32.mrf.mxu0  ;;  %v3615_v32 = vadd.f32 %v14551_v49, %v10144_v43  ;;  %v3976_v18 = vmax.f32 %v3610_v10, 0.0  ;;  %v16109_v10 = vld [vmem:[#allocation66_spill] sm:$0xff] }
 0x49e   :  { %v7772_v22 = vadd.f32 %v7771_v35, %v7339_v58  ;;  %v7340_v2 = vmul.f32 %v16105_v4, %v6140_v21  ;;  %v6141_v11 = vmax.f32 %v5371_v47, 0.0  ;;  %v5373_v17 = vadd.f32 %v5372_v61, %v13736_v34  ;;  %v16108_v61 = vld [vmem:[#allocation59_spill] sm:$0xff] }
 0x49f   :  { %v5376_v41 = vpop.f32.mrf.mxu0  ;;  %9032 = vmatmul.mubr.msk.f32.gmra.mxu0 %vm2149_vm2, %v3974_v12  ;;  %v3977_v43 = vmax.f32 %v3615_v32, 0.0 }
 0x4a0   :  { %v7802_v5 = vadd.f32 %v7801_v8, %v7340_v2  ;;  %v7341_v55 = vmul.f32 %v16106_v57, %v6141_v11  ;;  %v6142_v14 = vmax.f32 %v5373_v17, 0.0  ;;  %v5377_v54 = vadd.f32 %v5376_v41, %v13729_v6  ;;  %5668 = vmatprep.mubr.f32.mxu0 %v15906_v50  ;;  %v3619_v8 = vpop.f32.mrf.mxu1 }
 0x4a1   :  { %v5378_v36 = vpop.f32.mrf.mxu0  ;;  %v3620_v11 = vadd.f32 %v14551_v49, %v3619_v8 }
 0x4a2   :  { %v7773_v27 = vadd.f32 %v7772_v22, %v7341_v55  ;;  %v7342_v37 = vmul.f32 %v16106_v57, %v6142_v14  ;;  %v6143_v30 = vmax.f32 %v5377_v54, 0.0  ;;  %v5379_v44 = vadd.f32 %v5378_v36, %v13736_v34  ;;  %v10150_v41 = vpop.f32.mrf.mxu1 }
 0x4a3   :  { %v5382_v59 = vpop.f32.mrf.mxu0  ;;  %9033 = vmatmul.mubr.msk.f32.gmra.mxu0 %vm2149_vm2, %v3975_v13 }
 0x4a4   :  { %v7803_v45 = vadd.f32 %v7802_v5, %v7342_v37  ;;  %v7343_v48 = vmul.f32 %v16107_v1, %v6143_v30  ;;  %v6144_v35 = vmax.f32 %v5379_v44, 0.0  ;;  %v5383_v56 = vadd.f32 %v5382_v59, %v13729_v6  ;;  %5674 = vmatprep.mubr.f32.mxu0 %v15906_v50 }
 0x4a5   :  { %v5384_v16 = vpop.f32.mrf.mxu0  ;;  %v3625_v30 = vadd.f32 %v14551_v49, %v10147_v15  ;;  %v3978_v44 = vmax.f32 %v3620_v11, 0.0  ;;  %v8032_v15 = vld [vmem:[%s15509_s7 + $0xc8] sm:$0xff] }
 0x4a6   :  { %v7774_v4 = vadd.f32 %v7773_v27, %v7343_v48  ;;  %v7344_v58 = vmul.f32 %v16107_v1, %v6144_v35  ;;  %v6145_v21 = vmax.f32 %v5383_v56, 0.0  ;;  %v5385_v47 = vadd.f32 %v5384_v16, %v13736_v34  ;;  %v16110_v16 = vld [vmem:[#allocation131_spill] sm:$0xff]  ;;  %9512 = vmatprep.subr.mxu1 %v8032_v15 }
 0x4a7   :  { %v5388_v60 = vpop.f32.mrf.mxu0  ;;  %9034 = vmatmul.mubr.msk.f32.gmra.mxu0 %vm2149_vm2, %v3976_v18 }
 0x4a8   :  { %v7804_v12 = vadd.f32 %v7803_v45, %v7344_v58  ;;  %v7345_v52 = vmul.f32 %v16108_v61, %v6145_v21  ;;  %v6146_v22 = vmax.f32 %v5385_v47, 0.0  ;;  %v5389_v2 = vadd.f32 %v5388_v60, %v13729_v6  ;;  %5680 = vmatprep.mubr.f32.mxu0 %v15906_v50  ;;  %v3629_v45 = vpop.f32.mrf.mxu1 }
 0x4a9   :  { %v5390_v17 = vpop.f32.mrf.mxu0  ;;  %v3979_v21 = vmax.f32 %v3625_v30, 0.0  ;;  %v3630_v47 = vadd.f32 %v14551_v49, %v3629_v45 }
 0x4aa   :  { %v7775_v5 = vadd.f32 %v7774_v4, %v7345_v52  ;;  %v7346_v57 = vmul.f32 %v16108_v61, %v6146_v22  ;;  %v6147_v55 = vmax.f32 %v5389_v2, 0.0  ;;  %v5391_v14 = vadd.f32 %v5390_v17, %v13736_v34 }
 0x4ab   :  { %v5394_v54 = vpop.f32.mrf.mxu0  ;;  %9035 = vmatmul.mubr.msk.f32.gmra.mxu0 %vm2149_vm2, %v3977_v43  ;;  %v8016_v43 = vld [vmem:[%s15509_s7 + $0x48] sm:$0xff] }
 0x4ac   :  { %v7805_v13 = vadd.f32 %v7804_v12, %v7346_v57  ;;  %v7347_v36 = vmul.f32 %v16109_v10, %v6147_v55  ;;  %v6148_v27 = vmax.f32 %v5391_v14, 0.0  ;;  %v5395_v37 = vadd.f32 %v5394_v54, %v13729_v6  ;;  %5686 = vmatprep.mubr.f32.mxu0 %v15906_v50  ;;  %v10153_v12 = vpop.f32.mrf.mxu1  ;;  %9513 = vmatpush3.msra.mxu1 %v8016_v43 }
 0x4ad   :  { %v5396_v59 = vpop.f32.mrf.mxu0  ;;  %v3635_v54 = vadd.f32 %v14551_v49, %v10150_v41 }
 0x4ae   :  { %v7776_v1 = vadd.f32 %v7775_v5, %v7347_v36  ;;  %v7348_v48 = vmul.f32 %v16109_v10, %v6148_v27  ;;  %v6149_v35 = vmax.f32 %v5395_v37, 0.0  ;;  %v5397_v56 = vadd.f32 %v5396_v59, %v13736_v34  ;;  %v16111_v5 = vld [vmem:[#allocation140_spill] sm:$0xff]  ;;  %v3639_v36 = vpop.f32.mrf.mxu1 }
 0x4af   :  { %v5400_v32 = vpop.f32.mrf.mxu0  ;;  %9036 = vmatmul.mubr.msk.f32.gmra.mxu0 %vm2149_vm2, %v3978_v44  ;;  %v3981_v41 = vmax.f32 %v3635_v54, 0.0 }
 0x4b0   :  { %v7806_v18 = vadd.f32 %v7805_v13, %v7348_v48  ;;  %v7349_v8 = vmul.f32 %v16110_v16, %v6149_v35  ;;  %v6150_v4 = vmax.f32 %v5397_v56, 0.0  ;;  %v5401_v58 = vadd.f32 %v5400_v32, %v13729_v6  ;;  %5692 = vmatprep.mubr.f32.mxu0 %v15906_v50 }
 0x4b1   :  { %v5402_v60 = vpop.f32.mrf.mxu0  ;;  %v3980_v13 = vmax.f32 %v3630_v47, 0.0  ;;  %v3640_v32 = vadd.f32 %v14551_v49, %v3639_v36 }
 0x4b2   :  { %v7777_v61 = vadd.f32 %v7776_v1, %v7349_v8  ;;  %v7350_v52 = vmul.f32 %v16110_v16, %v6150_v4  ;;  %v6151_v22 = vmax.f32 %v5401_v58, 0.0  ;;  %v5403_v2 = vadd.f32 %v5402_v60, %v13736_v34  ;;  %v16112_v1 = vld [vmem:[#allocation17_spill] sm:$0xff]  ;;  %v10156_v16 = vpop.f32.mrf.mxu1  ;;  %v16113_v60 = vld [vmem:[#allocation150_spill] sm:$0xff] }
 0x4b3   :  { %v5406_v11 = vpop.f32.mrf.mxu0  ;;  %9037 = vmatmul.mubr.msk.f32.gmra.mxu0 %vm2149_vm2, %v3979_v21  ;;  %v3982_v43 = vmax.f32 %v3640_v32, 0.0  ;;  %v16115_v32 = vld [vmem:[#allocation89_spill] sm:$0xff] }
 0x4b4   :  { %v7807_v17 = vadd.f32 %v7806_v18, %v7350_v52  ;;  %v7351_v57 = vmul.f32 %v16111_v5, %v6151_v22  ;;  %v6152_v55 = vmax.f32 %v5403_v2, 0.0  ;;  %v5407_v14 = vadd.f32 %v5406_v11, %v13729_v6  ;;  %5698 = vmatprep.mubr.f32.mxu0 %v15906_v50 }
 0x4b5   :  { %v5408_v10 = vpop.f32.mrf.mxu0  ;;  %v3645_v2 = vadd.f32 %v14551_v49, %v10153_v12 }
 0x4b6   :  { %v7778_v27 = vadd.f32 %v7777_v61, %v7351_v57  ;;  %v7352_v37 = vmul.f32 %v16111_v5, %v6152_v55  ;;  %v6153_v30 = vmax.f32 %v5407_v14, 0.0  ;;  %v5409_v44 = vadd.f32 %v5408_v10, %v13736_v34  ;;  %v16114_v10 = vld [vmem:[#allocation85_spill] sm:$0xff] }
 0x4b7   :  { %v5412_v59 = vpop.f32.mrf.mxu0  ;;  %9038 = vmatmul.mubr.msk.f32.gmra.mxu0 %vm2149_vm2, %v3980_v13  ;;  %v3983_v12 = vmax.f32 %v3645_v2, 0.0 }
 0x4b8   :  { %v7808_v45 = vadd.f32 %v7807_v17, %v7352_v37  ;;  %v7353_v48 = vmul.f32 %v16112_v1, %v6153_v30  ;;  %v6154_v35 = vmax.f32 %v5409_v44, 0.0  ;;  %v5413_v56 = vadd.f32 %v5412_v59, %v13729_v6  ;;  %5704 = vmatprep.mubr.f32.mxu0 %v15906_v50  ;;  %v3649_v17 = vpop.f32.mrf.mxu1 }
 0x4b9   :  { %v5414_v18 = vpop.f32.mrf.mxu0  ;;  %v3650_v30 = vadd.f32 %v14551_v49, %v3649_v17 }
 0x4ba   :  { %v7779_v8 = vadd.f32 %v7778_v27, %v7353_v48  ;;  %v7354_v4 = vmul.f32 %v16112_v1, %v6154_v35  ;;  %v6155_v58 = vmax.f32 %v5413_v56, 0.0  ;;  %v5415_v15 = vadd.f32 %v5414_v18, %v13736_v34  ;;  %v10159_v59 = vpop.f32.mrf.mxu1 }
 0x4bb   :  { %v5418_v21 = vpop.f32.mrf.mxu0  ;;  %9039 = vmatmul.mubr.msk.f32.gmra.mxu0 %vm2149_vm2, %v3981_v41 }
 0x4bc   :  { %v7809_v47 = vadd.f32 %v7808_v45, %v7354_v4  ;;  %v7355_v61 = vmul.f32 %v16113_v60, %v6155_v58  ;;  %v6156_v52 = vmax.f32 %v5415_v15, 0.0  ;;  %v5419_v22 = vadd.f32 %v5418_v21, %v13729_v6  ;;  %5710 = vmatprep.mubr.f32.mxu0 %v15906_v50 }
 0x4bd   :  { %v5420_v11 = vpop.f32.mrf.mxu0  ;;  %v3655_v58 = vadd.f32 %v14551_v49, %v10156_v16  ;;  %v3984_v15 = vmax.f32 %v3650_v30, 0.0  ;;  %v16117_v30 = vld [vmem:[#allocation105_spill] sm:$0xff] }
 0x4be   :  { %v7780_v5 = vadd.f32 %v7779_v8, %v7355_v61  ;;  %v7356_v57 = vmul.f32 %v16113_v60, %v6156_v52  ;;  %v6157_v55 = vmax.f32 %v5419_v22, 0.0  ;;  %v5421_v14 = vadd.f32 %v5420_v11, %v13736_v34  ;;  %v16116_v11 = vld [vmem:[#allocation96_spill] sm:$0xff] }
 0x4bf   :  { %v5424_v54 = vpop.f32.mrf.mxu0  ;;  %9040 = vmatmul.mubr.msk.f32.gmra.mxu0 %vm2149_vm2, %v3982_v43  ;;  %v3985_v16 = vmax.f32 %v3655_v58, 0.0 }
 0x4c0   :  { %v7810_v13 = vadd.f32 %v7809_v47, %v7356_v57  ;;  %v7357_v36 = vmul.f32 %v16114_v10, %v6157_v55  ;;  %v6158_v27 = vmax.f32 %v5421_v14, 0.0  ;;  %v5425_v37 = vadd.f32 %v5424_v54, %v13729_v6  ;;  %5716 = vmatprep.mubr.f32.mxu0 %v15906_v50  ;;  %v3659_v47 = vpop.f32.mrf.mxu1 }
 0x4c1   :  { %v5426_v44 = vpop.f32.mrf.mxu0  ;;  %v3660_v55 = vadd.f32 %v14551_v49, %v3659_v47 }
 0x4c2   :  { %v7781_v45 = vadd.f32 %v7780_v5, %v7357_v36  ;;  %v7358_v1 = vmul.f32 %v16114_v10, %v6158_v27  ;;  %v6159_v48 = vmax.f32 %v5425_v37, 0.0  ;;  %v5427_v35 = vadd.f32 %v5426_v44, %v13736_v34  ;;  %v10162_v54 = vpop.f32.mrf.mxu1 }
 0x4c3   :  { %v5430_v56 = vpop.f32.mrf.mxu0  ;;  %9041 = vmatmul.mubr.msk.f32.gmra.mxu0 %vm2149_vm2, %v3983_v12 }
 0x4c4   :  { %v7811_v41 = vadd.f32 %v7810_v13, %v7358_v1  ;;  %v7359_v18 = vmul.f32 %v16115_v32, %v6159_v48  ;;  %v6160_v8 = vmax.f32 %v5427_v35, 0.0  ;;  %v5431_v4 = vadd.f32 %v5430_v56, %v13729_v6  ;;  %5722 = vmatprep.mubr.f32.mxu0 %v15906_v50 }
 0x4c5   :  { %v5432_v21 = vpop.f32.mrf.mxu0  ;;  %v3665_v48 = vadd.f32 %v14551_v49, %v10159_v59  ;;  %v3986_v35 = vmax.f32 %v3660_v55, 0.0  ;;  %v14816_v59 = vld [vmem:[%s15506_s4] ss:$0 sm:$0xff] }
 0x4c6   :  { %v7782_v60 = vadd.f32 %v7781_v45, %v7359_v18  ;;  %v7360_v61 = vmul.f32 %v16115_v32, %v6160_v8  ;;  %v6161_v52 = vmax.f32 %v5431_v4, 0.0  ;;  %v5433_v22 = vadd.f32 %v5432_v21, %v13736_v34 }
 0x4c7   :  { %v5436_v2 = vpop.f32.mrf.mxu0  ;;  %9042 = vmatmul.mubr.msk.f32.gmra.mxu0 %vm2149_vm2, %v3984_v15  ;;  %v3987_v49 = vmax.f32 %v3665_v48, 0.0 }
 0x4c8   :  { %v7812_v43 = vadd.f32 %v7811_v41, %v7360_v61  ;;  %v7361_v17 = vmul.f32 %v16116_v11, %v6161_v52  ;;  %v6162_v5 = vmax.f32 %v5433_v22, 0.0  ;;  %v5437_v57 = vadd.f32 %v5436_v2, %v13729_v6  ;;  %5728 = vmatprep.mubr.f32.mxu0 %v15906_v50  ;;  %v3669_v41 = vpop.f32.mrf.mxu1 }
 0x4c9   :  { %v5438_v14 = vpop.f32.mrf.mxu0  ;;  %v3670_v61 = vadd.f32 %v14816_v59, %v3669_v41 }
 0x4ca   :  { %v7783_v13 = vadd.f32 %v7782_v60, %v7361_v17  ;;  %v7362_v10 = vmul.f32 %v16116_v11, %v6162_v5  ;;  %v6163_v36 = vmax.f32 %v5437_v57, 0.0  ;;  %v5439_v27 = vadd.f32 %v5438_v14, %v13736_v34  ;;  %v10165_v22 = vpop.f32.mrf.mxu1 }
 0x4cb   :  { %v5442_v37 = vpop.f32.mrf.mxu0  ;;  %9043 = vmatmul.mubr.msk.f32.gmra.mxu0 %vm2149_vm2, %v3985_v16 }
 0x4cc   :  { %v7813_v12 = vadd.f32 %v7812_v43, %v7362_v10  ;;  %v7363_v44 = vmul.f32 %v16117_v30, %v6163_v36  ;;  %v6164_v45 = vmax.f32 %v5439_v27, 0.0  ;;  %v5443_v1 = vadd.f32 %v5442_v37, %v13729_v6  ;;  %5734 = vmatprep.mubr.f32.mxu0 %v15906_v50  ;;  %v3679_v27 = vpop.f32.mrf.mxu1 }
 0x4cd   :  { %v5444_v56 = vpop.f32.mrf.mxu0  ;;  %v3988_v10 = vmax.f32 %v3670_v61, 0.0 }
 0x4ce   :  { %v7784_v32 = vadd.f32 %v7783_v13, %v7363_v44  ;;  %v7364_v18 = vmul.f32 %v16117_v30, %v6164_v45  ;;  %v6165_v8 = vmax.f32 %v5443_v1, 0.0  ;;  %v5445_v4 = vadd.f32 %v5444_v56, %v13736_v34  ;;  %v8031_v44 = vld [vmem:[%s15509_s7 + $0xc0] sm:$0xff]  ;;  %v14834_v1 = vpop.permute.xlu0 %7016 }
 0x4cf   :  { %v5448_v58 = vpop.f32.mrf.mxu0  ;;  %9044 = vmatmul.mubr.msk.f32.gmra.mxu0 %vm2149_vm2, %v3986_v35  ;;  %v3675_v13 = vadd.f32 %v14816_v59, %v10162_v54  ;;  %v8015_v45 = vld [vmem:[%s15509_s7 + $0x40] sm:$0xff]  ;;  %9514 = vmatprep.subr.mxu1 %v8031_v44 }
 0x4d0   :  { %v7814_v15 = vadd.f32 %v7813_v12, %v7364_v18  ;;  %v7365_v21 = vmul.f32 %v13798_v26, %v6165_v8  ;;  %v6166_v47 = vmax.f32 %v5445_v4, 0.0  ;;  %v5449_v60 = vadd.f32 %v5448_v58, %v13729_v6  ;;  %5740 = vmatprep.mubr.f32.mxu0 %v15906_v50  ;;  %9515 = vmatpush3.msra.mxu1 %v8015_v45  ;;  %v10168_v8 = vpop.f32.mrf.mxu1 }
 0x4d1   :  { %v5450_v52 = vpop.f32.mrf.mxu0  ;;  %v3989_v41 = vmax.f32 %v3675_v13, 0.0 }
 0x4d2   :  { %v7785_v2 = vadd.f32 %v7784_v32, %v7365_v21  ;;  %v7366_v43 = vmul.f32 %v13798_v26, %v6166_v47  ;;  %v6167_v11 = vmax.f32 %v5449_v60, 0.0  ;;  %v5451_v17 = vadd.f32 %v5450_v52, %v13736_v34 }
 0x4d3   :  { %v5454_v5 = vpop.f32.mrf.mxu0  ;;  %9045 = vmatmul.mubr.msk.f32.gmra.mxu0 %vm2149_vm2, %v3987_v49  ;;  %v3680_v32 = vadd.f32 %v14816_v59, %v3679_v27 }
 0x4d4   :  { %v7815_v57 = vadd.f32 %v7814_v15, %v7366_v43  ;;  %v7367_v16 = vmul.f32 %v13862_v33, %v6167_v11  ;;  %v6168_v55 = vmax.f32 %v5451_v17, 0.0  ;;  %v5455_v14 = vadd.f32 %v5454_v5, %v13729_v6  ;;  %5746 = vmatprep.mubr.f32.mxu0 %v15906_v50  ;;  %v14848_v11 = vpop.permute.xlu0 %6920  ;;  %v3689_v17 = vpop.f32.mrf.mxu1 }
 0x4d5   :  { %v5456_v36 = vpop.f32.mrf.mxu0  ;;  %v3990_v43 = vmax.f32 %v3680_v32, 0.0 }
 0x4d6   :  { %v7786_v26 = vadd.f32 %v7785_v2, %v7367_v16  ;;  %v7368_v37 = vmul.f32 %v13862_v33, %v6168_v55  ;;  %v6169_v12 = vmax.f32 %v5455_v14, 0.0  ;;  %v5457_v30 = vadd.f32 %v5456_v36, %v13736_v34 }
 0x4d7   :  { %v5460_v54 = vpop.f32.mrf.mxu0  ;;  %9046 = vmatmul.mubr.msk.f32.gmra.mxu0 %vm2149_vm2, %v3988_v10  ;;  %v3685_v2 = vadd.f32 %v14816_v59, %v10165_v22 }
 0x4d8   :  { %v7816_v48 = vadd.f32 %v7815_v57, %v7368_v37  ;;  %v7369_v33 = vmul.f32 %v13926_v53, %v6169_v12  ;;  %v6170_v35 = vmax.f32 %v5457_v30, 0.0  ;;  %v5461_v56 = vadd.f32 %v5460_v54, %v13729_v6  ;;  %5752 = vmatprep.mubr.f32.mxu0 %v15906_v50  ;;  %v10171_v12 = vpop.f32.mrf.mxu1  ;;  %v8030_v54 = vld [vmem:[%s15509_s7 + $0xb8] sm:$0xff] }
 0x4d9   :  { %v5462_v18 = vpop.f32.mrf.mxu0  ;;  %v3991_v27 = vmax.f32 %v3685_v2, 0.0  ;;  %9516 = vmatprep.subr.mxu1 %v8030_v54  ;;  %v16119_v54 = vld [vmem:[#allocation77_spill] sm:$0xff] }
 0x4da   :  { %v7787_v4 = vadd.f32 %v7786_v26, %v7369_v33  ;;  %v7370_v58 = vmul.f32 %v13926_v53, %v6170_v35  ;;  %v6171_v15 = vmax.f32 %v5461_v56, 0.0  ;;  %v5463_v21 = vadd.f32 %v5462_v18, %v13736_v34 }
 0x4db   :  { %v5466_v47 = vpop.f32.mrf.mxu0  ;;  %9047 = vmatmul.mubr.msk.f32.gmra.mxu0 %vm2149_vm2, %v3989_v41  ;;  %v3690_v26 = vadd.f32 %v14816_v59, %v3689_v17  ;;  %v3695_v35 = vadd.f32 %v14816_v59, %v10168_v8 }
 0x4dc   :  { %v7817_v60 = vadd.f32 %v7816_v48, %v7370_v58  ;;  %v7371_v49 = vmul.f32 %v13995_v42, %v6171_v15  ;;  %v6172_v61 = vmax.f32 %v5463_v21, 0.0  ;;  %v5467_v52 = vadd.f32 %v5466_v47, %v13729_v6  ;;  %5758 = vmatprep.mubr.f32.mxu0 %v15906_v50  ;;  %v6825_v48 = vpop.permute.xlu0 %6824  ;;  %v3699_v15 = vpop.f32.mrf.mxu1 }
 0x4dd   :  { %v5468_v53 = vpop.f32.mrf.mxu0  ;;  %v3992_v18 = vmax.f32 %v3690_v26, 0.0  ;;  %v3700_v2 = vadd.f32 %v14816_v59, %v3699_v15 }
 0x4de   :  { %v7788_v5 = vadd.f32 %v7787_v4, %v7371_v49  ;;  %v7372_v57 = vmul.f32 %v13995_v42, %v6172_v61  ;;  %v6173_v16 = vmax.f32 %v5467_v52, 0.0  ;;  %v5469_v55 = vadd.f32 %v5468_v53, %v13736_v34 }
 0x4df   :  { %v5472_v14 = vpop.f32.mrf.mxu0  ;;  %9048 = vmatmul.mubr.msk.f32.gmra.mxu0 %vm2149_vm2, %v3990_v43  ;;  %v3993_v49 = vmax.f32 %v3695_v35, 0.0 }
 0x4e0   :  { %v7818_v13 = vadd.f32 %v7817_v60, %v7372_v57  ;;  %v7373_v10 = vmul.f32 %v14634_v62, %v6173_v16  ;;  %v6174_v36 = vmax.f32 %v5469_v55, 0.0  ;;  %v5473_v22 = vadd.f32 %v5472_v14, %v13729_v6  ;;  %5764 = vmatprep.mubr.f32.mxu0 %v15906_v50  ;;  %v10174_v57 = vpop.f32.mrf.mxu1 }
 0x4e1   :  { %v5474_v37 = vpop.f32.mrf.mxu0 }
 0x4e2   :  { %v7789_v42 = vadd.f32 %v7788_v5, %v7373_v10  ;;  %v7374_v30 = vmul.f32 %v14634_v62, %v6174_v36  ;;  %v6175_v44 = vmax.f32 %v5473_v22, 0.0  ;;  %v5475_v45 = vadd.f32 %v5474_v37, %v13736_v34  ;;  %v8014_v62 = vld [vmem:[%s15509_s7 + $0x38] sm:$0xff] }
 0x4e3   :  { %v5478_v33 = vpop.f32.mrf.mxu0  ;;  %9049 = vmatmul.mubr.msk.f32.gmra.mxu0 %vm2149_vm2, %v3991_v27  ;;  %9517 = vmatpush3.msra.mxu1 %v8014_v62 }
 0x4e4   :  { %v7819_v56 = vadd.f32 %v7818_v13, %v7374_v30  ;;  %v7375_v41 = vmul.f32 %v6825_v48, %v6175_v44  ;;  %v6176_v32 = vmax.f32 %v5475_v45, 0.0  ;;  %5770 = vmatprep.mubr.f32.mxu0 %v15906_v50  ;;  %v5479_v4 = vadd.f32 %v5478_v33, %v13729_v6  ;;  %v16118_v30 = vld [vmem:[#allocation36_spill] sm:$0xff] }
 0x4e5   :  { %v5480_v58 = vpop.f32.mrf.mxu0  ;;  %v3705_v13 = vadd.f32 %v14816_v59, %v10171_v12  ;;  %v3709_v12 = vpop.f32.mrf.mxu1 }
 0x4e6   :  { %v7790_v21 = vadd.f32 %v7789_v42, %v7375_v41  ;;  %v7376_v47 = vmul.f32 %v6825_v48, %v6176_v32  ;;  %v5481_v60 = vadd.f32 %v5480_v58, %v13736_v34  ;;  %v6177_v43 = vmax.f32 %v5479_v4, 0.0 }
 0x4e7   :  { %v5484_v8 = vpop.f32.mrf.mxu0  ;;  %9050 = vmatmul.mubr.msk.f32.gmra.mxu0 %vm2149_vm2, %v3992_v18  ;;  %v3994_v42 = vmax.f32 %v3700_v2, 0.0  ;;  %v3995_v62 = vmax.f32 %v3705_v13, 0.0 }
 0x4e8   :  { %v7791_v61 = vrot.slane %v7790_v21, 4  ;;  %v7820_v52 = vadd.f32 %v7819_v56, %v7376_v47  ;;  %5776 = vmatprep.mubr.f32.mxu0 %v15906_v50  ;;  %v6178_v53 = vmax.f32 %v5481_v60, 0.0  ;;  %v5485_v17 = vadd.f32 %v5484_v8, %v13729_v6  ;;  %v16120_v60 = vld [vmem:[#allocation18_spill] sm:$0xff] }
 0x4e9   :  { %v5486_v5 = vpop.f32.mrf.mxu0  ;;  %v7377_v44 = vmul.f32 %v16118_v30, %v6177_v43  ;;  %v10177_v43 = vpop.f32.mrf.mxu1 }
 0x4ea   :  { %v7792_v16 = vadd.f32 %v7791_v61, %v7790_v21  ;;  %v7821_v55 = vrot.slane %v7820_v52, 4  ;;  %v5487_v14 = vadd.f32 %v5486_v5, %v13736_v34  ;;  %v6179_v10 = vmax.f32 %v5485_v17, 0.0 }
 0x4eb   :  { %v5490_v36 = vpop.f32.mrf.mxu0  ;;  %9051 = vmatmul.mubr.msk.f32.gmra.mxu0 %vm2149_vm2, %v3993_v49  ;;  %v7378_v45 = vmul.f32 %v16118_v30, %v6178_v53  ;;  %v3710_v49 = vadd.f32 %v14816_v59, %v3709_v12  ;;  %v16121_v30 = vld [vmem:[#allocation55_spill] sm:$0xff] }
 0x4ec   :  { %v7793_v22 = vrot.slane %v7792_v16, 2  ;;  %v7822_v27 = vadd.f32 %v7821_v55, %v7820_v52  ;;  %v6180_v26 = vmax.f32 %v5487_v14, 0.0  ;;  %v5491_v37 = vadd.f32 %v5490_v36, %v13729_v6  ;;  %5782 = vmatprep.mubr.f32.mxu0 %v15906_v50 }
 0x4ed   :  { %v7379_v48 = vmul.f32 %v16119_v54, %v6179_v10  ;;  %v5492_v33 = vpop.f32.mrf.mxu0 }
 0x4ee   :  { %v7794_v35 = vadd.f32 %v7793_v22, %v7792_v16  ;;  %v7823_v56 = vrot.slane %v7822_v27, 2  ;;  %v7380_v41 = vmul.f32 %v16119_v54, %v6180_v26  ;;  %v6181_v32 = vmax.f32 %v5491_v37, 0.0  ;;  %v3719_v54 = vpop.f32.mrf.mxu1 }
 0x4ef   :  { %v7827_v18 = vadd.f32 %v7379_v48, %v7377_v44  ;;  %v5493_v4 = vadd.f32 %v5492_v33, %v13736_v34  ;;  %v5496_v58 = vpop.f32.mrf.mxu0  ;;  %9052 = vmatmul.mubr.msk.f32.gmra.mxu0 %vm2149_vm2, %v3994_v42  ;;  %v3715_v26 = vadd.f32 %v14816_v59, %v10174_v57  ;;  %v3996_v37 = vmax.f32 %v3710_v49, 0.0 }
 0x4f0   :  { %v7795_v15 = vrot.slane %v7794_v35, 1  ;;  %v7824_v21 = vadd.f32 %v7823_v56, %v7822_v27  ;;  %v7857_v47 = vadd.f32 %v7380_v41, %v7378_v45  ;;  %v7381_v8 = vmul.f32 %v16120_v60, %v6181_v32  ;;  %5788 = vmatprep.mubr.f32.mxu0 %v15906_v50  ;;  %v16122_v41 = vld [vmem:[#allocation118_spill] sm:$0xff] }
 0x4f1   :  { %v6182_v61 = vmax.f32 %v5493_v4, 0.0  ;;  %v5497_v52 = vadd.f32 %v5496_v58, %v13729_v6  ;;  %v5498_v2 = vpop.f32.mrf.mxu0  ;;  %v3997_v4 = vmax.f32 %v3715_v26, 0.0  ;;  %v3720_v58 = vadd.f32 %v14816_v59, %v3719_v54 }
 0x4f2   :  { %v7796_v53 = vadd.f32 %v7795_v15, %v7794_v35  ;;  %v7825_v17 = vrot.slane %v7824_v21, 1  ;;  %v7828_v5 = vadd.f32 %v7827_v18, %v7381_v8  ;;  %v5499_v16 = vadd.f32 %v5498_v2, %v13736_v34 }
 0x4f3   :  { %v7382_v55 = vmul.f32 %v16120_v60, %v6182_v61  ;;  %v6183_v14 = vmax.f32 %v5497_v52, 0.0  ;;  %v5502_v13 = vpop.f32.mrf.mxu0  ;;  %9053 = vmatmul.mubr.msk.f32.gmra.mxu0 %vm2149_vm2, %v3995_v62  ;;  %v16123_v52 = vld [vmem:[#allocation124_spill] sm:$0xff] }
 0x4f4   :  { %v7826_v10 = vadd.f32 %v7825_v17, %v7824_v21  ;;  %v6184_v36 = vmax.f32 %v5499_v16, 0.0  ;;  %v5503_v22 = vadd.f32 %v5502_v13, %v13729_v6  ;;  %5794 = vmatprep.mubr.f32.mxu0 %v15906_v50  ;;  %v14896_v27 = vsel %vm8068_vm6, %v7796_v53, %v14682_v19  ;;  %v10180_v21 = vpop.f32.mrf.mxu1  ;;  %v8013_v16 = vld [vmem:[%s15509_s7 + $0x30] sm:$0xff] }
 0x4f5   :  { %v7858_v42 = vadd.f32 %v7857_v47, %v7382_v55  ;;  %v7383_v44 = vmul.f32 %v16121_v30, %v6183_v14  ;;  %v5504_v45 = vpop.f32.mrf.mxu0  ;;  %v3725_v55 = vadd.f32 %v14816_v59, %v10177_v43  ;;  %v3998_v14 = vmax.f32 %v3720_v58, 0.0 }
 0x4f6   :  { %v7384_v48 = vmul.f32 %v16121_v30, %v6184_v36  ;;  %v6185_v33 = vmax.f32 %v5503_v22, 0.0  ;;  %v5505_v12 = vadd.f32 %v5504_v45, %v13736_v34  ;;  %v14904_v35 = vsel %vm8068_vm6, %v7826_v10, %v14690_v3  ;;  %v3729_v10 = vpop.f32.mrf.mxu1 }
 0x4f7   :  { %v7829_v56 = vadd.f32 %v7828_v5, %v7383_v44  ;;  %v5508_v19 = vpop.f32.mrf.mxu0  ;;  %9054 = vmatmul.mubr.msk.f32.gmra.mxu0 %vm2149_vm2, %v3996_v37  ;;  %v8029_v5 = vld [vmem:[%s15509_s7 + $0xb0] sm:$0xff]  ;;  %v16124_v44 = vld [vmem:[#allocation128_spill] sm:$0xff] }
 0x4f8   :  { %v7859_v57 = vadd.f32 %v7858_v42, %v7384_v48  ;;  %v7385_v32 = vmul.f32 %v16122_v41, %v6185_v33  ;;  %v6186_v62 = vmax.f32 %v5505_v12, 0.0  ;;  %v5509_v18 = vadd.f32 %v5508_v19, %v13729_v6  ;;  %5800 = vmatprep.mubr.f32.mxu0 %v15906_v50  ;;  %9518 = vmatprep.subr.mxu1 %v8029_v5 }
 0x4f9   :  { %v5510_v15 = vpop.f32.mrf.mxu0  ;;  %9519 = vmatpush3.msra.mxu1 %v8013_v16  ;;  %v3999_v48 = vmax.f32 %v3725_v55, 0.0  ;;  %v3730_v33 = vadd.f32 %v14816_v59, %v3729_v10  ;;  %v16126_v16 = vld [vmem:[#allocation141_spill] sm:$0xff] }
 0x4fa   :  { %v7830_v47 = vadd.f32 %v7829_v56, %v7385_v32  ;;  %v7386_v3 = vmul.f32 %v16122_v41, %v6186_v62  ;;  %v6187_v60 = vmax.f32 %v5509_v18, 0.0  ;;  %v5511_v8 = vadd.f32 %v5510_v15, %v13736_v34  ;;  %v10183_v56 = vpop.f32.mrf.mxu1 }
 0x4fb   :  { %v5514_v49 = vpop.f32.mrf.mxu0  ;;  %9055 = vmatmul.mubr.msk.f32.gmra.mxu0 %vm2149_vm2, %v3997_v4  ;;  %v16125_v4 = vld [vmem:[#allocation134_spill] sm:$0xff] }
 0x4fc   :  { %v7860_v61 = vadd.f32 %v7859_v57, %v7386_v3  ;;  %v7387_v2 = vmul.f32 %v16123_v52, %v6187_v60  ;;  %v6188_v53 = vmax.f32 %v5511_v8, 0.0  ;;  %v5515_v17 = vadd.f32 %v5514_v49, %v13729_v6  ;;  %5806 = vmatprep.mubr.f32.mxu0 %v15906_v50  ;;  %v3739_v49 = vpop.f32.mrf.mxu1 }
 0x4fd   :  { %v5516_v13 = vpop.f32.mrf.mxu0  ;;  %v3735_v3 = vadd.f32 %v14816_v59, %v10180_v21  ;;  %v4000_v60 = vmax.f32 %v3730_v33, 0.0  ;;  %v3740_v10 = vadd.f32 %v14816_v59, %v3739_v49 }
 0x4fe   :  { %v7831_v36 = vadd.f32 %v7830_v47, %v7387_v2  ;;  %v7388_v22 = vmul.f32 %v16123_v52, %v6188_v53  ;;  %v6189_v26 = vmax.f32 %v5515_v17, 0.0  ;;  %v5517_v37 = vadd.f32 %v5516_v13, %v13736_v34 }
 0x4ff   :  { %v5520_v42 = vpop.f32.mrf.mxu0  ;;  %9056 = vmatmul.mubr.msk.f32.gmra.mxu0 %vm2149_vm2, %v3998_v14  ;;  %v4001_v21 = vmax.f32 %v3735_v3, 0.0 }
 0x500   :  { %v7861_v30 = vadd.f32 %v7860_v61, %v7388_v22  ;;  %v7389_v45 = vmul.f32 %v16124_v44, %v6189_v26  ;;  %v6190_v54 = vmax.f32 %v5517_v37, 0.0  ;;  %v5521_v43 = vadd.f32 %v5520_v42, %v13729_v6  ;;  %5812 = vmatprep.mubr.f32.mxu0 %v15906_v50  ;;  %v10186_v22 = vpop.f32.mrf.mxu1 }
 0x501   :  { %v5522_v12 = vpop.f32.mrf.mxu0 }
 0x502   :  { %v7832_v19 = vadd.f32 %v7831_v36, %v7389_v45  ;;  %v7390_v57 = vmul.f32 %v16124_v44, %v6190_v54  ;;  %v6191_v41 = vmax.f32 %v5521_v43, 0.0  ;;  %v5523_v32 = vadd.f32 %v5522_v12, %v13736_v34  ;;  %v16127_v54 = vld [vmem:[#allocation13_spill] sm:$0xff] }
 0x503   :  { %v5526_v62 = vpop.f32.mrf.mxu0  ;;  %9057 = vmatmul.mubr.msk.f32.gmra.mxu0 %vm2149_vm2, %v3999_v48  ;;  %v3745_v12 = vadd.f32 %v14816_v59, %v10183_v56 }
 0x504   :  { %v7862_v18 = vadd.f32 %v7861_v30, %v7390_v57  ;;  %v7391_v58 = vmul.f32 %v16125_v4, %v6191_v41  ;;  %v6192_v15 = vmax.f32 %v5523_v32, 0.0  ;;  %v5527_v47 = vadd.f32 %v5526_v62, %v13729_v6  ;;  %5818 = vmatprep.mubr.f32.mxu0 %v15906_v50  ;;  %v3749_v41 = vpop.f32.mrf.mxu1 }
 0x505   :  { %v5528_v8 = vpop.f32.mrf.mxu0  ;;  %v4003_v56 = vmax.f32 %v3745_v12, 0.0  ;;  %v3750_v49 = vadd.f32 %v14816_v59, %v3749_v41 }
 0x506   :  { %v7833_v61 = vadd.f32 %v7832_v19, %v7391_v58  ;;  %v7392_v52 = vmul.f32 %v16125_v4, %v6192_v15  ;;  %v6193_v2 = vmax.f32 %v5527_v47, 0.0  ;;  %v5529_v53 = vadd.f32 %v5528_v8, %v13736_v34  ;;  %v16128_v47 = vld [vmem:[#allocation144_spill] sm:$0xff] }
 0x507   :  { %v5532_v17 = vpop.f32.mrf.mxu0  ;;  %9058 = vmatmul.mubr.msk.f32.gmra.mxu0 %vm2149_vm2, %v4000_v60  ;;  %v4002_v19 = vmax.f32 %v3740_v10, 0.0 }
 0x508   :  { %v7863_v5 = vadd.f32 %v7862_v18, %v7392_v52  ;;  %v7393_v55 = vmul.f32 %v16126_v16, %v6193_v2  ;;  %v6194_v14 = vmax.f32 %v5529_v53, 0.0  ;;  %v5533_v13 = vadd.f32 %v5532_v17, %v13729_v6  ;;  %5824 = vmatprep.mubr.f32.mxu0 %v15906_v50  ;;  %v10189_v52 = vpop.f32.mrf.mxu1 }
 0x509   :  { %v5534_v36 = vpop.f32.mrf.mxu0 }
 0x50a   :  { %v7834_v26 = vadd.f32 %v7833_v61, %v7393_v55  ;;  %v7394_v37 = vmul.f32 %v16126_v16, %v6194_v14  ;;  %v6195_v42 = vmax.f32 %v5533_v13, 0.0  ;;  %v5535_v30 = vadd.f32 %v5534_v36, %v13736_v34  ;;  %v16129_v14 = vld [vmem:[#allocation151_spill] sm:$0xff]  ;;  %v8028_v36 = vld [vmem:[%s15509_s7 + $0xa8] sm:$0xff] }
 0x50b   :  { %v5538_v44 = vpop.f32.mrf.mxu0  ;;  %9059 = vmatmul.mubr.msk.f32.gmra.mxu0 %vm2149_vm2, %v4001_v21  ;;  %9520 = vmatprep.subr.mxu1 %v8028_v36 }
 0x50c   :  { %v7864_v45 = vadd.f32 %v7863_v5, %v7394_v37  ;;  %v7395_v43 = vmul.f32 %v16127_v54, %v6195_v42  ;;  %v6196_v48 = vmax.f32 %v5535_v30, 0.0  ;;  %v5539_v33 = vadd.f32 %v5538_v44, %v13729_v6  ;;  %5830 = vmatprep.mubr.f32.mxu0 %v15906_v50  ;;  %v3759_v30 = vpop.f32.mrf.mxu1 }
 0x50d   :  { %v5540_v57 = vpop.f32.mrf.mxu0  ;;  %v4004_v37 = vmax.f32 %v3750_v49, 0.0 }
 0x50e   :  { %v7835_v32 = vadd.f32 %v7834_v26, %v7395_v43  ;;  %v7396_v62 = vmul.f32 %v16127_v54, %v6196_v48  ;;  %v6197_v18 = vmax.f32 %v5539_v33, 0.0  ;;  %v5541_v4 = vadd.f32 %v5540_v57, %v13736_v34  ;;  %v8012_v48 = vld [vmem:[%s15509_s7 + $0x28] sm:$0xff] }
 0x50f   :  { %v5544_v58 = vpop.f32.mrf.mxu0  ;;  %9060 = vmatmul.mubr.msk.f32.gmra.mxu0 %vm2149_vm2, %v4002_v19  ;;  %v3755_v26 = vadd.f32 %v14816_v59, %v10186_v22  ;;  %9521 = vmatpush3.msra.mxu1 %v8012_v48  ;;  %v16130_v22 = vld [vmem:[#allocation38_spill] sm:$0xff] }
 0x510   :  { %v7865_v15 = vadd.f32 %v7864_v45, %v7396_v62  ;;  %v7397_v3 = vmul.f32 %v16128_v47, %v6197_v18  ;;  %v6198_v60 = vmax.f32 %v5541_v4, 0.0  ;;  %v5545_v8 = vadd.f32 %v5544_v58, %v13729_v6  ;;  %5836 = vmatprep.mubr.f32.mxu0 %v15906_v50  ;;  %v10192_v4 = vpop.f32.mrf.mxu1 }
 0x511   :  { %v5546_v61 = vpop.f32.mrf.mxu0  ;;  %v3760_v62 = vadd.f32 %v14816_v59, %v3759_v30 }
 0x512   :  { %v7836_v2 = vadd.f32 %v7835_v32, %v7397_v3  ;;  %v7398_v53 = vmul.f32 %v16128_v47, %v6198_v60  ;;  %v6199_v17 = vmax.f32 %v5545_v8, 0.0  ;;  %v5547_v5 = vadd.f32 %v5546_v61, %v13736_v34 }
 0x513   :  { %v5550_v16 = vpop.f32.mrf.mxu0  ;;  %9061 = vmatmul.mubr.msk.f32.gmra.mxu0 %vm2149_vm2, %v4003_v56  ;;  %v4005_v32 = vmax.f32 %v3755_v26, 0.0  ;;  %v16131_v56 = vld [vmem:[#allocation44_spill] sm:$0xff] }
 0x514   :  { %v7866_v55 = vadd.f32 %v7865_v15, %v7398_v53  ;;  %v7399_v13 = vmul.f32 %v16129_v14, %v6199_v17  ;;  %v6200_v21 = vmax.f32 %v5547_v5, 0.0  ;;  %v5551_v10 = vadd.f32 %v5550_v16, %v13729_v6  ;;  %5842 = vmatprep.mubr.f32.mxu0 %v15906_v50  ;;  %v3769_v16 = vpop.f32.mrf.mxu1 }
 0x515   :  { %v5552_v42 = vpop.f32.mrf.mxu0  ;;  %v3765_v53 = vadd.f32 %v14816_v59, %v10189_v52  ;;  %v4006_v17 = vmax.f32 %v3760_v62, 0.0  ;;  %v3770_v30 = vadd.f32 %v14816_v59, %v3769_v16 }
 0x516   :  { %v7837_v44 = vadd.f32 %v7836_v2, %v7399_v13  ;;  %v7400_v45 = vmul.f32 %v16129_v14, %v6200_v21  ;;  %v6201_v54 = vmax.f32 %v5551_v10, 0.0  ;;  %v5553_v43 = vadd.f32 %v5552_v42, %v13736_v34 }
 0x517   :  { %v5556_v33 = vpop.f32.mrf.mxu0  ;;  %9062 = vmatmul.mubr.msk.f32.gmra.mxu0 %vm2149_vm2, %v4004_v37  ;;  %v4007_v52 = vmax.f32 %v3765_v53, 0.0  ;;  %v4008_v62 = vmax.f32 %v3770_v30, 0.0 }
 0x518   :  { %v7867_v12 = vadd.f32 %v7866_v55, %v7400_v45  ;;  %v7401_v19 = vmul.f32 %v16130_v22, %v6201_v54  ;;  %v6202_v57 = vmax.f32 %v5553_v43, 0.0  ;;  %v5557_v41 = vadd.f32 %v5556_v33, %v13729_v6  ;;  %5848 = vmatprep.mubr.f32.mxu0 %v15906_v50  ;;  %v10195_v45 = vpop.f32.mrf.mxu1 }
 0x519   :  { %v5558_v18 = vpop.f32.mrf.mxu0 }
 0x51a   :  { %v7838_v58 = vadd.f32 %v7837_v44, %v7401_v19  ;;  %v7402_v15 = vmul.f32 %v16130_v22, %v6202_v57  ;;  %v6203_v47 = vmax.f32 %v5557_v41, 0.0  ;;  %v5559_v3 = vadd.f32 %v5558_v18, %v13736_v34 }
 0x51b   :  { %v5562_v60 = vpop.f32.mrf.mxu0  ;;  %9063 = vmatmul.mubr.msk.f32.gmra.mxu0 %vm2149_vm2, %v4005_v32  ;;  %v3775_v32 = vadd.f32 %v14816_v59, %v10192_v4 }
 0x51c   :  { %v7868_v8 = vadd.f32 %v7867_v12, %v7402_v15  ;;  %v7403_v49 = vmul.f32 %v16131_v56, %v6203_v47  ;;  %v6204_v61 = vmax.f32 %v5559_v3, 0.0  ;;  %v5563_v2 = vadd.f32 %v5562_v60, %v13729_v6  ;;  %5854 = vmatprep.mubr.f32.mxu0 %v15906_v50 }
 0x51d   :  { %v5564_v5 = vpop.f32.mrf.mxu0  ;;  %v4009_v4 = vmax.f32 %v3775_v32, 0.0 }
 0x51e   :  { %v7839_v55 = vadd.f32 %v7838_v58, %v7403_v49  ;;  %v7404_v14 = vmul.f32 %v16131_v56, %v6204_v61  ;;  %v6205_v13 = vmax.f32 %v5563_v2, 0.0  ;;  %v5565_v21 = vadd.f32 %v5564_v5, %v13736_v34  ;;  %v3779_v58 = vpop.f32.mrf.mxu1 }
 0x51f   :  { %v5568_v10 = vpop.f32.mrf.mxu0  ;;  %9064 = vmatmul.mubr.msk.f32.gmra.mxu0 %vm2149_vm2, %v4006_v17  ;;  %v3780_v2 = vadd.f32 %v14816_v59, %v3779_v58 }
 0x520   :  { %v7869_v36 = vadd.f32 %v7868_v8, %v7404_v14  ;;  %v7405_v26 = vmul.f32 %v13776_v0, %v6205_v13  ;;  %v6206_v37 = vmax.f32 %v5565_v21, 0.0  ;;  %v5569_v42 = vadd.f32 %v5568_v10, %v13729_v6  ;;  %5860 = vmatprep.mubr.f32.mxu0 %v15906_v50  ;;  %v10198_v17 = vpop.f32.mrf.mxu1 }
 0x521   :  { %v5570_v44 = vpop.f32.mrf.mxu0 }
 0x522   :  { %v7840_v54 = vadd.f32 %v7839_v55, %v7405_v26  ;;  %v7406_v43 = vmul.f32 %v13776_v0, %v6206_v37  ;;  %v6207_v48 = vmax.f32 %v5569_v42, 0.0  ;;  %v5571_v33 = vadd.f32 %v5570_v44, %v13736_v34 }
 0x523   :  { %v5574_v12 = vpop.f32.mrf.mxu0  ;;  %9065 = vmatmul.mubr.msk.f32.gmra.mxu0 %vm2149_vm2, %v4007_v52  ;;  %v3785_v26 = vadd.f32 %v14816_v59, %v10195_v45  ;;  %v4010_v37 = vmax.f32 %v3780_v2, 0.0  ;;  %v3789_v52 = vpop.f32.mrf.mxu1 }
 0x524   :  { %v7870_v22 = vadd.f32 %v7869_v36, %v7406_v43  ;;  %v7407_v19 = vmul.f32 %v13840_v25, %v6207_v48  ;;  %v6208_v57 = vmax.f32 %v5571_v33, 0.0  ;;  %v5575_v41 = vadd.f32 %v5574_v12, %v13729_v6  ;;  %5866 = vmatprep.mubr.f32.mxu0 %v15906_v50 }
 0x525   :  { %v5576_v18 = vpop.f32.mrf.mxu0  ;;  %v4011_v45 = vmax.f32 %v3785_v26, 0.0 }
 0x526   :  { %v7841_v0 = vadd.f32 %v7840_v54, %v7407_v19  ;;  %v7408_v15 = vmul.f32 %v13840_v25, %v6208_v57  ;;  %v6209_v47 = vmax.f32 %v5575_v41, 0.0  ;;  %v5577_v3 = vadd.f32 %v5576_v18, %v13736_v34  ;;  %v10201_v41 = vpop.f32.mrf.mxu1 }
 0x527   :  { %v5580_v60 = vpop.f32.mrf.mxu0  ;;  %9066 = vmatmul.mubr.msk.f32.gmra.mxu0 %vm2149_vm2, %v4008_v62  ;;  %v3790_v19 = vadd.f32 %v14816_v59, %v3789_v52 }
 0x528   :  { %v7871_v8 = vadd.f32 %v7870_v22, %v7408_v15  ;;  %v7409_v56 = vmul.f32 %v13904_v46, %v6209_v47  ;;  %v6210_v49 = vmax.f32 %v5577_v3, 0.0  ;;  %v5581_v61 = vadd.f32 %v5580_v60, %v13729_v6  ;;  %5872 = vmatprep.mubr.f32.mxu0 %v15906_v50 }
 0x529   :  { %v5582_v53 = vpop.f32.mrf.mxu0  ;;  %v3795_v60 = vadd.f32 %v14816_v59, %v10198_v17 }
 0x52a   :  { %v7842_v25 = vadd.f32 %v7841_v0, %v7409_v56  ;;  %v7410_v5 = vmul.f32 %v13904_v46, %v6210_v49  ;;  %v6211_v16 = vmax.f32 %v5581_v61, 0.0  ;;  %v5583_v55 = vadd.f32 %v5582_v53, %v13736_v34  ;;  %v3799_v49 = vpop.f32.mrf.mxu1 }
 0x52b   :  { %v5586_v14 = vpop.f32.mrf.mxu0  ;;  %9067 = vmatmul.mubr.msk.f32.gmra.mxu0 %vm2149_vm2, %v4009_v4  ;;  %v4013_v17 = vmax.f32 %v3795_v60, 0.0 }
 0x52c   :  { %v7872_v13 = vadd.f32 %v7871_v8, %v7410_v5  ;;  %v7411_v21 = vmul.f32 %v13968_v9, %v6211_v16  ;;  %v6212_v10 = vmax.f32 %v5583_v55, 0.0  ;;  %v5587_v36 = vadd.f32 %v5586_v14, %v13729_v6  ;;  %5878 = vmatprep.mubr.f32.mxu0 %v15906_v50 }
 0x52d   :  { %v5588_v42 = vpop.f32.mrf.mxu0  ;;  %v4012_v8 = vmax.f32 %v3790_v19, 0.0  ;;  %v3800_v14 = vadd.f32 %v14816_v59, %v3799_v49 }
 0x52e   :  { %v7843_v46 = vadd.f32 %v7842_v25, %v7411_v21  ;;  %v7412_v30 = vmul.f32 %v13968_v9, %v6212_v10  ;;  %v6213_v44 = vmax.f32 %v5587_v36, 0.0  ;;  %v5589_v54 = vadd.f32 %v5588_v42, %v13736_v34  ;;  %v10204_v21 = vpop.f32.mrf.mxu1  ;;  %v8011_v42 = vld [vmem:[%s15509_s7 + $0x20] sm:$0xff] }
 0x52f   :  { %v5592_v43 = vpop.f32.mrf.mxu0  ;;  %9068 = vmatmul.mubr.msk.f32.gmra.mxu0 %vm2149_vm2, %v4010_v37  ;;  %v8027_v37 = vld [vmem:[%s15509_s7 + $0xa0] sm:$0xff] }
 0x530   :  { %v7873_v48 = vadd.f32 %v7872_v13, %v7412_v30  ;;  %v7413_v33 = vmul.f32 %v14033_v63, %v6213_v44  ;;  %v6214_v12 = vmax.f32 %v5589_v54, 0.0  ;;  %v5593_v22 = vadd.f32 %v5592_v43, %v13729_v6  ;;  %5884 = vmatprep.mubr.f32.mxu0 %v15906_v50  ;;  %9522 = vmatprep.subr.mxu1 %v8027_v37 }
 0x531   :  { %v5594_v57 = vpop.f32.mrf.mxu0  ;;  %9523 = vmatpush3.msra.mxu1 %v8011_v42  ;;  %v3805_v54 = vadd.f32 %v14816_v59, %v10201_v41  ;;  %v4014_v43 = vmax.f32 %v3800_v14, 0.0 }
 0x532   :  { %v7844_v9 = vadd.f32 %v7843_v46, %v7413_v33  ;;  %v7414_v32 = vmul.f32 %v14033_v63, %v6214_v12  ;;  %v6215_v62 = vmax.f32 %v5593_v22, 0.0  ;;  %v5595_v18 = vadd.f32 %v5594_v57, %v13736_v34  ;;  %v3809_v33 = vpop.f32.mrf.mxu1 }
 0x533   :  { %v5598_v58 = vpop.f32.mrf.mxu0  ;;  %9069 = vmatmul.mubr.msk.f32.gmra.mxu0 %vm2149_vm2, %v4011_v45  ;;  %v4015_v41 = vmax.f32 %v3805_v54, 0.0 }
 0x534   :  { %v7874_v0 = vadd.f32 %v7873_v48, %v7414_v32  ;;  %v7415_v15 = vmul.f32 %v14091_v39, %v6215_v62  ;;  %v6216_v47 = vmax.f32 %v5595_v18, 0.0  ;;  %v5599_v3 = vadd.f32 %v5598_v58, %v13729_v6  ;;  %5890 = vmatprep.mubr.f32.mxu0 %v15906_v50 }
 0x535   :  { %v5600_v56 = vpop.f32.mrf.mxu0  ;;  %v3810_v58 = vadd.f32 %v14816_v59, %v3809_v33 }
 0x536   :  { %v7845_v63 = vadd.f32 %v7844_v9, %v7415_v15  ;;  %v7416_v61 = vmul.f32 %v14091_v39, %v6216_v47  ;;  %v6217_v4 = vmax.f32 %v5599_v3, 0.0  ;;  %v5601_v2 = vadd.f32 %v5600_v56, %v13736_v34 }
 0x537   :  { %v5604_v53 = vpop.f32.mrf.mxu0  ;;  %9070 = vmatmul.mubr.msk.f32.gmra.mxu0 %vm2149_vm2, %v4012_v8 }
 0x538   :  { %v7875_v25 = vadd.f32 %v7874_v0, %v7416_v61  ;;  %v7417_v5 = vmul.f32 %v14146_v31, %v6217_v4  ;;  %v6218_v16 = vmax.f32 %v5601_v2, 0.0  ;;  %v5605_v55 = vadd.f32 %v5604_v53, %v13729_v6  ;;  %5896 = vmatprep.mubr.f32.mxu0 %v15906_v50 }
 0x539   :  { %v5606_v13 = vpop.f32.mrf.mxu0  ;;  %v3815_v61 = vadd.f32 %v14816_v59, %v10204_v21  ;;  %v4016_v4 = vmax.f32 %v3810_v58, 0.0 }
 0x53a   :  { %v7846_v39 = vadd.f32 %v7845_v63, %v7417_v5  ;;  %v7418_v10 = vmul.f32 %v14146_v31, %v6218_v16  ;;  %v6219_v36 = vmax.f32 %v5605_v55, 0.0  ;;  %v5607_v26 = vadd.f32 %v5606_v13, %v13736_v34  ;;  %v8026_v16 = vld [vmem:[%s15509_s7 + $0x98] sm:$0xff]  ;;  %v6925_v55 = vpop.permute.xlu0 %6924 }
 0x53b   :  { %v5610_v52 = vpop.f32.mrf.mxu0  ;;  %9071 = vmatmul.mubr.msk.f32.gmra.mxu0 %vm2149_vm2, %v4013_v17  ;;  %9524 = vmatprep.subr.mxu1 %v8026_v16  ;;  %v4017_v21 = vmax.f32 %v3815_v61, 0.0 }
 0x53c   :  { %v7876_v46 = vadd.f32 %v7875_v25, %v7418_v10  ;;  %v7419_v30 = vmul.f32 %v14196_v51, %v6219_v36  ;;  %v6220_v44 = vmax.f32 %v5607_v26, 0.0  ;;  %v5611_v31 = vadd.f32 %v5610_v52, %v13729_v6  ;;  %5902 = vmatprep.mubr.f32.mxu0 %v15906_v50 }
 0x53d   :  { %v5612_v48 = vpop.f32.mrf.mxu0 }
 0x53e   :  { %v7847_v12 = vadd.f32 %v7846_v39, %v7419_v30  ;;  %v7420_v22 = vmul.f32 %v14196_v51, %v6220_v44  ;;  %v6221_v45 = vmax.f32 %v5611_v31, 0.0  ;;  %v5613_v19 = vadd.f32 %v5612_v48, %v13736_v34 }
 0x53f   :  { %v5616_v57 = vpop.f32.mrf.mxu0  ;;  %9072 = vmatmul.mubr.msk.f32.gmra.mxu0 %vm2149_vm2, %v4014_v43 }
 0x540   :  { %v7877_v9 = vadd.f32 %v7876_v46, %v7420_v22  ;;  %v7421_v32 = vmul.f32 %v14414_v20, %v6221_v45  ;;  %v6222_v62 = vmax.f32 %v5613_v19, 0.0  ;;  %v5617_v18 = vadd.f32 %v5616_v57, %v13729_v6  ;;  %5908 = vmatprep.mubr.f32.mxu0 %v15906_v50 }
 0x541   :  { %v5618_v0 = vpop.f32.mrf.mxu0 }
 0x542   :  { %v7848_v15 = vadd.f32 %v7847_v12, %v7421_v32  ;;  %v7422_v51 = vmul.f32 %v14414_v20, %v6222_v62  ;;  %v6223_v47 = vmax.f32 %v5617_v18, 0.0  ;;  %v5619_v3 = vadd.f32 %v5618_v0, %v13736_v34  ;;  %v16132_v32 = vld [vmem:[#allocation98_spill] sm:$0xff] }
 0x543   :  { %v5622_v60 = vpop.f32.mrf.mxu0  ;;  %9073 = vmatmul.mubr.msk.f32.gmra.mxu0 %vm2149_vm2, %v4015_v41  ;;  %v16133_v41 = vld [vmem:[#allocation7_spill] sm:$0xff] }
 0x544   :  { %v7878_v8 = vadd.f32 %v7877_v9, %v7422_v51  ;;  %v7423_v56 = vmul.f32 %v14848_v11, %v6223_v47  ;;  %v6224_v49 = vmax.f32 %v5619_v3, 0.0  ;;  %v5623_v63 = vadd.f32 %v5622_v60, %v13729_v6  ;;  %5914 = vmatprep.mubr.f32.mxu0 %v15906_v50 }
 0x545   :  { %v5624_v2 = vpop.f32.mrf.mxu0 }
 0x546   :  { %v7849_v53 = vadd.f32 %v7848_v15, %v7423_v56  ;;  %v7424_v20 = vmul.f32 %v14848_v11, %v6224_v49  ;;  %v6225_v25 = vmax.f32 %v5623_v63, 0.0  ;;  %v5625_v5 = vadd.f32 %v5624_v2, %v13736_v34  ;;  %v8010_v11 = vld [vmem:[%s15509_s7 + $0x18] sm:$0xff] }
 0x547   :  { %v5628_v17 = vpop.f32.mrf.mxu0  ;;  %9074 = vmatmul.mubr.msk.f32.gmra.mxu0 %vm2149_vm2, %v4016_v4  ;;  %9525 = vmatpush3.msra.mxu1 %v8010_v11  ;;  %v16134_v4 = vld [vmem:[#allocation51_spill] sm:$0xff] }
 0x548   :  { %v7879_v14 = vadd.f32 %v7878_v8, %v7424_v20  ;;  %v7425_v13 = vmul.f32 %v6925_v55, %v6225_v25  ;;  %v6226_v59 = vmax.f32 %v5625_v5, 0.0  ;;  %5920 = vmatprep.mubr.f32.mxu0 %v15906_v50  ;;  %v5629_v39 = vadd.f32 %v5628_v17, %v13729_v6 }
 0x549   :  { %v5630_v10 = vpop.f32.mrf.mxu0 }
 0x54a   :  { %v7850_v36 = vadd.f32 %v7849_v53, %v7425_v13  ;;  %v7426_v26 = vmul.f32 %v6925_v55, %v6226_v59  ;;  %v5631_v37 = vadd.f32 %v5630_v10, %v13736_v34  ;;  %v6227_v30 = vmax.f32 %v5629_v39, 0.0 }
 0x54b   :  { %v5634_v42 = vpop.f32.mrf.mxu0  ;;  %9075 = vmatmul.mubr.msk.f32.gmra.mxu0 %vm2149_vm2, %v4017_v21 }
 0x54c   :  { %v7851_v52 = vrot.slane %v7850_v36, 4  ;;  %v7880_v46 = vadd.f32 %v7879_v14, %v7426_v26  ;;  %v6228_v44 = vmax.f32 %v5631_v37, 0.0  ;;  %v5635_v31 = vadd.f32 %v5634_v42, %v13729_v6  ;;  %v16135_v26 = vld [vmem:[#allocation113_spill] sm:$0xff] }
 0x54d   :  { %v5636_v54 = vpop.f32.mrf.mxu0  ;;  %v7427_v62 = vmul.f32 %v16132_v32, %v6227_v30 }
 0x54e   :  { %v7852_v43 = vadd.f32 %v7851_v52, %v7850_v36  ;;  %v7881_v48 = vrot.slane %v7880_v46, 4  ;;  %v5637_v33 = vadd.f32 %v5636_v54, %v13736_v34  ;;  %v6229_v12 = vmax.f32 %v5635_v31, 0.0 }
 0x54f   :  { %v5640_v22 = vpop.f32.mrf.mxu0  ;;  %v7428_v18 = vmul.f32 %v16132_v32, %v6228_v44 }
 0x550   :  { %v7853_v45 = vrot.slane %v7852_v43, 2  ;;  %v7882_v19 = vadd.f32 %v7881_v48, %v7880_v46  ;;  %v6230_v57 = vmax.f32 %v5637_v33, 0.0  ;;  %v5641_v9 = vadd.f32 %v5640_v22, %v13729_v6  ;;  %v16136_v48 = vld [vmem:[#allocation65_spill] sm:$0xff] }
 0x551   :  { %v7429_v58 = vmul.f32 %v16133_v41, %v6229_v12  ;;  %v5642_v0 = vpop.f32.mrf.mxu0 }
 0x552   :  { %v7854_v15 = vadd.f32 %v7853_v45, %v7852_v43  ;;  %v7883_v51 = vrot.slane %v7882_v19, 2  ;;  %v7430_v47 = vmul.f32 %v16133_v41, %v6230_v57  ;;  %v6231_v3 = vmax.f32 %v5641_v9, 0.0 }
 0x553   :  { %v7887_v60 = vadd.f32 %v7429_v58, %v7427_v62  ;;  %v5643_v8 = vadd.f32 %v5642_v0, %v13736_v34  ;;  %v5646_v56 = vpop.f32.mrf.mxu0  ;;  %v8025_v0 = vld [vmem:[%s15509_s7 + $0x90] sm:$0xff] }
 0x554   :  { %v7855_v49 = vrot.slane %v7854_v15, 1  ;;  %v7884_v63 = vadd.f32 %v7883_v51, %v7882_v19  ;;  %v7917_v61 = vadd.f32 %v7430_v47, %v7428_v18  ;;  %v7431_v2 = vmul.f32 %v16134_v4, %v6231_v3  ;;  %v16137_v18 = vld [vmem:[#allocation125_spill] sm:$0xff]  ;;  %9526 = vmatprep.subr.mxu1 %v8025_v0 }
 0x555   :  { %v6232_v53 = vmax.f32 %v5643_v8, 0.0  ;;  %v5647_v20 = vadd.f32 %v5646_v56, %v13729_v6  ;;  %v5648_v25 = vpop.f32.mrf.mxu0 }
 0x556   :  { %v7856_v5 = vadd.f32 %v7855_v49, %v7854_v15  ;;  %v7885_v16 = vrot.slane %v7884_v63, 1  ;;  %v7888_v55 = vadd.f32 %v7887_v60, %v7431_v2  ;;  %v5649_v17 = vadd.f32 %v5648_v25, %v13736_v34  ;;  %v8009_v15 = vld [vmem:[%s15509_s7 + $0x10] sm:$0xff] }
 0x557   :  { %v7432_v14 = vmul.f32 %v16134_v4, %v6232_v53  ;;  %v6233_v13 = vmax.f32 %v5647_v20, 0.0  ;;  %v5652_v59 = vpop.f32.mrf.mxu0  ;;  %9527 = vmatpush3.msra.mxu1 %v8009_v15 }
 0x558   :  { %v6234_v11 = vmax.f32 %v5649_v17, 0.0  ;;  %v5653_v21 = vadd.f32 %v5652_v59, %v13729_v6  ;;  %v7886_v39 = vadd.f32 %v7885_v16, %v7884_v63  ;;  %v15090_v10 = vsel %vm8070_vm7, %v7856_v5, %v14896_v27  ;;  %v16138_v63 = vld [vmem:[#allocation132_spill] sm:$0xff] }
 0x559   :  { %v7918_v36 = vadd.f32 %v7917_v61, %v7432_v14  ;;  %v7433_v37 = vmul.f32 %v16135_v26, %v6233_v13  ;;  %v5654_v42 = vpop.f32.mrf.mxu0  ;;  %v16139_v14 = vld [vmem:[#allocation137_spill] sm:$0xff] }
 0x55a   :  { %v7434_v52 = vmul.f32 %v16135_v26, %v6234_v11  ;;  %v6235_v46 = vmax.f32 %v5653_v21, 0.0  ;;  %v5655_v30 = vadd.f32 %v5654_v42, %v13736_v34  ;;  %v15097_v44 = vsel %vm8070_vm7, %v7886_v39, %v14904_v35 }
 0x55b   :  { %v7889_v31 = vadd.f32 %v7888_v55, %v7433_v37  ;;  %v5658_v54 = vpop.f32.mrf.mxu0 }
 0x55c   :  { %v7919_v43 = vadd.f32 %v7918_v36, %v7434_v52  ;;  %v7435_v33 = vmul.f32 %v16136_v48, %v6235_v46  ;;  %v6236_v27 = vmax.f32 %v5655_v30, 0.0  ;;  %v5659_v12 = vadd.f32 %v5658_v54, %v13729_v6  ;;  %v16140_v46 = vld [vmem:[#allocation9_spill] sm:$0xff] }
 0x55d   :  { %v5660_v22 = vpop.f32.mrf.mxu0 }
 0x55e   :  { %v7890_v45 = vadd.f32 %v7889_v31, %v7435_v33  ;;  %v7436_v19 = vmul.f32 %v16136_v48, %v6236_v27  ;;  %v6237_v57 = vmax.f32 %v5659_v12, 0.0  ;;  %v5661_v9 = vadd.f32 %v5660_v22, %v13736_v34 }
 0x55f   :  { %v5664_v32 = vpop.f32.mrf.mxu0 }
 0x560   :  { %v7920_v62 = vadd.f32 %v7919_v43, %v7436_v19  ;;  %v7437_v35 = vmul.f32 %v16137_v18, %v6237_v57  ;;  %v6238_v41 = vmax.f32 %v5661_v9, 0.0  ;;  %v5665_v58 = vadd.f32 %v5664_v32, %v13729_v6  ;;  %v16141_v19 = vld [vmem:[#allocation21_spill] sm:$0xff] }
 0x561   :  { %v5666_v51 = vpop.f32.mrf.mxu0 }
 0x562   :  { %v7891_v47 = vadd.f32 %v7890_v45, %v7437_v35  ;;  %v7438_v3 = vmul.f32 %v16137_v18, %v6238_v41  ;;  %v6239_v60 = vmax.f32 %v5665_v58, 0.0  ;;  %v5667_v8 = vadd.f32 %v5666_v51, %v13736_v34  ;;  %v16142_v51 = vld [vmem:[#allocation147_spill] sm:$0xff] }
 0x563   :  { %v5670_v56 = vpop.f32.mrf.mxu0 }
 0x564   :  { %v7921_v49 = vadd.f32 %v7920_v62, %v7438_v3  ;;  %v7439_v61 = vmul.f32 %v16138_v63, %v6239_v60  ;;  %v6240_v4 = vmax.f32 %v5667_v8, 0.0  ;;  %v5671_v2 = vadd.f32 %v5670_v56, %v13729_v6 }
 0x565   :  { %v5672_v53 = vpop.f32.mrf.mxu0 }
 0x566   :  { %v7892_v20 = vadd.f32 %v7891_v47, %v7439_v61  ;;  %v7440_v25 = vmul.f32 %v16138_v63, %v6240_v4  ;;  %v6241_v5 = vmax.f32 %v5671_v2, 0.0  ;;  %v5673_v16 = vadd.f32 %v5672_v53, %v13736_v34  ;;  %v16143_v53 = vld [vmem:[#allocation34_spill] sm:$0xff] }
 0x567   :  { %v5676_v55 = vpop.f32.mrf.mxu0 }
 0x568   :  { %v7922_v17 = vadd.f32 %v7921_v49, %v7440_v25  ;;  %v7441_v13 = vmul.f32 %v16139_v14, %v6241_v5  ;;  %v6242_v59 = vmax.f32 %v5673_v16, 0.0  ;;  %v5677_v11 = vadd.f32 %v5676_v55, %v13729_v6  ;;  %v8024_v16 = vld [vmem:[%s15509_s7 + $0x88] sm:$0xff] }
 0x569   :  { %v5678_v21 = vpop.f32.mrf.mxu0  ;;  %9528 = vmatprep.subr.mxu1 %v8024_v16 }
 0x56a   :  { %v7893_v39 = vadd.f32 %v7892_v20, %v7441_v13  ;;  %v7442_v36 = vmul.f32 %v16139_v14, %v6242_v59  ;;  %v6243_v26 = vmax.f32 %v5677_v11, 0.0  ;;  %v5679_v37 = vadd.f32 %v5678_v21, %v13736_v34  ;;  %v8008_v11 = vld [vmem:[%s15509_s7 + $0x8] sm:$0xff] }
 0x56b   :  { %v5682_v42 = vpop.f32.mrf.mxu0  ;;  %9529 = vmatpush3.msra.mxu1 %v8008_v11 }
 0x56c   :  { %v7923_v52 = vadd.f32 %v7922_v17, %v7442_v36  ;;  %v7443_v30 = vmul.f32 %v16140_v46, %v6243_v26  ;;  %v6244_v31 = vmax.f32 %v5679_v37, 0.0  ;;  %v5683_v54 = vadd.f32 %v5682_v42, %v13729_v6  ;;  %v16144_v36 = vld [vmem:[#allocation40_spill] sm:$0xff] }
 0x56d   :  { %v5684_v43 = vpop.f32.mrf.mxu0 }
 0x56e   :  { %v7894_v48 = vadd.f32 %v7893_v39, %v7443_v30  ;;  %v7444_v33 = vmul.f32 %v16140_v46, %v6244_v31  ;;  %v6245_v27 = vmax.f32 %v5683_v54, 0.0  ;;  %v5685_v12 = vadd.f32 %v5684_v43, %v13736_v34 }
 0x56f   :  { %v5688_v22 = vpop.f32.mrf.mxu0 }
 0x570   :  { %v7924_v45 = vadd.f32 %v7923_v52, %v7444_v33  ;;  %v7445_v57 = vmul.f32 %v16141_v19, %v6245_v27  ;;  %v6246_v9 = vmax.f32 %v5685_v12, 0.0  ;;  %v5689_v32 = vadd.f32 %v5688_v22, %v13729_v6  ;;  %v16145_v33 = vld [vmem:[#allocation107_spill] sm:$0xff] }
 0x571   :  { %v5690_v62 = vpop.f32.mrf.mxu0 }
 0x572   :  { %v7895_v18 = vadd.f32 %v7894_v48, %v7445_v57  ;;  %v7446_v35 = vmul.f32 %v16141_v19, %v6246_v9  ;;  %v6247_v41 = vmax.f32 %v5689_v32, 0.0  ;;  %v5691_v58 = vadd.f32 %v5690_v62, %v13736_v34 }
 0x573   :  { %v5694_v0 = vpop.f32.mrf.mxu0 }
 0x574   :  { %v7925_v15 = vadd.f32 %v7924_v45, %v7446_v35  ;;  %v7447_v47 = vmul.f32 %v16142_v51, %v6247_v41  ;;  %v6248_v3 = vmax.f32 %v5691_v58, 0.0  ;;  %v5695_v60 = vadd.f32 %v5694_v0, %v13729_v6  ;;  %v16146_v35 = vld [vmem:[#allocation112_spill] sm:$0xff] }
 0x575   :  { %v5696_v8 = vpop.f32.mrf.mxu0 }
 0x576   :  { %v7896_v56 = vadd.f32 %v7895_v18, %v7447_v47  ;;  %v7448_v49 = vmul.f32 %v16142_v51, %v6248_v3  ;;  %v6249_v63 = vmax.f32 %v5695_v60, 0.0  ;;  %v5697_v61 = vadd.f32 %v5696_v8, %v13736_v34 }
 0x577   :  { %v5700_v4 = vpop.f32.mrf.mxu0 }
 0x578   :  { %v7926_v2 = vadd.f32 %v7925_v15, %v7448_v49  ;;  %v7449_v20 = vmul.f32 %v16143_v53, %v6249_v63  ;;  %v6250_v25 = vmax.f32 %v5697_v61, 0.0  ;;  %v5701_v5 = vadd.f32 %v5700_v4, %v13729_v6 }
 0x579   :  { %v5702_v55 = vpop.f32.mrf.mxu0 }
 0x57a   :  { %v7897_v17 = vadd.f32 %v7896_v56, %v7449_v20  ;;  %v7450_v14 = vmul.f32 %v16143_v53, %v6250_v25  ;;  %v6251_v13 = vmax.f32 %v5701_v5, 0.0  ;;  %v5703_v59 = vadd.f32 %v5702_v55, %v13736_v34 }
 0x57b   :  { %v5706_v21 = vpop.f32.mrf.mxu0 }
 0x57c   :  { %v7927_v39 = vadd.f32 %v7926_v2, %v7450_v14  ;;  %v7451_v26 = vmul.f32 %v16144_v36, %v6251_v13  ;;  %v6252_v37 = vmax.f32 %v5703_v59, 0.0  ;;  %v5707_v42 = vadd.f32 %v5706_v21, %v13729_v6 }
 0x57d   :  { %v5708_v52 = vpop.f32.mrf.mxu0 }
 0x57e   :  { %v7898_v46 = vadd.f32 %v7897_v17, %v7451_v26  ;;  %v7452_v30 = vmul.f32 %v16144_v36, %v6252_v37  ;;  %v6253_v31 = vmax.f32 %v5707_v42, 0.0  ;;  %v5709_v54 = vadd.f32 %v5708_v52, %v13736_v34 }
 0x57f   :  { %v5712_v43 = vpop.f32.mrf.mxu0 }
 0x580   :  { %v7928_v48 = vadd.f32 %v7927_v39, %v7452_v30  ;;  %v7453_v27 = vmul.f32 %v16145_v33, %v6253_v31  ;;  %v6254_v12 = vmax.f32 %v5709_v54, 0.0  ;;  %v5713_v22 = vadd.f32 %v5712_v43, %v13729_v6 }
 0x581   :  { %v5714_v45 = vpop.f32.mrf.mxu0 }
 0x582   :  { %v7899_v19 = vadd.f32 %v7898_v46, %v7453_v27  ;;  %v7454_v57 = vmul.f32 %v16145_v33, %v6254_v12  ;;  %v6255_v9 = vmax.f32 %v5713_v22, 0.0  ;;  %v5715_v32 = vadd.f32 %v5714_v45, %v13736_v34 }
 0x583   :  { %v5718_v62 = vpop.f32.mrf.mxu0 }
 0x584   :  { %v7929_v18 = vadd.f32 %v7928_v48, %v7454_v57  ;;  %v7455_v41 = vmul.f32 %v16146_v35, %v6255_v9  ;;  %v6256_v58 = vmax.f32 %v5715_v32, 0.0  ;;  %v5719_v0 = vadd.f32 %v5718_v62, %v13729_v6 }
 0x585   :  { %v5720_v15 = vpop.f32.mrf.mxu0 }
 0x586   :  { %v7900_v51 = vadd.f32 %v7899_v19, %v7455_v41  ;;  %v7456_v47 = vmul.f32 %v16146_v35, %v6256_v58  ;;  %v6257_v3 = vmax.f32 %v5719_v0, 0.0  ;;  %v5721_v60 = vadd.f32 %v5720_v15, %v13736_v34 }
 0x587   :  { %v5724_v8 = vpop.f32.mrf.mxu0 }
 0x588   :  { %v7930_v56 = vadd.f32 %v7929_v18, %v7456_v47  ;;  %v7457_v49 = vmul.f32 %v13872_v29, %v6257_v3  ;;  %v6258_v63 = vmax.f32 %v5721_v60, 0.0  ;;  %v5725_v61 = vadd.f32 %v5724_v8, %v13729_v6  ;;  %v8023_v8 = vld [vmem:[%s15509_s7 + $0x80] sm:$0xff] }
 0x589   :  { %v5726_v4 = vpop.f32.mrf.mxu0  ;;  %9530 = vmatprep.subr.mxu1 %v8023_v8 }
 0x58a   :  { %v7901_v2 = vadd.f32 %v7900_v51, %v7457_v49  ;;  %v7458_v53 = vmul.f32 %v13872_v29, %v6258_v63  ;;  %v6259_v20 = vmax.f32 %v5725_v61, 0.0  ;;  %v5727_v25 = vadd.f32 %v5726_v4, %v13736_v34 }
 0x58b   :  { %v5730_v5 = vpop.f32.mrf.mxu0 }
 0x58c   :  { %v7931_v16 = vadd.f32 %v7930_v56, %v7458_v53  ;;  %v7459_v55 = vmul.f32 %v13936_v24, %v6259_v20  ;;  %v6260_v17 = vmax.f32 %v5727_v25, 0.0  ;;  %v5731_v14 = vadd.f32 %v5730_v5, %v13729_v6  ;;  %v8007_v56 = vld [vmem:[%s15509_s7] sm:$0xff] }
 0x58d   :  { %v5732_v13 = vpop.f32.mrf.mxu0  ;;  %9531 = vmatpush3.msra.mxu1 %v8007_v56  ;;  %v16147_v20 = vld [vmem:[#allocation116_spill] sm:$0xff] }
 0x58e   :  { %v7902_v59 = vadd.f32 %v7901_v2, %v7459_v55  ;;  %v7460_v11 = vmul.f32 %v13936_v24, %v6260_v17  ;;  %v6261_v21 = vmax.f32 %v5731_v14, 0.0  ;;  %v5733_v39 = vadd.f32 %v5732_v13, %v13736_v34  ;;  %10205 = vmatprep.subr.mxu1 %v15906_v50  ;;  %v15188_v55 = vpop.permute.xlu1 %7116 }
 0x58f   :  { %v5736_v36 = vpop.f32.mrf.mxu0 }
 0x590   :  { %v7932_v26 = vadd.f32 %v7931_v16, %v7460_v11  ;;  %v7461_v29 = vmul.f32 %v14005_v38, %v6261_v21  ;;  %v6262_v37 = vmax.f32 %v5733_v39, 0.0  ;;  %v5737_v42 = vadd.f32 %v5736_v36, %v13729_v6 }
 0x591   :  { %v5738_v52 = vpop.f32.mrf.mxu0 }
 0x592   :  { %v7903_v46 = vadd.f32 %v7902_v59, %v7461_v29  ;;  %v7462_v30 = vmul.f32 %v14005_v38, %v6262_v37  ;;  %v6263_v31 = vmax.f32 %v5737_v42, 0.0  ;;  %v5739_v54 = vadd.f32 %v5738_v52, %v13736_v34 }
 0x593   :  { %v5742_v43 = vpop.f32.mrf.mxu0 }
 0x594   :  { %v7933_v48 = vadd.f32 %v7932_v26, %v7462_v30  ;;  %v7463_v24 = vmul.f32 %v14063_v23, %v6263_v31  ;;  %v6264_v33 = vmax.f32 %v5739_v54, 0.0  ;;  %v5743_v27 = vadd.f32 %v5742_v43, %v13729_v6  ;;  %v7021_v30 = vpop.permute.xlu1 %7020 }
 0x595   :  { %v5744_v12 = vpop.f32.mrf.mxu0 }
 0x596   :  { %v7904_v22 = vadd.f32 %v7903_v46, %v7463_v24  ;;  %v7464_v45 = vmul.f32 %v14063_v23, %v6264_v33  ;;  %v6265_v19 = vmax.f32 %v5743_v27, 0.0  ;;  %v5745_v57 = vadd.f32 %v5744_v12, %v13736_v34 }
 0x597   :  { %v5748_v9 = vpop.f32.mrf.mxu0 }
 0x598   :  { %v7934_v32 = vadd.f32 %v7933_v48, %v7464_v45  ;;  %v7465_v38 = vmul.f32 %v14119_v28, %v6265_v19  ;;  %v6266_v62 = vmax.f32 %v5745_v57, 0.0  ;;  %v5749_v18 = vadd.f32 %v5748_v9, %v13729_v6  ;;  %v7025_v19 = vpop.permute.xlu0 %7024 }
 0x599   :  { %v5750_v35 = vpop.f32.mrf.mxu0 }
 0x59a   :  { %v7905_v41 = vadd.f32 %v7904_v22, %v7465_v38  ;;  %v7466_v58 = vmul.f32 %v14119_v28, %v6266_v62  ;;  %v6267_v0 = vmax.f32 %v5749_v18, 0.0  ;;  %v5751_v15 = vadd.f32 %v5750_v35, %v13736_v34 }
 0x59b   :  { %v5754_v51 = vpop.f32.mrf.mxu0 }
 0x59c   :  { %v7935_v47 = vadd.f32 %v7934_v32, %v7466_v58  ;;  %v7467_v23 = vmul.f32 %v14171_v40, %v6267_v0  ;;  %v6268_v3 = vmax.f32 %v5751_v15, 0.0  ;;  %v5755_v60 = vadd.f32 %v5754_v51, %v13729_v6 }
 0x59d   :  { %v5756_v49 = vpop.f32.mrf.mxu0 }
 0x59e   :  { %v7906_v28 = vadd.f32 %v7905_v41, %v7467_v23  ;;  %v7468_v63 = vmul.f32 %v14171_v40, %v6268_v3  ;;  %v6269_v61 = vmax.f32 %v5755_v60, 0.0  ;;  %v5757_v4 = vadd.f32 %v5756_v49, %v13736_v34 }
 0x59f   :  { %v5760_v2 = vpop.f32.mrf.mxu0 }
 0x5a0   :  { %v7936_v53 = vadd.f32 %v7935_v47, %v7468_v63  ;;  %v7469_v25 = vmul.f32 %v16147_v20, %v6269_v61  ;;  %v6270_v5 = vmax.f32 %v5757_v4, 0.0  ;;  %v5761_v16 = vadd.f32 %v5760_v2, %v13729_v6 }
 0x5a1   :  { %v5762_v17 = vpop.f32.mrf.mxu0 }
 0x5a2   :  { %v7907_v14 = vadd.f32 %v7906_v28, %v7469_v25  ;;  %v7470_v13 = vmul.f32 %v16147_v20, %v6270_v5  ;;  %v6271_v40 = vmax.f32 %v5761_v16, 0.0  ;;  %v5763_v59 = vadd.f32 %v5762_v17, %v13736_v34 }
 0x5a3   :  { %v5766_v11 = vpop.f32.mrf.mxu0 }
 0x5a4   :  { %v7937_v21 = vadd.f32 %v7936_v53, %v7470_v13  ;;  %v7471_v39 = vmul.f32 %v14834_v1, %v6271_v40  ;;  %v6272_v36 = vmax.f32 %v5763_v59, 0.0  ;;  %v5767_v26 = vadd.f32 %v5766_v11, %v13729_v6 }
 0x5a5   :  { %v5768_v29 = vpop.f32.mrf.mxu0 }
 0x5a6   :  { %v7908_v37 = vadd.f32 %v7907_v14, %v7471_v39  ;;  %v7472_v42 = vmul.f32 %v14834_v1, %v6272_v36  ;;  %v6273_v52 = vmax.f32 %v5767_v26, 0.0  ;;  %v5769_v46 = vadd.f32 %v5768_v29, %v13736_v34 }
 0x5a7   :  { %v5772_v31 = vpop.f32.mrf.mxu0 }
 0x5a8   :  { %v7938_v54 = vadd.f32 %v7937_v21, %v7472_v42  ;;  %v7473_v43 = vmul.f32 %v7021_v30, %v6273_v52  ;;  %v6274_v48 = vmax.f32 %v5769_v46, 0.0  ;;  %v5773_v24 = vadd.f32 %v5772_v31, %v13729_v6 }
 0x5a9   :  { %v5774_v33 = vpop.f32.mrf.mxu0 }
 0x5aa   :  { %v7909_v27 = vadd.f32 %v7908_v37, %v7473_v43  ;;  %v7474_v12 = vmul.f32 %v7021_v30, %v6274_v48  ;;  %v6275_v22 = vmax.f32 %v5773_v24, 0.0  ;;  %v5775_v45 = vadd.f32 %v5774_v33, %v13736_v34 }
 0x5ab   :  { %v5778_v57 = vpop.f32.mrf.mxu0 }
 0x5ac   :  { %v7939_v9 = vadd.f32 %v7938_v54, %v7474_v12  ;;  %v7475_v1 = vmul.f32 %v7025_v19, %v6275_v22  ;;  %v6276_v32 = vmax.f32 %v5775_v45, 0.0 }
 0x5ad   :  { %v5780_v38 = vpop.f32.mrf.mxu0 }
 0x5ae   :  { %v7910_v62 = vadd.f32 %v7909_v27, %v7475_v1  ;;  %v7476_v18 = vmul.f32 %v7025_v19, %v6276_v32  ;;  %v5781_v46 = vadd.f32 %v5780_v38, %v13736_v34  ;;  %v16148_v19 = vld [vmem:[#allocation5_spill] sm:$0xff] }
 0x5af   :  { %v5784_v35 = vpop.f32.mrf.mxu0 }
 0x5b0   :  { %v7911_v41 = vrot.slane %v7910_v62, 4  ;;  %v7940_v58 = vadd.f32 %v7939_v9, %v7476_v18  ;;  %v5785_v29 = vadd.f32 %v5784_v35, %v13729_v6  ;;  %v6278_v45 = vmax.f32 %v5781_v46, 0.0  ;;  %v16149_v18 = vld [vmem:[#allocation103_spill] sm:$0xff] }
 0x5b1   :  { %v5786_v0 = vpop.f32.mrf.mxu0 }
 0x5b2   :  { %v7912_v15 = vadd.f32 %v7911_v41, %v7910_v62  ;;  %v7941_v51 = vrot.slane %v7940_v58, 4  ;;  %v6279_v30 = vmax.f32 %v5785_v29, 0.0 }
 0x5b3   :  { %v5790_v47 = vpop.f32.mrf.mxu0 }
 0x5b4   :  { %v7913_v23 = vrot.slane %v7912_v15, 2  ;;  %v7942_v3 = vadd.f32 %v7941_v51, %v7940_v58  ;;  %v5791_v42 = vadd.f32 %v5790_v47, %v13729_v6  ;;  %v16150_v58 = vld [vmem:[#allocation20_spill] sm:$0xff] }
 0x5b5   :  { %v5792_v60 = vpop.f32.mrf.mxu0 }
 0x5b6   :  { %v7914_v8 = vadd.f32 %v7913_v23, %v7912_v15  ;;  %v7943_v56 = vrot.slane %v7942_v3, 2  ;;  %v5793_v31 = vadd.f32 %v5792_v60, %v13736_v34  ;;  %v6281_v33 = vmax.f32 %v5791_v42, 0.0 }
 0x5b7   :  { %v5796_v49 = vpop.f32.mrf.mxu0 }
 0x5b8   :  { %v7915_v28 = vrot.slane %v7914_v8, 1  ;;  %v7944_v63 = vadd.f32 %v7943_v56, %v7942_v3  ;;  %v5797_v54 = vadd.f32 %v5796_v49, %v13729_v6  ;;  %v6282_v9 = vmax.f32 %v5793_v31, 0.0  ;;  %v16151_v49 = vld [vmem:[#allocation24_spill] sm:$0xff] }
 0x5b9   :  { %v5798_v61 = vpop.f32.mrf.mxu0  ;;  %v7478_v3 = vmul.f32 %v16149_v18, %v6278_v45 }
 0x5ba   :  { %v7916_v4 = vadd.f32 %v7915_v28, %v7914_v8  ;;  %v7945_v2 = vrot.slane %v7944_v63, 1  ;;  %v5799_v27 = vadd.f32 %v5798_v61, %v13736_v34  ;;  %v6283_v1 = vmax.f32 %v5797_v54, 0.0 }
 0x5bb   :  { %v5802_v53 = vpop.f32.mrf.mxu0  ;;  %v7482_v56 = vmul.f32 %v16150_v58, %v6282_v9  ;;  %v16154_v9 = vld [vmem:[#allocation101_spill] sm:$0xff] }
 0x5bc   :  { %v7946_v20 = vadd.f32 %v7945_v2, %v7944_v63  ;;  %v15199_v25 = vsel %vm8072_vm8, %v7916_v4, %v15090_v10  ;;  %v5779_v10 = vadd.f32 %v5778_v57, %v13729_v6  ;;  %v5803_v12 = vadd.f32 %v5802_v53, %v13729_v6 }
 0x5bd   :  { %v5804_v5 = vpop.f32.mrf.mxu0  ;;  %v7479_v57 = vmul.f32 %v16148_v19, %v6279_v30  ;;  %v6284_v15 = vmax.f32 %v5799_v27, 0.0  ;;  %v7483_v28 = vmul.f32 %v16151_v49, %v6283_v1 }
 0x5be   :  { %v15202_v16 = vsel %vm8072_vm8, %v7946_v20, %v15097_v44  ;;  %v5787_v44 = vadd.f32 %v5786_v0, %v13736_v34  ;;  %v6277_v48 = vmax.f32 %v5779_v10, 0.0  ;;  %v5805_v32 = vadd.f32 %v5804_v5, %v13736_v34 }
 0x5bf   :  { %v5808_v17 = vpop.f32.mrf.mxu0  ;;  %v7481_v0 = vmul.f32 %v16150_v58, %v6281_v33  ;;  %v6285_v51 = vmax.f32 %v5803_v12, 0.0  ;;  %v16155_v58 = vld [vmem:[#allocation111_spill] sm:$0xff] }
 0x5c0   :  { %v6280_v24 = vmax.f32 %v5787_v44, 0.0  ;;  %v5809_v38 = vadd.f32 %v5808_v17, %v13729_v6  ;;  %v7477_v35 = vmul.f32 %v16149_v18, %v6277_v48  ;;  %v6286_v63 = vmax.f32 %v5805_v32, 0.0  ;;  %v16153_v48 = vld [vmem:[#allocation90_spill] sm:$0xff] }
 0x5c1   :  { %v5810_v14 = vpop.f32.mrf.mxu0  ;;  %v7484_v17 = vmul.f32 %v16151_v49, %v6284_v15  ;;  %v16156_v49 = vld [vmem:[#allocation123_spill] sm:$0xff] }
 0x5c2   :  { %v7480_v41 = vmul.f32 %v16148_v19, %v6280_v24  ;;  %v5811_v47 = vadd.f32 %v5810_v14, %v13736_v34  ;;  %v7947_v60 = vadd.f32 %v7479_v57, %v7477_v35  ;;  %v6287_v61 = vmax.f32 %v5809_v38, 0.0  ;;  %v16152_v14 = vld [vmem:[#allocation27_spill] sm:$0xff] }
 0x5c3   :  { %v5814_v13 = vpop.f32.mrf.mxu0  ;;  %v7485_v29 = vmul.f32 %v16152_v14, %v6285_v51  ;;  %v7486_v54 = vmul.f32 %v16152_v14, %v6286_v63 }
 0x5c4   :  { %v5815_v8 = vadd.f32 %v5814_v13, %v13729_v6  ;;  %v7977_v2 = vadd.f32 %v7480_v41, %v7478_v3  ;;  %v7948_v5 = vadd.f32 %v7947_v60, %v7481_v0  ;;  %v6288_v10 = vmax.f32 %v5811_v47, 0.0 }
 0x5c5   :  { %v5816_v40 = vpop.f32.mrf.mxu0 }
 0x5c6   :  { %v5817_v53 = vadd.f32 %v5816_v40, %v13736_v34  ;;  %v6289_v13 = vmax.f32 %v5815_v8, 0.0  ;;  %v7978_v30 = vadd.f32 %v7977_v2, %v7482_v56  ;;  %v7949_v31 = vadd.f32 %v7948_v5, %v7483_v28 }
 0x5c7   :  { %v5820_v59 = vpop.f32.mrf.mxu0  ;;  %v7487_v40 = vmul.f32 %v16153_v48, %v6287_v61  ;;  %v7488_v57 = vmul.f32 %v16153_v48, %v6288_v10 }
 0x5c8   :  { %v5821_v20 = vadd.f32 %v5820_v59, %v13729_v6  ;;  %v6290_v59 = vmax.f32 %v5817_v53, 0.0  ;;  %v7979_v45 = vadd.f32 %v7978_v30, %v7484_v17  ;;  %v7950_v19 = vadd.f32 %v7949_v31, %v7485_v29  ;;  %v16157_v17 = vld [vmem:[#allocation129_spill] sm:$0xff] }
 0x5c9   :  { %v5822_v11 = vpop.f32.mrf.mxu0 }
 0x5ca   :  { %v5823_v42 = vadd.f32 %v5822_v11, %v13736_v34  ;;  %v6291_v33 = vmax.f32 %v5821_v20, 0.0  ;;  %v7980_v18 = vadd.f32 %v7979_v45, %v7486_v54  ;;  %v7951_v35 = vadd.f32 %v7950_v19, %v7487_v40  ;;  %v16159_v45 = vld [vmem:[#allocation143_spill] sm:$0xff] }
 0x5cb   :  { %v5826_v21 = vpop.f32.mrf.mxu0 }
 0x5cc   :  { %v5827_v46 = vadd.f32 %v5826_v21, %v13729_v6  ;;  %v7489_v21 = vmul.f32 %v16154_v9, %v6289_v13  ;;  %v6292_v1 = vmax.f32 %v5823_v42, 0.0  ;;  %v7491_v0 = vmul.f32 %v16155_v58, %v6291_v33 }
 0x5cd   :  { %v5828_v39 = vpop.f32.mrf.mxu0  ;;  %v7981_v47 = vadd.f32 %v7980_v18, %v7488_v57  ;;  %v16160_v18 = vld [vmem:[#allocation148_spill] sm:$0xff] }
 0x5ce   :  { %v5829_v27 = vadd.f32 %v5828_v39, %v13736_v34  ;;  %v6293_v32 = vmax.f32 %v5827_v46, 0.0  ;;  %v7952_v8 = vadd.f32 %v7951_v35, %v7489_v21  ;;  %v7492_v56 = vmul.f32 %v16155_v58, %v6292_v1 }
 0x5cf   :  { %v5832_v36 = vpop.f32.mrf.mxu0 }
 0x5d0   :  { %v5833_v12 = vadd.f32 %v5832_v36, %v13729_v6  ;;  %v7490_v36 = vmul.f32 %v16154_v9, %v6290_v59  ;;  %v6294_v15 = vmax.f32 %v5829_v27, 0.0  ;;  %v7953_v5 = vadd.f32 %v7952_v8, %v7491_v0 }
 0x5d1   :  { %v15204_v26 = vpop.f32.mrf.mxu0 }
 0x5d2   :  { %v5835_v38 = vadd.f32 %v15204_v26, %v13736_v34  ;;  %v6295_v51 = vmax.f32 %v5833_v12, 0.0  ;;  %v7982_v20 = vadd.f32 %v7981_v47, %v7490_v36 }
 0x5d3   :  { %v15207_v37 = vpop.f32.mrf.mxu0 }
 0x5d4   :  { %v5839_v41 = vadd.f32 %v15207_v37, %v13729_v6  ;;  %v7493_v37 = vmul.f32 %v16156_v49, %v6293_v32  ;;  %v6296_v28 = vmax.f32 %v5835_v38, 0.0  ;;  %v7983_v46 = vadd.f32 %v7982_v20, %v7492_v56 }
 0x5d5   :  { %v15212_v52 = vpop.f32.mrf.mxu0 }
 0x5d6   :  { %v5841_v3 = vadd.f32 %v15212_v52, %v13736_v34  ;;  %v6297_v63 = vmax.f32 %v5839_v41, 0.0  ;;  %v7494_v52 = vmul.f32 %v16156_v49, %v6294_v15  ;;  %v7954_v30 = vadd.f32 %v7953_v5, %v7493_v37 }
 0x5d7   :  { %v15217_v43 = vpop.f32.mrf.mxu0 }
 0x5d8   :  { %v5845_v60 = vadd.f32 %v15217_v43, %v13729_v6  ;;  %v7495_v43 = vmul.f32 %v16157_v17, %v6295_v51  ;;  %v6298_v14 = vmax.f32 %v5841_v3, 0.0  ;;  %v7984_v33 = vadd.f32 %v7983_v46, %v7494_v52  ;;  %v16161_v3 = vld [vmem:[#allocation26_spill] sm:$0xff] }
 0x5d9   :  { %v15221_v22 = vpop.f32.mrf.mxu0 }
 0x5da   :  { %v5847_v61 = vadd.f32 %v15221_v22, %v13736_v34  ;;  %v6299_v29 = vmax.f32 %v5845_v60, 0.0  ;;  %v7496_v22 = vmul.f32 %v16157_v17, %v6296_v28  ;;  %v7955_v27 = vadd.f32 %v7954_v30, %v7495_v43 }
 0x5db   :  { %v5850_v62 = vpop.f32.mrf.mxu0 }
 0x5dc   :  { %v5851_v2 = vadd.f32 %v5850_v62, %v13729_v6  ;;  %v16158_v62 = vld [vmem:[#allocation138_spill] sm:$0xff]  ;;  %v6300_v54 = vmax.f32 %v5847_v61, 0.0  ;;  %v7985_v21 = vadd.f32 %v7984_v33, %v7496_v22  ;;  %v16162_v61 = vld [vmem:[#allocation87_spill] sm:$0xff] }
 0x5dd   :  { %v15230_v23 = vpop.f32.mrf.mxu0  ;;  %v7497_v31 = vmul.f32 %v16158_v62, %v6297_v63 }
 0x5de   :  { %v5853_v10 = vadd.f32 %v15230_v23, %v13736_v34  ;;  %v6301_v48 = vmax.f32 %v5851_v2, 0.0  ;;  %v7498_v23 = vmul.f32 %v16158_v62, %v6298_v14 }
 0x5df   :  { %v5856_v4 = vpop.f32.mrf.mxu0  ;;  %v7956_v38 = vadd.f32 %v7955_v27, %v7497_v31 }
 0x5e0   :  { %v5857_v13 = vadd.f32 %v5856_v4, %v13729_v6  ;;  %v7499_v4 = vmul.f32 %v16159_v45, %v6299_v29  ;;  %v6302_v19 = vmax.f32 %v5853_v10, 0.0  ;;  %v7501_v35 = vmul.f32 %v16160_v18, %v6301_v48  ;;  %v16163_v10 = vld [vmem:[#allocation39_spill] sm:$0xff] }
 0x5e1   :  { %v5858_v44 = vpop.f32.mrf.mxu0  ;;  %v7986_v15 = vadd.f32 %v7985_v21, %v7498_v23 }
 0x5e2   :  { %v5859_v40 = vadd.f32 %v5858_v44, %v13736_v34  ;;  %v6303_v57 = vmax.f32 %v5857_v13, 0.0  ;;  %v7500_v44 = vmul.f32 %v16159_v45, %v6300_v54  ;;  %v7957_v51 = vadd.f32 %v7956_v38, %v7499_v4 }
 0x5e3   :  { %v5862_v24 = vpop.f32.mrf.mxu0  ;;  %v7502_v47 = vmul.f32 %v16160_v18, %v6302_v19 }
 0x5e4   :  { %v5863_v12 = vadd.f32 %v5862_v24, %v13729_v6  ;;  %v6304_v41 = vmax.f32 %v5859_v40, 0.0  ;;  %v7987_v37 = vadd.f32 %v7986_v15, %v7500_v44  ;;  %v7958_v28 = vadd.f32 %v7957_v51, %v7501_v35  ;;  %v16164_v40 = vld [vmem:[#allocation46_spill] sm:$0xff] }
 0x5e5   :  { %v5864_v11 = vpop.f32.mrf.mxu0 }
 0x5e6   :  { %v5865_v1 = vadd.f32 %v5864_v11, %v13736_v34  ;;  %v6305_v24 = vmax.f32 %v5863_v12, 0.0  ;;  %v7503_v11 = vmul.f32 %v16161_v3, %v6303_v57  ;;  %v7504_v63 = vmul.f32 %v16161_v3, %v6304_v41 }
 0x5e7   :  { %v5868_v39 = vpop.f32.mrf.mxu0  ;;  %v7988_v52 = vadd.f32 %v7987_v37, %v7502_v47 }
 0x5e8   :  { %v5869_v32 = vadd.f32 %v5868_v39, %v13729_v6  ;;  %v6306_v39 = vmax.f32 %v5865_v1, 0.0  ;;  %v7505_v2 = vmul.f32 %v16162_v61, %v6305_v24  ;;  %v7959_v17 = vadd.f32 %v7958_v28, %v7503_v11  ;;  %v16166_v24 = vld [vmem:[#allocation58_spill] sm:$0xff] }
 0x5e9   :  { %v5870_v26 = vpop.f32.mrf.mxu0  ;;  %v7989_v30 = vadd.f32 %v7988_v52, %v7504_v63 }
 0x5ea   :  { %v5871_v58 = vadd.f32 %v5870_v26, %v13736_v34  ;;  %v6307_v8 = vmax.f32 %v5869_v32, 0.0  ;;  %v7506_v29 = vmul.f32 %v16162_v61, %v6306_v39  ;;  %v7960_v54 = vadd.f32 %v7959_v17, %v7505_v2  ;;  %v16167_v39 = vld [vmem:[#allocation114_spill] sm:$0xff]  ;;  %v16168_v2 = vld [vmem:[#allocation60_spill] sm:$0xff] }
 0x5eb   :  { %v5874_v53 = vpop.f32.mrf.mxu0 }
 0x5ec   :  { %v5875_v0 = vadd.f32 %v5874_v53, %v13729_v6  ;;  %v6308_v53 = vmax.f32 %v5871_v58, 0.0  ;;  %v7507_v13 = vmul.f32 %v16163_v10, %v6307_v8  ;;  %v7990_v4 = vadd.f32 %v7989_v30, %v7506_v29  ;;  %v7121_v30 = vpop.permute.xlu1 %7120 }
 0x5ed   :  { %v5876_v42 = vpop.f32.mrf.mxu0 }
 0x5ee   :  { %v5877_v56 = vadd.f32 %v5876_v42, %v13736_v34  ;;  %v6309_v20 = vmax.f32 %v5875_v0, 0.0  ;;  %v7508_v48 = vmul.f32 %v16163_v10, %v6308_v53  ;;  %v7961_v19 = vadd.f32 %v7960_v54, %v7507_v13 }
 0x5ef   :  { %v5880_v59 = vpop.f32.mrf.mxu0 }
 0x5f0   :  { %v5881_v49 = vadd.f32 %v5880_v59, %v13729_v6  ;;  %v6310_v42 = vmax.f32 %v5877_v56, 0.0  ;;  %v7509_v59 = vmul.f32 %v16164_v40, %v6309_v20  ;;  %v7991_v18 = vadd.f32 %v7990_v4, %v7508_v48 }
 0x5f1   :  { %v5882_v9 = vpop.f32.mrf.mxu0 }
 0x5f2   :  { %v5883_v5 = vadd.f32 %v5882_v9, %v13736_v34  ;;  %v6311_v46 = vmax.f32 %v5881_v49, 0.0  ;;  %v7510_v57 = vmul.f32 %v16164_v40, %v6310_v42  ;;  %v16165_v9 = vld [vmem:[#allocation56_spill] sm:$0xff]  ;;  %v7962_v35 = vadd.f32 %v7961_v19, %v7509_v59 }
 0x5f3   :  { %v5886_v36 = vpop.f32.mrf.mxu0 }
 0x5f4   :  { %v5887_v43 = vadd.f32 %v5886_v36, %v13729_v6  ;;  %v6312_v33 = vmax.f32 %v5883_v5, 0.0  ;;  %v7511_v21 = vmul.f32 %v16165_v9, %v6311_v46  ;;  %v7992_v47 = vadd.f32 %v7991_v18, %v7510_v57 }
 0x5f5   :  { %v5888_v60 = vpop.f32.mrf.mxu0 }
 0x5f6   :  { %v5889_v22 = vadd.f32 %v5888_v60, %v13736_v34  ;;  %v6313_v27 = vmax.f32 %v5887_v43, 0.0  ;;  %v7512_v41 = vmul.f32 %v16165_v9, %v6312_v33  ;;  %v7963_v3 = vadd.f32 %v7962_v35, %v7511_v21 }
 0x5f7   :  { %v5892_v26 = vpop.f32.mrf.mxu0 }
 0x5f8   :  { %v5893_v62 = vadd.f32 %v5892_v26, %v13729_v6  ;;  %v6314_v1 = vmax.f32 %v5889_v22, 0.0  ;;  %v7513_v58 = vmul.f32 %v16166_v24, %v6313_v27  ;;  %v7993_v28 = vadd.f32 %v7992_v47, %v7512_v41 }
 0x5f9   :  { %v5894_v14 = vpop.f32.mrf.mxu0 }
 0x5fa   :  { %v5895_v12 = vadd.f32 %v5894_v14, %v13736_v34  ;;  %v6315_v32 = vmax.f32 %v5893_v62, 0.0  ;;  %v7514_v60 = vmul.f32 %v16166_v24, %v6314_v1  ;;  %v7964_v26 = vadd.f32 %v7963_v3, %v7513_v58 }
 0x5fb   :  { %v5898_v31 = vpop.f32.mrf.mxu0 }
 0x5fc   :  { %v5899_v23 = vadd.f32 %v5898_v31, %v13729_v6  ;;  %v6316_v0 = vmax.f32 %v5895_v12, 0.0  ;;  %v7515_v8 = vmul.f32 %v16167_v39, %v6315_v32  ;;  %v7994_v43 = vadd.f32 %v7993_v28, %v7514_v60 }
 0x5fd   :  { %v5900_v45 = vpop.f32.mrf.mxu0 }
 0x5fe   :  { %v5901_v38 = vadd.f32 %v5900_v45, %v13736_v34  ;;  %v6317_v15 = vmax.f32 %v5899_v23, 0.0  ;;  %v7516_v61 = vmul.f32 %v16167_v39, %v6316_v0  ;;  %v7965_v14 = vadd.f32 %v7964_v26, %v7515_v8  ;;  %v8164_v26 = vld [vmem:[%s15511_s9 + $0x40] sm:$0xff] }
 0x5ff   :  { %v5904_v44 = vpop.f32.mrf.mxu0 }
 0x600   :  { %v5905_v36 = vadd.f32 %v5904_v44, %v13729_v6  ;;  %v6318_v56 = vmax.f32 %v5901_v38, 0.0  ;;  %v7517_v53 = vmul.f32 %v16168_v2, %v6317_v15  ;;  %v7995_v22 = vadd.f32 %v7994_v43, %v7516_v61  ;;  %v7125_v38 = vpop.permute.xlu1 %7124  ;;  %v8163_v61 = vld [vmem:[%s15511_s9 + $0x38] sm:$0xff]  ;;  %v8156_v43 = vld [vmem:[%s15511_s9] sm:$0xff] }
 0x601   :  { %v5906_v51 = vpop.f32.mrf.mxu0 }
 0x602   :  { %v5907_v11 = vadd.f32 %v5906_v51, %v13736_v34  ;;  %v6319_v49 = vmax.f32 %v5905_v36, 0.0  ;;  %v7518_v29 = vmul.f32 %v16168_v2, %v6318_v56  ;;  %v7966_v62 = vadd.f32 %v7965_v14, %v7517_v53  ;;  %v8162_v2 = vld [vmem:[%s15511_s9 + $0x30] sm:$0xff]  ;;  %v8161_v53 = vld [vmem:[%s15511_s9 + $0x28] sm:$0xff] }
 0x603   :  { %v5910_v37 = vpop.f32.mrf.mxu0 }
 0x604   :  { %v5911_v63 = vadd.f32 %v5910_v37, %v13729_v6  ;;  %v6320_v20 = vmax.f32 %v5907_v11, 0.0  ;;  %v7519_v10 = vmul.f32 %v14620_v7, %v6319_v49  ;;  %v7996_v33 = vadd.f32 %v7995_v22, %v7518_v29  ;;  %v8168_v37 = vld [vmem:[%s15511_s9 + $0x60] sm:$0xf]  ;;  %v8264_v22 = vld [vmem:[%s15513_s11 + $0x58] sm:$0xff] }
 0x605   :  { %v5912_v5 = vpop.f32.mrf.mxu0  ;;  %v9076_v29 = vld [vmem:[%s15510_s8] ss:$0 sm:$0xff] }
 0x606   :  { %v6321_v52 = vmax.f32 %v5911_v63, 0.0  ;;  %v5913_v17 = vadd.f32 %v5912_v5, %v13736_v34  ;;  %v7520_v31 = vmul.f32 %v14620_v7, %v6320_v20  ;;  %v7967_v27 = vadd.f32 %v7966_v62, %v7519_v10  ;;  %v8167_v63 = vld [vmem:[%s15511_s9 + $0x58] sm:$0xff]  ;;  %v8160_v20 = vld [vmem:[%s15511_s9 + $0x20] sm:$0xff]  ;;  %v8263_v62 = vld [vmem:[%s15513_s11 + $0x50] sm:$0xff] }
 0x607   :  { %v5916_v13 = vpop.f32.mrf.mxu0  ;;  %v8159_v5 = vld [vmem:[%s15511_s9 + $0x18] sm:$0xff] }
 0x608   :  { %v6322_v42 = vmax.f32 %v5913_v17, 0.0  ;;  %v5917_v46 = vadd.f32 %v5916_v13, %v13729_v6  ;;  %v7521_v48 = vmul.f32 %v15188_v55, %v6321_v52  ;;  %v7997_v57 = vadd.f32 %v7996_v33, %v7520_v31  ;;  %v8158_v52 = vld [vmem:[%s15511_s9 + $0x10] sm:$0xff]  ;;  %v8157_v17 = vld [vmem:[%s15511_s9 + $0x8] sm:$0xff]  ;;  %v8257_v33 = vld [vmem:[%s15513_s11 + $0x20] sm:$0xff] }
 0x609   :  { %v5918_v54 = vpop.f32.mrf.mxu0  ;;  %v8262_v31 = vld [vmem:[%s15513_s11 + $0x48] sm:$0xff] }
 0x60a   :  { %v6323_v40 = vmax.f32 %v5917_v46, 0.0  ;;  %v5919_v59 = vadd.f32 %v5918_v54, %v13736_v34  ;;  %v7522_v23 = vmul.f32 %v15188_v55, %v6322_v42  ;;  %v7968_v21 = vadd.f32 %v7967_v27, %v7521_v48  ;;  %v8261_v54 = vld [vmem:[%s15513_s11 + $0x40] sm:$0xff]  ;;  %v8260_v48 = vld [vmem:[%s15513_s11 + $0x38] sm:$0xff] }
 0x60b   :  { %v5922_v12 = vpop.f32.mrf.mxu0  ;;  %v8256_v27 = vld [vmem:[%s15513_s11 + $0x18] sm:$0xff] }
 0x60c   :  { %v7523_v45 = vmul.f32 %v7121_v30, %v6323_v40  ;;  %v6324_v4 = vmax.f32 %v5919_v59, 0.0  ;;  %v5923_v19 = vadd.f32 %v5922_v12, %v13729_v6  ;;  %v7998_v44 = vadd.f32 %v7997_v57, %v7522_v23  ;;  %v8259_v40 = vld [vmem:[%s15513_s11 + $0x30] sm:$0xff]  ;;  %v8258_v59 = vld [vmem:[%s15513_s11 + $0x28] sm:$0xff] }
 0x60d   :  { %v5924_v9 = vpop.f32.mrf.mxu0  ;;  %v8255_v12 = vld [vmem:[%s15513_s11 + $0x10] sm:$0xff]  ;;  %v8254_v23 = vld [vmem:[%s15513_s11 + $0x8] sm:$0xff] }
 0x60e   :  { %v7524_v1 = vmul.f32 %v7121_v30, %v6324_v4  ;;  %v6325_v7 = vmax.f32 %v5923_v19, 0.0  ;;  %v5925_v32 = vadd.f32 %v5924_v9, %v13736_v34  ;;  %v7969_v18 = vadd.f32 %v7968_v21, %v7523_v45  ;;  %v8265_v30 = vld [vmem:[%s15513_s11 + $0x60] sm:$0xf] }
 0x60f   :  { %v8253_v45 = vld [vmem:[%s15513_s11] sm:$0xff] }
 0x610   :  { %v7525_v35 = vmul.f32 %v7125_v38, %v6325_v7  ;;  %v6326_v41 = vmax.f32 %v5925_v32, 0.0  ;;  %v7999_v36 = vadd.f32 %v7998_v44, %v7524_v1  ;;  %v9077_v4 = vld [vmem:[%s15512_s10] ss:$0 sm:$0xff]  ;;  %v8361_v7 = vld [vmem:[%s15515_s13 + $0x58] sm:$0xff]  ;;  %v8360_v32 = vld [vmem:[%s15515_s13 + $0x50] sm:$0xff] }
 0x611   :  { %v8362_v1 = vld [vmem:[%s15515_s13 + $0x60] sm:$0xf] }
 0x612   :  { %v7970_v24 = vadd.f32 %v7969_v18, %v7525_v35  ;;  %v7526_v58 = vmul.f32 %v7125_v38, %v6326_v41  ;;  %v8359_v38 = vld [vmem:[%s15515_s13 + $0x48] sm:$0xff]  ;;  %v8358_v44 = vld [vmem:[%s15515_s13 + $0x40] sm:$0xff]  ;;  %v8357_v18 = vld [vmem:[%s15515_s13 + $0x38] sm:$0xff] }
 0x613   :  { %v8356_v35 = vld [vmem:[%s15515_s13 + $0x30] sm:$0xff]  ;;  %v8355_v41 = vld [vmem:[%s15515_s13 + $0x28] sm:$0xff] }
 0x614   :  { %v7971_v55 = vrot.slane %v7970_v24, 4  ;;  %v8000_v0 = vadd.f32 %v7999_v36, %v7526_v58  ;;  %v8354_v36 = vld [vmem:[%s15515_s13 + $0x20] sm:$0xff]  ;;  %v8352_v58 = vld [vmem:[%s15515_s13 + $0x10] sm:$0xff] }
 0x616   :  { %v7972_v15 = vadd.f32 %v7971_v55, %v7970_v24  ;;  %v8001_v51 = vrot.slane %v8000_v0, 4  ;;  %v8353_v24 = vld [vmem:[%s15515_s13 + $0x18] sm:$0xff]  ;;  %v8351_v55 = vld [vmem:[%s15515_s13 + $0x8] sm:$0xff] }
 0x618   :  { %v7973_v6 = vrot.slane %v7972_v15, 2  ;;  %v8002_v47 = vadd.f32 %v8001_v51, %v8000_v0  ;;  %v8350_v0 = vld [vmem:[%s15515_s13] sm:$0xff] }
 0x61a   :  { %v7974_v3 = vadd.f32 %v7973_v6, %v7972_v15  ;;  %v8003_v11 = vrot.slane %v8002_v47, 2  ;;  %v9080_v15 = vld [vmem:[%s15514_s12] ss:$0 sm:$0xff]  ;;  %s10454_s12 = smov [#allocation2]  }
 0x61b   :  { %s8462_s13 = sshll.u32 %s10454_s12, 4  ;;  %s8463_s13 = int_to_ptr.vmem [resolvable:$true] %s8462_s13 }
 0x61c   :  { %v7975_v60 = vrot.slane %v7974_v3, 1  ;;  %v8004_v39 = vadd.f32 %v8003_v11, %v8002_v47  ;;  %v9083_v11 = vld [vmem:[%s15516_s14] ss:$0 sm:$0xff]  ;;  %s10429_s29 = scalar_lea.vmem %s8463_s13, 128  ;;  %p10434_p1 = scmp.lt.s32.totalorder %s8463_s13, %s8463_s13 }
 0x61d   :  { %p10430_p0 = scmp.ne.s32.totalorder %s8463_s13, %s10429_s29  ;;  %p10435_p2 = scmp.lt.s32.totalorder %s10429_s29, %s10429_s29 }
 0x61e   :  { %v8005_v8 = vrot.slane %v8004_v39, 1  ;;  %v7976_v34 = vadd.f32 %v7975_v60, %v7974_v3 }
 0x61f   :  { %p10436_p3 = por %p10435_p2, %p10434_p1 }
 0x620   :  { %v8006_v56 = vadd.f32 %v8005_v8, %v8004_v39  ;;  %v8075_v28 = vsel %vm8074_vm9, %v7976_v34, %v15199_v25  ;;  %v8165_v25 = vld [vmem:[%s15511_s9 + $0x48] sm:$0xff] }
 0x621   :  { %p10437_p4 = pnand %p10436_p3, %p10430_p0 }
 0x622   :  { %v8082_v49 = vsel %vm8074_vm9, %v8006_v56, %v15202_v16  ;;  %v8166_v16 = vld [vmem:[%s15511_s9 + $0x50] sm:$0xff] }
 0x623   :  { %8149 = vmatprep.mubr.f32.mxu1 %v8082_v49 }
 0x624   :  { %8150 = vmatmul.mubr.f32.vlgmr.msra.gmra.mxu1 %v8075_v28 }
 0x625   :  { %10206 = vmatpush3.msk.msra.mxu1 %vm860_vm0, %v8168_v37  ;;  %10231 = vmatprep.mubr.msk.f32.mxu1 %vm10453_vm10, %v15906_v50 }
 0x626   :  { %10207 = vmatprep.subr.mxu1 %v15906_v50 }
 0x627   :  { %10208 = vmatpush3.msra.mxu1 %v8167_v63 }
 0x628   :  { %10209 = vmatprep.subr.mxu1 %v15906_v50 }
 0x629   :  { %10210 = vmatpush3.msra.mxu1 %v8166_v16 }
 0x62a   :  { %10211 = vmatprep.subr.mxu1 %v15906_v50 }
 0x62b   :  { %10212 = vmatpush3.msra.mxu1 %v8165_v25 }
 0x62c   :  { %10213 = vmatprep.subr.mxu1 %v15906_v50 }
 0x62d   :  { %10214 = vmatpush3.msra.mxu1 %v8164_v26 }
 0x62e   :  { %10215 = vmatprep.subr.mxu1 %v15906_v50 }
 0x62f   :  { %10216 = vmatpush3.msra.mxu1 %v8163_v61 }
 0x630   :  { %10217 = vmatprep.subr.mxu1 %v15906_v50 }
 0x631   :  { %10218 = vmatpush3.msra.mxu1 %v8162_v2 }
 0x632   :  { %10219 = vmatprep.subr.mxu1 %v15906_v50 }
 0x633   :  { %10220 = vmatpush3.msra.mxu1 %v8161_v53 }
 0x634   :  { %10221 = vmatprep.subr.mxu1 %v15906_v50 }
 0x635   :  { %10222 = vmatpush3.msra.mxu1 %v8160_v20 }
 0x636   :  { %10223 = vmatprep.subr.mxu1 %v15906_v50 }
 0x637   :  { %10224 = vmatpush3.msra.mxu1 %v8159_v5 }
 0x638   :  { %10225 = vmatprep.subr.mxu1 %v15906_v50 }
 0x639   :  { %10226 = vmatpush3.msra.mxu1 %v8158_v52 }
 0x63a   :  { %10227 = vmatprep.subr.mxu1 %v15906_v50 }
 0x63b   :  { %10228 = vmatpush3.msra.mxu1 %v8157_v17 }
 0x63c   :  { %10229 = vmatprep.subr.mxu1 %v15906_v50 }
 0x63d   :  { %10230 = vmatpush3.msra.mxu1 %v8156_v43 }
 0x63e   :  { %10234 = vmatprep.subr.mxu1 %v15906_v50 }
 0x6e4   :  { %v9532_v14 = vpop.f32.mrf.mxu1 }
 0x6e6   :  { %v9533_v10 = vpop.f32.mrf.mxu1 }
 0x6e7   :  { %v9534_v13 = vadd.f32 %v9533_v10, %v9532_v14 }
 0x6e9   :  { %v8152_v42 = vadd.f32 %v9534_v13, %v9076_v29 }
 0x6eb   :  { %v8155_v46 = vmax.f32 %v8152_v42, 0.0 }
 0x6ed   :  { %10232 = vmatmul.mubr.msk.f32.vlgmr.msra.gmra.mxu1 %vm2149_vm2, %v8155_v46 }
 0x6ee   :  { %10235 = vmatpush3.msk.msra.mxu1 %vm860_vm0, %v8265_v30  ;;  %10260 = vmatprep.mubr.msk.f32.mxu1 %vm10453_vm10, %v15906_v50 }
 0x6ef   :  { %10236 = vmatprep.subr.mxu1 %v15906_v50 }
 0x6f0   :  { %10237 = vmatpush3.msra.mxu1 %v8264_v22 }
 0x6f1   :  { %10238 = vmatprep.subr.mxu1 %v15906_v50 }
 0x6f2   :  { %10239 = vmatpush3.msra.mxu1 %v8263_v62 }
 0x6f3   :  { %10240 = vmatprep.subr.mxu1 %v15906_v50 }
 0x6f4   :  { %10241 = vmatpush3.msra.mxu1 %v8262_v31 }
 0x6f5   :  { %10242 = vmatprep.subr.mxu1 %v15906_v50 }
 0x6f6   :  { %10243 = vmatpush3.msra.mxu1 %v8261_v54 }
 0x6f7   :  { %10244 = vmatprep.subr.mxu1 %v15906_v50 }
 0x6f8   :  { %10245 = vmatpush3.msra.mxu1 %v8260_v48 }
 0x6f9   :  { %10246 = vmatprep.subr.mxu1 %v15906_v50 }
 0x6fa   :  { %10247 = vmatpush3.msra.mxu1 %v8259_v40 }
 0x6fb   :  { %10248 = vmatprep.subr.mxu1 %v15906_v50 }
 0x6fc   :  { %10249 = vmatpush3.msra.mxu1 %v8258_v59 }
 0x6fd   :  { %10250 = vmatprep.subr.mxu1 %v15906_v50 }
 0x6fe   :  { %10251 = vmatpush3.msra.mxu1 %v8257_v33 }
 0x6ff   :  { %10252 = vmatprep.subr.mxu1 %v15906_v50 }
 0x700   :  { %10253 = vmatpush3.msra.mxu1 %v8256_v27 }
 0x701   :  { %10254 = vmatprep.subr.mxu1 %v15906_v50 }
 0x702   :  { %10255 = vmatpush3.msra.mxu1 %v8255_v12 }
 0x703   :  { %10256 = vmatprep.subr.mxu1 %v15906_v50 }
 0x704   :  { %10257 = vmatpush3.msra.mxu1 %v8254_v23 }
 0x705   :  { %10258 = vmatprep.subr.mxu1 %v15906_v50 }
 0x706   :  { %10259 = vmatpush3.msra.mxu1 %v8253_v45 }
 0x707   :  { %10263 = vmatprep.subr.mxu1 %v15906_v50 }
 0x7ad   :  { %v8248_v19 = vpop.f32.mrf.mxu1 }
 0x7ae   :  { %v8249_v57 = vadd.f32 %v9077_v4, %v8248_v19 }
 0x7af   :  { %v10233_v9 = vpop.f32.mrf.mxu1 }
 0x7b0   :  { %v8252_v21 = vmax.f32 %v8249_v57, 0.0 }
 0x7b2   :  { %10261 = vmatmul.mubr.msk.f32.vlgmr.msra.gmra.mxu1 %vm2149_vm2, %v8252_v21 }
 0x7b3   :  { %10264 = vmatpush3.msk.msra.mxu1 %vm860_vm0, %v8362_v1  ;;  %10289 = vmatprep.mubr.msk.f32.mxu1 %vm10453_vm10, %v15906_v50 }
 0x7b4   :  { %10265 = vmatprep.subr.mxu1 %v15906_v50 }
 0x7b5   :  { %10266 = vmatpush3.msra.mxu1 %v8361_v7 }
 0x7b6   :  { %10267 = vmatprep.subr.mxu1 %v15906_v50 }
 0x7b7   :  { %10268 = vmatpush3.msra.mxu1 %v8360_v32 }
 0x7b8   :  { %10269 = vmatprep.subr.mxu1 %v15906_v50 }
 0x7b9   :  { %10270 = vmatpush3.msra.mxu1 %v8359_v38 }
 0x7ba   :  { %10271 = vmatprep.subr.mxu1 %v15906_v50 }
 0x7bb   :  { %10272 = vmatpush3.msra.mxu1 %v8358_v44 }
 0x7bc   :  { %10273 = vmatprep.subr.mxu1 %v15906_v50 }
 0x7bd   :  { %10274 = vmatpush3.msra.mxu1 %v8357_v18 }
 0x7be   :  { %10275 = vmatprep.subr.mxu1 %v15906_v50 }
 0x7bf   :  { %10276 = vmatpush3.msra.mxu1 %v8356_v35 }
 0x7c0   :  { %10277 = vmatprep.subr.mxu1 %v15906_v50 }
 0x7c1   :  { %10278 = vmatpush3.msra.mxu1 %v8355_v41 }
 0x7c2   :  { %10279 = vmatprep.subr.mxu1 %v15906_v50 }
 0x7c3   :  { %10280 = vmatpush3.msra.mxu1 %v8354_v36 }
 0x7c4   :  { %10281 = vmatprep.subr.mxu1 %v15906_v50 }
 0x7c5   :  { %10282 = vmatpush3.msra.mxu1 %v8353_v24 }
 0x7c6   :  { %10283 = vmatprep.subr.mxu1 %v15906_v50 }
 0x7c7   :  { %10284 = vmatpush3.msra.mxu1 %v8352_v58 }
 0x7c8   :  { %10285 = vmatprep.subr.mxu1 %v15906_v50 }
 0x7c9   :  { %10286 = vmatpush3.msra.mxu1 %v8351_v55 }
 0x7ca   :  { %10287 = vmatprep.subr.mxu1 %v15906_v50 }
 0x7cb   :  { %10288 = vmatpush3.msra.mxu1 %v8350_v0 }
 0x872   :  { %v8345_v51 = vpop.f32.mrf.mxu1 }
 0x873   :  { %v8346_v6 = vadd.f32 %v9080_v15, %v8345_v51 }
 0x874   :  { %v10262_v47 = vpop.f32.mrf.mxu1 }
 0x875   :  { %v8349_v3 = vmax.f32 %v8346_v6, 0.0 }
 0x877   :  { %10290 = vmatmul.mubr.msk.f32.vlgmr.msra.gmra.mxu1 %vm2149_vm2, %v8349_v3 }
 0x937   :  { %v8442_v60 = vpop.f32.mrf.mxu1 }
 0x938   :  { %v8443_v39 = vadd.f32 %v9083_v11, %v8442_v60 }
 0x939   :  { %v10291_v8 = vpop.f32.mrf.mxu1 }
 0x93a   :  { %8446 = vmax.xlane.f32.xlu0 %v8443_v39 }
 0x9c3   :  { %v8447_v50 = vpop.xlane.xlu0 %8446 }
 0x9c4   :  { %v8448_v34 = vsub.f32 %v8443_v39, %v8447_v50 }
 0x9c6   :  { %v8449_v56 = vmul.f32 1.442695, %v8448_v34 }
 0x9c8   :  { %10300 = vpow2.f32 %v8449_v56 }
 0x9d5   :  { %v10301_v49 = vpop.eup %10300 }
 0x9d6   :  { %8451 = vadd.xlane.f32.xlu1 %v10301_v49 }
 0xa5f   :  { %v8452_v37 = vpop.xlane.xlu1 %8451 }
 0xa60   :  { %10302 = vrcp.f32 %v8452_v37 }
 0xa6d   :  { %v10303_v28 = vpop.eup %10302 }
 0xa6e   :  { %v8454_v63 = vmul.f32 %v10303_v28, %v10301_v49 }
 0xa70   :  { %8455 = vst [vmem:[#allocation2] sm:$0xff] %v8454_v63 }
 0xa71   :  { %10440 = shalt.err (!%p10437_p4)
}
 0xa72   :  { %8465 = dma.vmem_to_hbm [thread:$0]  %s8463_s13, 128, %s15517_s15, [#allocation3]  }
 0xa73   :  { %10449 = dma.done.wait [#allocation3], 128  }
 0xa74   :  { %10450 = vsyncadd [#allocation3], 4294967168 }
 0xa75   :  { %8469 = vsyncpa [#allocation3], 1 }

</bundles_post_ra>
